<compile_context>
chip_gen: v7x
topology: tpu7x:2x2x1
jax: 0.10.0
libtpu: 0.0.40
codegen_flags: <defaults>
</compile_context>

<pallas_src>
import functools

import jax
import jax.numpy as jnp
from jax.experimental import pallas as pl
from jax.experimental.pallas import tpu as pltpu

LANE = 128     # pad GEMM-N / channel dims to this for lane-dense stores
SUBLANE = 8    # pad GEMM-M / width dims to this for aligned reshapes


def _round_up(x, m):
    return (x + m - 1) // m * m


def _cdiv(a, b):
    return (a + b - 1) // b


# --------------------------- classifier GEMM kernel -------------------------

def _gemm_kernel(x_ref, w_ref, b_ref, o_ref, *, apply_relu):
    # Output block index map is k-invariant -> o_ref stays VMEM-resident across
    # the K axis; accumulate directly into it (f32), no scratch needed.
    @pl.when(pl.program_id(2) == 0)
    def _():
        o_ref[...] = jnp.zeros_like(o_ref)

    o_ref[...] += jnp.dot(x_ref[...], w_ref[...],
                          preferred_element_type=jnp.float32)

    @pl.when(pl.program_id(2) == pl.num_programs(2) - 1)
    def _():
        r = o_ref[...] + b_ref[...]
        if apply_relu:
            r = jnp.maximum(r, 0.0)
        o_ref[...] = r


def matmul_bias_act(x, w, b, *, apply_relu):
    """y = x @ w + b (optional ReLU).  x: (M, K), w: (K, N), b: (N,).
    Operands are cast to bf16 for the MXU; accumulation / output are f32."""
    M, K = x.shape
    K2, N = w.shape
    assert K == K2
    tm = min(256, _round_up(M, SUBLANE))
    tk = min(512, _round_up(K, LANE))      # 128/256-aligned K tiles
    tn = min(512, _round_up(N, LANE))
    Mp, Kp, Np = _round_up(M, tm), _round_up(K, tk), _round_up(N, tn)
    xp = jnp.pad(x, ((0, Mp - M), (0, Kp - K))).astype(jnp.bfloat16)
    wp = jnp.pad(w, ((0, Kp - K), (0, Np - N))).astype(jnp.bfloat16)
    bp = jnp.pad(b, (0, Np - N)).reshape(1, Np).astype(jnp.float32)
    out = pl.pallas_call(
        functools.partial(_gemm_kernel, apply_relu=apply_relu),
        out_shape=jax.ShapeDtypeStruct((Mp, Np), jnp.float32),
        grid=(Mp // tm, Np // tn, Kp // tk),
        in_specs=[
            pl.BlockSpec((tm, tk), lambda m, n, k: (m, k)),
            pl.BlockSpec((tk, tn), lambda m, n, k: (k, n)),
            pl.BlockSpec((1, tn), lambda m, n, k: (0, n)),
        ],
        out_specs=pl.BlockSpec((tm, tn), lambda m, n, k: (m, n)),
        compiler_params=pltpu.CompilerParams(
            dimension_semantics=("parallel", "parallel", "arbitrary")),
    )(xp, wp, bp)
    return out[:M, :N]


# ------------------------------ fused conv kernel ---------------------------

def _conv_kernel(x_ref, w_ref, b_ref, o_ref, *scratch_refs,
                 KH, TH, n_tiles, OWp, Cp, pool, PH, relu):
    # x_ref: (1, Hf, OWp, Kf) bf16  (KW taps pre-folded into Kf = KW*C)
    # w_ref: (KH, Kf, Cp)     bf16
    # b_ref: (1, Cp)          f32
    # o_ref: (1, PH, OWp, Cp) f32 if pool else (1, TOH, OWp, Cp) f32
    Kf = x_ref.shape[-1]
    M = TH * OWp
    conv_map = scratch_refs[0] if pool else None   # (TOH, OWp, Cp) f32 scratch

    for t in range(n_tiles):
        # Per-tile accumulator (<= ~32 vregs) stays vreg-resident over KH taps.
        acc = jnp.zeros((M, Cp), jnp.float32)
        for kh in range(KH):
            xt = x_ref[0, t * TH + kh:t * TH + kh + TH, :, :]   # (TH, OWp, Kf)
            xt = xt.reshape(M, Kf)                              # OWp % 8 == 0
            acc = acc + jnp.dot(xt, w_ref[kh],
                                preferred_element_type=jnp.float32)
        acc = acc + b_ref[...]
        if relu:
            acc = jnp.maximum(acc, 0.0)
        tile = acc.reshape(TH, OWp, Cp)
        if pool:
            conv_map[t * TH:(t + 1) * TH] = tile
        else:
            o_ref[0, t * TH:(t + 1) * TH] = tile.astype(o_ref.dtype)

    if pool:
        # Row direction of the 3x3 / stride-2 max-pool, fused in the epilogue.
        # (Column window-max + stride-2 decimation is finished in XLA.)
        for p in range(PH):
            r = jnp.maximum(jnp.maximum(conv_map[2 * p], conv_map[2 * p + 1]),
                            conv_map[2 * p + 2])
            o_ref[0, p] = r.astype(o_ref.dtype)


def conv2d_block(x, w, b, *, pad, pool=False, relu=True, out_hw=None):
    """Stride-1 conv (+ ReLU, + optional fused 3x3/s2 max-pool row stage).

    x: (N, H, W, C) NHWC, C >= real Cin (extra channels get zero weights).
    w: (KH, KW, Cin, Cout), b: (Cout,).
    Returns (N, PH, PW, 128) if pool else (N, OH, OW, 128); real channels live
    in [:Cout] and the padded lanes are exactly zero."""
    N, H, W, C = x.shape
    KH, KW, Cin, Cout = w.shape
    assert Cin <= C
    if out_hw is None:
        OH = H + 2 * pad - KH + 1
        OW = W + 2 * pad - KW + 1
    else:
        OH, OW = out_hw
    OWp = _round_up(OW, SUBLANE)
    Cp = _round_up(Cout, LANE)
    TH = max(1, 256 // OWp)                       # ~256-row flattened tiles
    TH = min(TH, _round_up(OH, SUBLANE))
    n_tiles = _cdiv(OH, TH)
    TOH = n_tiles * TH
    Hf = TOH + KH - 1
    Kf = KW * C

    # KW-tap fold in XLA (bf16): xf[n, h, w', kw*C + c] = xpad[n, h, w'+kw, c].
    xb = x.astype(jnp.bfloat16)
    Wneed = OWp + KW - 1
    xp = jnp.pad(xb, ((0, 0), (pad, Hf - H - pad),
                      (pad, Wneed - W - pad), (0, 0)))
    xf = jnp.concatenate([xp[:, :, kw:kw + OWp, :] for kw in range(KW)],
                         axis=-1)                                 # (N,Hf,OWp,Kf)
    wp = jnp.pad(w, ((0, 0), (0, 0), (0, C - Cin), (0, Cp - Cout)))
    wf = wp.reshape(KH, KW * C, Cp).astype(jnp.bfloat16)
    bp = jnp.pad(b, (0, Cp - Cout)).reshape(1, Cp).astype(jnp.float32)

    if pool:
        PH = (OH - 3) // 2 + 1
        PW = (OW - 3) // 2 + 1
        out_rows = PH
        scratch = [pltpu.VMEM((TOH, OWp, Cp), jnp.float32)]
    else:
        PH = PW = 0
        out_rows = TOH
        scratch = []

    out = pl.pallas_call(
        functools.partial(_conv_kernel, KH=KH, TH=TH, n_tiles=n_tiles,
                          OWp=OWp, Cp=Cp, pool=pool, PH=PH, relu=relu),
        out_shape=jax.ShapeDtypeStruct((N, out_rows, OWp, Cp), jnp.float32),
        grid=(N,),
        in_specs=[
            pl.BlockSpec((1, Hf, OWp, Kf), lambda n: (n, 0, 0, 0)),
            pl.BlockSpec((KH, Kf, Cp), lambda n: (0, 0, 0)),
            pl.BlockSpec((1, Cp), lambda n: (0, 0)),
        ],
        out_specs=pl.BlockSpec((1, out_rows, OWp, Cp), lambda n: (n, 0, 0, 0)),
        scratch_shapes=scratch,
        compiler_params=pltpu.CompilerParams(
            dimension_semantics=("parallel",)),
    )(xf, wf, bp)

    if pool:
        # Finish the pool: column window max over valid cols, then stride-2
        # decimation (fuses with the next layer's slice/pad/fold in XLA).
        y = jnp.maximum(jnp.maximum(out[:, :, 0:OW - 2, :],
                                    out[:, :, 1:OW - 1, :]),
                        out[:, :, 2:OW, :])
        return y[:, :, ::2, :]                    # (N, PH, PW, Cp)
    return out[:, :OH, :OW, :]


# ----------------------- space-to-depth for the stride-4 conv ---------------

def space_to_depth_input(x, s, pad):
    """(N, H, W, C) -> (N, ceil((H+2p)/s), ceil((W+2p)/s), s*s*C)."""
    N, H, W, C = x.shape
    xp = jnp.pad(x, ((0, 0), (pad, pad), (pad, pad), (0, 0)))
    Hp, Wp = H + 2 * pad, W + 2 * pad
    Hq, Wq = _cdiv(Hp, s), _cdiv(Wp, s)
    xp = jnp.pad(xp, ((0, 0), (0, Hq * s - Hp), (0, Wq * s - Wp), (0, 0)))
    xr = xp.reshape(N, Hq, s, Wq, s, C).transpose(0, 1, 3, 2, 4, 5)
    return xr.reshape(N, Hq, Wq, s * s * C)


def space_to_depth_weights(w, s):
    """(KH, KW, Cin, Cout) -> (ceil(KH/s), ceil(KW/s), s*s*Cin, Cout)."""
    KH, KW, Cin, Cout = w.shape
    KHq, KWq = _cdiv(KH, s), _cdiv(KW, s)
    wp = jnp.pad(w, ((0, KHq * s - KH), (0, KWq * s - KW), (0, 0), (0, 0)))
    wr = wp.reshape(KHq, s, KWq, s, Cin, Cout).transpose(0, 2, 1, 3, 4, 5)
    return wr.reshape(KHq, KWq, s * s * Cin, Cout)


# --------------------------- parameters & forward ---------------------------

def init_params(key, conv_size, mlp_size, num_classes):
    C = conv_size
    conv_shapes = [
        (11, 11, 3, C),
        (5, 5, C, 3 * C),
        (3, 3, 3 * C, 6 * C),
        (3, 3, 6 * C, 4 * C),
        (3, 3, 4 * C, 4 * C),
    ]
    lin_shapes = [
        (4 * C * 3 * 3, mlp_size),
        (mlp_size, mlp_size),
        (mlp_size, num_classes),
    ]
    params = {}
    keys = iter(jax.random.split(key, 2 * (len(conv_shapes) + len(lin_shapes))))
    for n, shp in enumerate(conv_shapes):
        fan_in = shp[0] * shp[1] * shp[2]
        bound = 1.0 / float(fan_in) ** 0.5
        params[f"conv{n}_w"] = jax.random.uniform(
            next(keys), shp, jnp.float32, -bound, bound)
        params[f"conv{n}_b"] = jax.random.uniform(
            next(keys), (shp[3],), jnp.float32, -bound, bound)
    for n, shp in enumerate(lin_shapes):
        bound = 1.0 / float(shp[0]) ** 0.5
        params[f"fc{n}_w"] = jax.random.uniform(
            next(keys), shp, jnp.float32, -bound, bound)
        params[f"fc{n}_b"] = jax.random.uniform(
            next(keys), (shp[1],), jnp.float32, -bound, bound)
    return params


def alexnet_forward(params, x_nchw):
    x = jnp.transpose(x_nchw, (0, 2, 3, 1))               # NCHW -> NHWC
    # conv0: 11x11 / stride 4 / pad 2, rewritten via space-to-depth (factor 4)
    # as a stride-1 3x3 conv over 48 input channels (K folds to 144).
    s = 4
    oh0 = (x.shape[1] + 2 * 2 - 11) // s + 1
    ow0 = (x.shape[2] + 2 * 2 - 11) // s + 1
    x0 = space_to_depth_input(x, s, 2)
    w0 = space_to_depth_weights(params["conv0_w"], s)
    x = conv2d_block(x0, w0, params["conv0_b"], pad=0, pool=True,
                     out_hw=(oh0, ow0))
    x = conv2d_block(x, params["conv1_w"], params["conv1_b"], pad=2, pool=True)
    x = conv2d_block(x, params["conv2_w"], params["conv2_b"], pad=1)
    x = conv2d_block(x, params["conv3_w"], params["conv3_b"], pad=1)
    x = conv2d_block(x, params["conv4_w"], params["conv4_b"], pad=1, pool=True)
    # flatten exactly like torch.flatten(x, 1) on NCHW, dropping the padded
    # channels that were only carried for lane density.
    c_real = params["conv4_w"].shape[3]
    x = x[:, :, :, :c_real]
    x = jnp.transpose(x, (0, 3, 1, 2)).reshape(x.shape[0], -1)
    # TODO(synk): Dropout omitted (inference / eval() semantics => identity).
    x = matmul_bias_act(x, params["fc0_w"], params["fc0_b"], apply_relu=True)
    x = matmul_bias_act(x, params["fc1_w"], params["fc1_b"], apply_relu=True)
    x = matmul_bias_act(x, params["fc2_w"], params["fc2_b"], apply_relu=False)
    return x


# ------------------------- pure-JAX reference (check) -----------------------

def alexnet_reference(params, x_nchw):
    # Matches the kernel numerics: bf16 matmul operands, f32 accumulation.
    x = jnp.transpose(x_nchw, (0, 2, 3, 1))

    def conv(x, w, b, stride, pad):
        y = jax.lax.conv_general_dilated(
            x.astype(jnp.bfloat16), w.astype(jnp.bfloat16),
            window_strides=(stride, stride),
            padding=[(pad, pad), (pad, pad)],
            dimension_numbers=("NHWC", "HWIO", "NHWC"),
            preferred_element_type=jnp.float32)
        return jax.nn.relu(y + b)

    def pool(x):
        return jax.lax.reduce_window(x, -jnp.inf, jax.lax.max,
                                     (1, 3, 3, 1), (1, 2, 2, 1), "VALID")

    def fc(x, w, b):
        return jnp.dot(x.astype(jnp.bfloat16), w.astype(jnp.bfloat16),
                       preferred_element_type=jnp.float32) + b

    x = conv(x, params["conv0_w"], params["conv0_b"], 4, 2); x = pool(x)
    x = conv(x, params["conv1_w"], params["conv1_b"], 1, 2); x = pool(x)
    x = conv(x, params["conv2_w"], params["conv2_b"], 1, 1)
    x = conv(x, params["conv3_w"], params["conv3_b"], 1, 1)
    x = conv(x, params["conv4_w"], params["conv4_b"], 1, 1); x = pool(x)
    x = jnp.transpose(x, (0, 3, 1, 2)).reshape(x.shape[0], -1)
    x = jax.nn.relu(fc(x, params["fc0_w"], params["fc0_b"]))
    x = jax.nn.relu(fc(x, params["fc1_w"], params["fc1_b"]))
    return fc(x, params["fc2_w"], params["fc2_b"])


if __name__ == "__main__":
    # Small cfg: CONV_SIZE=8, MLP_SIZE=32, NUM_CLASSES=10.  Spatial size 127 is
    # the smallest that yields the 3x3 feature map the classifier expects.
    CONV_SIZE, MLP_SIZE, NUM_CLASSES = 8, 32, 10
    key = jax.random.PRNGKey(0)
    k_params, k_x = jax.random.split(key)
    params = init_params(k_params, CONV_SIZE, MLP_SIZE, NUM_CLASSES)
    x = jax.random.normal(k_x, (2, 3, 127, 127), dtype=jnp.float32)

    fwd = jax.jit(alexnet_forward)
    out = fwd(params, x)
    jax.block_until_ready(out)
    assert out.shape == (2, NUM_CLASSES), out.shape
    assert out.dtype == jnp.float32

    ref = jax.jit(alexnet_reference)(params, x)
    jax.block_until_ready(ref)
    assert jnp.allclose(out, ref, atol=2e-2, rtol=2e-2), (
        float(jnp.max(jnp.abs(out - ref))))
    print("KERNEL_OK")
</pallas_src>

<mosaic_0001>
module attributes {stable_mosaic.version = 11 : i64} {
  func.func @_conv_kernel(%arg0: i32, %arg1: memref<1x34x32x144xbf16, #tpu.memory_space<vmem>>, %arg2: memref<3x144x128xbf16, #tpu.memory_space<vmem>>, %arg3: memref<1x128xf32, #tpu.memory_space<vmem>>, %arg4: memref<1x15x32x128xf32, #tpu.memory_space<vmem>>, %arg5: memref<32x32x128xf32, #tpu.memory_space<vmem>>) attributes {dimension_semantics = [#tpu.dimension_semantics<parallel>], iteration_bounds = array<i64: 2>, scalar_prefetch = 0 : i64, scratch_operands = 1 : i64, tpu.core_type = #tpu.core_type<tc>, window_params = [{transform_indices = @transform_0, window_bounds = array<i64: 1, 34, 32, 144>}, {pipeline_mode = #tpu.pipeline_mode<synchronous>, transform_indices = @transform_1, window_bounds = array<i64: 3, 144, 128>}, {pipeline_mode = #tpu.pipeline_mode<synchronous>, transform_indices = @transform_2, window_bounds = array<i64: 1, 128>}, {transform_indices = @transform_3, window_bounds = array<i64: 1, 15, 32, 128>}]} {
    %cst = arith.constant 0.000000e+00 : f32
    %0 = vector.broadcast %cst : f32 to vector<256x128xf32>
    %c0 = arith.constant 0 : index
    %c0_0 = arith.constant 0 : index
    %c0_1 = arith.constant 0 : index
    %c0_2 = arith.constant 0 : index
    %1 = vector.load %arg1[%c0, %c0_0, %c0_1, %c0_2] : memref<1x34x32x144xbf16, #tpu.memory_space<vmem>>, vector<1x8x32x144xbf16>
    %2 = vector.shape_cast %1 : vector<1x8x32x144xbf16> to vector<8x32x144xbf16>
    %3 = vector.shape_cast %2 : vector<8x32x144xbf16> to vector<256x144xbf16>
    %c0_3 = arith.constant 0 : index
    %c0_4 = arith.constant 0 : index
    %c0_5 = arith.constant 0 : index
    %4 = vector.load %arg2[%c0_3, %c0_4, %c0_5] : memref<3x144x128xbf16, #tpu.memory_space<vmem>>, vector<1x144x128xbf16>
    %5 = vector.shape_cast %4 : vector<1x144x128xbf16> to vector<144x128xbf16>
    %cst_6 = arith.constant dense<0.000000e+00> : vector<256x128xf32>
    %6 = tpu.matmul %3, %5, %cst_6 {dimension_numbers = #tpu.dot_dimension_numbers<[1], [0], [0], [1], [0, 0, 1, 1], [], []>} : vector<256x144xbf16>, vector<144x128xbf16>, vector<256x128xf32> -> vector<256x128xf32>
    %7 = arith.addf %0, %6 : vector<256x128xf32>
    %c0_7 = arith.constant 0 : index
    %c1 = arith.constant 1 : index
    %c0_8 = arith.constant 0 : index
    %c0_9 = arith.constant 0 : index
    %8 = vector.load %arg1[%c0_7, %c1, %c0_8, %c0_9] : memref<1x34x32x144xbf16, #tpu.memory_space<vmem>>, vector<1x8x32x144xbf16>
    %9 = vector.shape_cast %8 : vector<1x8x32x144xbf16> to vector<8x32x144xbf16>
    %10 = vector.shape_cast %9 : vector<8x32x144xbf16> to vector<256x144xbf16>
    %c1_10 = arith.constant 1 : index
    %c0_11 = arith.constant 0 : index
    %c0_12 = arith.constant 0 : index
    %11 = vector.load %arg2[%c1_10, %c0_11, %c0_12] : memref<3x144x128xbf16, #tpu.memory_space<vmem>>, vector<1x144x128xbf16>
    %12 = vector.shape_cast %11 : vector<1x144x128xbf16> to vector<144x128xbf16>
    %cst_13 = arith.constant dense<0.000000e+00> : vector<256x128xf32>
    %13 = tpu.matmul %10, %12, %cst_13 {dimension_numbers = #tpu.dot_dimension_numbers<[1], [0], [0], [1], [0, 0, 1, 1], [], []>} : vector<256x144xbf16>, vector<144x128xbf16>, vector<256x128xf32> -> vector<256x128xf32>
    %14 = arith.addf %7, %13 : vector<256x128xf32>
    %c0_14 = arith.constant 0 : index
    %c2 = arith.constant 2 : index
    %c0_15 = arith.constant 0 : index
    %c0_16 = arith.constant 0 : index
    %15 = vector.load %arg1[%c0_14, %c2, %c0_15, %c0_16] : memref<1x34x32x144xbf16, #tpu.memory_space<vmem>>, vector<1x8x32x144xbf16>
    %16 = vector.shape_cast %15 : vector<1x8x32x144xbf16> to vector<8x32x144xbf16>
    %17 = vector.shape_cast %16 : vector<8x32x144xbf16> to vector<256x144xbf16>
    %c2_17 = arith.constant 2 : index
    %c0_18 = arith.constant 0 : index
    %c0_19 = arith.constant 0 : index
    %18 = vector.load %arg2[%c2_17, %c0_18, %c0_19] : memref<3x144x128xbf16, #tpu.memory_space<vmem>>, vector<1x144x128xbf16>
    %19 = vector.shape_cast %18 : vector<1x144x128xbf16> to vector<144x128xbf16>
    %cst_20 = arith.constant dense<0.000000e+00> : vector<256x128xf32>
    %20 = tpu.matmul %17, %19, %cst_20 {dimension_numbers = #tpu.dot_dimension_numbers<[1], [0], [0], [1], [0, 0, 1, 1], [], []>} : vector<256x144xbf16>, vector<144x128xbf16>, vector<256x128xf32> -> vector<256x128xf32>
    %21 = arith.addf %14, %20 : vector<256x128xf32>
    %c0_21 = arith.constant 0 : index
    %c0_22 = arith.constant 0 : index
    %22 = vector.load %arg3[%c0_21, %c0_22] : memref<1x128xf32, #tpu.memory_space<vmem>>, vector<1x128xf32>
    %23 = vector.broadcast %22 : vector<1x128xf32> to vector<256x128xf32>
    %24 = arith.addf %21, %23 : vector<256x128xf32>
    %cst_23 = arith.constant 0.000000e+00 : f32
    %25 = vector.broadcast %cst_23 : f32 to vector<256x128xf32>
    %26 = arith.maximumf %24, %25 : vector<256x128xf32>
    %27 = vector.shape_cast %26 : vector<256x128xf32> to vector<8x32x128xf32>
    %c0_24 = arith.constant 0 : index
    %c0_25 = arith.constant 0 : index
    %c0_26 = arith.constant 0 : index
    %28 = vector.load %arg5[%c0_24, %c0_25, %c0_26] : memref<32x32x128xf32, #tpu.memory_space<vmem>>, vector<8x32x128xf32>
    tpu.vector_store %arg5[%c0_24, %c0_25, %c0_26], %27 {strides = array<i32>} : memref<32x32x128xf32, #tpu.memory_space<vmem>>, vector<8x32x128xf32>,
    %cst_27 = arith.constant 0.000000e+00 : f32
    %29 = vector.broadcast %cst_27 : f32 to vector<256x128xf32>
    %c0_28 = arith.constant 0 : index
    %c8 = arith.constant 8 : index
    %c0_29 = arith.constant 0 : index
    %c0_30 = arith.constant 0 : index
    %30 = vector.load %arg1[%c0_28, %c8, %c0_29, %c0_30] : memref<1x34x32x144xbf16, #tpu.memory_space<vmem>>, vector<1x8x32x144xbf16>
    %31 = vector.shape_cast %30 : vector<1x8x32x144xbf16> to vector<8x32x144xbf16>
    %32 = vector.shape_cast %31 : vector<8x32x144xbf16> to vector<256x144xbf16>
    %c0_31 = arith.constant 0 : index
    %c0_32 = arith.constant 0 : index
    %c0_33 = arith.constant 0 : index
    %33 = vector.load %arg2[%c0_31, %c0_32, %c0_33] : memref<3x144x128xbf16, #tpu.memory_space<vmem>>, vector<1x144x128xbf16>
    %34 = vector.shape_cast %33 : vector<1x144x128xbf16> to vector<144x128xbf16>
    %cst_34 = arith.constant dense<0.000000e+00> : vector<256x128xf32>
    %35 = tpu.matmul %32, %34, %cst_34 {dimension_numbers = #tpu.dot_dimension_numbers<[1], [0], [0], [1], [0, 0, 1, 1], [], []>} : vector<256x144xbf16>, vector<144x128xbf16>, vector<256x128xf32> -> vector<256x128xf32>
    %36 = arith.addf %29, %35 : vector<256x128xf32>
    %c0_35 = arith.constant 0 : index
    %c9 = arith.constant 9 : index
    %c0_36 = arith.constant 0 : index
    %c0_37 = arith.constant 0 : index
    %37 = vector.load %arg1[%c0_35, %c9, %c0_36, %c0_37] : memref<1x34x32x144xbf16, #tpu.memory_space<vmem>>, vector<1x8x32x144xbf16>
    %38 = vector.shape_cast %37 : vector<1x8x32x144xbf16> to vector<8x32x144xbf16>
    %39 = vector.shape_cast %38 : vector<8x32x144xbf16> to vector<256x144xbf16>
    %c1_38 = arith.constant 1 : index
    %c0_39 = arith.constant 0 : index
    %c0_40 = arith.constant 0 : index
    %40 = vector.load %arg2[%c1_38, %c0_39, %c0_40] : memref<3x144x128xbf16, #tpu.memory_space<vmem>>, vector<1x144x128xbf16>
    %41 = vector.shape_cast %40 : vector<1x144x128xbf16> to vector<144x128xbf16>
    %cst_41 = arith.constant dense<0.000000e+00> : vector<256x128xf32>
    %42 = tpu.matmul %39, %41, %cst_41 {dimension_numbers = #tpu.dot_dimension_numbers<[1], [0], [0], [1], [0, 0, 1, 1], [], []>} : vector<256x144xbf16>, vector<144x128xbf16>, vector<256x128xf32> -> vector<256x128xf32>
    %43 = arith.addf %36, %42 : vector<256x128xf32>
    %c0_42 = arith.constant 0 : index
    %c10 = arith.constant 10 : index
    %c0_43 = arith.constant 0 : index
    %c0_44 = arith.constant 0 : index
    %44 = vector.load %arg1[%c0_42, %c10, %c0_43, %c0_44] : memref<1x34x32x144xbf16, #tpu.memory_space<vmem>>, vector<1x8x32x144xbf16>
    %45 = vector.shape_cast %44 : vector<1x8x32x144xbf16> to vector<8x32x144xbf16>
    %46 = vector.shape_cast %45 : vector<8x32x144xbf16> to vector<256x144xbf16>
    %c2_45 = arith.constant 2 : index
    %c0_46 = arith.constant 0 : index
    %c0_47 = arith.constant 0 : index
    %47 = vector.load %arg2[%c2_45, %c0_46, %c0_47] : memref<3x144x128xbf16, #tpu.memory_space<vmem>>, vector<1x144x128xbf16>
    %48 = vector.shape_cast %47 : vector<1x144x128xbf16> to vector<144x128xbf16>
    %cst_48 = arith.constant dense<0.000000e+00> : vector<256x128xf32>
    %49 = tpu.matmul %46, %48, %cst_48 {dimension_numbers = #tpu.dot_dimension_numbers<[1], [0], [0], [1], [0, 0, 1, 1], [], []>} : vector<256x144xbf16>, vector<144x128xbf16>, vector<256x128xf32> -> vector<256x128xf32>
    %50 = arith.addf %43, %49 : vector<256x128xf32>
    %c0_49 = arith.constant 0 : index
    %c0_50 = arith.constant 0 : index
    %51 = vector.load %arg3[%c0_49, %c0_50] : memref<1x128xf32, #tpu.memory_space<vmem>>, vector<1x128xf32>
    %52 = vector.broadcast %51 : vector<1x128xf32> to vector<256x128xf32>
    %53 = arith.addf %50, %52 : vector<256x128xf32>
    %cst_51 = arith.constant 0.000000e+00 : f32
    %54 = vector.broadcast %cst_51 : f32 to vector<256x128xf32>
    %55 = arith.maximumf %53, %54 : vector<256x128xf32>
    %56 = vector.shape_cast %55 : vector<256x128xf32> to vector<8x32x128xf32>
    %c8_52 = arith.constant 8 : index
    %c0_53 = arith.constant 0 : index
    %c0_54 = arith.constant 0 : index
    %57 = vector.load %arg5[%c8_52, %c0_53, %c0_54] : memref<32x32x128xf32, #tpu.memory_space<vmem>>, vector<8x32x128xf32>
    tpu.vector_store %arg5[%c8_52, %c0_53, %c0_54], %56 {strides = array<i32>} : memref<32x32x128xf32, #tpu.memory_space<vmem>>, vector<8x32x128xf32>,
    %cst_55 = arith.constant 0.000000e+00 : f32
    %58 = vector.broadcast %cst_55 : f32 to vector<256x128xf32>
    %c0_56 = arith.constant 0 : index
    %c16 = arith.constant 16 : index
    %c0_57 = arith.constant 0 : index
    %c0_58 = arith.constant 0 : index
    %59 = vector.load %arg1[%c0_56, %c16, %c0_57, %c0_58] : memref<1x34x32x144xbf16, #tpu.memory_space<vmem>>, vector<1x8x32x144xbf16>
    %60 = vector.shape_cast %59 : vector<1x8x32x144xbf16> to vector<8x32x144xbf16>
    %61 = vector.shape_cast %60 : vector<8x32x144xbf16> to vector<256x144xbf16>
    %c0_59 = arith.constant 0 : index
    %c0_60 = arith.constant 0 : index
    %c0_61 = arith.constant 0 : index
    %62 = vector.load %arg2[%c0_59, %c0_60, %c0_61] : memref<3x144x128xbf16, #tpu.memory_space<vmem>>, vector<1x144x128xbf16>
    %63 = vector.shape_cast %62 : vector<1x144x128xbf16> to vector<144x128xbf16>
    %cst_62 = arith.constant dense<0.000000e+00> : vector<256x128xf32>
    %64 = tpu.matmul %61, %63, %cst_62 {dimension_numbers = #tpu.dot_dimension_numbers<[1], [0], [0], [1], [0, 0, 1, 1], [], []>} : vector<256x144xbf16>, vector<144x128xbf16>, vector<256x128xf32> -> vector<256x128xf32>
    %65 = arith.addf %58, %64 : vector<256x128xf32>
    %c0_63 = arith.constant 0 : index
    %c17 = arith.constant 17 : index
    %c0_64 = arith.constant 0 : index
    %c0_65 = arith.constant 0 : index
    %66 = vector.load %arg1[%c0_63, %c17, %c0_64, %c0_65] : memref<1x34x32x144xbf16, #tpu.memory_space<vmem>>, vector<1x8x32x144xbf16>
    %67 = vector.shape_cast %66 : vector<1x8x32x144xbf16> to vector<8x32x144xbf16>
    %68 = vector.shape_cast %67 : vector<8x32x144xbf16> to vector<256x144xbf16>
    %c1_66 = arith.constant 1 : index
    %c0_67 = arith.constant 0 : index
    %c0_68 = arith.constant 0 : index
    %69 = vector.load %arg2[%c1_66, %c0_67, %c0_68] : memref<3x144x128xbf16, #tpu.memory_space<vmem>>, vector<1x144x128xbf16>
    %70 = vector.shape_cast %69 : vector<1x144x128xbf16> to vector<144x128xbf16>
    %cst_69 = arith.constant dense<0.000000e+00> : vector<256x128xf32>
    %71 = tpu.matmul %68, %70, %cst_69 {dimension_numbers = #tpu.dot_dimension_numbers<[1], [0], [0], [1], [0, 0, 1, 1], [], []>} : vector<256x144xbf16>, vector<144x128xbf16>, vector<256x128xf32> -> vector<256x128xf32>
    %72 = arith.addf %65, %71 : vector<256x128xf32>
    %c0_70 = arith.constant 0 : index
    %c18 = arith.constant 18 : index
    %c0_71 = arith.constant 0 : index
    %c0_72 = arith.constant 0 : index
    %73 = vector.load %arg1[%c0_70, %c18, %c0_71, %c0_72] : memref<1x34x32x144xbf16, #tpu.memory_space<vmem>>, vector<1x8x32x144xbf16>
    %74 = vector.shape_cast %73 : vector<1x8x32x144xbf16> to vector<8x32x144xbf16>
    %75 = vector.shape_cast %74 : vector<8x32x144xbf16> to vector<256x144xbf16>
    %c2_73 = arith.constant 2 : index
    %c0_74 = arith.constant 0 : index
    %c0_75 = arith.constant 0 : index
    %76 = vector.load %arg2[%c2_73, %c0_74, %c0_75] : memref<3x144x128xbf16, #tpu.memory_space<vmem>>, vector<1x144x128xbf16>
    %77 = vector.shape_cast %76 : vector<1x144x128xbf16> to vector<144x128xbf16>
    %cst_76 = arith.constant dense<0.000000e+00> : vector<256x128xf32>
    %78 = tpu.matmul %75, %77, %cst_76 {dimension_numbers = #tpu.dot_dimension_numbers<[1], [0], [0], [1], [0, 0, 1, 1], [], []>} : vector<256x144xbf16>, vector<144x128xbf16>, vector<256x128xf32> -> vector<256x128xf32>
    %79 = arith.addf %72, %78 : vector<256x128xf32>
    %c0_77 = arith.constant 0 : index
    %c0_78 = arith.constant 0 : index
    %80 = vector.load %arg3[%c0_77, %c0_78] : memref<1x128xf32, #tpu.memory_space<vmem>>, vector<1x128xf32>
    %81 = vector.broadcast %80 : vector<1x128xf32> to vector<256x128xf32>
    %82 = arith.addf %79, %81 : vector<256x128xf32>
    %cst_79 = arith.constant 0.000000e+00 : f32
    %83 = vector.broadcast %cst_79 : f32 to vector<256x128xf32>
    %84 = arith.maximumf %82, %83 : vector<256x128xf32>
    %85 = vector.shape_cast %84 : vector<256x128xf32> to vector<8x32x128xf32>
    %c16_80 = arith.constant 16 : index
    %c0_81 = arith.constant 0 : index
    %c0_82 = arith.constant 0 : index
    %86 = vector.load %arg5[%c16_80, %c0_81, %c0_82] : memref<32x32x128xf32, #tpu.memory_space<vmem>>, vector<8x32x128xf32>
    tpu.vector_store %arg5[%c16_80, %c0_81, %c0_82], %85 {strides = array<i32>} : memref<32x32x128xf32, #tpu.memory_space<vmem>>, vector<8x32x128xf32>,
    %cst_83 = arith.constant 0.000000e+00 : f32
    %87 = vector.broadcast %cst_83 : f32 to vector<256x128xf32>
    %c0_84 = arith.constant 0 : index
    %c24 = arith.constant 24 : index
    %c0_85 = arith.constant 0 : index
    %c0_86 = arith.constant 0 : index
    %88 = vector.load %arg1[%c0_84, %c24, %c0_85, %c0_86] : memref<1x34x32x144xbf16, #tpu.memory_space<vmem>>, vector<1x8x32x144xbf16>
    %89 = vector.shape_cast %88 : vector<1x8x32x144xbf16> to vector<8x32x144xbf16>
    %90 = vector.shape_cast %89 : vector<8x32x144xbf16> to vector<256x144xbf16>
    %c0_87 = arith.constant 0 : index
    %c0_88 = arith.constant 0 : index
    %c0_89 = arith.constant 0 : index
    %91 = vector.load %arg2[%c0_87, %c0_88, %c0_89] : memref<3x144x128xbf16, #tpu.memory_space<vmem>>, vector<1x144x128xbf16>
    %92 = vector.shape_cast %91 : vector<1x144x128xbf16> to vector<144x128xbf16>
    %cst_90 = arith.constant dense<0.000000e+00> : vector<256x128xf32>
    %93 = tpu.matmul %90, %92, %cst_90 {dimension_numbers = #tpu.dot_dimension_numbers<[1], [0], [0], [1], [0, 0, 1, 1], [], []>} : vector<256x144xbf16>, vector<144x128xbf16>, vector<256x128xf32> -> vector<256x128xf32>
    %94 = arith.addf %87, %93 : vector<256x128xf32>
    %c0_91 = arith.constant 0 : index
    %c25 = arith.constant 25 : index
    %c0_92 = arith.constant 0 : index
    %c0_93 = arith.constant 0 : index
    %95 = vector.load %arg1[%c0_91, %c25, %c0_92, %c0_93] : memref<1x34x32x144xbf16, #tpu.memory_space<vmem>>, vector<1x8x32x144xbf16>
    %96 = vector.shape_cast %95 : vector<1x8x32x144xbf16> to vector<8x32x144xbf16>
    %97 = vector.shape_cast %96 : vector<8x32x144xbf16> to vector<256x144xbf16>
    %c1_94 = arith.constant 1 : index
    %c0_95 = arith.constant 0 : index
    %c0_96 = arith.constant 0 : index
    %98 = vector.load %arg2[%c1_94, %c0_95, %c0_96] : memref<3x144x128xbf16, #tpu.memory_space<vmem>>, vector<1x144x128xbf16>
    %99 = vector.shape_cast %98 : vector<1x144x128xbf16> to vector<144x128xbf16>
    %cst_97 = arith.constant dense<0.000000e+00> : vector<256x128xf32>
    %100 = tpu.matmul %97, %99, %cst_97 {dimension_numbers = #tpu.dot_dimension_numbers<[1], [0], [0], [1], [0, 0, 1, 1], [], []>} : vector<256x144xbf16>, vector<144x128xbf16>, vector<256x128xf32> -> vector<256x128xf32>
    %101 = arith.addf %94, %100 : vector<256x128xf32>
    %c0_98 = arith.constant 0 : index
    %c26 = arith.constant 26 : index
    %c0_99 = arith.constant 0 : index
    %c0_100 = arith.constant 0 : index
    %102 = vector.load %arg1[%c0_98, %c26, %c0_99, %c0_100] : memref<1x34x32x144xbf16, #tpu.memory_space<vmem>>, vector<1x8x32x144xbf16>
    %103 = vector.shape_cast %102 : vector<1x8x32x144xbf16> to vector<8x32x144xbf16>
    %104 = vector.shape_cast %103 : vector<8x32x144xbf16> to vector<256x144xbf16>
    %c2_101 = arith.constant 2 : index
    %c0_102 = arith.constant 0 : index
    %c0_103 = arith.constant 0 : index
    %105 = vector.load %arg2[%c2_101, %c0_102, %c0_103] : memref<3x144x128xbf16, #tpu.memory_space<vmem>>, vector<1x144x128xbf16>
    %106 = vector.shape_cast %105 : vector<1x144x128xbf16> to vector<144x128xbf16>
    %cst_104 = arith.constant dense<0.000000e+00> : vector<256x128xf32>
    %107 = tpu.matmul %104, %106, %cst_104 {dimension_numbers = #tpu.dot_dimension_numbers<[1], [0], [0], [1], [0, 0, 1, 1], [], []>} : vector<256x144xbf16>, vector<144x128xbf16>, vector<256x128xf32> -> vector<256x128xf32>
    %108 = arith.addf %101, %107 : vector<256x128xf32>
    %c0_105 = arith.constant 0 : index
    %c0_106 = arith.constant 0 : index
    %109 = vector.load %arg3[%c0_105, %c0_106] : memref<1x128xf32, #tpu.memory_space<vmem>>, vector<1x128xf32>
    %110 = vector.broadcast %109 : vector<1x128xf32> to vector<256x128xf32>
    %111 = arith.addf %108, %110 : vector<256x128xf32>
    %cst_107 = arith.constant 0.000000e+00 : f32
    %112 = vector.broadcast %cst_107 : f32 to vector<256x128xf32>
    %113 = arith.maximumf %111, %112 : vector<256x128xf32>
    %114 = vector.shape_cast %113 : vector<256x128xf32> to vector<8x32x128xf32>
    %c24_108 = arith.constant 24 : index
    %c0_109 = arith.constant 0 : index
    %c0_110 = arith.constant 0 : index
    %115 = vector.load %arg5[%c24_108, %c0_109, %c0_110] : memref<32x32x128xf32, #tpu.memory_space<vmem>>, vector<8x32x128xf32>
    tpu.vector_store %arg5[%c24_108, %c0_109, %c0_110], %114 {strides = array<i32>} : memref<32x32x128xf32, #tpu.memory_space<vmem>>, vector<8x32x128xf32>,
    %c0_111 = arith.constant 0 : index
    %c0_112 = arith.constant 0 : index
    %c0_113 = arith.constant 0 : index
    %116 = vector.load %arg5[%c0_111, %c0_112, %c0_113] : memref<32x32x128xf32, #tpu.memory_space<vmem>>, vector<1x32x128xf32>
    %117 = vector.shape_cast %116 : vector<1x32x128xf32> to vector<32x128xf32>
    %c1_114 = arith.constant 1 : index
    %c0_115 = arith.constant 0 : index
    %c0_116 = arith.constant 0 : index
    %118 = vector.load %arg5[%c1_114, %c0_115, %c0_116] : memref<32x32x128xf32, #tpu.memory_space<vmem>>, vector<1x32x128xf32>
    %119 = vector.shape_cast %118 : vector<1x32x128xf32> to vector<32x128xf32>
    %120 = arith.maximumf %117, %119 : vector<32x128xf32>
    %c2_117 = arith.constant 2 : index
    %c0_118 = arith.constant 0 : index
    %c0_119 = arith.constant 0 : index
    %121 = vector.load %arg5[%c2_117, %c0_118, %c0_119] : memref<32x32x128xf32, #tpu.memory_space<vmem>>, vector<1x32x128xf32>
    %122 = vector.shape_cast %121 : vector<1x32x128xf32> to vector<32x128xf32>
    %123 = arith.maximumf %120, %122 : vector<32x128xf32>
    %c0_120 = arith.constant 0 : index
    %c0_121 = arith.constant 0 : index
    %c0_122 = arith.constant 0 : index
    %c0_123 = arith.constant 0 : index
    %124 = vector.load %arg4[%c0_120, %c0_121, %c0_122, %c0_123] : memref<1x15x32x128xf32, #tpu.memory_space<vmem>>, vector<1x1x32x128xf32>
    %125 = vector.shape_cast %124 : vector<1x1x32x128xf32> to vector<32x128xf32>
    %126 = vector.shape_cast %123 : vector<32x128xf32> to vector<1x1x32x128xf32>
    tpu.vector_store %arg4[%c0_120, %c0_121, %c0_122, %c0_123], %126 {strides = array<i32>} : memref<1x15x32x128xf32, #tpu.memory_space<vmem>>, vector<1x1x32x128xf32>,
    %c2_124 = arith.constant 2 : index
    %c0_125 = arith.constant 0 : index
    %c0_126 = arith.constant 0 : index
    %127 = vector.load %arg5[%c2_124, %c0_125, %c0_126] : memref<32x32x128xf32, #tpu.memory_space<vmem>>, vector<1x32x128xf32>
    %128 = vector.shape_cast %127 : vector<1x32x128xf32> to vector<32x128xf32>
    %c3 = arith.constant 3 : index
    %c0_127 = arith.constant 0 : index
    %c0_128 = arith.constant 0 : index
    %129 = vector.load %arg5[%c3, %c0_127, %c0_128] : memref<32x32x128xf32, #tpu.memory_space<vmem>>, vector<1x32x128xf32>
    %130 = vector.shape_cast %129 : vector<1x32x128xf32> to vector<32x128xf32>
    %131 = arith.maximumf %128, %130 : vector<32x128xf32>
    %c4 = arith.constant 4 : index
    %c0_129 = arith.constant 0 : index
    %c0_130 = arith.constant 0 : index
    %132 = vector.load %arg5[%c4, %c0_129, %c0_130] : memref<32x32x128xf32, #tpu.memory_space<vmem>>, vector<1x32x128xf32>
    %133 = vector.shape_cast %132 : vector<1x32x128xf32> to vector<32x128xf32>
    %134 = arith.maximumf %131, %133 : vector<32x128xf32>
    %c0_131 = arith.constant 0 : index
    %c1_132 = arith.constant 1 : index
    %c0_133 = arith.constant 0 : index
    %c0_134 = arith.constant 0 : index
    %135 = vector.load %arg4[%c0_131, %c1_132, %c0_133, %c0_134] : memref<1x15x32x128xf32, #tpu.memory_space<vmem>>, vector<1x1x32x128xf32>
    %136 = vector.shape_cast %135 : vector<1x1x32x128xf32> to vector<32x128xf32>
    %137 = vector.shape_cast %134 : vector<32x128xf32> to vector<1x1x32x128xf32>
    tpu.vector_store %arg4[%c0_131, %c1_132, %c0_133, %c0_134], %137 {strides = array<i32>} : memref<1x15x32x128xf32, #tpu.memory_space<vmem>>, vector<1x1x32x128xf32>,
    %c4_135 = arith.constant 4 : index
    %c0_136 = arith.constant 0 : index
    %c0_137 = arith.constant 0 : index
    %138 = vector.load %arg5[%c4_135, %c0_136, %c0_137] : memref<32x32x128xf32, #tpu.memory_space<vmem>>, vector<1x32x128xf32>
    %139 = vector.shape_cast %138 : vector<1x32x128xf32> to vector<32x128xf32>
    %c5 = arith.constant 5 : index
    %c0_138 = arith.constant 0 : index
    %c0_139 = arith.constant 0 : index
    %140 = vector.load %arg5[%c5, %c0_138, %c0_139] : memref<32x32x128xf32, #tpu.memory_space<vmem>>, vector<1x32x128xf32>
    %141 = vector.shape_cast %140 : vector<1x32x128xf32> to vector<32x128xf32>
    %142 = arith.maximumf %139, %141 : vector<32x128xf32>
    %c6 = arith.constant 6 : index
    %c0_140 = arith.constant 0 : index
    %c0_141 = arith.constant 0 : index
    %143 = vector.load %arg5[%c6, %c0_140, %c0_141] : memref<32x32x128xf32, #tpu.memory_space<vmem>>, vector<1x32x128xf32>
    %144 = vector.shape_cast %143 : vector<1x32x128xf32> to vector<32x128xf32>
    %145 = arith.maximumf %142, %144 : vector<32x128xf32>
    %c0_142 = arith.constant 0 : index
    %c2_143 = arith.constant 2 : index
    %c0_144 = arith.constant 0 : index
    %c0_145 = arith.constant 0 : index
    %146 = vector.load %arg4[%c0_142, %c2_143, %c0_144, %c0_145] : memref<1x15x32x128xf32, #tpu.memory_space<vmem>>, vector<1x1x32x128xf32>
    %147 = vector.shape_cast %146 : vector<1x1x32x128xf32> to vector<32x128xf32>
    %148 = vector.shape_cast %145 : vector<32x128xf32> to vector<1x1x32x128xf32>
    tpu.vector_store %arg4[%c0_142, %c2_143, %c0_144, %c0_145], %148 {strides = array<i32>} : memref<1x15x32x128xf32, #tpu.memory_space<vmem>>, vector<1x1x32x128xf32>,
    %c6_146 = arith.constant 6 : index
    %c0_147 = arith.constant 0 : index
    %c0_148 = arith.constant 0 : index
    %149 = vector.load %arg5[%c6_146, %c0_147, %c0_148] : memref<32x32x128xf32, #tpu.memory_space<vmem>>, vector<1x32x128xf32>
    %150 = vector.shape_cast %149 : vector<1x32x128xf32> to vector<32x128xf32>
    %c7 = arith.constant 7 : index
    %c0_149 = arith.constant 0 : index
    %c0_150 = arith.constant 0 : index
    %151 = vector.load %arg5[%c7, %c0_149, %c0_150] : memref<32x32x128xf32, #tpu.memory_space<vmem>>, vector<1x32x128xf32>
    %152 = vector.shape_cast %151 : vector<1x32x128xf32> to vector<32x128xf32>
    %153 = arith.maximumf %150, %152 : vector<32x128xf32>
    %c8_151 = arith.constant 8 : index
    %c0_152 = arith.constant 0 : index
    %c0_153 = arith.constant 0 : index
    %154 = vector.load %arg5[%c8_151, %c0_152, %c0_153] : memref<32x32x128xf32, #tpu.memory_space<vmem>>, vector<1x32x128xf32>
    %155 = vector.shape_cast %154 : vector<1x32x128xf32> to vector<32x128xf32>
    %156 = arith.maximumf %153, %155 : vector<32x128xf32>
    %c0_154 = arith.constant 0 : index
    %c3_155 = arith.constant 3 : index
    %c0_156 = arith.constant 0 : index
    %c0_157 = arith.constant 0 : index
    %157 = vector.load %arg4[%c0_154, %c3_155, %c0_156, %c0_157] : memref<1x15x32x128xf32, #tpu.memory_space<vmem>>, vector<1x1x32x128xf32>
    %158 = vector.shape_cast %157 : vector<1x1x32x128xf32> to vector<32x128xf32>
    %159 = vector.shape_cast %156 : vector<32x128xf32> to vector<1x1x32x128xf32>
    tpu.vector_store %arg4[%c0_154, %c3_155, %c0_156, %c0_157], %159 {strides = array<i32>} : memref<1x15x32x128xf32, #tpu.memory_space<vmem>>, vector<1x1x32x128xf32>,
    %c8_158 = arith.constant 8 : index
    %c0_159 = arith.constant 0 : index
    %c0_160 = arith.constant 0 : index
    %160 = vector.load %arg5[%c8_158, %c0_159, %c0_160] : memref<32x32x128xf32, #tpu.memory_space<vmem>>, vector<1x32x128xf32>
    %161 = vector.shape_cast %160 : vector<1x32x128xf32> to vector<32x128xf32>
    %c9_161 = arith.constant 9 : index
    %c0_162 = arith.constant 0 : index
    %c0_163 = arith.constant 0 : index
    %162 = vector.load %arg5[%c9_161, %c0_162, %c0_163] : memref<32x32x128xf32, #tpu.memory_space<vmem>>, vector<1x32x128xf32>
    %163 = vector.shape_cast %162 : vector<1x32x128xf32> to vector<32x128xf32>
    %164 = arith.maximumf %161, %163 : vector<32x128xf32>
    %c10_164 = arith.constant 10 : index
    %c0_165 = arith.constant 0 : index
    %c0_166 = arith.constant 0 : index
    %165 = vector.load %arg5[%c10_164, %c0_165, %c0_166] : memref<32x32x128xf32, #tpu.memory_space<vmem>>, vector<1x32x128xf32>
    %166 = vector.shape_cast %165 : vector<1x32x128xf32> to vector<32x128xf32>
    %167 = arith.maximumf %164, %166 : vector<32x128xf32>
    %c0_167 = arith.constant 0 : index
    %c4_168 = arith.constant 4 : index
    %c0_169 = arith.constant 0 : index
    %c0_170 = arith.constant 0 : index
    %168 = vector.load %arg4[%c0_167, %c4_168, %c0_169, %c0_170] : memref<1x15x32x128xf32, #tpu.memory_space<vmem>>, vector<1x1x32x128xf32>
    %169 = vector.shape_cast %168 : vector<1x1x32x128xf32> to vector<32x128xf32>
    %170 = vector.shape_cast %167 : vector<32x128xf32> to vector<1x1x32x128xf32>
    tpu.vector_store %arg4[%c0_167, %c4_168, %c0_169, %c0_170], %170 {strides = array<i32>} : memref<1x15x32x128xf32, #tpu.memory_space<vmem>>, vector<1x1x32x128xf32>,
    %c10_171 = arith.constant 10 : index
    %c0_172 = arith.constant 0 : index
    %c0_173 = arith.constant 0 : index
    %171 = vector.load %arg5[%c10_171, %c0_172, %c0_173] : memref<32x32x128xf32, #tpu.memory_space<vmem>>, vector<1x32x128xf32>
    %172 = vector.shape_cast %171 : vector<1x32x128xf32> to vector<32x128xf32>
    %c11 = arith.constant 11 : index
    %c0_174 = arith.constant 0 : index
    %c0_175 = arith.constant 0 : index
    %173 = vector.load %arg5[%c11, %c0_174, %c0_175] : memref<32x32x128xf32, #tpu.memory_space<vmem>>, vector<1x32x128xf32>
    %174 = vector.shape_cast %173 : vector<1x32x128xf32> to vector<32x128xf32>
    %175 = arith.maximumf %172, %174 : vector<32x128xf32>
    %c12 = arith.constant 12 : index
    %c0_176 = arith.constant 0 : index
    %c0_177 = arith.constant 0 : index
    %176 = vector.load %arg5[%c12, %c0_176, %c0_177] : memref<32x32x128xf32, #tpu.memory_space<vmem>>, vector<1x32x128xf32>
    %177 = vector.shape_cast %176 : vector<1x32x128xf32> to vector<32x128xf32>
    %178 = arith.maximumf %175, %177 : vector<32x128xf32>
    %c0_178 = arith.constant 0 : index
    %c5_179 = arith.constant 5 : index
    %c0_180 = arith.constant 0 : index
    %c0_181 = arith.constant 0 : index
    %179 = vector.load %arg4[%c0_178, %c5_179, %c0_180, %c0_181] : memref<1x15x32x128xf32, #tpu.memory_space<vmem>>, vector<1x1x32x128xf32>
    %180 = vector.shape_cast %179 : vector<1x1x32x128xf32> to vector<32x128xf32>
    %181 = vector.shape_cast %178 : vector<32x128xf32> to vector<1x1x32x128xf32>
    tpu.vector_store %arg4[%c0_178, %c5_179, %c0_180, %c0_181], %181 {strides = array<i32>} : memref<1x15x32x128xf32, #tpu.memory_space<vmem>>, vector<1x1x32x128xf32>,
    %c12_182 = arith.constant 12 : index
    %c0_183 = arith.constant 0 : index
    %c0_184 = arith.constant 0 : index
    %182 = vector.load %arg5[%c12_182, %c0_183, %c0_184] : memref<32x32x128xf32, #tpu.memory_space<vmem>>, vector<1x32x128xf32>
    %183 = vector.shape_cast %182 : vector<1x32x128xf32> to vector<32x128xf32>
    %c13 = arith.constant 13 : index
    %c0_185 = arith.constant 0 : index
    %c0_186 = arith.constant 0 : index
    %184 = vector.load %arg5[%c13, %c0_185, %c0_186] : memref<32x32x128xf32, #tpu.memory_space<vmem>>, vector<1x32x128xf32>
    %185 = vector.shape_cast %184 : vector<1x32x128xf32> to vector<32x128xf32>
    %186 = arith.maximumf %183, %185 : vector<32x128xf32>
    %c14 = arith.constant 14 : index
    %c0_187 = arith.constant 0 : index
    %c0_188 = arith.constant 0 : index
    %187 = vector.load %arg5[%c14, %c0_187, %c0_188] : memref<32x32x128xf32, #tpu.memory_space<vmem>>, vector<1x32x128xf32>
    %188 = vector.shape_cast %187 : vector<1x32x128xf32> to vector<32x128xf32>
    %189 = arith.maximumf %186, %188 : vector<32x128xf32>
    %c0_189 = arith.constant 0 : index
    %c6_190 = arith.constant 6 : index
    %c0_191 = arith.constant 0 : index
    %c0_192 = arith.constant 0 : index
    %190 = vector.load %arg4[%c0_189, %c6_190, %c0_191, %c0_192] : memref<1x15x32x128xf32, #tpu.memory_space<vmem>>, vector<1x1x32x128xf32>
    %191 = vector.shape_cast %190 : vector<1x1x32x128xf32> to vector<32x128xf32>
    %192 = vector.shape_cast %189 : vector<32x128xf32> to vector<1x1x32x128xf32>
    tpu.vector_store %arg4[%c0_189, %c6_190, %c0_191, %c0_192], %192 {strides = array<i32>} : memref<1x15x32x128xf32, #tpu.memory_space<vmem>>, vector<1x1x32x128xf32>,
    %c14_193 = arith.constant 14 : index
    %c0_194 = arith.constant 0 : index
    %c0_195 = arith.constant 0 : index
    %193 = vector.load %arg5[%c14_193, %c0_194, %c0_195] : memref<32x32x128xf32, #tpu.memory_space<vmem>>, vector<1x32x128xf32>
    %194 = vector.shape_cast %193 : vector<1x32x128xf32> to vector<32x128xf32>
    %c15 = arith.constant 15 : index
    %c0_196 = arith.constant 0 : index
    %c0_197 = arith.constant 0 : index
    %195 = vector.load %arg5[%c15, %c0_196, %c0_197] : memref<32x32x128xf32, #tpu.memory_space<vmem>>, vector<1x32x128xf32>
    %196 = vector.shape_cast %195 : vector<1x32x128xf32> to vector<32x128xf32>
    %197 = arith.maximumf %194, %196 : vector<32x128xf32>
    %c16_198 = arith.constant 16 : index
    %c0_199 = arith.constant 0 : index
    %c0_200 = arith.constant 0 : index
    %198 = vector.load %arg5[%c16_198, %c0_199, %c0_200] : memref<32x32x128xf32, #tpu.memory_space<vmem>>, vector<1x32x128xf32>
    %199 = vector.shape_cast %198 : vector<1x32x128xf32> to vector<32x128xf32>
    %200 = arith.maximumf %197, %199 : vector<32x128xf32>
    %c0_201 = arith.constant 0 : index
    %c7_202 = arith.constant 7 : index
    %c0_203 = arith.constant 0 : index
    %c0_204 = arith.constant 0 : index
    %201 = vector.load %arg4[%c0_201, %c7_202, %c0_203, %c0_204] : memref<1x15x32x128xf32, #tpu.memory_space<vmem>>, vector<1x1x32x128xf32>
    %202 = vector.shape_cast %201 : vector<1x1x32x128xf32> to vector<32x128xf32>
    %203 = vector.shape_cast %200 : vector<32x128xf32> to vector<1x1x32x128xf32>
    tpu.vector_store %arg4[%c0_201, %c7_202, %c0_203, %c0_204], %203 {strides = array<i32>} : memref<1x15x32x128xf32, #tpu.memory_space<vmem>>, vector<1x1x32x128xf32>,
    %c16_205 = arith.constant 16 : index
    %c0_206 = arith.constant 0 : index
    %c0_207 = arith.constant 0 : index
    %204 = vector.load %arg5[%c16_205, %c0_206, %c0_207] : memref<32x32x128xf32, #tpu.memory_space<vmem>>, vector<1x32x128xf32>
    %205 = vector.shape_cast %204 : vector<1x32x128xf32> to vector<32x128xf32>
    %c17_208 = arith.constant 17 : index
    %c0_209 = arith.constant 0 : index
    %c0_210 = arith.constant 0 : index
    %206 = vector.load %arg5[%c17_208, %c0_209, %c0_210] : memref<32x32x128xf32, #tpu.memory_space<vmem>>, vector<1x32x128xf32>
    %207 = vector.shape_cast %206 : vector<1x32x128xf32> to vector<32x128xf32>
    %208 = arith.maximumf %205, %207 : vector<32x128xf32>
    %c18_211 = arith.constant 18 : index
    %c0_212 = arith.constant 0 : index
    %c0_213 = arith.constant 0 : index
    %209 = vector.load %arg5[%c18_211, %c0_212, %c0_213] : memref<32x32x128xf32, #tpu.memory_space<vmem>>, vector<1x32x128xf32>
    %210 = vector.shape_cast %209 : vector<1x32x128xf32> to vector<32x128xf32>
    %211 = arith.maximumf %208, %210 : vector<32x128xf32>
    %c0_214 = arith.constant 0 : index
    %c8_215 = arith.constant 8 : index
    %c0_216 = arith.constant 0 : index
    %c0_217 = arith.constant 0 : index
    %212 = vector.load %arg4[%c0_214, %c8_215, %c0_216, %c0_217] : memref<1x15x32x128xf32, #tpu.memory_space<vmem>>, vector<1x1x32x128xf32>
    %213 = vector.shape_cast %212 : vector<1x1x32x128xf32> to vector<32x128xf32>
    %214 = vector.shape_cast %211 : vector<32x128xf32> to vector<1x1x32x128xf32>
    tpu.vector_store %arg4[%c0_214, %c8_215, %c0_216, %c0_217], %214 {strides = array<i32>} : memref<1x15x32x128xf32, #tpu.memory_space<vmem>>, vector<1x1x32x128xf32>,
    %c18_218 = arith.constant 18 : index
    %c0_219 = arith.constant 0 : index
    %c0_220 = arith.constant 0 : index
    %215 = vector.load %arg5[%c18_218, %c0_219, %c0_220] : memref<32x32x128xf32, #tpu.memory_space<vmem>>, vector<1x32x128xf32>
    %216 = vector.shape_cast %215 : vector<1x32x128xf32> to vector<32x128xf32>
    %c19 = arith.constant 19 : index
    %c0_221 = arith.constant 0 : index
    %c0_222 = arith.constant 0 : index
    %217 = vector.load %arg5[%c19, %c0_221, %c0_222] : memref<32x32x128xf32, #tpu.memory_space<vmem>>, vector<1x32x128xf32>
    %218 = vector.shape_cast %217 : vector<1x32x128xf32> to vector<32x128xf32>
    %219 = arith.maximumf %216, %218 : vector<32x128xf32>
    %c20 = arith.constant 20 : index
    %c0_223 = arith.constant 0 : index
    %c0_224 = arith.constant 0 : index
    %220 = vector.load %arg5[%c20, %c0_223, %c0_224] : memref<32x32x128xf32, #tpu.memory_space<vmem>>, vector<1x32x128xf32>
    %221 = vector.shape_cast %220 : vector<1x32x128xf32> to vector<32x128xf32>
    %222 = arith.maximumf %219, %221 : vector<32x128xf32>
    %c0_225 = arith.constant 0 : index
    %c9_226 = arith.constant 9 : index
    %c0_227 = arith.constant 0 : index
    %c0_228 = arith.constant 0 : index
    %223 = vector.load %arg4[%c0_225, %c9_226, %c0_227, %c0_228] : memref<1x15x32x128xf32, #tpu.memory_space<vmem>>, vector<1x1x32x128xf32>
    %224 = vector.shape_cast %223 : vector<1x1x32x128xf32> to vector<32x128xf32>
    %225 = vector.shape_cast %222 : vector<32x128xf32> to vector<1x1x32x128xf32>
    tpu.vector_store %arg4[%c0_225, %c9_226, %c0_227, %c0_228], %225 {strides = array<i32>} : memref<1x15x32x128xf32, #tpu.memory_space<vmem>>, vector<1x1x32x128xf32>,
    %c20_229 = arith.constant 20 : index
    %c0_230 = arith.constant 0 : index
    %c0_231 = arith.constant 0 : index
    %226 = vector.load %arg5[%c20_229, %c0_230, %c0_231] : memref<32x32x128xf32, #tpu.memory_space<vmem>>, vector<1x32x128xf32>
    %227 = vector.shape_cast %226 : vector<1x32x128xf32> to vector<32x128xf32>
    %c21 = arith.constant 21 : index
    %c0_232 = arith.constant 0 : index
    %c0_233 = arith.constant 0 : index
    %228 = vector.load %arg5[%c21, %c0_232, %c0_233] : memref<32x32x128xf32, #tpu.memory_space<vmem>>, vector<1x32x128xf32>
    %229 = vector.shape_cast %228 : vector<1x32x128xf32> to vector<32x128xf32>
    %230 = arith.maximumf %227, %229 : vector<32x128xf32>
    %c22 = arith.constant 22 : index
    %c0_234 = arith.constant 0 : index
    %c0_235 = arith.constant 0 : index
    %231 = vector.load %arg5[%c22, %c0_234, %c0_235] : memref<32x32x128xf32, #tpu.memory_space<vmem>>, vector<1x32x128xf32>
    %232 = vector.shape_cast %231 : vector<1x32x128xf32> to vector<32x128xf32>
    %233 = arith.maximumf %230, %232 : vector<32x128xf32>
    %c0_236 = arith.constant 0 : index
    %c10_237 = arith.constant 10 : index
    %c0_238 = arith.constant 0 : index
    %c0_239 = arith.constant 0 : index
    %234 = vector.load %arg4[%c0_236, %c10_237, %c0_238, %c0_239] : memref<1x15x32x128xf32, #tpu.memory_space<vmem>>, vector<1x1x32x128xf32>
    %235 = vector.shape_cast %234 : vector<1x1x32x128xf32> to vector<32x128xf32>
    %236 = vector.shape_cast %233 : vector<32x128xf32> to vector<1x1x32x128xf32>
    tpu.vector_store %arg4[%c0_236, %c10_237, %c0_238, %c0_239], %236 {strides = array<i32>} : memref<1x15x32x128xf32, #tpu.memory_space<vmem>>, vector<1x1x32x128xf32>,
    %c22_240 = arith.constant 22 : index
    %c0_241 = arith.constant 0 : index
    %c0_242 = arith.constant 0 : index
    %237 = vector.load %arg5[%c22_240, %c0_241, %c0_242] : memref<32x32x128xf32, #tpu.memory_space<vmem>>, vector<1x32x128xf32>
    %238 = vector.shape_cast %237 : vector<1x32x128xf32> to vector<32x128xf32>
    %c23 = arith.constant 23 : index
    %c0_243 = arith.constant 0 : index
    %c0_244 = arith.constant 0 : index
    %239 = vector.load %arg5[%c23, %c0_243, %c0_244] : memref<32x32x128xf32, #tpu.memory_space<vmem>>, vector<1x32x128xf32>
    %240 = vector.shape_cast %239 : vector<1x32x128xf32> to vector<32x128xf32>
    %241 = arith.maximumf %238, %240 : vector<32x128xf32>
    %c24_245 = arith.constant 24 : index
    %c0_246 = arith.constant 0 : index
    %c0_247 = arith.constant 0 : index
    %242 = vector.load %arg5[%c24_245, %c0_246, %c0_247] : memref<32x32x128xf32, #tpu.memory_space<vmem>>, vector<1x32x128xf32>
    %243 = vector.shape_cast %242 : vector<1x32x128xf32> to vector<32x128xf32>
    %244 = arith.maximumf %241, %243 : vector<32x128xf32>
    %c0_248 = arith.constant 0 : index
    %c11_249 = arith.constant 11 : index
    %c0_250 = arith.constant 0 : index
    %c0_251 = arith.constant 0 : index
    %245 = vector.load %arg4[%c0_248, %c11_249, %c0_250, %c0_251] : memref<1x15x32x128xf32, #tpu.memory_space<vmem>>, vector<1x1x32x128xf32>
    %246 = vector.shape_cast %245 : vector<1x1x32x128xf32> to vector<32x128xf32>
    %247 = vector.shape_cast %244 : vector<32x128xf32> to vector<1x1x32x128xf32>
    tpu.vector_store %arg4[%c0_248, %c11_249, %c0_250, %c0_251], %247 {strides = array<i32>} : memref<1x15x32x128xf32, #tpu.memory_space<vmem>>, vector<1x1x32x128xf32>,
    %c24_252 = arith.constant 24 : index
    %c0_253 = arith.constant 0 : index
    %c0_254 = arith.constant 0 : index
    %248 = vector.load %arg5[%c24_252, %c0_253, %c0_254] : memref<32x32x128xf32, #tpu.memory_space<vmem>>, vector<1x32x128xf32>
    %249 = vector.shape_cast %248 : vector<1x32x128xf32> to vector<32x128xf32>
    %c25_255 = arith.constant 25 : index
    %c0_256 = arith.constant 0 : index
    %c0_257 = arith.constant 0 : index
    %250 = vector.load %arg5[%c25_255, %c0_256, %c0_257] : memref<32x32x128xf32, #tpu.memory_space<vmem>>, vector<1x32x128xf32>
    %251 = vector.shape_cast %250 : vector<1x32x128xf32> to vector<32x128xf32>
    %252 = arith.maximumf %249, %251 : vector<32x128xf32>
    %c26_258 = arith.constant 26 : index
    %c0_259 = arith.constant 0 : index
    %c0_260 = arith.constant 0 : index
    %253 = vector.load %arg5[%c26_258, %c0_259, %c0_260] : memref<32x32x128xf32, #tpu.memory_space<vmem>>, vector<1x32x128xf32>
    %254 = vector.shape_cast %253 : vector<1x32x128xf32> to vector<32x128xf32>
    %255 = arith.maximumf %252, %254 : vector<32x128xf32>
    %c0_261 = arith.constant 0 : index
    %c12_262 = arith.constant 12 : index
    %c0_263 = arith.constant 0 : index
    %c0_264 = arith.constant 0 : index
    %256 = vector.load %arg4[%c0_261, %c12_262, %c0_263, %c0_264] : memref<1x15x32x128xf32, #tpu.memory_space<vmem>>, vector<1x1x32x128xf32>
    %257 = vector.shape_cast %256 : vector<1x1x32x128xf32> to vector<32x128xf32>
    %258 = vector.shape_cast %255 : vector<32x128xf32> to vector<1x1x32x128xf32>
    tpu.vector_store %arg4[%c0_261, %c12_262, %c0_263, %c0_264], %258 {strides = array<i32>} : memref<1x15x32x128xf32, #tpu.memory_space<vmem>>, vector<1x1x32x128xf32>,
    %c26_265 = arith.constant 26 : index
    %c0_266 = arith.constant 0 : index
    %c0_267 = arith.constant 0 : index
    %259 = vector.load %arg5[%c26_265, %c0_266, %c0_267] : memref<32x32x128xf32, #tpu.memory_space<vmem>>, vector<1x32x128xf32>
    %260 = vector.shape_cast %259 : vector<1x32x128xf32> to vector<32x128xf32>
    %c27 = arith.constant 27 : index
    %c0_268 = arith.constant 0 : index
    %c0_269 = arith.constant 0 : index
    %261 = vector.load %arg5[%c27, %c0_268, %c0_269] : memref<32x32x128xf32, #tpu.memory_space<vmem>>, vector<1x32x128xf32>
    %262 = vector.shape_cast %261 : vector<1x32x128xf32> to vector<32x128xf32>
    %263 = arith.maximumf %260, %262 : vector<32x128xf32>
    %c28 = arith.constant 28 : index
    %c0_270 = arith.constant 0 : index
    %c0_271 = arith.constant 0 : index
    %264 = vector.load %arg5[%c28, %c0_270, %c0_271] : memref<32x32x128xf32, #tpu.memory_space<vmem>>, vector<1x32x128xf32>
    %265 = vector.shape_cast %264 : vector<1x32x128xf32> to vector<32x128xf32>
    %266 = arith.maximumf %263, %265 : vector<32x128xf32>
    %c0_272 = arith.constant 0 : index
    %c13_273 = arith.constant 13 : index
    %c0_274 = arith.constant 0 : index
    %c0_275 = arith.constant 0 : index
    %267 = vector.load %arg4[%c0_272, %c13_273, %c0_274, %c0_275] : memref<1x15x32x128xf32, #tpu.memory_space<vmem>>, vector<1x1x32x128xf32>
    %268 = vector.shape_cast %267 : vector<1x1x32x128xf32> to vector<32x128xf32>
    %269 = vector.shape_cast %266 : vector<32x128xf32> to vector<1x1x32x128xf32>
    tpu.vector_store %arg4[%c0_272, %c13_273, %c0_274, %c0_275], %269 {strides = array<i32>} : memref<1x15x32x128xf32, #tpu.memory_space<vmem>>, vector<1x1x32x128xf32>,
    %c28_276 = arith.constant 28 : index
    %c0_277 = arith.constant 0 : index
    %c0_278 = arith.constant 0 : index
    %270 = vector.load %arg5[%c28_276, %c0_277, %c0_278] : memref<32x32x128xf32, #tpu.memory_space<vmem>>, vector<1x32x128xf32>
    %271 = vector.shape_cast %270 : vector<1x32x128xf32> to vector<32x128xf32>
    %c29 = arith.constant 29 : index
    %c0_279 = arith.constant 0 : index
    %c0_280 = arith.constant 0 : index
    %272 = vector.load %arg5[%c29, %c0_279, %c0_280] : memref<32x32x128xf32, #tpu.memory_space<vmem>>, vector<1x32x128xf32>
    %273 = vector.shape_cast %272 : vector<1x32x128xf32> to vector<32x128xf32>
    %274 = arith.maximumf %271, %273 : vector<32x128xf32>
    %c30 = arith.constant 30 : index
    %c0_281 = arith.constant 0 : index
    %c0_282 = arith.constant 0 : index
    %275 = vector.load %arg5[%c30, %c0_281, %c0_282] : memref<32x32x128xf32, #tpu.memory_space<vmem>>, vector<1x32x128xf32>
    %276 = vector.shape_cast %275 : vector<1x32x128xf32> to vector<32x128xf32>
    %277 = arith.maximumf %274, %276 : vector<32x128xf32>
    %c0_283 = arith.constant 0 : index
    %c14_284 = arith.constant 14 : index
    %c0_285 = arith.constant 0 : index
    %c0_286 = arith.constant 0 : index
    %278 = vector.load %arg4[%c0_283, %c14_284, %c0_285, %c0_286] : memref<1x15x32x128xf32, #tpu.memory_space<vmem>>, vector<1x1x32x128xf32>
    %279 = vector.shape_cast %278 : vector<1x1x32x128xf32> to vector<32x128xf32>
    %280 = vector.shape_cast %277 : vector<32x128xf32> to vector<1x1x32x128xf32>
    tpu.vector_store %arg4[%c0_283, %c14_284, %c0_285, %c0_286], %280 {strides = array<i32>} : memref<1x15x32x128xf32, #tpu.memory_space<vmem>>, vector<1x1x32x128xf32>,
    return
  }
  func.func @transform_0(%arg0: i32) -> (i32, i32, i32, i32) {
    %c0_i32 = arith.constant 0 : i32
    %c0_i32_0 = arith.constant 0 : i32
    %c0_i32_1 = arith.constant 0 : i32
    %c0_i32_2 = arith.constant 0 : i32
    return %arg0, %c0_i32, %c0_i32_0, %c0_i32_1 : i32, i32, i32, i32
  }
  func.func @transform_1(%arg0: i32) -> (i32, i32, i32) {
    %c0_i32 = arith.constant 0 : i32
    %c0_i32_0 = arith.constant 0 : i32
    %c0_i32_1 = arith.constant 0 : i32
    %c0_i32_2 = arith.constant 0 : i32
    return %c0_i32, %c0_i32_0, %c0_i32_1 : i32, i32, i32
  }
  func.func @transform_2(%arg0: i32) -> (i32, i32) {
    %c0_i32 = arith.constant 0 : i32
    %c0_i32_0 = arith.constant 0 : i32
    %c0_i32_1 = arith.constant 0 : i32
    return %c0_i32, %c0_i32_0 : i32, i32
  }
  func.func @transform_3(%arg0: i32) -> (i32, i32, i32, i32) {
    %c0_i32 = arith.constant 0 : i32
    %c0_i32_0 = arith.constant 0 : i32
    %c0_i32_1 = arith.constant 0 : i32
    %c0_i32_2 = arith.constant 0 : i32
    return %arg0, %c0_i32, %c0_i32_0, %c0_i32_1 : i32, i32, i32, i32
  }
}

module attributes {stable_mosaic.version = 11 : i64} {
  func.func @_conv_kernel(%arg0: i32, %arg1: memref<1x20x16x640xbf16, #tpu.memory_space<vmem>>, %arg2: memref<5x640x128xbf16, #tpu.memory_space<vmem>>, %arg3: memref<1x128xf32, #tpu.memory_space<vmem>>, %arg4: memref<1x7x16x128xf32, #tpu.memory_space<vmem>>, %arg5: memref<16x16x128xf32, #tpu.memory_space<vmem>>) attributes {dimension_semantics = [#tpu.dimension_semantics<parallel>], iteration_bounds = array<i64: 2>, scalar_prefetch = 0 : i64, scratch_operands = 1 : i64, tpu.core_type = #tpu.core_type<tc>, window_params = [{transform_indices = @transform_0, window_bounds = array<i64: 1, 20, 16, 640>}, {pipeline_mode = #tpu.pipeline_mode<synchronous>, transform_indices = @transform_1, window_bounds = array<i64: 5, 640, 128>}, {pipeline_mode = #tpu.pipeline_mode<synchronous>, transform_indices = @transform_2, window_bounds = array<i64: 1, 128>}, {transform_indices = @transform_3, window_bounds = array<i64: 1, 7, 16, 128>}]} {
    %cst = arith.constant 0.000000e+00 : f32
    %0 = vector.broadcast %cst : f32 to vector<256x128xf32>
    %c0 = arith.constant 0 : index
    %c0_0 = arith.constant 0 : index
    %c0_1 = arith.constant 0 : index
    %c0_2 = arith.constant 0 : index
    %1 = vector.load %arg1[%c0, %c0_0, %c0_1, %c0_2] : memref<1x20x16x640xbf16, #tpu.memory_space<vmem>>, vector<1x16x16x640xbf16>
    %2 = vector.shape_cast %1 : vector<1x16x16x640xbf16> to vector<16x16x640xbf16>
    %3 = vector.shape_cast %2 : vector<16x16x640xbf16> to vector<256x640xbf16>
    %c0_3 = arith.constant 0 : index
    %c0_4 = arith.constant 0 : index
    %c0_5 = arith.constant 0 : index
    %4 = vector.load %arg2[%c0_3, %c0_4, %c0_5] : memref<5x640x128xbf16, #tpu.memory_space<vmem>>, vector<1x640x128xbf16>
    %5 = vector.shape_cast %4 : vector<1x640x128xbf16> to vector<640x128xbf16>
    %cst_6 = arith.constant dense<0.000000e+00> : vector<256x128xf32>
    %6 = tpu.matmul %3, %5, %cst_6 {dimension_numbers = #tpu.dot_dimension_numbers<[1], [0], [0], [1], [0, 0, 1, 1], [], []>} : vector<256x640xbf16>, vector<640x128xbf16>, vector<256x128xf32> -> vector<256x128xf32>
    %7 = arith.addf %0, %6 : vector<256x128xf32>
    %c0_7 = arith.constant 0 : index
    %c1 = arith.constant 1 : index
    %c0_8 = arith.constant 0 : index
    %c0_9 = arith.constant 0 : index
    %8 = vector.load %arg1[%c0_7, %c1, %c0_8, %c0_9] : memref<1x20x16x640xbf16, #tpu.memory_space<vmem>>, vector<1x16x16x640xbf16>
    %9 = vector.shape_cast %8 : vector<1x16x16x640xbf16> to vector<16x16x640xbf16>
    %10 = vector.shape_cast %9 : vector<16x16x640xbf16> to vector<256x640xbf16>
    %c1_10 = arith.constant 1 : index
    %c0_11 = arith.constant 0 : index
    %c0_12 = arith.constant 0 : index
    %11 = vector.load %arg2[%c1_10, %c0_11, %c0_12] : memref<5x640x128xbf16, #tpu.memory_space<vmem>>, vector<1x640x128xbf16>
    %12 = vector.shape_cast %11 : vector<1x640x128xbf16> to vector<640x128xbf16>
    %cst_13 = arith.constant dense<0.000000e+00> : vector<256x128xf32>
    %13 = tpu.matmul %10, %12, %cst_13 {dimension_numbers = #tpu.dot_dimension_numbers<[1], [0], [0], [1], [0, 0, 1, 1], [], []>} : vector<256x640xbf16>, vector<640x128xbf16>, vector<256x128xf32> -> vector<256x128xf32>
    %14 = arith.addf %7, %13 : vector<256x128xf32>
    %c0_14 = arith.constant 0 : index
    %c2 = arith.constant 2 : index
    %c0_15 = arith.constant 0 : index
    %c0_16 = arith.constant 0 : index
    %15 = vector.load %arg1[%c0_14, %c2, %c0_15, %c0_16] : memref<1x20x16x640xbf16, #tpu.memory_space<vmem>>, vector<1x16x16x640xbf16>
    %16 = vector.shape_cast %15 : vector<1x16x16x640xbf16> to vector<16x16x640xbf16>
    %17 = vector.shape_cast %16 : vector<16x16x640xbf16> to vector<256x640xbf16>
    %c2_17 = arith.constant 2 : index
    %c0_18 = arith.constant 0 : index
    %c0_19 = arith.constant 0 : index
    %18 = vector.load %arg2[%c2_17, %c0_18, %c0_19] : memref<5x640x128xbf16, #tpu.memory_space<vmem>>, vector<1x640x128xbf16>
    %19 = vector.shape_cast %18 : vector<1x640x128xbf16> to vector<640x128xbf16>
    %cst_20 = arith.constant dense<0.000000e+00> : vector<256x128xf32>
    %20 = tpu.matmul %17, %19, %cst_20 {dimension_numbers = #tpu.dot_dimension_numbers<[1], [0], [0], [1], [0, 0, 1, 1], [], []>} : vector<256x640xbf16>, vector<640x128xbf16>, vector<256x128xf32> -> vector<256x128xf32>
    %21 = arith.addf %14, %20 : vector<256x128xf32>
    %c0_21 = arith.constant 0 : index
    %c3 = arith.constant 3 : index
    %c0_22 = arith.constant 0 : index
    %c0_23 = arith.constant 0 : index
    %22 = vector.load %arg1[%c0_21, %c3, %c0_22, %c0_23] : memref<1x20x16x640xbf16, #tpu.memory_space<vmem>>, vector<1x16x16x640xbf16>
    %23 = vector.shape_cast %22 : vector<1x16x16x640xbf16> to vector<16x16x640xbf16>
    %24 = vector.shape_cast %23 : vector<16x16x640xbf16> to vector<256x640xbf16>
    %c3_24 = arith.constant 3 : index
    %c0_25 = arith.constant 0 : index
    %c0_26 = arith.constant 0 : index
    %25 = vector.load %arg2[%c3_24, %c0_25, %c0_26] : memref<5x640x128xbf16, #tpu.memory_space<vmem>>, vector<1x640x128xbf16>
    %26 = vector.shape_cast %25 : vector<1x640x128xbf16> to vector<640x128xbf16>
    %cst_27 = arith.constant dense<0.000000e+00> : vector<256x128xf32>
    %27 = tpu.matmul %24, %26, %cst_27 {dimension_numbers = #tpu.dot_dimension_numbers<[1], [0], [0], [1], [0, 0, 1, 1], [], []>} : vector<256x640xbf16>, vector<640x128xbf16>, vector<256x128xf32> -> vector<256x128xf32>
    %28 = arith.addf %21, %27 : vector<256x128xf32>
    %c0_28 = arith.constant 0 : index
    %c4 = arith.constant 4 : index
    %c0_29 = arith.constant 0 : index
    %c0_30 = arith.constant 0 : index
    %29 = vector.load %arg1[%c0_28, %c4, %c0_29, %c0_30] : memref<1x20x16x640xbf16, #tpu.memory_space<vmem>>, vector<1x16x16x640xbf16>
    %30 = vector.shape_cast %29 : vector<1x16x16x640xbf16> to vector<16x16x640xbf16>
    %31 = vector.shape_cast %30 : vector<16x16x640xbf16> to vector<256x640xbf16>
    %c4_31 = arith.constant 4 : index
    %c0_32 = arith.constant 0 : index
    %c0_33 = arith.constant 0 : index
    %32 = vector.load %arg2[%c4_31, %c0_32, %c0_33] : memref<5x640x128xbf16, #tpu.memory_space<vmem>>, vector<1x640x128xbf16>
    %33 = vector.shape_cast %32 : vector<1x640x128xbf16> to vector<640x128xbf16>
    %cst_34 = arith.constant dense<0.000000e+00> : vector<256x128xf32>
    %34 = tpu.matmul %31, %33, %cst_34 {dimension_numbers = #tpu.dot_dimension_numbers<[1], [0], [0], [1], [0, 0, 1, 1], [], []>} : vector<256x640xbf16>, vector<640x128xbf16>, vector<256x128xf32> -> vector<256x128xf32>
    %35 = arith.addf %28, %34 : vector<256x128xf32>
    %c0_35 = arith.constant 0 : index
    %c0_36 = arith.constant 0 : index
    %36 = vector.load %arg3[%c0_35, %c0_36] : memref<1x128xf32, #tpu.memory_space<vmem>>, vector<1x128xf32>
    %37 = vector.broadcast %36 : vector<1x128xf32> to vector<256x128xf32>
    %38 = arith.addf %35, %37 : vector<256x128xf32>
    %cst_37 = arith.constant 0.000000e+00 : f32
    %39 = vector.broadcast %cst_37 : f32 to vector<256x128xf32>
    %40 = arith.maximumf %38, %39 : vector<256x128xf32>
    %41 = vector.shape_cast %40 : vector<256x128xf32> to vector<16x16x128xf32>
    %c0_38 = arith.constant 0 : index
    %c0_39 = arith.constant 0 : index
    %c0_40 = arith.constant 0 : index
    %42 = vector.load %arg5[%c0_38, %c0_39, %c0_40] : memref<16x16x128xf32, #tpu.memory_space<vmem>>, vector<16x16x128xf32>
    tpu.vector_store %arg5[%c0_38, %c0_39, %c0_40], %41 {strides = array<i32>} : memref<16x16x128xf32, #tpu.memory_space<vmem>>, vector<16x16x128xf32>,
    %c0_41 = arith.constant 0 : index
    %c0_42 = arith.constant 0 : index
    %c0_43 = arith.constant 0 : index
    %43 = vector.load %arg5[%c0_41, %c0_42, %c0_43] : memref<16x16x128xf32, #tpu.memory_space<vmem>>, vector<1x16x128xf32>
    %44 = vector.shape_cast %43 : vector<1x16x128xf32> to vector<16x128xf32>
    %c1_44 = arith.constant 1 : index
    %c0_45 = arith.constant 0 : index
    %c0_46 = arith.constant 0 : index
    %45 = vector.load %arg5[%c1_44, %c0_45, %c0_46] : memref<16x16x128xf32, #tpu.memory_space<vmem>>, vector<1x16x128xf32>
    %46 = vector.shape_cast %45 : vector<1x16x128xf32> to vector<16x128xf32>
    %47 = arith.maximumf %44, %46 : vector<16x128xf32>
    %c2_47 = arith.constant 2 : index
    %c0_48 = arith.constant 0 : index
    %c0_49 = arith.constant 0 : index
    %48 = vector.load %arg5[%c2_47, %c0_48, %c0_49] : memref<16x16x128xf32, #tpu.memory_space<vmem>>, vector<1x16x128xf32>
    %49 = vector.shape_cast %48 : vector<1x16x128xf32> to vector<16x128xf32>
    %50 = arith.maximumf %47, %49 : vector<16x128xf32>
    %c0_50 = arith.constant 0 : index
    %c0_51 = arith.constant 0 : index
    %c0_52 = arith.constant 0 : index
    %c0_53 = arith.constant 0 : index
    %51 = vector.load %arg4[%c0_50, %c0_51, %c0_52, %c0_53] : memref<1x7x16x128xf32, #tpu.memory_space<vmem>>, vector<1x1x16x128xf32>
    %52 = vector.shape_cast %51 : vector<1x1x16x128xf32> to vector<16x128xf32>
    %53 = vector.shape_cast %50 : vector<16x128xf32> to vector<1x1x16x128xf32>
    tpu.vector_store %arg4[%c0_50, %c0_51, %c0_52, %c0_53], %53 {strides = array<i32>} : memref<1x7x16x128xf32, #tpu.memory_space<vmem>>, vector<1x1x16x128xf32>,
    %c2_54 = arith.constant 2 : index
    %c0_55 = arith.constant 0 : index
    %c0_56 = arith.constant 0 : index
    %54 = vector.load %arg5[%c2_54, %c0_55, %c0_56] : memref<16x16x128xf32, #tpu.memory_space<vmem>>, vector<1x16x128xf32>
    %55 = vector.shape_cast %54 : vector<1x16x128xf32> to vector<16x128xf32>
    %c3_57 = arith.constant 3 : index
    %c0_58 = arith.constant 0 : index
    %c0_59 = arith.constant 0 : index
    %56 = vector.load %arg5[%c3_57, %c0_58, %c0_59] : memref<16x16x128xf32, #tpu.memory_space<vmem>>, vector<1x16x128xf32>
    %57 = vector.shape_cast %56 : vector<1x16x128xf32> to vector<16x128xf32>
    %58 = arith.maximumf %55, %57 : vector<16x128xf32>
    %c4_60 = arith.constant 4 : index
    %c0_61 = arith.constant 0 : index
    %c0_62 = arith.constant 0 : index
    %59 = vector.load %arg5[%c4_60, %c0_61, %c0_62] : memref<16x16x128xf32, #tpu.memory_space<vmem>>, vector<1x16x128xf32>
    %60 = vector.shape_cast %59 : vector<1x16x128xf32> to vector<16x128xf32>
    %61 = arith.maximumf %58, %60 : vector<16x128xf32>
    %c0_63 = arith.constant 0 : index
    %c1_64 = arith.constant 1 : index
    %c0_65 = arith.constant 0 : index
    %c0_66 = arith.constant 0 : index
    %62 = vector.load %arg4[%c0_63, %c1_64, %c0_65, %c0_66] : memref<1x7x16x128xf32, #tpu.memory_space<vmem>>, vector<1x1x16x128xf32>
    %63 = vector.shape_cast %62 : vector<1x1x16x128xf32> to vector<16x128xf32>
    %64 = vector.shape_cast %61 : vector<16x128xf32> to vector<1x1x16x128xf32>
    tpu.vector_store %arg4[%c0_63, %c1_64, %c0_65, %c0_66], %64 {strides = array<i32>} : memref<1x7x16x128xf32, #tpu.memory_space<vmem>>, vector<1x1x16x128xf32>,
    %c4_67 = arith.constant 4 : index
    %c0_68 = arith.constant 0 : index
    %c0_69 = arith.constant 0 : index
    %65 = vector.load %arg5[%c4_67, %c0_68, %c0_69] : memref<16x16x128xf32, #tpu.memory_space<vmem>>, vector<1x16x128xf32>
    %66 = vector.shape_cast %65 : vector<1x16x128xf32> to vector<16x128xf32>
    %c5 = arith.constant 5 : index
    %c0_70 = arith.constant 0 : index
    %c0_71 = arith.constant 0 : index
    %67 = vector.load %arg5[%c5, %c0_70, %c0_71] : memref<16x16x128xf32, #tpu.memory_space<vmem>>, vector<1x16x128xf32>
    %68 = vector.shape_cast %67 : vector<1x16x128xf32> to vector<16x128xf32>
    %69 = arith.maximumf %66, %68 : vector<16x128xf32>
    %c6 = arith.constant 6 : index
    %c0_72 = arith.constant 0 : index
    %c0_73 = arith.constant 0 : index
    %70 = vector.load %arg5[%c6, %c0_72, %c0_73] : memref<16x16x128xf32, #tpu.memory_space<vmem>>, vector<1x16x128xf32>
    %71 = vector.shape_cast %70 : vector<1x16x128xf32> to vector<16x128xf32>
    %72 = arith.maximumf %69, %71 : vector<16x128xf32>
    %c0_74 = arith.constant 0 : index
    %c2_75 = arith.constant 2 : index
    %c0_76 = arith.constant 0 : index
    %c0_77 = arith.constant 0 : index
    %73 = vector.load %arg4[%c0_74, %c2_75, %c0_76, %c0_77] : memref<1x7x16x128xf32, #tpu.memory_space<vmem>>, vector<1x1x16x128xf32>
    %74 = vector.shape_cast %73 : vector<1x1x16x128xf32> to vector<16x128xf32>
    %75 = vector.shape_cast %72 : vector<16x128xf32> to vector<1x1x16x128xf32>
    tpu.vector_store %arg4[%c0_74, %c2_75, %c0_76, %c0_77], %75 {strides = array<i32>} : memref<1x7x16x128xf32, #tpu.memory_space<vmem>>, vector<1x1x16x128xf32>,
    %c6_78 = arith.constant 6 : index
    %c0_79 = arith.constant 0 : index
    %c0_80 = arith.constant 0 : index
    %76 = vector.load %arg5[%c6_78, %c0_79, %c0_80] : memref<16x16x128xf32, #tpu.memory_space<vmem>>, vector<1x16x128xf32>
    %77 = vector.shape_cast %76 : vector<1x16x128xf32> to vector<16x128xf32>
    %c7 = arith.constant 7 : index
    %c0_81 = arith.constant 0 : index
    %c0_82 = arith.constant 0 : index
    %78 = vector.load %arg5[%c7, %c0_81, %c0_82] : memref<16x16x128xf32, #tpu.memory_space<vmem>>, vector<1x16x128xf32>
    %79 = vector.shape_cast %78 : vector<1x16x128xf32> to vector<16x128xf32>
    %80 = arith.maximumf %77, %79 : vector<16x128xf32>
    %c8 = arith.constant 8 : index
    %c0_83 = arith.constant 0 : index
    %c0_84 = arith.constant 0 : index
    %81 = vector.load %arg5[%c8, %c0_83, %c0_84] : memref<16x16x128xf32, #tpu.memory_space<vmem>>, vector<1x16x128xf32>
    %82 = vector.shape_cast %81 : vector<1x16x128xf32> to vector<16x128xf32>
    %83 = arith.maximumf %80, %82 : vector<16x128xf32>
    %c0_85 = arith.constant 0 : index
    %c3_86 = arith.constant 3 : index
    %c0_87 = arith.constant 0 : index
    %c0_88 = arith.constant 0 : index
    %84 = vector.load %arg4[%c0_85, %c3_86, %c0_87, %c0_88] : memref<1x7x16x128xf32, #tpu.memory_space<vmem>>, vector<1x1x16x128xf32>
    %85 = vector.shape_cast %84 : vector<1x1x16x128xf32> to vector<16x128xf32>
    %86 = vector.shape_cast %83 : vector<16x128xf32> to vector<1x1x16x128xf32>
    tpu.vector_store %arg4[%c0_85, %c3_86, %c0_87, %c0_88], %86 {strides = array<i32>} : memref<1x7x16x128xf32, #tpu.memory_space<vmem>>, vector<1x1x16x128xf32>,
    %c8_89 = arith.constant 8 : index
    %c0_90 = arith.constant 0 : index
    %c0_91 = arith.constant 0 : index
    %87 = vector.load %arg5[%c8_89, %c0_90, %c0_91] : memref<16x16x128xf32, #tpu.memory_space<vmem>>, vector<1x16x128xf32>
    %88 = vector.shape_cast %87 : vector<1x16x128xf32> to vector<16x128xf32>
    %c9 = arith.constant 9 : index
    %c0_92 = arith.constant 0 : index
    %c0_93 = arith.constant 0 : index
    %89 = vector.load %arg5[%c9, %c0_92, %c0_93] : memref<16x16x128xf32, #tpu.memory_space<vmem>>, vector<1x16x128xf32>
    %90 = vector.shape_cast %89 : vector<1x16x128xf32> to vector<16x128xf32>
    %91 = arith.maximumf %88, %90 : vector<16x128xf32>
    %c10 = arith.constant 10 : index
    %c0_94 = arith.constant 0 : index
    %c0_95 = arith.constant 0 : index
    %92 = vector.load %arg5[%c10, %c0_94, %c0_95] : memref<16x16x128xf32, #tpu.memory_space<vmem>>, vector<1x16x128xf32>
    %93 = vector.shape_cast %92 : vector<1x16x128xf32> to vector<16x128xf32>
    %94 = arith.maximumf %91, %93 : vector<16x128xf32>
    %c0_96 = arith.constant 0 : index
    %c4_97 = arith.constant 4 : index
    %c0_98 = arith.constant 0 : index
    %c0_99 = arith.constant 0 : index
    %95 = vector.load %arg4[%c0_96, %c4_97, %c0_98, %c0_99] : memref<1x7x16x128xf32, #tpu.memory_space<vmem>>, vector<1x1x16x128xf32>
    %96 = vector.shape_cast %95 : vector<1x1x16x128xf32> to vector<16x128xf32>
    %97 = vector.shape_cast %94 : vector<16x128xf32> to vector<1x1x16x128xf32>
    tpu.vector_store %arg4[%c0_96, %c4_97, %c0_98, %c0_99], %97 {strides = array<i32>} : memref<1x7x16x128xf32, #tpu.memory_space<vmem>>, vector<1x1x16x128xf32>,
    %c10_100 = arith.constant 10 : index
    %c0_101 = arith.constant 0 : index
    %c0_102 = arith.constant 0 : index
    %98 = vector.load %arg5[%c10_100, %c0_101, %c0_102] : memref<16x16x128xf32, #tpu.memory_space<vmem>>, vector<1x16x128xf32>
    %99 = vector.shape_cast %98 : vector<1x16x128xf32> to vector<16x128xf32>
    %c11 = arith.constant 11 : index
    %c0_103 = arith.constant 0 : index
    %c0_104 = arith.constant 0 : index
    %100 = vector.load %arg5[%c11, %c0_103, %c0_104] : memref<16x16x128xf32, #tpu.memory_space<vmem>>, vector<1x16x128xf32>
    %101 = vector.shape_cast %100 : vector<1x16x128xf32> to vector<16x128xf32>
    %102 = arith.maximumf %99, %101 : vector<16x128xf32>
    %c12 = arith.constant 12 : index
    %c0_105 = arith.constant 0 : index
    %c0_106 = arith.constant 0 : index
    %103 = vector.load %arg5[%c12, %c0_105, %c0_106] : memref<16x16x128xf32, #tpu.memory_space<vmem>>, vector<1x16x128xf32>
    %104 = vector.shape_cast %103 : vector<1x16x128xf32> to vector<16x128xf32>
    %105 = arith.maximumf %102, %104 : vector<16x128xf32>
    %c0_107 = arith.constant 0 : index
    %c5_108 = arith.constant 5 : index
    %c0_109 = arith.constant 0 : index
    %c0_110 = arith.constant 0 : index
    %106 = vector.load %arg4[%c0_107, %c5_108, %c0_109, %c0_110] : memref<1x7x16x128xf32, #tpu.memory_space<vmem>>, vector<1x1x16x128xf32>
    %107 = vector.shape_cast %106 : vector<1x1x16x128xf32> to vector<16x128xf32>
    %108 = vector.shape_cast %105 : vector<16x128xf32> to vector<1x1x16x128xf32>
    tpu.vector_store %arg4[%c0_107, %c5_108, %c0_109, %c0_110], %108 {strides = array<i32>} : memref<1x7x16x128xf32, #tpu.memory_space<vmem>>, vector<1x1x16x128xf32>,
    %c12_111 = arith.constant 12 : index
    %c0_112 = arith.constant 0 : index
    %c0_113 = arith.constant 0 : index
    %109 = vector.load %arg5[%c12_111, %c0_112, %c0_113] : memref<16x16x128xf32, #tpu.memory_space<vmem>>, vector<1x16x128xf32>
    %110 = vector.shape_cast %109 : vector<1x16x128xf32> to vector<16x128xf32>
    %c13 = arith.constant 13 : index
    %c0_114 = arith.constant 0 : index
    %c0_115 = arith.constant 0 : index
    %111 = vector.load %arg5[%c13, %c0_114, %c0_115] : memref<16x16x128xf32, #tpu.memory_space<vmem>>, vector<1x16x128xf32>
    %112 = vector.shape_cast %111 : vector<1x16x128xf32> to vector<16x128xf32>
    %113 = arith.maximumf %110, %112 : vector<16x128xf32>
    %c14 = arith.constant 14 : index
    %c0_116 = arith.constant 0 : index
    %c0_117 = arith.constant 0 : index
    %114 = vector.load %arg5[%c14, %c0_116, %c0_117] : memref<16x16x128xf32, #tpu.memory_space<vmem>>, vector<1x16x128xf32>
    %115 = vector.shape_cast %114 : vector<1x16x128xf32> to vector<16x128xf32>
    %116 = arith.maximumf %113, %115 : vector<16x128xf32>
    %c0_118 = arith.constant 0 : index
    %c6_119 = arith.constant 6 : index
    %c0_120 = arith.constant 0 : index
    %c0_121 = arith.constant 0 : index
    %117 = vector.load %arg4[%c0_118, %c6_119, %c0_120, %c0_121] : memref<1x7x16x128xf32, #tpu.memory_space<vmem>>, vector<1x1x16x128xf32>
    %118 = vector.shape_cast %117 : vector<1x1x16x128xf32> to vector<16x128xf32>
    %119 = vector.shape_cast %116 : vector<16x128xf32> to vector<1x1x16x128xf32>
    tpu.vector_store %arg4[%c0_118, %c6_119, %c0_120, %c0_121], %119 {strides = array<i32>} : memref<1x7x16x128xf32, #tpu.memory_space<vmem>>, vector<1x1x16x128xf32>,
    return
  }
  func.func @transform_0(%arg0: i32) -> (i32, i32, i32, i32) {
    %c0_i32 = arith.constant 0 : i32
    %c0_i32_0 = arith.constant 0 : i32
    %c0_i32_1 = arith.constant 0 : i32
    %c0_i32_2 = arith.constant 0 : i32
    return %arg0, %c0_i32, %c0_i32_0, %c0_i32_1 : i32, i32, i32, i32
  }
  func.func @transform_1(%arg0: i32) -> (i32, i32, i32) {
    %c0_i32 = arith.constant 0 : i32
    %c0_i32_0 = arith.constant 0 : i32
    %c0_i32_1 = arith.constant 0 : i32
    %c0_i32_2 = arith.constant 0 : i32
    return %c0_i32, %c0_i32_0, %c0_i32_1 : i32, i32, i32
  }
  func.func @transform_2(%arg0: i32) -> (i32, i32) {
    %c0_i32 = arith.constant 0 : i32
    %c0_i32_0 = arith.constant 0 : i32
    %c0_i32_1 = arith.constant 0 : i32
    return %c0_i32, %c0_i32_0 : i32, i32
  }
  func.func @transform_3(%arg0: i32) -> (i32, i32, i32, i32) {
    %c0_i32 = arith.constant 0 : i32
    %c0_i32_0 = arith.constant 0 : i32
    %c0_i32_1 = arith.constant 0 : i32
    %c0_i32_2 = arith.constant 0 : i32
    return %arg0, %c0_i32, %c0_i32_0, %c0_i32_1 : i32, i32, i32, i32
  }
}

module attributes {stable_mosaic.version = 11 : i64} {
  func.func @_conv_kernel(%arg0: i32, %arg1: memref<1x10x8x384xbf16, #tpu.memory_space<vmem>>, %arg2: memref<3x384x128xbf16, #tpu.memory_space<vmem>>, %arg3: memref<1x128xf32, #tpu.memory_space<vmem>>, %arg4: memref<1x8x8x128xf32, #tpu.memory_space<vmem>>) attributes {dimension_semantics = [#tpu.dimension_semantics<parallel>], iteration_bounds = array<i64: 2>, scalar_prefetch = 0 : i64, scratch_operands = 0 : i64, tpu.core_type = #tpu.core_type<tc>, window_params = [{transform_indices = @transform_0, window_bounds = array<i64: 1, 10, 8, 384>}, {pipeline_mode = #tpu.pipeline_mode<synchronous>, transform_indices = @transform_1, window_bounds = array<i64: 3, 384, 128>}, {pipeline_mode = #tpu.pipeline_mode<synchronous>, transform_indices = @transform_2, window_bounds = array<i64: 1, 128>}, {transform_indices = @transform_3, window_bounds = array<i64: 1, 8, 8, 128>}]} {
    %cst = arith.constant 0.000000e+00 : f32
    %0 = vector.broadcast %cst : f32 to vector<64x128xf32>
    %c0 = arith.constant 0 : index
    %c0_0 = arith.constant 0 : index
    %c0_1 = arith.constant 0 : index
    %c0_2 = arith.constant 0 : index
    %1 = vector.load %arg1[%c0, %c0_0, %c0_1, %c0_2] : memref<1x10x8x384xbf16, #tpu.memory_space<vmem>>, vector<1x8x8x384xbf16>
    %2 = vector.shape_cast %1 : vector<1x8x8x384xbf16> to vector<8x8x384xbf16>
    %3 = vector.shape_cast %2 : vector<8x8x384xbf16> to vector<64x384xbf16>
    %c0_3 = arith.constant 0 : index
    %c0_4 = arith.constant 0 : index
    %c0_5 = arith.constant 0 : index
    %4 = vector.load %arg2[%c0_3, %c0_4, %c0_5] : memref<3x384x128xbf16, #tpu.memory_space<vmem>>, vector<1x384x128xbf16>
    %5 = vector.shape_cast %4 : vector<1x384x128xbf16> to vector<384x128xbf16>
    %cst_6 = arith.constant dense<0.000000e+00> : vector<64x128xf32>
    %6 = tpu.matmul %3, %5, %cst_6 {dimension_numbers = #tpu.dot_dimension_numbers<[1], [0], [0], [1], [0, 0, 1, 1], [], []>} : vector<64x384xbf16>, vector<384x128xbf16>, vector<64x128xf32> -> vector<64x128xf32>
    %7 = arith.addf %0, %6 : vector<64x128xf32>
    %c0_7 = arith.constant 0 : index
    %c1 = arith.constant 1 : index
    %c0_8 = arith.constant 0 : index
    %c0_9 = arith.constant 0 : index
    %8 = vector.load %arg1[%c0_7, %c1, %c0_8, %c0_9] : memref<1x10x8x384xbf16, #tpu.memory_space<vmem>>, vector<1x8x8x384xbf16>
    %9 = vector.shape_cast %8 : vector<1x8x8x384xbf16> to vector<8x8x384xbf16>
    %10 = vector.shape_cast %9 : vector<8x8x384xbf16> to vector<64x384xbf16>
    %c1_10 = arith.constant 1 : index
    %c0_11 = arith.constant 0 : index
    %c0_12 = arith.constant 0 : index
    %11 = vector.load %arg2[%c1_10, %c0_11, %c0_12] : memref<3x384x128xbf16, #tpu.memory_space<vmem>>, vector<1x384x128xbf16>
    %12 = vector.shape_cast %11 : vector<1x384x128xbf16> to vector<384x128xbf16>
    %cst_13 = arith.constant dense<0.000000e+00> : vector<64x128xf32>
    %13 = tpu.matmul %10, %12, %cst_13 {dimension_numbers = #tpu.dot_dimension_numbers<[1], [0], [0], [1], [0, 0, 1, 1], [], []>} : vector<64x384xbf16>, vector<384x128xbf16>, vector<64x128xf32> -> vector<64x128xf32>
    %14 = arith.addf %7, %13 : vector<64x128xf32>
    %c0_14 = arith.constant 0 : index
    %c2 = arith.constant 2 : index
    %c0_15 = arith.constant 0 : index
    %c0_16 = arith.constant 0 : index
    %15 = vector.load %arg1[%c0_14, %c2, %c0_15, %c0_16] : memref<1x10x8x384xbf16, #tpu.memory_space<vmem>>, vector<1x8x8x384xbf16>
    %16 = vector.shape_cast %15 : vector<1x8x8x384xbf16> to vector<8x8x384xbf16>
    %17 = vector.shape_cast %16 : vector<8x8x384xbf16> to vector<64x384xbf16>
    %c2_17 = arith.constant 2 : index
    %c0_18 = arith.constant 0 : index
    %c0_19 = arith.constant 0 : index
    %18 = vector.load %arg2[%c2_17, %c0_18, %c0_19] : memref<3x384x128xbf16, #tpu.memory_space<vmem>>, vector<1x384x128xbf16>
    %19 = vector.shape_cast %18 : vector<1x384x128xbf16> to vector<384x128xbf16>
    %cst_20 = arith.constant dense<0.000000e+00> : vector<64x128xf32>
    %20 = tpu.matmul %17, %19, %cst_20 {dimension_numbers = #tpu.dot_dimension_numbers<[1], [0], [0], [1], [0, 0, 1, 1], [], []>} : vector<64x384xbf16>, vector<384x128xbf16>, vector<64x128xf32> -> vector<64x128xf32>
    %21 = arith.addf %14, %20 : vector<64x128xf32>
    %c0_21 = arith.constant 0 : index
    %c0_22 = arith.constant 0 : index
    %22 = vector.load %arg3[%c0_21, %c0_22] : memref<1x128xf32, #tpu.memory_space<vmem>>, vector<1x128xf32>
    %23 = vector.broadcast %22 : vector<1x128xf32> to vector<64x128xf32>
    %24 = arith.addf %21, %23 : vector<64x128xf32>
    %cst_23 = arith.constant 0.000000e+00 : f32
    %25 = vector.broadcast %cst_23 : f32 to vector<64x128xf32>
    %26 = arith.maximumf %24, %25 : vector<64x128xf32>
    %27 = vector.shape_cast %26 : vector<64x128xf32> to vector<8x8x128xf32>
    %c0_24 = arith.constant 0 : index
    %c0_25 = arith.constant 0 : index
    %c0_26 = arith.constant 0 : index
    %c0_27 = arith.constant 0 : index
    %28 = vector.load %arg4[%c0_24, %c0_25, %c0_26, %c0_27] : memref<1x8x8x128xf32, #tpu.memory_space<vmem>>, vector<1x8x8x128xf32>
    %29 = vector.shape_cast %28 : vector<1x8x8x128xf32> to vector<8x8x128xf32>
    %30 = vector.shape_cast %27 : vector<8x8x128xf32> to vector<1x8x8x128xf32>
    tpu.vector_store %arg4[%c0_24, %c0_25, %c0_26, %c0_27], %30 {strides = array<i32>} : memref<1x8x8x128xf32, #tpu.memory_space<vmem>>, vector<1x8x8x128xf32>,
    return
  }
  func.func @transform_0(%arg0: i32) -> (i32, i32, i32, i32) {
    %c0_i32 = arith.constant 0 : i32
    %c0_i32_0 = arith.constant 0 : i32
    %c0_i32_1 = arith.constant 0 : i32
    %c0_i32_2 = arith.constant 0 : i32
    return %arg0, %c0_i32, %c0_i32_0, %c0_i32_1 : i32, i32, i32, i32
  }
  func.func @transform_1(%arg0: i32) -> (i32, i32, i32) {
    %c0_i32 = arith.constant 0 : i32
    %c0_i32_0 = arith.constant 0 : i32
    %c0_i32_1 = arith.constant 0 : i32
    %c0_i32_2 = arith.constant 0 : i32
    return %c0_i32, %c0_i32_0, %c0_i32_1 : i32, i32, i32
  }
  func.func @transform_2(%arg0: i32) -> (i32, i32) {
    %c0_i32 = arith.constant 0 : i32
    %c0_i32_0 = arith.constant 0 : i32
    %c0_i32_1 = arith.constant 0 : i32
    return %c0_i32, %c0_i32_0 : i32, i32
  }
  func.func @transform_3(%arg0: i32) -> (i32, i32, i32, i32) {
    %c0_i32 = arith.constant 0 : i32
    %c0_i32_0 = arith.constant 0 : i32
    %c0_i32_1 = arith.constant 0 : i32
    %c0_i32_2 = arith.constant 0 : i32
    return %arg0, %c0_i32, %c0_i32_0, %c0_i32_1 : i32, i32, i32, i32
  }
}

module attributes {stable_mosaic.version = 11 : i64} {
  func.func @_conv_kernel(%arg0: i32, %arg1: memref<1x10x8x384xbf16, #tpu.memory_space<vmem>>, %arg2: memref<3x384x128xbf16, #tpu.memory_space<vmem>>, %arg3: memref<1x128xf32, #tpu.memory_space<vmem>>, %arg4: memref<1x3x8x128xf32, #tpu.memory_space<vmem>>, %arg5: memref<8x8x128xf32, #tpu.memory_space<vmem>>) attributes {dimension_semantics = [#tpu.dimension_semantics<parallel>], iteration_bounds = array<i64: 2>, scalar_prefetch = 0 : i64, scratch_operands = 1 : i64, tpu.core_type = #tpu.core_type<tc>, window_params = [{transform_indices = @transform_0, window_bounds = array<i64: 1, 10, 8, 384>}, {pipeline_mode = #tpu.pipeline_mode<synchronous>, transform_indices = @transform_1, window_bounds = array<i64: 3, 384, 128>}, {pipeline_mode = #tpu.pipeline_mode<synchronous>, transform_indices = @transform_2, window_bounds = array<i64: 1, 128>}, {transform_indices = @transform_3, window_bounds = array<i64: 1, 3, 8, 128>}]} {
    %cst = arith.constant 0.000000e+00 : f32
    %0 = vector.broadcast %cst : f32 to vector<64x128xf32>
    %c0 = arith.constant 0 : index
    %c0_0 = arith.constant 0 : index
    %c0_1 = arith.constant 0 : index
    %c0_2 = arith.constant 0 : index
    %1 = vector.load %arg1[%c0, %c0_0, %c0_1, %c0_2] : memref<1x10x8x384xbf16, #tpu.memory_space<vmem>>, vector<1x8x8x384xbf16>
    %2 = vector.shape_cast %1 : vector<1x8x8x384xbf16> to vector<8x8x384xbf16>
    %3 = vector.shape_cast %2 : vector<8x8x384xbf16> to vector<64x384xbf16>
    %c0_3 = arith.constant 0 : index
    %c0_4 = arith.constant 0 : index
    %c0_5 = arith.constant 0 : index
    %4 = vector.load %arg2[%c0_3, %c0_4, %c0_5] : memref<3x384x128xbf16, #tpu.memory_space<vmem>>, vector<1x384x128xbf16>
    %5 = vector.shape_cast %4 : vector<1x384x128xbf16> to vector<384x128xbf16>
    %cst_6 = arith.constant dense<0.000000e+00> : vector<64x128xf32>
    %6 = tpu.matmul %3, %5, %cst_6 {dimension_numbers = #tpu.dot_dimension_numbers<[1], [0], [0], [1], [0, 0, 1, 1], [], []>} : vector<64x384xbf16>, vector<384x128xbf16>, vector<64x128xf32> -> vector<64x128xf32>
    %7 = arith.addf %0, %6 : vector<64x128xf32>
    %c0_7 = arith.constant 0 : index
    %c1 = arith.constant 1 : index
    %c0_8 = arith.constant 0 : index
    %c0_9 = arith.constant 0 : index
    %8 = vector.load %arg1[%c0_7, %c1, %c0_8, %c0_9] : memref<1x10x8x384xbf16, #tpu.memory_space<vmem>>, vector<1x8x8x384xbf16>
    %9 = vector.shape_cast %8 : vector<1x8x8x384xbf16> to vector<8x8x384xbf16>
    %10 = vector.shape_cast %9 : vector<8x8x384xbf16> to vector<64x384xbf16>
    %c1_10 = arith.constant 1 : index
    %c0_11 = arith.constant 0 : index
    %c0_12 = arith.constant 0 : index
    %11 = vector.load %arg2[%c1_10, %c0_11, %c0_12] : memref<3x384x128xbf16, #tpu.memory_space<vmem>>, vector<1x384x128xbf16>
    %12 = vector.shape_cast %11 : vector<1x384x128xbf16> to vector<384x128xbf16>
    %cst_13 = arith.constant dense<0.000000e+00> : vector<64x128xf32>
    %13 = tpu.matmul %10, %12, %cst_13 {dimension_numbers = #tpu.dot_dimension_numbers<[1], [0], [0], [1], [0, 0, 1, 1], [], []>} : vector<64x384xbf16>, vector<384x128xbf16>, vector<64x128xf32> -> vector<64x128xf32>
    %14 = arith.addf %7, %13 : vector<64x128xf32>
    %c0_14 = arith.constant 0 : index
    %c2 = arith.constant 2 : index
    %c0_15 = arith.constant 0 : index
    %c0_16 = arith.constant 0 : index
    %15 = vector.load %arg1[%c0_14, %c2, %c0_15, %c0_16] : memref<1x10x8x384xbf16, #tpu.memory_space<vmem>>, vector<1x8x8x384xbf16>
    %16 = vector.shape_cast %15 : vector<1x8x8x384xbf16> to vector<8x8x384xbf16>
    %17 = vector.shape_cast %16 : vector<8x8x384xbf16> to vector<64x384xbf16>
    %c2_17 = arith.constant 2 : index
    %c0_18 = arith.constant 0 : index
    %c0_19 = arith.constant 0 : index
    %18 = vector.load %arg2[%c2_17, %c0_18, %c0_19] : memref<3x384x128xbf16, #tpu.memory_space<vmem>>, vector<1x384x128xbf16>
    %19 = vector.shape_cast %18 : vector<1x384x128xbf16> to vector<384x128xbf16>
    %cst_20 = arith.constant dense<0.000000e+00> : vector<64x128xf32>
    %20 = tpu.matmul %17, %19, %cst_20 {dimension_numbers = #tpu.dot_dimension_numbers<[1], [0], [0], [1], [0, 0, 1, 1], [], []>} : vector<64x384xbf16>, vector<384x128xbf16>, vector<64x128xf32> -> vector<64x128xf32>
    %21 = arith.addf %14, %20 : vector<64x128xf32>
    %c0_21 = arith.constant 0 : index
    %c0_22 = arith.constant 0 : index
    %22 = vector.load %arg3[%c0_21, %c0_22] : memref<1x128xf32, #tpu.memory_space<vmem>>, vector<1x128xf32>
    %23 = vector.broadcast %22 : vector<1x128xf32> to vector<64x128xf32>
    %24 = arith.addf %21, %23 : vector<64x128xf32>
    %cst_23 = arith.constant 0.000000e+00 : f32
    %25 = vector.broadcast %cst_23 : f32 to vector<64x128xf32>
    %26 = arith.maximumf %24, %25 : vector<64x128xf32>
    %27 = vector.shape_cast %26 : vector<64x128xf32> to vector<8x8x128xf32>
    %c0_24 = arith.constant 0 : index
    %c0_25 = arith.constant 0 : index
    %c0_26 = arith.constant 0 : index
    %28 = vector.load %arg5[%c0_24, %c0_25, %c0_26] : memref<8x8x128xf32, #tpu.memory_space<vmem>>, vector<8x8x128xf32>
    tpu.vector_store %arg5[%c0_24, %c0_25, %c0_26], %27 {strides = array<i32>} : memref<8x8x128xf32, #tpu.memory_space<vmem>>, vector<8x8x128xf32>,
    %c0_27 = arith.constant 0 : index
    %c0_28 = arith.constant 0 : index
    %c0_29 = arith.constant 0 : index
    %29 = vector.load %arg5[%c0_27, %c0_28, %c0_29] : memref<8x8x128xf32, #tpu.memory_space<vmem>>, vector<1x8x128xf32>
    %30 = vector.shape_cast %29 : vector<1x8x128xf32> to vector<8x128xf32>
    %c1_30 = arith.constant 1 : index
    %c0_31 = arith.constant 0 : index
    %c0_32 = arith.constant 0 : index
    %31 = vector.load %arg5[%c1_30, %c0_31, %c0_32] : memref<8x8x128xf32, #tpu.memory_space<vmem>>, vector<1x8x128xf32>
    %32 = vector.shape_cast %31 : vector<1x8x128xf32> to vector<8x128xf32>
    %33 = arith.maximumf %30, %32 : vector<8x128xf32>
    %c2_33 = arith.constant 2 : index
    %c0_34 = arith.constant 0 : index
    %c0_35 = arith.constant 0 : index
    %34 = vector.load %arg5[%c2_33, %c0_34, %c0_35] : memref<8x8x128xf32, #tpu.memory_space<vmem>>, vector<1x8x128xf32>
    %35 = vector.shape_cast %34 : vector<1x8x128xf32> to vector<8x128xf32>
    %36 = arith.maximumf %33, %35 : vector<8x128xf32>
    %c0_36 = arith.constant 0 : index
    %c0_37 = arith.constant 0 : index
    %c0_38 = arith.constant 0 : index
    %c0_39 = arith.constant 0 : index
    %37 = vector.load %arg4[%c0_36, %c0_37, %c0_38, %c0_39] : memref<1x3x8x128xf32, #tpu.memory_space<vmem>>, vector<1x1x8x128xf32>
    %38 = vector.shape_cast %37 : vector<1x1x8x128xf32> to vector<8x128xf32>
    %39 = vector.shape_cast %36 : vector<8x128xf32> to vector<1x1x8x128xf32>
    tpu.vector_store %arg4[%c0_36, %c0_37, %c0_38, %c0_39], %39 {strides = array<i32>} : memref<1x3x8x128xf32, #tpu.memory_space<vmem>>, vector<1x1x8x128xf32>,
    %c2_40 = arith.constant 2 : index
    %c0_41 = arith.constant 0 : index
    %c0_42 = arith.constant 0 : index
    %40 = vector.load %arg5[%c2_40, %c0_41, %c0_42] : memref<8x8x128xf32, #tpu.memory_space<vmem>>, vector<1x8x128xf32>
    %41 = vector.shape_cast %40 : vector<1x8x128xf32> to vector<8x128xf32>
    %c3 = arith.constant 3 : index
    %c0_43 = arith.constant 0 : index
    %c0_44 = arith.constant 0 : index
    %42 = vector.load %arg5[%c3, %c0_43, %c0_44] : memref<8x8x128xf32, #tpu.memory_space<vmem>>, vector<1x8x128xf32>
    %43 = vector.shape_cast %42 : vector<1x8x128xf32> to vector<8x128xf32>
    %44 = arith.maximumf %41, %43 : vector<8x128xf32>
    %c4 = arith.constant 4 : index
    %c0_45 = arith.constant 0 : index
    %c0_46 = arith.constant 0 : index
    %45 = vector.load %arg5[%c4, %c0_45, %c0_46] : memref<8x8x128xf32, #tpu.memory_space<vmem>>, vector<1x8x128xf32>
    %46 = vector.shape_cast %45 : vector<1x8x128xf32> to vector<8x128xf32>
    %47 = arith.maximumf %44, %46 : vector<8x128xf32>
    %c0_47 = arith.constant 0 : index
    %c1_48 = arith.constant 1 : index
    %c0_49 = arith.constant 0 : index
    %c0_50 = arith.constant 0 : index
    %48 = vector.load %arg4[%c0_47, %c1_48, %c0_49, %c0_50] : memref<1x3x8x128xf32, #tpu.memory_space<vmem>>, vector<1x1x8x128xf32>
    %49 = vector.shape_cast %48 : vector<1x1x8x128xf32> to vector<8x128xf32>
    %50 = vector.shape_cast %47 : vector<8x128xf32> to vector<1x1x8x128xf32>
    tpu.vector_store %arg4[%c0_47, %c1_48, %c0_49, %c0_50], %50 {strides = array<i32>} : memref<1x3x8x128xf32, #tpu.memory_space<vmem>>, vector<1x1x8x128xf32>,
    %c4_51 = arith.constant 4 : index
    %c0_52 = arith.constant 0 : index
    %c0_53 = arith.constant 0 : index
    %51 = vector.load %arg5[%c4_51, %c0_52, %c0_53] : memref<8x8x128xf32, #tpu.memory_space<vmem>>, vector<1x8x128xf32>
    %52 = vector.shape_cast %51 : vector<1x8x128xf32> to vector<8x128xf32>
    %c5 = arith.constant 5 : index
    %c0_54 = arith.constant 0 : index
    %c0_55 = arith.constant 0 : index
    %53 = vector.load %arg5[%c5, %c0_54, %c0_55] : memref<8x8x128xf32, #tpu.memory_space<vmem>>, vector<1x8x128xf32>
    %54 = vector.shape_cast %53 : vector<1x8x128xf32> to vector<8x128xf32>
    %55 = arith.maximumf %52, %54 : vector<8x128xf32>
    %c6 = arith.constant 6 : index
    %c0_56 = arith.constant 0 : index
    %c0_57 = arith.constant 0 : index
    %56 = vector.load %arg5[%c6, %c0_56, %c0_57] : memref<8x8x128xf32, #tpu.memory_space<vmem>>, vector<1x8x128xf32>
    %57 = vector.shape_cast %56 : vector<1x8x128xf32> to vector<8x128xf32>
    %58 = arith.maximumf %55, %57 : vector<8x128xf32>
    %c0_58 = arith.constant 0 : index
    %c2_59 = arith.constant 2 : index
    %c0_60 = arith.constant 0 : index
    %c0_61 = arith.constant 0 : index
    %59 = vector.load %arg4[%c0_58, %c2_59, %c0_60, %c0_61] : memref<1x3x8x128xf32, #tpu.memory_space<vmem>>, vector<1x1x8x128xf32>
    %60 = vector.shape_cast %59 : vector<1x1x8x128xf32> to vector<8x128xf32>
    %61 = vector.shape_cast %58 : vector<8x128xf32> to vector<1x1x8x128xf32>
    tpu.vector_store %arg4[%c0_58, %c2_59, %c0_60, %c0_61], %61 {strides = array<i32>} : memref<1x3x8x128xf32, #tpu.memory_space<vmem>>, vector<1x1x8x128xf32>,
    return
  }
  func.func @transform_0(%arg0: i32) -> (i32, i32, i32, i32) {
    %c0_i32 = arith.constant 0 : i32
    %c0_i32_0 = arith.constant 0 : i32
    %c0_i32_1 = arith.constant 0 : i32
    %c0_i32_2 = arith.constant 0 : i32
    return %arg0, %c0_i32, %c0_i32_0, %c0_i32_1 : i32, i32, i32, i32
  }
  func.func @transform_1(%arg0: i32) -> (i32, i32, i32) {
    %c0_i32 = arith.constant 0 : i32
    %c0_i32_0 = arith.constant 0 : i32
    %c0_i32_1 = arith.constant 0 : i32
    %c0_i32_2 = arith.constant 0 : i32
    return %c0_i32, %c0_i32_0, %c0_i32_1 : i32, i32, i32
  }
  func.func @transform_2(%arg0: i32) -> (i32, i32) {
    %c0_i32 = arith.constant 0 : i32
    %c0_i32_0 = arith.constant 0 : i32
    %c0_i32_1 = arith.constant 0 : i32
    return %c0_i32, %c0_i32_0 : i32, i32
  }
  func.func @transform_3(%arg0: i32) -> (i32, i32, i32, i32) {
    %c0_i32 = arith.constant 0 : i32
    %c0_i32_0 = arith.constant 0 : i32
    %c0_i32_1 = arith.constant 0 : i32
    %c0_i32_2 = arith.constant 0 : i32
    return %arg0, %c0_i32, %c0_i32_0, %c0_i32_1 : i32, i32, i32, i32
  }
}

module attributes {stable_mosaic.version = 11 : i64} {
  func.func @_gemm_kernel(%arg0: i32, %arg1: i32, %arg2: i32, %arg3: memref<8x384xbf16, #tpu.memory_space<vmem>>, %arg4: memref<384x128xbf16, #tpu.memory_space<vmem>>, %arg5: memref<1x128xf32, #tpu.memory_space<vmem>>, %arg6: memref<8x128xf32, #tpu.memory_space<vmem>>) attributes {dimension_semantics = [#tpu.dimension_semantics<parallel>, #tpu.dimension_semantics<parallel>, #tpu.dimension_semantics<arbitrary>], iteration_bounds = array<i64: 1, 1, 1>, scalar_prefetch = 0 : i64, scratch_operands = 0 : i64, tpu.core_type = #tpu.core_type<tc>, window_params = [{transform_indices = @transform_0, window_bounds = array<i64: 8, 384>}, {transform_indices = @transform_1, window_bounds = array<i64: 384, 128>}, {transform_indices = @transform_2, window_bounds = array<i64: 1, 128>}, {transform_indices = @transform_3, window_bounds = array<i64: 8, 128>}]} {
    %c0_i32 = arith.constant 0 : i32
    %0 = arith.cmpi eq, %arg2, %c0_i32 : i32
    %1 = arith.extui %0 : i1 to i32
    %c0_i32_0 = arith.constant 0 : i32
    %2 = arith.cmpi ne, %1, %c0_i32_0 : i32
    scf.if %2 {
      %cst_10 = arith.constant 0.000000e+00 : f32
      %12 = vector.broadcast %cst_10 : f32 to vector<8x128xf32>
      %c0_11 = arith.constant 0 : index
      %c0_12 = arith.constant 0 : index
      %13 = vector.load %arg6[%c0_11, %c0_12] : memref<8x128xf32, #tpu.memory_space<vmem>>, vector<8x128xf32>
      tpu.vector_store %arg6[%c0_11, %c0_12], %12 {strides = array<i32>} : memref<8x128xf32, #tpu.memory_space<vmem>>, vector<8x128xf32>,
    } else {
    }
    %c0 = arith.constant 0 : index
    %c0_1 = arith.constant 0 : index
    %3 = vector.load %arg6[%c0, %c0_1] : memref<8x128xf32, #tpu.memory_space<vmem>>, vector<8x128xf32>
    %c0_2 = arith.constant 0 : index
    %c0_3 = arith.constant 0 : index
    %4 = vector.load %arg3[%c0_2, %c0_3] : memref<8x384xbf16, #tpu.memory_space<vmem>>, vector<8x384xbf16>
    %c0_4 = arith.constant 0 : index
    %c0_5 = arith.constant 0 : index
    %5 = vector.load %arg4[%c0_4, %c0_5] : memref<384x128xbf16, #tpu.memory_space<vmem>>, vector<384x128xbf16>
    %cst = arith.constant dense<0.000000e+00> : vector<8x128xf32>
    %6 = tpu.matmul %4, %5, %cst {dimension_numbers = #tpu.dot_dimension_numbers<[1], [0], [0], [1], [0, 0, 1, 1], [], []>} : vector<8x384xbf16>, vector<384x128xbf16>, vector<8x128xf32> -> vector<8x128xf32>
    %7 = arith.addf %3, %6 : vector<8x128xf32>
    %c0_6 = arith.constant 0 : index
    %c0_7 = arith.constant 0 : index
    %8 = vector.load %arg6[%c0_6, %c0_7] : memref<8x128xf32, #tpu.memory_space<vmem>>, vector<8x128xf32>
    tpu.vector_store %arg6[%c0_6, %c0_7], %7 {strides = array<i32>} : memref<8x128xf32, #tpu.memory_space<vmem>>, vector<8x128xf32>,
    %c0_i32_8 = arith.constant 0 : i32
    %9 = arith.cmpi eq, %arg2, %c0_i32_8 : i32
    %10 = arith.extui %9 : i1 to i32
    %c0_i32_9 = arith.constant 0 : i32
    %11 = arith.cmpi ne, %10, %c0_i32_9 : i32
    scf.if %11 {
      %c0_10 = arith.constant 0 : index
      %c0_11 = arith.constant 0 : index
      %12 = vector.load %arg6[%c0_10, %c0_11] : memref<8x128xf32, #tpu.memory_space<vmem>>, vector<8x128xf32>
      %c0_12 = arith.constant 0 : index
      %c0_13 = arith.constant 0 : index
      %13 = vector.load %arg5[%c0_12, %c0_13] : memref<1x128xf32, #tpu.memory_space<vmem>>, vector<1x128xf32>
      %14 = vector.broadcast %13 : vector<1x128xf32> to vector<8x128xf32>
      %15 = arith.addf %12, %14 : vector<8x128xf32>
      %cst_14 = arith.constant 0.000000e+00 : f32
      %16 = vector.broadcast %cst_14 : f32 to vector<8x128xf32>
      %17 = arith.maximumf %15, %16 : vector<8x128xf32>
      %c0_15 = arith.constant 0 : index
      %c0_16 = arith.constant 0 : index
      %18 = vector.load %arg6[%c0_15, %c0_16] : memref<8x128xf32, #tpu.memory_space<vmem>>, vector<8x128xf32>
      tpu.vector_store %arg6[%c0_15, %c0_16], %17 {strides = array<i32>} : memref<8x128xf32, #tpu.memory_space<vmem>>, vector<8x128xf32>,
    } else {
    }
    return
  }
  func.func @transform_0(%arg0: i32, %arg1: i32, %arg2: i32) -> (i32, i32) {
    %c0_i32 = arith.constant 0 : i32
    return %arg0, %arg2 : i32, i32
  }
  func.func @transform_1(%arg0: i32, %arg1: i32, %arg2: i32) -> (i32, i32) {
    %c0_i32 = arith.constant 0 : i32
    return %arg2, %arg1 : i32, i32
  }
  func.func @transform_2(%arg0: i32, %arg1: i32, %arg2: i32) -> (i32, i32) {
    %c0_i32 = arith.constant 0 : i32
    %c0_i32_0 = arith.constant 0 : i32
    return %c0_i32, %arg1 : i32, i32
  }
  func.func @transform_3(%arg0: i32, %arg1: i32, %arg2: i32) -> (i32, i32) {
    %c0_i32 = arith.constant 0 : i32
    return %arg0, %arg1 : i32, i32
  }
}

module attributes {stable_mosaic.version = 11 : i64} {
  func.func @_gemm_kernel(%arg0: i32, %arg1: i32, %arg2: i32, %arg3: memref<8x128xbf16, #tpu.memory_space<vmem>>, %arg4: memref<128x128xbf16, #tpu.memory_space<vmem>>, %arg5: memref<1x128xf32, #tpu.memory_space<vmem>>, %arg6: memref<8x128xf32, #tpu.memory_space<vmem>>) attributes {dimension_semantics = [#tpu.dimension_semantics<parallel>, #tpu.dimension_semantics<parallel>, #tpu.dimension_semantics<arbitrary>], iteration_bounds = array<i64: 1, 1, 1>, scalar_prefetch = 0 : i64, scratch_operands = 0 : i64, tpu.core_type = #tpu.core_type<tc>, window_params = [{transform_indices = @transform_0, window_bounds = array<i64: 8, 128>}, {transform_indices = @transform_1, window_bounds = array<i64: 128, 128>}, {transform_indices = @transform_2, window_bounds = array<i64: 1, 128>}, {transform_indices = @transform_3, window_bounds = array<i64: 8, 128>}]} {
    %c0_i32 = arith.constant 0 : i32
    %0 = arith.cmpi eq, %arg2, %c0_i32 : i32
    %1 = arith.extui %0 : i1 to i32
    %c0_i32_0 = arith.constant 0 : i32
    %2 = arith.cmpi ne, %1, %c0_i32_0 : i32
    scf.if %2 {
      %cst_10 = arith.constant 0.000000e+00 : f32
      %12 = vector.broadcast %cst_10 : f32 to vector<8x128xf32>
      %c0_11 = arith.constant 0 : index
      %c0_12 = arith.constant 0 : index
      %13 = vector.load %arg6[%c0_11, %c0_12] : memref<8x128xf32, #tpu.memory_space<vmem>>, vector<8x128xf32>
      tpu.vector_store %arg6[%c0_11, %c0_12], %12 {strides = array<i32>} : memref<8x128xf32, #tpu.memory_space<vmem>>, vector<8x128xf32>,
    } else {
    }
    %c0 = arith.constant 0 : index
    %c0_1 = arith.constant 0 : index
    %3 = vector.load %arg6[%c0, %c0_1] : memref<8x128xf32, #tpu.memory_space<vmem>>, vector<8x128xf32>
    %c0_2 = arith.constant 0 : index
    %c0_3 = arith.constant 0 : index
    %4 = vector.load %arg3[%c0_2, %c0_3] : memref<8x128xbf16, #tpu.memory_space<vmem>>, vector<8x128xbf16>
    %c0_4 = arith.constant 0 : index
    %c0_5 = arith.constant 0 : index
    %5 = vector.load %arg4[%c0_4, %c0_5] : memref<128x128xbf16, #tpu.memory_space<vmem>>, vector<128x128xbf16>
    %cst = arith.constant dense<0.000000e+00> : vector<8x128xf32>
    %6 = tpu.matmul %4, %5, %cst {dimension_numbers = #tpu.dot_dimension_numbers<[1], [0], [0], [1], [0, 0, 1, 1], [], []>} : vector<8x128xbf16>, vector<128x128xbf16>, vector<8x128xf32> -> vector<8x128xf32>
    %7 = arith.addf %3, %6 : vector<8x128xf32>
    %c0_6 = arith.constant 0 : index
    %c0_7 = arith.constant 0 : index
    %8 = vector.load %arg6[%c0_6, %c0_7] : memref<8x128xf32, #tpu.memory_space<vmem>>, vector<8x128xf32>
    tpu.vector_store %arg6[%c0_6, %c0_7], %7 {strides = array<i32>} : memref<8x128xf32, #tpu.memory_space<vmem>>, vector<8x128xf32>,
    %c0_i32_8 = arith.constant 0 : i32
    %9 = arith.cmpi eq, %arg2, %c0_i32_8 : i32
    %10 = arith.extui %9 : i1 to i32
    %c0_i32_9 = arith.constant 0 : i32
    %11 = arith.cmpi ne, %10, %c0_i32_9 : i32
    scf.if %11 {
      %c0_10 = arith.constant 0 : index
      %c0_11 = arith.constant 0 : index
      %12 = vector.load %arg6[%c0_10, %c0_11] : memref<8x128xf32, #tpu.memory_space<vmem>>, vector<8x128xf32>
      %c0_12 = arith.constant 0 : index
      %c0_13 = arith.constant 0 : index
      %13 = vector.load %arg5[%c0_12, %c0_13] : memref<1x128xf32, #tpu.memory_space<vmem>>, vector<1x128xf32>
      %14 = vector.broadcast %13 : vector<1x128xf32> to vector<8x128xf32>
      %15 = arith.addf %12, %14 : vector<8x128xf32>
      %cst_14 = arith.constant 0.000000e+00 : f32
      %16 = vector.broadcast %cst_14 : f32 to vector<8x128xf32>
      %17 = arith.maximumf %15, %16 : vector<8x128xf32>
      %c0_15 = arith.constant 0 : index
      %c0_16 = arith.constant 0 : index
      %18 = vector.load %arg6[%c0_15, %c0_16] : memref<8x128xf32, #tpu.memory_space<vmem>>, vector<8x128xf32>
      tpu.vector_store %arg6[%c0_15, %c0_16], %17 {strides = array<i32>} : memref<8x128xf32, #tpu.memory_space<vmem>>, vector<8x128xf32>,
    } else {
    }
    return
  }
  func.func @transform_0(%arg0: i32, %arg1: i32, %arg2: i32) -> (i32, i32) {
    %c0_i32 = arith.constant 0 : i32
    return %arg0, %arg2 : i32, i32
  }
  func.func @transform_1(%arg0: i32, %arg1: i32, %arg2: i32) -> (i32, i32) {
    %c0_i32 = arith.constant 0 : i32
    return %arg2, %arg1 : i32, i32
  }
  func.func @transform_2(%arg0: i32, %arg1: i32, %arg2: i32) -> (i32, i32) {
    %c0_i32 = arith.constant 0 : i32
    %c0_i32_0 = arith.constant 0 : i32
    return %c0_i32, %arg1 : i32, i32
  }
  func.func @transform_3(%arg0: i32, %arg1: i32, %arg2: i32) -> (i32, i32) {
    %c0_i32 = arith.constant 0 : i32
    return %arg0, %arg1 : i32, i32
  }
}

module attributes {stable_mosaic.version = 11 : i64} {
  func.func @_gemm_kernel(%arg0: i32, %arg1: i32, %arg2: i32, %arg3: memref<8x128xbf16, #tpu.memory_space<vmem>>, %arg4: memref<128x128xbf16, #tpu.memory_space<vmem>>, %arg5: memref<1x128xf32, #tpu.memory_space<vmem>>, %arg6: memref<8x128xf32, #tpu.memory_space<vmem>>) attributes {dimension_semantics = [#tpu.dimension_semantics<parallel>, #tpu.dimension_semantics<parallel>, #tpu.dimension_semantics<arbitrary>], iteration_bounds = array<i64: 1, 1, 1>, scalar_prefetch = 0 : i64, scratch_operands = 0 : i64, tpu.core_type = #tpu.core_type<tc>, window_params = [{transform_indices = @transform_0, window_bounds = array<i64: 8, 128>}, {transform_indices = @transform_1, window_bounds = array<i64: 128, 128>}, {transform_indices = @transform_2, window_bounds = array<i64: 1, 128>}, {transform_indices = @transform_3, window_bounds = array<i64: 8, 128>}]} {
    %c0_i32 = arith.constant 0 : i32
    %0 = arith.cmpi eq, %arg2, %c0_i32 : i32
    %1 = arith.extui %0 : i1 to i32
    %c0_i32_0 = arith.constant 0 : i32
    %2 = arith.cmpi ne, %1, %c0_i32_0 : i32
    scf.if %2 {
      %cst_10 = arith.constant 0.000000e+00 : f32
      %12 = vector.broadcast %cst_10 : f32 to vector<8x128xf32>
      %c0_11 = arith.constant 0 : index
      %c0_12 = arith.constant 0 : index
      %13 = vector.load %arg6[%c0_11, %c0_12] : memref<8x128xf32, #tpu.memory_space<vmem>>, vector<8x128xf32>
      tpu.vector_store %arg6[%c0_11, %c0_12], %12 {strides = array<i32>} : memref<8x128xf32, #tpu.memory_space<vmem>>, vector<8x128xf32>,
    } else {
    }
    %c0 = arith.constant 0 : index
    %c0_1 = arith.constant 0 : index
    %3 = vector.load %arg6[%c0, %c0_1] : memref<8x128xf32, #tpu.memory_space<vmem>>, vector<8x128xf32>
    %c0_2 = arith.constant 0 : index
    %c0_3 = arith.constant 0 : index
    %4 = vector.load %arg3[%c0_2, %c0_3] : memref<8x128xbf16, #tpu.memory_space<vmem>>, vector<8x128xbf16>
    %c0_4 = arith.constant 0 : index
    %c0_5 = arith.constant 0 : index
    %5 = vector.load %arg4[%c0_4, %c0_5] : memref<128x128xbf16, #tpu.memory_space<vmem>>, vector<128x128xbf16>
    %cst = arith.constant dense<0.000000e+00> : vector<8x128xf32>
    %6 = tpu.matmul %4, %5, %cst {dimension_numbers = #tpu.dot_dimension_numbers<[1], [0], [0], [1], [0, 0, 1, 1], [], []>} : vector<8x128xbf16>, vector<128x128xbf16>, vector<8x128xf32> -> vector<8x128xf32>
    %7 = arith.addf %3, %6 : vector<8x128xf32>
    %c0_6 = arith.constant 0 : index
    %c0_7 = arith.constant 0 : index
    %8 = vector.load %arg6[%c0_6, %c0_7] : memref<8x128xf32, #tpu.memory_space<vmem>>, vector<8x128xf32>
    tpu.vector_store %arg6[%c0_6, %c0_7], %7 {strides = array<i32>} : memref<8x128xf32, #tpu.memory_space<vmem>>, vector<8x128xf32>,
    %c0_i32_8 = arith.constant 0 : i32
    %9 = arith.cmpi eq, %arg2, %c0_i32_8 : i32
    %10 = arith.extui %9 : i1 to i32
    %c0_i32_9 = arith.constant 0 : i32
    %11 = arith.cmpi ne, %10, %c0_i32_9 : i32
    scf.if %11 {
      %c0_10 = arith.constant 0 : index
      %c0_11 = arith.constant 0 : index
      %12 = vector.load %arg6[%c0_10, %c0_11] : memref<8x128xf32, #tpu.memory_space<vmem>>, vector<8x128xf32>
      %c0_12 = arith.constant 0 : index
      %c0_13 = arith.constant 0 : index
      %13 = vector.load %arg5[%c0_12, %c0_13] : memref<1x128xf32, #tpu.memory_space<vmem>>, vector<1x128xf32>
      %14 = vector.broadcast %13 : vector<1x128xf32> to vector<8x128xf32>
      %15 = arith.addf %12, %14 : vector<8x128xf32>
      %c0_14 = arith.constant 0 : index
      %c0_15 = arith.constant 0 : index
      %16 = vector.load %arg6[%c0_14, %c0_15] : memref<8x128xf32, #tpu.memory_space<vmem>>, vector<8x128xf32>
      tpu.vector_store %arg6[%c0_14, %c0_15], %15 {strides = array<i32>} : memref<8x128xf32, #tpu.memory_space<vmem>>, vector<8x128xf32>,
    } else {
    }
    return
  }
  func.func @transform_0(%arg0: i32, %arg1: i32, %arg2: i32) -> (i32, i32) {
    %c0_i32 = arith.constant 0 : i32
    return %arg0, %arg2 : i32, i32
  }
  func.func @transform_1(%arg0: i32, %arg1: i32, %arg2: i32) -> (i32, i32) {
    %c0_i32 = arith.constant 0 : i32
    return %arg2, %arg1 : i32, i32
  }
  func.func @transform_2(%arg0: i32, %arg1: i32, %arg2: i32) -> (i32, i32) {
    %c0_i32 = arith.constant 0 : i32
    %c0_i32_0 = arith.constant 0 : i32
    return %c0_i32, %arg1 : i32, i32
  }
  func.func @transform_3(%arg0: i32, %arg1: i32, %arg2: i32) -> (i32, i32) {
    %c0_i32 = arith.constant 0 : i32
    return %arg0, %arg1 : i32, i32
  }
}

</mosaic_0001>

<bundles_post_ra>
// kernel: alexnet_forward.10
= control target key start
LH: loop header
LB: loop body
LE: loop exit
PB: predicated region body
PF: predicated region fallthrough
CT: control target
= control target key end

     0   :  { %s2131_s12 = smov 0   ;;  %s2467_s0 = inlined_call_operand.vmem [shape: bf16[2,10,8,384], index: 0, kind: input, shape index: {}]   ;;  %s2468_s1 = inlined_call_operand.vmem [shape: bf16[3,384,128], index: 1, kind: input, shape index: {}]   ;;  %s2469_s2 = inlined_call_operand.vmem [shape: f32[1,128], index: 2, kind: input, shape index: {}]   ;;  %s2470_s3 = inlined_call_operand.vmem [shape: f32[2,8,8,128], index: 3, kind: output, shape index: {}]  }
   0x1 LB: > { %s1476_s13 = sadd.s32 4294967295, %s2109_s12   ;;  %p1480_p0 = scmp.ge.s32.totalorder %s2109_s12, 1  ;;  %s2109_s12 = sphi %s2131_s12, %s13_s12  }
   0x2   : > { %p137_p1 = scmp.lt.s32.totalorder %s2109_s12, 3 }
   0x4   : > { %p138_p2 = pnand %p1480_p0, %p137_p1 }
   0x5   : > { %v2001_v0 = vld [vmem:[%s2468_s1 + $0x100] sm:$0xff] (!%p138_p2)   ;;  %v2004_v3 = vld [vmem:[%s2468_s1 + $0x108] sm:$0xff] (!%p138_p2)   ;;  %v2007_v6 = vld [vmem:[%s2468_s1 + $0x110] sm:$0xff] (!%p138_p2)   ;;  %p161_p3 = scmp.lt.s32.totalorder (!%p138_p2), %s1476_s13, 1 }
   0x6   : > { %141 = sbr.rel (%p138_p2) target bundleno = 353 (0x161), region = 32  ;;  %v2002_v1 = vld [vmem:[%s2468_s1 + $0x140] sm:$0xff] (!%p138_p2)   ;;  %1724 = vmatprep.subr.bf16.mxu0 (!%p138_p2), %v2001_v0  ;;  %v2005_v4 = vld [vmem:[%s2468_s1 + $0x148] sm:$0xff] (!%p138_p2)   ;;  %v2008_v7 = vld [vmem:[%s2468_s1 + $0x150] sm:$0xff] (!%p138_p2)  }
   0x7   : > { %v2003_v2 = vld [vmem:[%s2468_s1 + $0xc0] sm:$0xff] (!%p138_p2)   ;;  %1880 = vmatprep.subr.bf16.mxu1 (!%p138_p2), %v2002_v1  ;;  %v2006_v5 = vld [vmem:[%s2468_s1 + $0xc8] sm:$0xff] (!%p138_p2)   ;;  %v2009_v8 = vld [vmem:[%s2468_s1 + $0xd0] sm:$0xff] (!%p138_p2)  }
   0x8   : > { %1725 = vmatpush3.bf16.msra.mxu0 (!%p138_p2), %v2003_v2  ;;  %1881 = vmatpush3.bf16.msra.mxu1 (!%p138_p2), %v2002_v1  ;;  %v2010_v9 = vld [vmem:[%s2468_s1 + $0x118] sm:$0xff] (!%p138_p2)   ;;  %v2013_v12 = vld [vmem:[%s2468_s1 + $0x120] sm:$0xff] (!%p138_p2)   ;;  %v2016_v15 = vld [vmem:[%s2468_s1 + $0x128] sm:$0xff] (!%p138_p2)  }
   0x9   : > { %1726 = vmatprep.subr.bf16.mxu0 (!%p138_p2), %v2004_v3  ;;  %1882 = vmatprep.subr.bf16.mxu1 (!%p138_p2), %v2005_v4  ;;  %v2011_v10 = vld [vmem:[%s2468_s1 + $0x158] sm:$0xff] (!%p138_p2)   ;;  %v2014_v13 = vld [vmem:[%s2468_s1 + $0x160] sm:$0xff] (!%p138_p2)   ;;  %v2017_v16 = vld [vmem:[%s2468_s1 + $0x168] sm:$0xff] (!%p138_p2)  }
   0xa   : > { %v2012_v11 = vld [vmem:[%s2468_s1 + $0xd8] sm:$0xff] (!%p138_p2)   ;;  %v2015_v14 = vld [vmem:[%s2468_s1 + $0xe0] sm:$0xff] (!%p138_p2)   ;;  %v2018_v17 = vld [vmem:[%s2468_s1 + $0xe8] sm:$0xff] (!%p138_p2)  }
   0xb   : > { %v2019_v18 = vld [vmem:[%s2468_s1 + $0x130] sm:$0xff] (!%p138_p2)   ;;  %v2022_v21 = vld [vmem:[%s2468_s1 + $0x138] sm:$0xff] (!%p138_p2)   ;;  %v2028_v28 = vld [vmem:[%s2468_s1 + $0x40] sm:$0xff] (!%p138_p2)  }
   0xc   : > { %1727 = vmatpush3.bf16.msra.mxu0 (!%p138_p2), %v2006_v5  ;;  %1883 = vmatpush3.bf16.msra.mxu1 (!%p138_p2), %v2005_v4  ;;  %v2020_v19 = vld [vmem:[%s2468_s1 + $0x170] sm:$0xff] (!%p138_p2)   ;;  %v2023_v22 = vld [vmem:[%s2468_s1 + $0x178] sm:$0xff] (!%p138_p2)   ;;  %v2029_v29 = vld [vmem:[%s2468_s1 + $0x80] sm:$0xff] (!%p138_p2)  }
   0xd   : > { %1728 = vmatprep.subr.bf16.mxu0 %v2007_v6  ;;  %1884 = vmatprep.subr.bf16.mxu1 %v2008_v7  ;;  %s2472_s13 = smov (!%p161_p3, %s1476_s13), 1  ;;  %v2021_v20 = vld [vmem:[%s2468_s1 + $0xf0] sm:$0xff]   ;;  %v2024_v27 = vld [vmem:[%s2468_s1 + $0xf8] sm:$0xff]   ;;  %v2031_v31 = vld [vmem:[%s2468_s1] sm:$0xff]  }
   0xe   : > { %s1992_s23 = smul.u32 120, %s2472_s13  ;;  %v2032_v33 = vld [vmem:[%s2468_s1 + $0x48] sm:$0xff]   ;;  %v2037_v39 = vld [vmem:[%s2468_s1 + $0x50] sm:$0xff]   ;;  %v2040_v45 = vld [vmem:[%s2468_s1 + $0x58] sm:$0xff]   ;;  %s1723_s17 = sshll.u32 %s2472_s13, 6 }
   0xf   : > { %v2033_v34 = vld [vmem:[%s2468_s1 + $0x88] sm:$0xff]   ;;  %v2038_v40 = vld [vmem:[%s2468_s1 + $0x90] sm:$0xff]   ;;  %v2041_v46 = vld [vmem:[%s2468_s1 + $0x98] sm:$0xff]   ;;  %s2452_s20 = scalar_lea.vmem %s2470_s3, %s1723_s17 }
  0x10   : > { %1729 = vmatpush3.bf16.msra.mxu0 %v2009_v8  ;;  %1885 = vmatpush3.bf16.msra.mxu1 %v2008_v7  ;;  %s2209_s5 = scalar_lea.vmem %s2467_s0, %s1992_s23  ;;  %v2034_v38 = vld [vmem:[%s2468_s1 + $0x8] sm:$0xff]   ;;  %v2039_v42 = vld [vmem:[%s2468_s1 + $0x10] sm:$0xff]   ;;  %v2042_v48 = vld [vmem:[%s2468_s1 + $0x18] sm:$0xff]  }
  0x11   : > { %1730 = vmatprep.subr.bf16.mxu0 %v2010_v9  ;;  %1886 = vmatprep.subr.bf16.mxu1 %v2011_v10  ;;  %v2221_v23 = vld [vmem:[%s2209_s5 + $0xc] sm:$0xff]  ;;  %v2224_v24 = vld [vmem:[%s2209_s5 + $0x18] sm:$0xff]  ;;  %v2027_v26 = vld [vmem:[%s2209_s5 + $0x14] ss:$12 sps:$4 sm:$0xff]  }
  0x12   : > { %v1549_v25 = vcombine.high %v2221_v23, %v2224_v24  ;;  %1896 = vmatprep.mubr.bf16.mxu1 %v2027_v26  ;;  %v2030_v30 = vld [vmem:[%s2209_s5 + $0x2c] ss:$12 sps:$4 sm:$0xff]   ;;  %v1548_v32 = vcombine.low %v2221_v23, %v2224_v24  ;;  %v2251_v35 = vld [vmem:[%s2209_s5 + $0x24] sm:$0xff]  ;;  %v2254_v36 = vld [vmem:[%s2209_s5 + $0x30] sm:$0xff] }
  0x13   : > { %v1552_v37 = vcombine.high %v2251_v35, %v2254_v36  ;;  %v1551_v41 = vcombine.low %v2251_v35, %v2254_v36  ;;  %v2273_v43 = vld [vmem:[%s2209_s5 + $0x3c] sm:$0xff]  ;;  %v2276_v44 = vld [vmem:[%s2209_s5 + $0x48] sm:$0xff]  ;;  %v2299_v52 = vld [vmem:[%s2209_s5 + $0x54] sm:$0xff] }
  0x14   : > { %1731 = vmatpush3.bf16.msra.mxu0 %v2012_v11  ;;  %1887 = vmatpush3.bf16.msra.mxu1 %v2011_v10  ;;  %v1555_v47 = vcombine.high %v2273_v43, %v2276_v44  ;;  %v2045_v49 = vld [vmem:[%s2468_s1 + $0x60] sm:$0xff]   ;;  %v1554_v54 = vcombine.low %v2273_v43, %v2276_v44  ;;  %v2048_v56 = vld [vmem:[%s2468_s1 + $0x68] sm:$0xff]   ;;  %v2054_v61 = vld [vmem:[%s2468_s1 + $0x70] sm:$0xff]  }
  0x15   : > { %1732 = vmatprep.subr.bf16.mxu0 %v2013_v12  ;;  %1888 = vmatprep.subr.bf16.mxu1 %v2014_v13  ;;  %v2046_v50 = vld [vmem:[%s2468_s1 + $0xa0] sm:$0xff]   ;;  %v2049_v57 = vld [vmem:[%s2468_s1 + $0xa8] sm:$0xff]   ;;  %v2055_v62 = vld [vmem:[%s2468_s1 + $0xb0] sm:$0xff]  }
  0x16   : > { %542 = vmatprep.mubr.bf16.mxu0 %v1549_v25  ;;  %v2047_v51 = vld [vmem:[%s2468_s1 + $0x20] sm:$0xff]   ;;  %v2056_v59 = vld [vmem:[%s2209_s5 + $0x5c] ss:$12 sps:$4 sm:$0xff]   ;;  %v2057_v63 = vld [vmem:[%s2468_s1 + $0x30] sm:$0xff]  }
  0x17   : > { %v2302_v53 = vld [vmem:[%s2209_s5 + $0x60] sm:$0xff]  ;;  %v2050_v60 = vld [vmem:[%s2468_s1 + $0x28] sm:$0xff]   ;;  %v2058_v3 = vld [vmem:[%s2468_s1 + $0x78] sm:$0xff]  }
  0x18   : > { %1733 = vmatpush3.bf16.msra.mxu0 %v2015_v14  ;;  %1889 = vmatpush3.bf16.msra.mxu1 %v2014_v13  ;;  %v2053_v55 = vld [vmem:[%s2209_s5 + $0x44] ss:$12 sps:$4 sm:$0xff]   ;;  %v1558_v58 = vcombine.high %v2299_v52, %v2302_v53  ;;  %v1557_v1 = vcombine.low %v2299_v52, %v2302_v53  ;;  %v2063_v2 = vld [vmem:[%s2209_s5 + $0x8] ss:$12 sps:$4 sm:$0xff]   ;;  %v2059_v4 = vld [vmem:[%s2468_s1 + $0xb8] sm:$0xff]   ;;  %v2361_v14 = vcombine.high %v2224_v24, %v2251_v35 }
  0x19   : > { %1734 = vmatprep.subr.bf16.mxu0 %v2016_v15  ;;  %1890 = vmatprep.subr.bf16.mxu1 %v2017_v16  ;;  %v172_v0 = vld [vmem:[%s2209_s5] sm:$0xff]  ;;  %v2060_v6 = vld [vmem:[%s2468_s1 + $0x38] sm:$0xff]   ;;  %v2068_v12 = vld [vmem:[%s2468_s1 + $0x1c8] sm:$0xff]  }
  0x1a   : > { %v1585_v5 = vcombine.high %v172_v0, %v2221_v23  ;;  %v2064_v7 = vld [vmem:[%s2468_s1 + $0x1c0] sm:$0xff]   ;;  %v1584_v10 = vcombine.low %v172_v0, %v2221_v23  ;;  %v2069_v13 = vld [vmem:[%s2468_s1 + $0x208] sm:$0xff]   ;;  %v1591_v23 = vcombine.high %v2254_v36, %v2273_v43  ;;  %v2090_v26 = vld [vmem:[%s2209_s5 + $0x50] ss:$12 sps:$4 sm:$0xff]  }
  0x1b   : > { %v2065_v8 = vld [vmem:[%s2468_s1 + $0x200] sm:$0xff]   ;;  %v2070_v15 = vld [vmem:[%s2468_s1 + $0x188] sm:$0xff]  }
  0x1c   : > { %1735 = vmatpush3.bf16.msra.mxu0 %v2018_v17  ;;  %1891 = vmatpush3.bf16.msra.mxu1 %v2017_v16  ;;  %v2066_v9 = vld [vmem:[%s2209_s5 + $0x20] ss:$12 sps:$4 sm:$0xff]   ;;  %v2073_v16 = vld [vmem:[%s2468_s1 + $0x1d0] sm:$0xff]   ;;  %v2088_v25 = vld [vmem:[%s2209_s5 + $0x38] ss:$12 sps:$4 sm:$0xff]  }
  0x1d   : > { %1736 = vmatprep.subr.bf16.mxu0 %v2019_v18  ;;  %1892 = vmatprep.subr.bf16.mxu1 %v2020_v19  ;;  %v2067_v11 = vld [vmem:[%s2468_s1 + $0x180] sm:$0xff]   ;;  %v2074_v17 = vld [vmem:[%s2468_s1 + $0x210] sm:$0xff]   ;;  %v1587_v18 = vcombine.low %v2224_v24, %v2251_v35 }
  0x1e   : > { %v2081_v24 = vld [vmem:[%s2468_s1 + $0x1e0] sm:$0xff]   ;;  %v2091_v35 = vld [vmem:[%s2468_s1 + $0x1f0] sm:$0xff]  }
  0x20   : > { %1737 = vmatpush3.bf16.msra.mxu0 %v2021_v20  ;;  %1893 = vmatpush3.bf16.msra.mxu1 %v2020_v19  ;;  %v2075_v19 = vld [vmem:[%s2468_s1 + $0x190] sm:$0xff]   ;;  %v2076_v20 = vld [vmem:[%s2468_s1 + $0x1d8] sm:$0xff]  }
  0x21   : > { %1738 = vmatprep.subr.bf16.mxu0 %v2022_v21  ;;  %1894 = vmatprep.subr.bf16.mxu1 %v2023_v22  ;;  %v2077_v21 = vld [vmem:[%s2468_s1 + $0x218] sm:$0xff]  }
  0x24   : > { %1739 = vmatpush3.bf16.msra.mxu0 %v2024_v27  ;;  %1895 = vmatpush3.bf16.msra.mxu1 %v2023_v22  ;;  %v2078_v22 = vld [vmem:[%s2468_s1 + $0x198] sm:$0xff]   ;;  %v2082_v27 = vld [vmem:[%s2468_s1 + $0x220] sm:$0xff]  }
  0x25   : > { %1776 = vmatprep.subr.bf16.mxu0 %v2028_v28  ;;  %1904 = vmatprep.subr.bf16.mxu1 %v2029_v29  ;;  %v1590_v28 = vcombine.low %v2254_v36, %v2273_v43  ;;  %v2092_v36 = vld [vmem:[%s2468_s1 + $0x230] sm:$0xff]   ;;  %v2096_v43 = vld [vmem:[%s2468_s1 + $0x1b8] sm:$0xff]  }
  0x27   : > { %543 = vmatmul.mubr.bf16.vlgmr.msra.gmra.mrb[0].mxu0 %v1548_v32  ;;  %1897 = vmatmul.mubr.bf16.vlgmr.msra.gmra.mrb[0].mxu1 %v2030_v30  ;;  %v2084_v30 = vld [vmem:[%s2468_s1 + $0x1e8] sm:$0xff]  }
  0x28   : > { %1777 = vmatpush3.bf16.msra.mxu0 %v2031_v31  ;;  %1905 = vmatpush3.bf16.msra.mxu1 %v2029_v29  ;;  %v2083_v29 = vld [vmem:[%s2468_s1 + $0x1a0] sm:$0xff]   ;;  %v2085_v31 = vld [vmem:[%s2468_s1 + $0x228] sm:$0xff]  }
  0x29   : > { %1778 = vmatprep.subr.bf16.mxu0 %v2032_v33  ;;  %1906 = vmatprep.subr.bf16.mxu1 %v2033_v34  ;;  %v2086_v32 = vld [vmem:[%s2468_s1 + $0x1a8] sm:$0xff]   ;;  %v1594_v33 = vcombine.high %v2276_v44, %v2299_v52 }
  0x2a   : > { %550 = vmatprep.mubr.bf16.mxu0 %v1552_v37  ;;  %1900 = vmatprep.mubr.bf16.mxu1 %v2053_v55  ;;  %v1593_v37 = vcombine.low %v2276_v44, %v2299_v52  ;;  %v2098_v44 = vld [vmem:[%s2209_s5 + $0x38] ss:$12 sps:$4 sm:$0xff]  }
  0x2c   : > { %1779 = vmatpush3.bf16.msra.mxu0 %v2034_v38  ;;  %1907 = vmatpush3.bf16.msra.mxu1 %v2033_v34  ;;  %v2097_v34 = vld [vmem:[%s2209_s5 + $0x20] ss:$12 sps:$4 sm:$0xff]  }
  0x2d   : > { %1780 = vmatprep.subr.bf16.mxu0 %v2037_v39  ;;  %1908 = vmatprep.subr.bf16.mxu1 %v2038_v40  ;;  %v1634_v38 = vld [vmem:[%s2209_s5 + $0x6c] sm:$0xff] }
  0x2e   : > { %v2093_v39 = vld [vmem:[%s2468_s1 + $0x1b0] sm:$0xff]  }
  0x2f   : > { %551 = vmatmul.mubr.bf16.gmra.mrb[4].mxu0 %v1551_v41  ;;  %1901 = vmatmul.mubr.bf16.gmra.mrb[4].mxu1 %v2056_v59  ;;  %v2094_v41 = vld [vmem:[%s2468_s1 + $0x1f8] sm:$0xff]  }
  0x30   : > { %1781 = vmatpush3.bf16.msra.mxu0 %v2039_v42  ;;  %1909 = vmatpush3.bf16.msra.mxu1 %v2038_v40  ;;  %v1693_v40 = vcombine.low %v2302_v53, %v1634_v38  ;;  %v2095_v42 = vld [vmem:[%s2468_s1 + $0x238] sm:$0xff]  }
  0x31   : > { %1782 = vmatprep.subr.bf16.mxu0 %v2040_v45  ;;  %1910 = vmatprep.subr.bf16.mxu1 %v2041_v46  ;;  %v2099_v45 = vld [vmem:[%s2209_s5 + $0x50] ss:$12 sps:$4 sm:$0xff]  }
  0x32   : > { %558 = vmatprep.mubr.bf16.mxu0 %v1555_v47  ;;  %1920 = vmatprep.mubr.bf16.mxu1 %v2063_v2  ;;  %v1694_v47 = vcombine.high %v2302_v53, %v1634_v38 }
  0x34   : > { %1783 = vmatpush3.bf16.msra.mxu0 %v2042_v48  ;;  %1911 = vmatpush3.bf16.msra.mxu1 %v2041_v46  ;;  %v2100_v46 = vld [vmem:[%s2209_s5 + $0x68] ss:$12 sps:$4 sm:$0xff]  }
  0x35   : > { %1784 = vmatprep.subr.bf16.mxu0 %v2045_v49  ;;  %1912 = vmatprep.subr.bf16.mxu1 %v2046_v50 }
  0x37   : > { %559 = vmatmul.mubr.bf16.gmra.mrb[8].mxu0 %v1554_v54 }
  0x38   : > { %1785 = vmatpush3.bf16.msra.mxu0 %v2047_v51  ;;  %1913 = vmatpush3.bf16.msra.mxu1 %v2046_v50 }
  0x39   : > { %1786 = vmatprep.subr.bf16.mxu0 %v2048_v56  ;;  %1914 = vmatprep.subr.bf16.mxu1 %v2049_v57 }
  0x3a   : > { %566 = vmatprep.mubr.bf16.mxu0 %v1558_v58 }
  0x3c   : > { %1787 = vmatpush3.bf16.msra.mxu0 %v2050_v60  ;;  %1915 = vmatpush3.bf16.msra.mxu1 %v2049_v57 }
  0x3d   : > { %1788 = vmatprep.subr.bf16.mxu0 %v2054_v61  ;;  %1916 = vmatprep.subr.bf16.mxu1 %v2055_v62 }
  0x3f   : > { %567 = vmatmul.mubr.bf16.gmra.mrb[12].mxu0 %v1557_v1 }
  0x40   : > { %1789 = vmatpush3.bf16.msra.mxu0 %v2057_v63  ;;  %1917 = vmatpush3.bf16.msra.mxu1 %v2055_v62 }
  0x41   : > { %1790 = vmatprep.subr.bf16.mxu0 %v2058_v3  ;;  %1918 = vmatprep.subr.bf16.mxu1 %v2059_v4 }
  0x42   : > { %880 = vmatprep.mubr.bf16.mxu0 %v1585_v5 }
  0x44   : > { %1791 = vmatpush3.bf16.msra.mxu0 %v2060_v6  ;;  %1919 = vmatpush3.bf16.msra.mxu1 %v2059_v4 }
  0x45   : > { %1828 = vmatprep.subr.bf16.mxu0 %v2064_v7  ;;  %1928 = vmatprep.subr.bf16.mxu1 %v2065_v8 }
  0x47   : > { %881 = vmatmul.mubr.bf16.vlgmr.msra.gmra.mrb[16].mxu0 %v1584_v10  ;;  %1921 = vmatmul.mubr.bf16.vlgmr.msra.gmra.mrb[0].mxu1 %v2066_v9 }
  0x48   : > { %1829 = vmatpush3.bf16.msra.mxu0 %v2067_v11  ;;  %1929 = vmatpush3.bf16.msra.mxu1 %v2065_v8 }
  0x49   : > { %1830 = vmatprep.subr.bf16.mxu0 %v2068_v12  ;;  %1930 = vmatprep.subr.bf16.mxu1 %v2069_v13 }
  0x4a   : > { %888 = vmatprep.mubr.bf16.mxu0 %v2361_v14  ;;  %1924 = vmatprep.mubr.bf16.mxu1 %v2088_v25 }
  0x4c   : > { %1831 = vmatpush3.bf16.msra.mxu0 %v2070_v15  ;;  %1931 = vmatpush3.bf16.msra.mxu1 %v2069_v13 }
  0x4d   : > { %1832 = vmatprep.subr.bf16.mxu0 %v2073_v16  ;;  %1932 = vmatprep.subr.bf16.mxu1 %v2074_v17 }
  0x4f   : > { %889 = vmatmul.mubr.bf16.gmra.mrb[20].mxu0 %v1587_v18  ;;  %1925 = vmatmul.mubr.bf16.gmra.mrb[4].mxu1 %v2090_v26 }
  0x50   : > { %1833 = vmatpush3.bf16.msra.mxu0 %v2075_v19  ;;  %1933 = vmatpush3.bf16.msra.mxu1 %v2074_v17 }
  0x51   : > { %1834 = vmatprep.subr.bf16.mxu0 %v2076_v20  ;;  %1934 = vmatprep.subr.bf16.mxu1 %v2077_v21 }
  0x52   : > { %896 = vmatprep.mubr.bf16.mxu0 %v1591_v23  ;;  %1944 = vmatprep.mubr.bf16.mxu1 %v2097_v34 }
  0x54   : > { %1835 = vmatpush3.bf16.msra.mxu0 %v2078_v22  ;;  %1935 = vmatpush3.bf16.msra.mxu1 %v2077_v21 }
  0x55   : > { %1836 = vmatprep.subr.bf16.mxu0 %v2081_v24  ;;  %1936 = vmatprep.subr.bf16.mxu1 %v2082_v27 }
  0x57   : > { %897 = vmatmul.mubr.bf16.gmra.mrb[24].mxu0 %v1590_v28 }
  0x58   : > { %1837 = vmatpush3.bf16.msra.mxu0 %v2083_v29  ;;  %1937 = vmatpush3.bf16.msra.mxu1 %v2082_v27 }
  0x59   : > { %1838 = vmatprep.subr.bf16.mxu0 %v2084_v30  ;;  %1938 = vmatprep.subr.bf16.mxu1 %v2085_v31 }
  0x5a   : > { %904 = vmatprep.mubr.bf16.mxu0 %v1594_v33 }
  0x5c   : > { %1839 = vmatpush3.bf16.msra.mxu0 %v2086_v32  ;;  %1939 = vmatpush3.bf16.msra.mxu1 %v2085_v31 }
  0x5d   : > { %1840 = vmatprep.subr.bf16.mxu0 %v2091_v35  ;;  %1940 = vmatprep.subr.bf16.mxu1 %v2092_v36 }
  0x5f   : > { %905 = vmatmul.mubr.bf16.gmra.mrb[28].mxu0 %v1593_v37 }
  0x60   : > { %1841 = vmatpush3.bf16.msra.mxu0 %v2093_v39  ;;  %1941 = vmatpush3.bf16.msra.mxu1 %v2092_v36 }
  0x61   : > { %1842 = vmatprep.subr.bf16.mxu0 %v2094_v41  ;;  %1942 = vmatprep.subr.bf16.mxu1 %v2095_v42 }
  0x62   : > { %1284 = vmatprep.mubr.bf16.mxu0 %v2361_v14 }
  0x64   : > { %1843 = vmatpush3.bf16.msra.mxu0 %v2096_v43  ;;  %1943 = vmatpush3.bf16.msra.mxu1 %v2095_v42 }
  0x67   : > { %1285 = vmatmul.mubr.bf16.vlgmr.msra.gmra.mrb[32].mxu0 %v1587_v18  ;;  %1945 = vmatmul.mubr.bf16.vlgmr.msra.gmra.mrb[0].mxu1 %v2098_v44 }
  0x68   : > { %1292 = vmatprep.mubr.bf16.mxu0 %v1591_v23  ;;  %1948 = vmatprep.mubr.bf16.mxu1 %v2099_v45 }
  0x6f   : > { %1293 = vmatmul.mubr.bf16.gmra.mrb[36].mxu0 %v1590_v28  ;;  %1949 = vmatmul.mubr.bf16.gmra.mrb[4].mxu1 %v2100_v46 }
  0x70   : > { %1300 = vmatprep.mubr.bf16.mxu0 %v1594_v33 }
  0x77   : > { %1301 = vmatmul.mubr.bf16.gmra.mrb[40].mxu0 %v1593_v37 }
  0x78   : > { %1308 = vmatprep.mubr.bf16.mxu0 %v1694_v47 }
  0x7f   : > { %1309 = vmatmul.mubr.bf16.gmra.mrb[44].mxu0 %v1693_v40 }
  0xfa   : > { %v1740_v48 = vpop.f32.mrb[0].mxu0 }
  0xfb   : > { %v1741_v49 = vpop.f32.mrb[1].mxu0 }
  0xfc   : > { %v1742_v50 = vadd.f32 %v1741_v49, %v1740_v48  ;;  %v1743_v51 = vpop.f32.mrb[2].mxu0 }
  0xfd   : > { %v1744_v52 = vpop.f32.mrb[3].mxu0 }
  0xfe   : > { %v1745_v54 = vadd.f32 %v1744_v52, %v1743_v51  ;;  %v1720_v51 = vld [vmem:[%s2469_s2] ss:$0 sm:$0xff] }
 0x102   : > { %v1746_v55 = vpop.f32.mrb[4].mxu0 }
 0x103   : > { %v1747_v56 = vpop.f32.mrb[5].mxu0 }
 0x104   : > { %v1748_v57 = vadd.f32 %v1747_v56, %v1746_v55  ;;  %v1749_v58 = vpop.f32.mrb[6].mxu0 }
 0x105   : > { %v1750_v59 = vpop.f32.mrb[7].mxu0 }
 0x106   : > { %v1751_v60 = vadd.f32 %v1750_v59, %v1749_v58 }
 0x10a   : > { %v1752_v61 = vpop.f32.mrb[8].mxu0 }
 0x10b   : > { %v1753_v62 = vpop.f32.mrb[9].mxu0 }
 0x10c   : > { %v1754_v63 = vadd.f32 %v1753_v62, %v1752_v61  ;;  %v1755_v0 = vpop.f32.mrb[10].mxu0 }
 0x10d   : > { %v1756_v53 = vpop.f32.mrb[11].mxu0 }
 0x10e   : > { %v1757_v1 = vadd.f32 %v1756_v53, %v1755_v0 }
 0x112   : > { %v1758_v2 = vpop.f32.mrb[12].mxu0 }
 0x113   : > { %v1759_v3 = vpop.f32.mrb[13].mxu0 }
 0x114   : > { %v1760_v4 = vadd.f32 %v1759_v3, %v1758_v2  ;;  %v1761_v5 = vpop.f32.mrb[14].mxu0 }
 0x115   : > { %v1762_v6 = vpop.f32.mrb[15].mxu0 }
 0x116   : > { %v1763_v7 = vadd.f32 %v1762_v6, %v1761_v5 }
 0x11a   : > { %v1792_v8 = vpop.f32.mrb[16].mxu0 }
 0x11b   : > { %v1793_v9 = vpop.f32.mrb[17].mxu0 }
 0x11c   : > { %v1794_v10 = vadd.f32 %v1793_v9, %v1792_v8  ;;  %v1795_v11 = vpop.f32.mrb[18].mxu0 }
 0x11d   : > { %v1796_v12 = vpop.f32.mrb[19].mxu0 }
 0x11e   : > { %v1955_v13 = vadd.f32 %v1794_v10, %v1742_v50  ;;  %v1797_v14 = vadd.f32 %v1796_v12, %v1795_v11 }
 0x120   : > { %v1961_v15 = vadd.f32 %v1797_v14, %v1745_v54 }
 0x122   : > { %v1798_v16 = vpop.f32.mrb[20].mxu0 }
 0x123   : > { %v1799_v17 = vpop.f32.mrb[21].mxu0 }
 0x124   : > { %v1800_v18 = vadd.f32 %v1799_v17, %v1798_v16  ;;  %v1801_v19 = vpop.f32.mrb[22].mxu0 }
 0x125   : > { %v1802_v20 = vpop.f32.mrb[23].mxu0 }
 0x126   : > { %v1952_v21 = vadd.f32 %v1800_v18, %v1748_v57  ;;  %v1803_v22 = vadd.f32 %v1802_v20, %v1801_v19 }
 0x128   : > { %v1958_v23 = vadd.f32 %v1803_v22, %v1751_v60 }
 0x12a   : > { %v1804_v24 = vpop.f32.mrb[24].mxu0 }
 0x12b   : > { %v1805_v25 = vpop.f32.mrb[25].mxu0 }
 0x12c   : > { %v1806_v26 = vadd.f32 %v1805_v25, %v1804_v24  ;;  %v1807_v27 = vpop.f32.mrb[26].mxu0 }
 0x12d   : > { %v1808_v28 = vpop.f32.mrb[27].mxu0 }
 0x12e   : > { %v1967_v29 = vadd.f32 %v1806_v26, %v1754_v63  ;;  %v1809_v30 = vadd.f32 %v1808_v28, %v1807_v27 }
 0x130   : > { %v1973_v31 = vadd.f32 %v1809_v30, %v1757_v1 }
 0x132   : > { %v1810_v32 = vpop.f32.mrb[28].mxu0 }
 0x133   : > { %v1811_v33 = vpop.f32.mrb[29].mxu0 }
 0x134   : > { %v1812_v34 = vadd.f32 %v1811_v33, %v1810_v32  ;;  %v1813_v35 = vpop.f32.mrb[30].mxu0 }
 0x135   : > { %v1814_v36 = vpop.f32.mrb[31].mxu0 }
 0x136   : > { %v2441_v37 = vadd.f32 %v1812_v34, %v1760_v4  ;;  %v1815_v38 = vadd.f32 %v1814_v36, %v1813_v35 }
 0x138   : > { %v2443_v39 = vadd.f32 %v1815_v38, %v1763_v7 }
 0x13a   : > { %v1844_v40 = vpop.f32.mrb[32].mxu0  ;;  %v1946_v41 = vpop.f32.mrb[0].mxu1 }
 0x13b   : > { %v1845_v42 = vpop.f32.mrb[33].mxu0  ;;  %v1351_v43 = vpop.f32.mrb[1].mxu1 }
 0x13c   : > { %v1846_v44 = vadd.f32 %v1845_v42, %v1844_v40  ;;  %v1847_v45 = vpop.f32.mrb[34].mxu0  ;;  %v1947_v46 = vpop.f32.mrb[2].mxu1 }
 0x13d   : > { %v1848_v47 = vpop.f32.mrb[35].mxu0  ;;  %v1354_v48 = vpop.f32.mrb[3].mxu1 }
 0x13e   : > { %v1956_v49 = vadd.f32 %v1955_v13, %v1846_v44  ;;  %v1849_v50 = vadd.f32 %v1848_v47, %v1847_v45 }
 0x140   : > { %v1957_v52 = vadd.f32 %v1956_v49, %v1351_v43  ;;  %v1962_v54 = vadd.f32 %v1961_v15, %v1849_v50 }
 0x142   : > { %v1397_v55 = vadd.f32 %v1957_v52, %v1720_v51  ;;  %v1963_v56 = vadd.f32 %v1962_v54, %v1354_v48  ;;  %v1850_v57 = vpop.f32.mrb[36].mxu0  ;;  %v1950_v58 = vpop.f32.mrb[4].mxu1 }
 0x143   : > { %v1851_v59 = vpop.f32.mrb[37].mxu0  ;;  %v1367_v60 = vpop.f32.mrb[5].mxu1 }
 0x144   : > { %v1405_v61 = vmax.f32 %v1397_v55, 0.0  ;;  %v1398_v62 = vadd.f32 %v1963_v56, %v1720_v51  ;;  %v1852_v63 = vadd.f32 %v1851_v59, %v1850_v57  ;;  %v1853_v0 = vpop.f32.mrb[38].mxu0  ;;  %v1951_v53 = vpop.f32.mrb[6].mxu1 }
 0x145   : > { %v1854_v1 = vpop.f32.mrb[39].mxu0  ;;  %v1370_v2 = vpop.f32.mrb[7].mxu1 }
 0x146   : > { %1413 = vst [vmem:[%s2452_s20] sm:$0xff] %v1405_v61  ;;  %v1406_v3 = vmax.f32 %v1398_v62, 0.0  ;;  %v1953_v4 = vadd.f32 %v1952_v21, %v1852_v63  ;;  %v1855_v5 = vadd.f32 %v1854_v1, %v1853_v0 }
 0x148   : > { %1414 = vst [vmem:[%s2452_s20 + $0x8] sm:$0xff] %v1406_v3  ;;  %v1954_v6 = vadd.f32 %v1953_v4, %v1946_v41  ;;  %v1959_v7 = vadd.f32 %v1958_v23, %v1855_v5 }
 0x14a   : > { %v1399_v8 = vadd.f32 %v1954_v6, %v1720_v51  ;;  %v1960_v9 = vadd.f32 %v1959_v7, %v1947_v46  ;;  %v1856_v10 = vpop.f32.mrb[40].mxu0 }
 0x14b   : > { %v1857_v11 = vpop.f32.mrb[41].mxu0 }
 0x14c   : > { %v1407_v12 = vmax.f32 %v1399_v8, 0.0  ;;  %v1400_v13 = vadd.f32 %v1960_v9, %v1720_v51  ;;  %v1858_v14 = vadd.f32 %v1857_v11, %v1856_v10  ;;  %v1859_v15 = vpop.f32.mrb[42].mxu0 }
 0x14d   : > { %v1860_v16 = vpop.f32.mrb[43].mxu0 }
 0x14e   : > { %1415 = vst [vmem:[%s2452_s20 + $0x10] sm:$0xff] %v1407_v12  ;;  %v1408_v17 = vmax.f32 %v1400_v13, 0.0  ;;  %v1968_v18 = vadd.f32 %v1967_v29, %v1858_v14  ;;  %v1861_v19 = vadd.f32 %v1860_v16, %v1859_v15 }
 0x150   : > { %1416 = vst [vmem:[%s2452_s20 + $0x18] sm:$0xff] %v1408_v17  ;;  %v1969_v20 = vadd.f32 %v1968_v18, %v1367_v60  ;;  %v1974_v21 = vadd.f32 %v1973_v31, %v1861_v19 }
 0x152   : > { %v1401_v22 = vadd.f32 %v1969_v20, %v1720_v51  ;;  %v1975_v23 = vadd.f32 %v1974_v21, %v1370_v2  ;;  %v1862_v24 = vpop.f32.mrb[44].mxu0 }
 0x153   : > { %v1863_v25 = vpop.f32.mrb[45].mxu0 }
 0x154   : > { %v1409_v26 = vmax.f32 %v1401_v22, 0.0  ;;  %v1402_v27 = vadd.f32 %v1975_v23, %v1720_v51  ;;  %v1864_v28 = vadd.f32 %v1863_v25, %v1862_v24  ;;  %v1865_v30 = vpop.f32.mrb[46].mxu0 }
 0x155   : > { %v1866_v32 = vpop.f32.mrb[47].mxu0 }
 0x156   : > { %1417 = vst [vmem:[%s2452_s20 + $0x20] sm:$0xff] %v1409_v26  ;;  %v1410_v33 = vmax.f32 %v1402_v27, 0.0  ;;  %v1965_v29 = vadd.f32 %v2441_v37, %v1864_v28  ;;  %v1867_v34 = vadd.f32 %v1866_v32, %v1865_v30 }
 0x158   : > { %1418 = vst [vmem:[%s2452_s20 + $0x28] sm:$0xff] %v1410_v33  ;;  %v1966_v35 = vadd.f32 %v1965_v29, %v1950_v58  ;;  %v1971_v31 = vadd.f32 %v2443_v39, %v1867_v34 }
 0x15a   : > { %v1403_v36 = vadd.f32 %v1966_v35, %v1720_v51  ;;  %v1972_v38 = vadd.f32 %v1971_v31, %v1951_v53 }
 0x15c   : > { %v1411_v40 = vmax.f32 %v1403_v36, 0.0  ;;  %v1404_v41 = vadd.f32 %v1972_v38, %v1720_v51 }
 0x15e   : > { %1419 = vst [vmem:[%s2452_s20 + $0x30] sm:$0xff] %v1411_v40  ;;  %v1412_v42 = vmax.f32 %v1404_v41, 0.0 }
 0x160   : > { %1420 = vst [vmem:[%s2452_s20 + $0x38] sm:$0xff] %v1412_v42 }
 0x161 PF: > { %s13_s12 = sadd.s32 1, %s2109_s12  }
 0x162   : > { %p10_p4 = scmp.ge.s32.totalorder %s13_s12, 4  }
 0x164   :  { %12 = sbr.rel (!%p10_p4) target bundleno = 1 (0x1), region = 66 }

// kernel: alexnet_forward.8
= control target key start
LH: loop header
LB: loop body
LE: loop exit
PB: predicated region body
PF: predicated region fallthrough
CT: control target
= control target key end

     0   :  { %s8313_s12 = smov 0   ;;  %s10411_s0 = inlined_call_operand.vmem [shape: bf16[2,34,32,144], index: 0, kind: input, shape index: {}]   ;;  %s10412_s1 = inlined_call_operand.vmem [shape: bf16[3,144,128], index: 1, kind: input, shape index: {}]   ;;  %s10413_s2 = inlined_call_operand.vmem [shape: f32[1,128], index: 2, kind: input, shape index: {}]   ;;  %s10414_s3 = inlined_call_operand.vmem [shape: f32[2,15,32,128], index: 3, kind: output, shape index: {}]  }
   0x1 LB: > { %s6669_s13 = sadd.s32 4294967295, %s8290_s12   ;;  %p6673_p0 = scmp.ge.s32.totalorder %s8290_s12, 1  ;;  %s8290_s12 = sphi %s8313_s12, %s13_s12  }
   0x2   : > { %p137_p1 = scmp.lt.s32.totalorder %s8290_s12, 3 }
   0x4   : > { %p138_p2 = pnand %p6673_p0, %p137_p1 }
   0x6   : > { %141 = sbr.rel (%p138_p2) target bundleno = 1026 (0x402), region = 32 }
   0xd   : > { %v7929_v0 = vld [vmem:[%s10412_s1 + $0x48] sm:$0xff]   ;;  %v10415_v1 = vmov 0   ;;  %v7930_v2 = vld [vmem:[%s10412_s1] sm:$0xff]   ;;  %v7931_v3 = vld [vmem:[%s10412_s1 + $0x50] sm:$0xff]   ;;  %p161_p3 = scmp.lt.s32.totalorder %s6669_s13, 1  ;;  %vm472_vm0 = vcmask 130048  }
   0xe   : > { %521 = vmatprep.subr.bf16.mxu0 %v10415_v1  ;;  %928 = vmatprep.subr.bf16.mxu1 %v10415_v1  ;;  %v7932_v4 = vld [vmem:[%s10412_s1 + $0x8] sm:$0xff]   ;;  %v7933_v5 = vld [vmem:[%s10412_s1 + $0x58] sm:$0xff]   ;;  %v7934_v6 = vld [vmem:[%s10412_s1 + $0x10] sm:$0xff]  }
   0xf   : > { %522 = vmatpush1.bf16.msra.mxu0 %v7929_v0  ;;  %929 = vmatpush1.bf16.msra.mxu1 %v7930_v2  ;;  %s10435_s13 = smov (!%p161_p3, %s6669_s13), 1  ;;  %v7935_v7 = vld [vmem:[%s10412_s1 + $0x60] sm:$0xff]   ;;  %v7936_v8 = vld [vmem:[%s10412_s1 + $0x18] sm:$0xff]   ;;  %v7937_v9 = vld [vmem:[%s10412_s1 + $0x68] sm:$0xff]  }
  0x10   : > { %523 = vmatprep.subr.bf16.mxu0 %v10415_v1  ;;  %930 = vmatprep.subr.bf16.mxu1 %v10415_v1  ;;  %s7918_s30 = smul.u32 1088, %s10435_s13  ;;  %v7938_v10 = vld [vmem:[%s10412_s1 + $0x20] sm:$0xff]   ;;  %v7939_v11 = vld [vmem:[%s10412_s1 + $0x70] sm:$0xff]   ;;  %v7940_v12 = vld [vmem:[%s10412_s1 + $0x28] sm:$0xff]  }
  0x11   : > { %v7941_v15 = vld [vmem:[%s10412_s1 + $0x78] sm:$0xff]   ;;  %v7942_v16 = vld [vmem:[%s10412_s1 + $0x30] sm:$0xff]   ;;  %v7943_v17 = vld [vmem:[%s10412_s1 + $0x80] sm:$0xff]   ;;  %s7919_s19 = smul.u32 480, %s10435_s13 }
  0x12   : > { %s8367_s10 = scalar_lea.vmem %s10411_s0, %s7918_s30  ;;  %v7944_v18 = vld [vmem:[%s10412_s1 + $0x38] sm:$0xff]   ;;  %v7945_v19 = vld [vmem:[%s10412_s1 + $0x88] sm:$0xff]   ;;  %v7946_v20 = vld [vmem:[%s10412_s1 + $0x40] sm:$0xff]  }
  0x13   : > { %524 = vmatpush1.bf16.msra.mxu0 %v7931_v3  ;;  %931 = vmatpush1.bf16.msra.mxu1 %v7932_v4  ;;  %v7949_v13 = vld [vmem:[%s8367_s10 + $0x24] ss:$8 sps:$4 sm:$0xff]   ;;  %v7947_v21 = vld [vmem:[%s8367_s10 + $0x20] ss:$8 sps:$4 sm:$0xff]   ;;  %v7953_v23 = vld [vmem:[%s10412_s1 + $0x90] sm:$0xff]   ;;  %s9213_s21 = scalar_lea.vmem %s10414_s3, %s7919_s19 }
  0x14   : > { %525 = vmatprep.subr.bf16.mxu0 %v10415_v1  ;;  %932 = vmatprep.subr.bf16.mxu1 %v10415_v1  ;;  %v7952_v14 = vld [vmem:[%s8367_s10 + $0x4] ss:$8 sps:$4 sm:$0xff]   ;;  %v7950_v22 = vld [vmem:[%s8367_s10] ss:$8 sps:$4 sm:$0xff]   ;;  %v7955_v25 = vld [vmem:[%s8367_s10 + $0x34] ss:$8 sps:$4 sm:$0xff]  }
  0x15   : > { %6767 = vmatprep.mubr.msk.bf16.mxu0 %vm472_vm0, %v7949_v13  ;;  %6824 = vmatprep.mubr.msk.bf16.mxu1 %vm472_vm0, %v7952_v14  ;;  %v7954_v24 = vld [vmem:[%s10412_s1 + $0x48] sm:$0xff]   ;;  %v7957_v26 = vld [vmem:[%s8367_s10 + $0x14] ss:$8 sps:$4 sm:$0xff]   ;;  %v7959_v29 = vld [vmem:[%s8367_s10 + $0x30] ss:$8 sps:$4 sm:$0xff]  }
  0x16   : > { %v7964_v27 = vld [vmem:[%s10412_s1 + $0x98] sm:$0xff]   ;;  %v7965_v28 = vld [vmem:[%s10412_s1 + $0x50] sm:$0xff]   ;;  %v8430_v31 = vld [vmem:[%s8367_s10 + $0x44] ss:$8 sps:$4 sm:$0xff]  }
  0x17   : > { %526 = vmatpush1.bf16.msra.mxu0 %v7933_v5  ;;  %933 = vmatpush1.bf16.msra.mxu1 %v7934_v6  ;;  %v7960_v30 = vld [vmem:[%s8367_s10 + $0x10] ss:$8 sps:$4 sm:$0xff]   ;;  %v7969_v32 = vld [vmem:[%s10412_s1 + $0xa0] sm:$0xff]   ;;  %v7977_v34 = vld [vmem:[%s10412_s1 + $0xa8] sm:$0xff]  }
  0x18   : > { %527 = vmatprep.subr.bf16.mxu0 %v10415_v1  ;;  %934 = vmatprep.subr.bf16.mxu1 %v10415_v1  ;;  %v7970_v33 = vld [vmem:[%s10412_s1 + $0x58] sm:$0xff]   ;;  %v7978_v35 = vld [vmem:[%s10412_s1 + $0x60] sm:$0xff]   ;;  %v7985_v38 = vld [vmem:[%s10412_s1 + $0xb0] sm:$0xff]  }
  0x19   : > { %v8451_v36 = vld [vmem:[%s8367_s10 + $0x40] ss:$8 sps:$4 sm:$0xff]   ;;  %v8455_v37 = vld [vmem:[%s8367_s10 + $0x54] ss:$8 sps:$4 sm:$0xff]   ;;  %v8477_v42 = vld [vmem:[%s8367_s10 + $0x50] ss:$8 sps:$4 sm:$0xff]  }
  0x1a   : > { %v7986_v39 = vld [vmem:[%s10412_s1 + $0x68] sm:$0xff]   ;;  %v7993_v40 = vld [vmem:[%s10412_s1 + $0xb8] sm:$0xff]   ;;  %v7994_v41 = vld [vmem:[%s10412_s1 + $0x70] sm:$0xff]  }
  0x1b   : > { %528 = vmatpush1.bf16.msra.mxu0 %v7935_v7  ;;  %935 = vmatpush1.bf16.msra.mxu1 %v7936_v8  ;;  %v8481_v43 = vld [vmem:[%s8367_s10 + $0x64] ss:$8 sps:$4 sm:$0xff]   ;;  %v8001_v45 = vld [vmem:[%s10412_s1 + $0x78] sm:$0xff]   ;;  %v8504_v48 = vld [vmem:[%s8367_s10 + $0x60] ss:$8 sps:$4 sm:$0xff]  }
  0x1c   : > { %529 = vmatprep.subr.bf16.mxu0 %v10415_v1  ;;  %936 = vmatprep.subr.bf16.mxu1 %v10415_v1  ;;  %v8000_v44 = vld [vmem:[%s10412_s1 + $0xc0] sm:$0xff]   ;;  %v8006_v46 = vld [vmem:[%s10412_s1 + $0xc8] sm:$0xff]   ;;  %v8508_v49 = vld [vmem:[%s8367_s10 + $0x74] ss:$8 sps:$4 sm:$0xff]  }
  0x1d   : > { %v8007_v47 = vld [vmem:[%s10412_s1 + $0x80] sm:$0xff]   ;;  %v8014_v50 = vld [vmem:[%s10412_s1 + $0xd0] sm:$0xff]   ;;  %v8015_v51 = vld [vmem:[%s10412_s1 + $0x88] sm:$0xff]  }
  0x1e   : > { %v8525_v52 = vld [vmem:[%s8367_s10 + $0x70] ss:$8 sps:$4 sm:$0xff]   ;;  %v8529_v53 = vld [vmem:[%s8367_s10 + $0x84] ss:$8 sps:$4 sm:$0xff]   ;;  %v8539_v54 = vld [vmem:[%s8367_s10 + $0x80] ss:$8 sps:$4 sm:$0xff]  }
  0x1f   : > { %530 = vmatpush1.bf16.msra.mxu0 %v7937_v9  ;;  %937 = vmatpush1.bf16.msra.mxu1 %v7938_v10  ;;  %v8542_v55 = vld [vmem:[%s8367_s10 + $0x94] ss:$8 sps:$4 sm:$0xff]   ;;  %v8551_v56 = vld [vmem:[%s8367_s10 + $0x90] ss:$8 sps:$4 sm:$0xff]   ;;  %v8554_v57 = vld [vmem:[%s8367_s10 + $0xa4] ss:$8 sps:$4 sm:$0xff]  }
  0x20   : > { %531 = vmatprep.subr.bf16.mxu0 %v10415_v1  ;;  %938 = vmatprep.subr.bf16.mxu1 %v10415_v1  ;;  %v8563_v58 = vld [vmem:[%s8367_s10 + $0xa0] ss:$8 sps:$4 sm:$0xff]   ;;  %v8566_v59 = vld [vmem:[%s8367_s10 + $0xb4] ss:$8 sps:$4 sm:$0xff]   ;;  %v8575_v60 = vld [vmem:[%s8367_s10 + $0xb0] ss:$8 sps:$4 sm:$0xff]  }
  0x21   : > { %v8578_v61 = vld [vmem:[%s8367_s10 + $0xc4] ss:$8 sps:$4 sm:$0xff]   ;;  %v8587_v62 = vld [vmem:[%s8367_s10 + $0xc0] ss:$8 sps:$4 sm:$0xff]   ;;  %v8590_v63 = vld [vmem:[%s8367_s10 + $0xd4] ss:$8 sps:$4 sm:$0xff]  }
  0x22   : > { %v8599_v0 = vld [vmem:[%s8367_s10 + $0xd0] ss:$8 sps:$4 sm:$0xff]   ;;  %v8602_v2 = vld [vmem:[%s8367_s10 + $0xe4] ss:$8 sps:$4 sm:$0xff]   ;;  %v8611_v3 = vld [vmem:[%s8367_s10 + $0xe0] ss:$8 sps:$4 sm:$0xff]  }
  0x23   : > { %532 = vmatpush1.bf16.msra.mxu0 %v7939_v11  ;;  %939 = vmatpush1.bf16.msra.mxu1 %v7940_v12  ;;  %v8614_v4 = vld [vmem:[%s8367_s10 + $0xf4] ss:$8 sps:$4 sm:$0xff]   ;;  %v8623_v5 = vld [vmem:[%s8367_s10 + $0xf0] ss:$8 sps:$4 sm:$0xff]   ;;  %v8626_v6 = vld [vmem:[%s8367_s10 + $0x104] ss:$8 sps:$4 sm:$0xff]  }
  0x24   : > { %533 = vmatprep.subr.bf16.mxu0 %v10415_v1  ;;  %940 = vmatprep.subr.bf16.mxu1 %v10415_v1  ;;  %v8635_v7 = vld [vmem:[%s8367_s10 + $0x100] ss:$8 sps:$4 sm:$0xff]   ;;  %v8638_v8 = vld [vmem:[%s8367_s10 + $0x114] ss:$8 sps:$4 sm:$0xff]   ;;  %v8647_v9 = vld [vmem:[%s8367_s10 + $0x110] ss:$8 sps:$4 sm:$0xff]  }
  0x25   : > { %v8650_v10 = vld [vmem:[%s8367_s10 + $0x124] ss:$8 sps:$4 sm:$0xff]   ;;  %v8659_v11 = vld [vmem:[%s8367_s10 + $0x120] ss:$8 sps:$4 sm:$0xff]   ;;  %v8668_v14 = vld [vmem:[%s8367_s10 + $0x134] ss:$8 sps:$4 sm:$0xff]  }
  0x26   : > { %v8022_v12 = vld [vmem:[%s10412_s1] sm:$0xff]  }
  0x27   : > { %534 = vmatpush1.bf16.msra.mxu0 %v7941_v15  ;;  %941 = vmatpush1.bf16.msra.mxu1 %v7942_v16  ;;  %v8030_v15 = vld [vmem:[%s10412_s1 + $0x8] sm:$0xff]   ;;  %v8031_v16 = vld [vmem:[%s10412_s1 + $0x98] sm:$0xff]  }
  0x28   : > { %535 = vmatprep.subr.bf16.mxu0 %v10415_v1  ;;  %942 = vmatprep.subr.bf16.mxu1 %v10415_v1 }
  0x2b   : > { %536 = vmatpush1.bf16.msra.mxu0 %v7943_v17  ;;  %943 = vmatpush1.bf16.msra.mxu1 %v7944_v18  ;;  %v8685_v17 = vld [vmem:[%s8367_s10 + $0x130] ss:$8 sps:$4 sm:$0xff]   ;;  %v8688_v18 = vld [vmem:[%s8367_s10 + $0x144] ss:$8 sps:$4 sm:$0xff]  }
  0x2c   : > { %537 = vmatprep.subr.bf16.mxu0 %v10415_v1  ;;  %944 = vmatprep.subr.bf16.mxu1 %v10415_v1 }
  0x2f   : > { %538 = vmatpush1.bf16.msra.mxu0 %v7945_v19  ;;  %945 = vmatpush1.bf16.msra.mxu1 %v7946_v20  ;;  %v8035_v19 = vld [vmem:[%s10412_s1 + $0x10] sm:$0xff]   ;;  %v8036_v20 = vld [vmem:[%s10412_s1 + $0xa0] sm:$0xff]  }
  0x30   : > { %1387 = vmatprep.subr.bf16.mxu0 %v10415_v1  ;;  %2031 = vmatprep.subr.bf16.mxu1 %v10415_v1 }
  0x32   : > { %554 = vmatmul.mubr.bf16.vlgmr.msra.gmra.mrb[0].mxu0 %v7947_v21  ;;  %961 = vmatmul.mubr.bf16.vlgmr.msra.gmra.mrb[0].mxu1 %v7950_v22  ;;  %v8044_v22 = vld [vmem:[%s10412_s1 + $0xa8] sm:$0xff]  }
  0x33   : > { %1388 = vmatpush1.bf16.msra.mxu0 %v7953_v23  ;;  %2032 = vmatpush1.bf16.msra.mxu1 %v7954_v24  ;;  %v8713_v23 = vld [vmem:[%s8367_s10 + $0x140] ss:$8 sps:$4 sm:$0xff]   ;;  %v8716_v24 = vld [vmem:[%s8367_s10 + $0x154] ss:$8 sps:$4 sm:$0xff]  }
  0x34   : > { %6768 = vmatprep.mubr.msk.bf16.mxu0 %vm472_vm0, %v7955_v25  ;;  %6825 = vmatprep.mubr.msk.bf16.mxu1 %vm472_vm0, %v7957_v26  ;;  %v8052_v26 = vld [vmem:[%s10412_s1 + $0xb0] sm:$0xff]  }
  0x35   : > { %1389 = vmatprep.subr.bf16.mxu0 %v10415_v1  ;;  %2033 = vmatprep.subr.bf16.mxu1 %v10415_v1 }
  0x37   : > { %1390 = vmatpush1.bf16.msra.mxu0 %v7964_v27  ;;  %2034 = vmatpush1.bf16.msra.mxu1 %v7965_v28  ;;  %v8059_v27 = vld [vmem:[%s10412_s1 + $0x28] sm:$0xff]   ;;  %v8060_v28 = vld [vmem:[%s10412_s1 + $0xb8] sm:$0xff]  }
  0x38   : > { %1391 = vmatprep.subr.bf16.mxu0 %v10415_v1  ;;  %2035 = vmatprep.subr.bf16.mxu1 %v10415_v1 }
  0x3a   : > { %562 = vmatmul.mubr.bf16.gmra.mrb[4].mxu0 %v7959_v29  ;;  %969 = vmatmul.mubr.bf16.gmra.mrb[4].mxu1 %v7960_v30  ;;  %v8744_v30 = vld [vmem:[%s8367_s10 + $0x164] ss:$8 sps:$4 sm:$0xff]  }
  0x3b   : > { %6769 = vmatprep.mubr.msk.bf16.mxu0 %vm472_vm0, %v8430_v31  ;;  %6826 = vmatprep.mubr.msk.bf16.mxu1 %vm472_vm0, %v7949_v13  ;;  %v8023_v13 = vld [vmem:[%s10412_s1 + $0x90] sm:$0xff]  }
  0x3c   : > { %1392 = vmatpush1.bf16.msra.mxu0 %v7969_v32  ;;  %2036 = vmatpush1.bf16.msra.mxu1 %v7970_v33  ;;  %v8067_v32 = vld [vmem:[%s10412_s1 + $0xc0] sm:$0xff]   ;;  %v8072_v33 = vld [vmem:[%s10412_s1 + $0x38] sm:$0xff]  }
  0x3d   : > { %1393 = vmatprep.subr.bf16.mxu0 %v10415_v1  ;;  %2037 = vmatprep.subr.bf16.mxu1 %v10415_v1 }
  0x40   : > { %1394 = vmatpush1.bf16.msra.mxu0 %v7977_v34  ;;  %2038 = vmatpush1.bf16.msra.mxu1 %v7978_v35  ;;  %v8073_v34 = vld [vmem:[%s10412_s1 + $0xc8] sm:$0xff]  }
  0x41   : > { %1395 = vmatprep.subr.bf16.mxu0 %v10415_v1  ;;  %2039 = vmatprep.subr.bf16.mxu1 %v10415_v1  ;;  %v8769_v35 = vld [vmem:[%s8367_s10 + $0x160] ss:$8 sps:$4 sm:$0xff]  }
  0x42   : > { %570 = vmatmul.mubr.bf16.gmra.mrb[8].mxu0 %v8451_v36  ;;  %977 = vmatmul.mubr.bf16.gmra.mrb[8].mxu1 %v7947_v21  ;;  %v8043_v21 = vld [vmem:[%s10412_s1 + $0x18] sm:$0xff]  }
  0x43   : > { %6770 = vmatprep.mubr.msk.bf16.mxu0 %vm472_vm0, %v8455_v37  ;;  %6827 = vmatprep.mubr.msk.bf16.mxu1 %vm472_vm0, %v7955_v25  ;;  %v8051_v25 = vld [vmem:[%s10412_s1 + $0x20] sm:$0xff]  }
  0x44   : > { %1396 = vmatpush1.bf16.msra.mxu0 %v7985_v38  ;;  %2040 = vmatpush1.bf16.msra.mxu1 %v7986_v39  ;;  %v8081_v38 = vld [vmem:[%s10412_s1 + $0xd0] sm:$0xff]  }
  0x45   : > { %1397 = vmatprep.subr.bf16.mxu0 %v10415_v1  ;;  %2041 = vmatprep.subr.bf16.mxu1 %v10415_v1  ;;  %v8791_v39 = vld [vmem:[%s8367_s10 + $0x170] ss:$8 sps:$4 sm:$0xff]  }
  0x48   : > { %1398 = vmatpush1.bf16.msra.mxu0 %v7993_v40  ;;  %2042 = vmatpush1.bf16.msra.mxu1 %v7994_v41  ;;  %v8794_v40 = vld [vmem:[%s8367_s10 + $0x184] ss:$8 sps:$4 sm:$0xff]   ;;  %v8803_v41 = vld [vmem:[%s8367_s10 + $0x180] ss:$8 sps:$4 sm:$0xff]  }
  0x49   : > { %1399 = vmatprep.subr.bf16.mxu0 %v10415_v1  ;;  %2043 = vmatprep.subr.bf16.mxu1 %v10415_v1 }
  0x4a   : > { %578 = vmatmul.mubr.bf16.gmra.mrb[12].mxu0 %v8477_v42  ;;  %985 = vmatmul.mubr.bf16.gmra.mrb[12].mxu1 %v7959_v29  ;;  %v8741_v29 = vld [vmem:[%s8367_s10 + $0x150] ss:$8 sps:$4 sm:$0xff]  }
  0x4b   : > { %6771 = vmatprep.mubr.msk.bf16.mxu0 %vm472_vm0, %v8481_v43  ;;  %6828 = vmatprep.mubr.msk.bf16.mxu1 %vm472_vm0, %v8430_v31 }
  0x4c   : > { %1400 = vmatpush1.bf16.msra.mxu0 %v8000_v44  ;;  %2044 = vmatpush1.bf16.msra.mxu1 %v8001_v45  ;;  %v8818_v44 = vld [vmem:[%s8367_s10 + $0x1a4] ss:$8 sps:$4 sm:$0xff]   ;;  %v8827_v45 = vld [vmem:[%s8367_s10 + $0x1a0] ss:$8 sps:$4 sm:$0xff]  }
  0x4d   : > { %1401 = vmatprep.subr.bf16.mxu0 %v10415_v1  ;;  %2045 = vmatprep.subr.bf16.mxu1 %v10415_v1 }
  0x50   : > { %1402 = vmatpush1.bf16.msra.mxu0 %v8006_v46  ;;  %2046 = vmatpush1.bf16.msra.mxu1 %v8007_v47  ;;  %v8830_v46 = vld [vmem:[%s8367_s10 + $0x1b4] ss:$8 sps:$4 sm:$0xff]   ;;  %v8839_v47 = vld [vmem:[%s8367_s10 + $0x1b0] ss:$8 sps:$4 sm:$0xff]  }
  0x51   : > { %1403 = vmatprep.subr.bf16.mxu0 %v10415_v1  ;;  %2047 = vmatprep.subr.bf16.mxu1 %v10415_v1 }
  0x52   : > { %586 = vmatmul.mubr.bf16.gmra.mrb[16].mxu0 %v8504_v48  ;;  %993 = vmatmul.mubr.bf16.gmra.mrb[16].mxu1 %v8451_v36 }
  0x53   : > { %6772 = vmatprep.mubr.msk.bf16.mxu0 %vm472_vm0, %v8508_v49  ;;  %6829 = vmatprep.mubr.msk.bf16.mxu1 %vm472_vm0, %v8455_v37 }
  0x54   : > { %1404 = vmatpush1.bf16.msra.mxu0 %v8014_v50  ;;  %2048 = vmatpush1.bf16.msra.mxu1 %v8015_v51  ;;  %v8854_v50 = vld [vmem:[%s8367_s10 + $0x1d4] ss:$8 sps:$4 sm:$0xff]  }
  0x55   : > { %2438 = vmatprep.subr.bf16.mxu0 %v10415_v1  ;;  %2896 = vmatprep.subr.bf16.mxu1 %v10415_v1 }
  0x5a   : > { %594 = vmatmul.mubr.bf16.gmra.mrb[20].mxu0 %v8525_v52  ;;  %1001 = vmatmul.mubr.bf16.gmra.mrb[20].mxu1 %v8477_v42 }
  0x5b   : > { %6773 = vmatprep.mubr.msk.bf16.mxu0 %vm472_vm0, %v8529_v53  ;;  %6830 = vmatprep.mubr.msk.bf16.mxu1 %vm472_vm0, %v8481_v43 }
  0x62   : > { %602 = vmatmul.mubr.bf16.gmra.mrb[24].mxu0 %v8539_v54  ;;  %1009 = vmatmul.mubr.bf16.gmra.mrb[24].mxu1 %v8504_v48 }
  0x63   : > { %6774 = vmatprep.mubr.msk.bf16.mxu0 %vm472_vm0, %v8542_v55  ;;  %6831 = vmatprep.mubr.msk.bf16.mxu1 %vm472_vm0, %v8508_v49 }
  0x6a   : > { %610 = vmatmul.mubr.bf16.gmra.mrb[28].mxu0 %v8551_v56  ;;  %1017 = vmatmul.mubr.bf16.gmra.mrb[28].mxu1 %v8525_v52 }
  0x6b   : > { %6775 = vmatprep.mubr.msk.bf16.mxu0 %vm472_vm0, %v8554_v57  ;;  %6832 = vmatprep.mubr.msk.bf16.mxu1 %vm472_vm0, %v8529_v53 }
  0x72   : > { %618 = vmatmul.mubr.bf16.gmra.mrb[32].mxu0 %v8563_v58  ;;  %1025 = vmatmul.mubr.bf16.gmra.mrb[32].mxu1 %v8539_v54 }
  0x73   : > { %6776 = vmatprep.mubr.msk.bf16.mxu0 %vm472_vm0, %v8566_v59  ;;  %6833 = vmatprep.mubr.msk.bf16.mxu1 %vm472_vm0, %v8542_v55 }
  0x7a   : > { %626 = vmatmul.mubr.bf16.gmra.mrb[36].mxu0 %v8575_v60  ;;  %1033 = vmatmul.mubr.bf16.gmra.mrb[36].mxu1 %v8551_v56 }
  0x7b   : > { %6777 = vmatprep.mubr.msk.bf16.mxu0 %vm472_vm0, %v8578_v61  ;;  %6834 = vmatprep.mubr.msk.bf16.mxu1 %vm472_vm0, %v8554_v57 }
  0x82   : > { %634 = vmatmul.mubr.bf16.gmra.mrb[40].mxu0 %v8587_v62  ;;  %1041 = vmatmul.mubr.bf16.gmra.mrb[40].mxu1 %v8563_v58 }
  0x83   : > { %6778 = vmatprep.mubr.msk.bf16.mxu0 %vm472_vm0, %v8590_v63  ;;  %6835 = vmatprep.mubr.msk.bf16.mxu1 %vm472_vm0, %v8566_v59 }
  0x8a   : > { %642 = vmatmul.mubr.bf16.gmra.mrb[44].mxu0 %v8599_v0  ;;  %1049 = vmatmul.mubr.bf16.gmra.mrb[44].mxu1 %v8575_v60 }
  0x8b   : > { %6779 = vmatprep.mubr.msk.bf16.mxu0 %vm472_vm0, %v8602_v2  ;;  %6836 = vmatprep.mubr.msk.bf16.mxu1 %vm472_vm0, %v8578_v61 }
  0x92   : > { %650 = vmatmul.mubr.bf16.gmra.mrb[48].mxu0 %v8611_v3  ;;  %1057 = vmatmul.mubr.bf16.gmra.mrb[48].mxu1 %v8587_v62 }
  0x93   : > { %6780 = vmatprep.mubr.msk.bf16.mxu0 %vm472_vm0, %v8614_v4  ;;  %6837 = vmatprep.mubr.msk.bf16.mxu1 %vm472_vm0, %v8590_v63 }
  0x9a   : > { %658 = vmatmul.mubr.bf16.gmra.mrb[52].mxu0 %v8623_v5  ;;  %1065 = vmatmul.mubr.bf16.gmra.mrb[52].mxu1 %v8599_v0 }
  0x9b   : > { %6781 = vmatprep.mubr.msk.bf16.mxu0 %vm472_vm0, %v8626_v6  ;;  %6838 = vmatprep.mubr.msk.bf16.mxu1 %vm472_vm0, %v8602_v2 }
  0xa2   : > { %666 = vmatmul.mubr.bf16.gmra.mrb[56].mxu0 %v8635_v7  ;;  %1073 = vmatmul.mubr.bf16.gmra.mrb[56].mxu1 %v8611_v3 }
  0xa3   : > { %6782 = vmatprep.mubr.msk.bf16.mxu0 %vm472_vm0, %v8638_v8  ;;  %6839 = vmatprep.mubr.msk.bf16.mxu1 %vm472_vm0, %v8614_v4 }
  0xaa   : > { %674 = vmatmul.mubr.bf16.gmra.mrb[60].mxu0 %v8647_v9  ;;  %1081 = vmatmul.mubr.bf16.gmra.mrb[60].mxu1 %v8623_v5 }
  0xab   : > { %6931 = vmatprep.mubr.msk.bf16.mxu0 %vm472_vm0, %v8430_v31  ;;  %7071 = vmatprep.mubr.msk.bf16.mxu1 %vm472_vm0, %v8650_v10  ;;  %v8066_v31 = vld [vmem:[%s10412_s1 + $0x30] sm:$0xff]  }
  0xb2   : > { %1420 = vmatmul.mubr.bf16.vlgmr.msra.gmra.mrb[64].mxu0 %v8451_v36  ;;  %2064 = vmatmul.mubr.bf16.vlgmr.msra.gmra.mrb[64].mxu1 %v8659_v11  ;;  %v8772_v36 = vld [vmem:[%s8367_s10 + $0x174] ss:$8 sps:$4 sm:$0xff]  }
  0xb3   : > { %2439 = vmatpush1.bf16.msra.mxu0 %v8022_v12  ;;  %2897 = vmatpush1.bf16.msra.mxu1 %v8023_v13  ;;  %v8881_v13 = vld [vmem:[%s8367_s10 + $0x1e0] ss:$8 sps:$4 sm:$0xff]  }
  0xb4   : > { %6932 = vmatprep.mubr.msk.bf16.mxu0 %vm472_vm0, %v8455_v37  ;;  %7072 = vmatprep.mubr.msk.bf16.mxu1 %vm472_vm0, %v8668_v14  ;;  %v8080_v37 = vld [vmem:[%s10412_s1 + $0x40] sm:$0xff]  }
  0xb5   : > { %2440 = vmatprep.subr.bf16.mxu0 %v10415_v1  ;;  %2898 = vmatprep.subr.bf16.mxu1 %v10415_v1 }
  0xb7   : > { %2441 = vmatpush1.bf16.msra.mxu0 %v8030_v15  ;;  %2899 = vmatpush1.bf16.msra.mxu1 %v8031_v16  ;;  %v8884_v16 = vld [vmem:[%s8367_s10 + $0x1f4] ss:$8 sps:$4 sm:$0xff]  }
  0xb8   : > { %2442 = vmatprep.subr.bf16.mxu0 %v10415_v1  ;;  %2900 = vmatprep.subr.bf16.mxu1 %v10415_v1 }
  0xba   : > { %1428 = vmatmul.mubr.bf16.gmra.mrb[68].mxu0 %v8477_v42  ;;  %2072 = vmatmul.mubr.bf16.gmra.mrb[68].mxu1 %v8685_v17  ;;  %v8806_v42 = vld [vmem:[%s8367_s10 + $0x194] ss:$8 sps:$4 sm:$0xff]  }
  0xbb   : > { %6933 = vmatprep.mubr.msk.bf16.mxu0 %vm472_vm0, %v8481_v43  ;;  %7073 = vmatprep.mubr.msk.bf16.mxu1 %vm472_vm0, %v8688_v18  ;;  %v8815_v43 = vld [vmem:[%s8367_s10 + $0x190] ss:$8 sps:$4 sm:$0xff]  }
  0xbc   : > { %2443 = vmatpush1.bf16.msra.mxu0 %v8035_v19  ;;  %2901 = vmatpush1.bf16.msra.mxu1 %v8036_v20 }
  0xbd   : > { %2444 = vmatprep.subr.bf16.mxu0 %v10415_v1  ;;  %2902 = vmatprep.subr.bf16.mxu1 %v10415_v1 }
  0xc0   : > { %2445 = vmatpush1.bf16.msra.mxu0 %v8043_v21  ;;  %2903 = vmatpush1.bf16.msra.mxu1 %v8044_v22 }
  0xc1   : > { %2446 = vmatprep.subr.bf16.mxu0 %v10415_v1  ;;  %2904 = vmatprep.subr.bf16.mxu1 %v10415_v1 }
  0xc2   : > { %1436 = vmatmul.mubr.bf16.gmra.mrb[72].mxu0 %v8504_v48  ;;  %2080 = vmatmul.mubr.bf16.gmra.mrb[72].mxu1 %v8713_v23  ;;  %v8842_v48 = vld [vmem:[%s8367_s10 + $0x1c4] ss:$8 sps:$4 sm:$0xff]  }
  0xc3   : > { %6934 = vmatprep.mubr.msk.bf16.mxu0 %vm472_vm0, %v8508_v49  ;;  %7074 = vmatprep.mubr.msk.bf16.mxu1 %vm472_vm0, %v8716_v24  ;;  %v8851_v49 = vld [vmem:[%s8367_s10 + $0x1c0] ss:$8 sps:$4 sm:$0xff]  }
  0xc4   : > { %2447 = vmatpush1.bf16.msra.mxu0 %v8051_v25  ;;  %2905 = vmatpush1.bf16.msra.mxu1 %v8052_v26 }
  0xc5   : > { %2448 = vmatprep.subr.bf16.mxu0 %v10415_v1  ;;  %2906 = vmatprep.subr.bf16.mxu1 %v10415_v1 }
  0xc8   : > { %2449 = vmatpush1.bf16.msra.mxu0 %v8059_v27  ;;  %2907 = vmatpush1.bf16.msra.mxu1 %v8060_v28 }
  0xc9   : > { %2450 = vmatprep.subr.bf16.mxu0 %v10415_v1  ;;  %2908 = vmatprep.subr.bf16.mxu1 %v10415_v1 }
  0xca   : > { %1444 = vmatmul.mubr.bf16.gmra.mrb[76].mxu0 %v8525_v52  ;;  %2088 = vmatmul.mubr.bf16.gmra.mrb[76].mxu1 %v8741_v29 }
  0xcb   : > { %6935 = vmatprep.mubr.msk.bf16.mxu0 %vm472_vm0, %v8529_v53  ;;  %7075 = vmatprep.mubr.msk.bf16.mxu1 %vm472_vm0, %v8744_v30 }
  0xcc   : > { %2451 = vmatpush1.bf16.msra.mxu0 %v8066_v31  ;;  %2909 = vmatpush1.bf16.msra.mxu1 %v8067_v32  ;;  %v8897_v31 = vld [vmem:[%s8367_s10 + $0x1f0] ss:$8 sps:$4 sm:$0xff]  }
  0xcd   : > { %2452 = vmatprep.subr.bf16.mxu0 %v10415_v1  ;;  %2910 = vmatprep.subr.bf16.mxu1 %v10415_v1 }
  0xd0   : > { %2453 = vmatpush1.bf16.msra.mxu0 %v8072_v33  ;;  %2911 = vmatpush1.bf16.msra.mxu1 %v8073_v34  ;;  %v8900_v34 = vld [vmem:[%s8367_s10 + $0x204] ss:$8 sps:$4 sm:$0xff]  }
  0xd1   : > { %2454 = vmatprep.subr.bf16.mxu0 %v10415_v1  ;;  %2912 = vmatprep.subr.bf16.mxu1 %v10415_v1 }
  0xd2   : > { %1452 = vmatmul.mubr.bf16.gmra.mrb[80].mxu0 %v8539_v54  ;;  %2096 = vmatmul.mubr.bf16.gmra.mrb[80].mxu1 %v8769_v35 }
  0xd3   : > { %6936 = vmatprep.mubr.msk.bf16.mxu0 %vm472_vm0, %v8542_v55  ;;  %7076 = vmatprep.mubr.msk.bf16.mxu1 %vm472_vm0, %v8772_v36 }
  0xd4   : > { %2455 = vmatpush1.bf16.msra.mxu0 %v8080_v37  ;;  %2913 = vmatpush1.bf16.msra.mxu1 %v8081_v38 }
  0xd5   : > { %3541 = vmatprep.subr.bf16.mxu0 %v10415_v1  ;;  %3948 = vmatprep.subr.bf16.mxu1 %v10415_v1 }
  0xda   : > { %1460 = vmatmul.mubr.bf16.gmra.mrb[84].mxu0 %v8551_v56  ;;  %2104 = vmatmul.mubr.bf16.gmra.mrb[84].mxu1 %v8791_v39 }
  0xdb   : > { %6937 = vmatprep.mubr.msk.bf16.mxu0 %vm472_vm0, %v8554_v57  ;;  %7077 = vmatprep.mubr.msk.bf16.mxu1 %vm472_vm0, %v8794_v40  ;;  %v8865_v57 = vld [vmem:[%s8367_s10 + $0x1d0] ss:$8 sps:$4 sm:$0xff]  }
  0xe2   : > { %1468 = vmatmul.mubr.bf16.gmra.mrb[88].mxu0 %v8563_v58  ;;  %2112 = vmatmul.mubr.bf16.gmra.mrb[88].mxu1 %v8803_v41 }
  0xe3   : > { %6938 = vmatprep.mubr.msk.bf16.mxu0 %vm472_vm0, %v8566_v59  ;;  %7078 = vmatprep.mubr.msk.bf16.mxu1 %vm472_vm0, %v8806_v42 }
  0xea   : > { %1476 = vmatmul.mubr.bf16.gmra.mrb[92].mxu0 %v8575_v60  ;;  %2120 = vmatmul.mubr.bf16.gmra.mrb[92].mxu1 %v8815_v43  ;;  %v8868_v60 = vld [vmem:[%s8367_s10 + $0x1e4] ss:$8 sps:$4 sm:$0xff]  }
  0xeb   : > { %6939 = vmatprep.mubr.msk.bf16.mxu0 %vm472_vm0, %v8578_v61  ;;  %7079 = vmatprep.mubr.msk.bf16.mxu1 %vm472_vm0, %v8818_v44 }
  0xf2   : > { %1484 = vmatmul.mubr.bf16.gmra.mrb[96].mxu0 %v8587_v62  ;;  %2128 = vmatmul.mubr.bf16.gmra.mrb[96].mxu1 %v8827_v45 }
  0xf3   : > { %6940 = vmatprep.mubr.msk.bf16.mxu0 %vm472_vm0, %v8590_v63  ;;  %7080 = vmatprep.mubr.msk.bf16.mxu1 %vm472_vm0, %v8830_v46 }
  0xfa   : > { %1492 = vmatmul.mubr.bf16.gmra.mrb[100].mxu0 %v8599_v0  ;;  %2136 = vmatmul.mubr.bf16.gmra.mrb[100].mxu1 %v8839_v47 }
  0xfb   : > { %6941 = vmatprep.mubr.msk.bf16.mxu0 %vm472_vm0, %v8602_v2  ;;  %7081 = vmatprep.mubr.msk.bf16.mxu1 %vm472_vm0, %v8842_v48 }
 0x102   : > { %1500 = vmatmul.mubr.bf16.gmra.mrb[104].mxu0 %v8611_v3  ;;  %2144 = vmatmul.mubr.bf16.gmra.mrb[104].mxu1 %v8851_v49 }
 0x103   : > { %6942 = vmatprep.mubr.msk.bf16.mxu0 %vm472_vm0, %v8614_v4  ;;  %7082 = vmatprep.mubr.msk.bf16.mxu1 %vm472_vm0, %v8854_v50 }
 0x105   : > { %v555_v51 = vpop.f32.mrb[0].mxu0  ;;  %v962_v52 = vpop.f32.mrb[0].mxu1 }
 0x106   : > { %v557_v53 = vpop.f32.mrb[1].mxu0  ;;  %v8862_v54 = vadd.f32 %v962_v52, %v555_v51  ;;  %v964_v55 = vpop.f32.mrb[1].mxu1 }
 0x107   : > { %v558_v56 = vpop.f32.mrb[2].mxu0  ;;  %v965_v58 = vpop.f32.mrb[2].mxu1 }
 0x108   : > { %v560_v59 = vpop.f32.mrb[3].mxu0  ;;  %v8870_v61 = vadd.f32 %v965_v58, %v558_v56  ;;  %v967_v62 = vpop.f32.mrb[3].mxu1 }
 0x109   : > { %v8913_v59 = vld [vmem:[%s8367_s10 + $0x200] ss:$8 sps:$4 sm:$0xff]  }
 0x10a   : > { %1508 = vmatmul.mubr.bf16.gmra.mrb[108].mxu0 %v8623_v5  ;;  %2152 = vmatmul.mubr.bf16.gmra.mrb[108].mxu1 %v8865_v57 }
 0x10b   : > { %6943 = vmatprep.mubr.msk.bf16.mxu0 %vm472_vm0, %v8626_v6  ;;  %7083 = vmatprep.mubr.msk.bf16.mxu1 %vm472_vm0, %v8868_v60 }
 0x10d   : > { %v563_v63 = vpop.f32.mrb[4].mxu0  ;;  %v970_v0 = vpop.f32.mrb[4].mxu1 }
 0x10e   : > { %v565_v2 = vpop.f32.mrb[5].mxu0  ;;  %v8878_v3 = vadd.f32 %v970_v0, %v563_v63  ;;  %v972_v4 = vpop.f32.mrb[5].mxu1  ;;  %v8916_v0 = vld [vmem:[%s8367_s10 + $0x214] ss:$8 sps:$4 sm:$0xff]  }
 0x10f   : > { %v566_v12 = vpop.f32.mrb[6].mxu0  ;;  %v973_v15 = vpop.f32.mrb[6].mxu1 }
 0x110   : > { %v568_v5 = vpop.f32.mrb[7].mxu0  ;;  %v8886_v19 = vadd.f32 %v973_v15, %v566_v12  ;;  %v975_v20 = vpop.f32.mrb[7].mxu1 }
 0x112   : > { %1516 = vmatmul.mubr.bf16.gmra.mrb[112].mxu0 %v8635_v7  ;;  %2160 = vmatmul.mubr.bf16.gmra.mrb[112].mxu1 %v8881_v13 }
 0x113   : > { %6944 = vmatprep.mubr.msk.bf16.mxu0 %vm472_vm0, %v8638_v8  ;;  %7084 = vmatprep.mubr.msk.bf16.mxu1 %vm472_vm0, %v8884_v16 }
 0x115   : > { %v571_v21 = vpop.f32.mrb[8].mxu0  ;;  %v978_v22 = vpop.f32.mrb[8].mxu1 }
 0x116   : > { %v573_v25 = vpop.f32.mrb[9].mxu0  ;;  %v8894_v26 = vadd.f32 %v978_v22, %v571_v21  ;;  %v980_v27 = vpop.f32.mrb[9].mxu1 }
 0x117   : > { %v574_v28 = vpop.f32.mrb[10].mxu0  ;;  %v981_v32 = vpop.f32.mrb[10].mxu1  ;;  %v8929_v25 = vld [vmem:[%s8367_s10 + $0x210] ss:$8 sps:$4 sm:$0xff]  }
 0x118   : > { %v576_v33 = vpop.f32.mrb[11].mxu0  ;;  %v8902_v37 = vadd.f32 %v981_v32, %v574_v28  ;;  %v983_v38 = vpop.f32.mrb[11].mxu1 }
 0x11a   : > { %1524 = vmatmul.mubr.bf16.gmra.mrb[116].mxu0 %v8647_v9  ;;  %2168 = vmatmul.mubr.bf16.gmra.mrb[116].mxu1 %v8897_v31 }
 0x11b   : > { %6945 = vmatprep.mubr.msk.bf16.mxu0 %vm472_vm0, %v8650_v10  ;;  %7085 = vmatprep.mubr.msk.bf16.mxu1 %vm472_vm0, %v8900_v34 }
 0x11d   : > { %v579_v51 = vpop.f32.mrb[12].mxu0  ;;  %v986_v52 = vpop.f32.mrb[12].mxu1 }
 0x11e   : > { %v581_v53 = vpop.f32.mrb[13].mxu0  ;;  %v8910_v55 = vadd.f32 %v986_v52, %v579_v51  ;;  %v988_v56 = vpop.f32.mrb[13].mxu1 }
 0x11f   : > { %v582_v58 = vpop.f32.mrb[14].mxu0  ;;  %v989_v62 = vpop.f32.mrb[14].mxu1 }
 0x120   : > { %v584_v63 = vpop.f32.mrb[15].mxu0  ;;  %v8918_v2 = vadd.f32 %v989_v62, %v582_v58  ;;  %v991_v4 = vpop.f32.mrb[15].mxu1  ;;  %v8085_v62 = vld [vmem:[%s10412_s1 + $0x48] sm:$0xff]  }
 0x122   : > { %1532 = vmatmul.mubr.bf16.gmra.mrb[120].mxu0 %v8659_v11  ;;  %2176 = vmatmul.mubr.bf16.gmra.mrb[120].mxu1 %v8913_v59 }
 0x123   : > { %6946 = vmatprep.mubr.msk.bf16.mxu0 %vm472_vm0, %v8668_v14  ;;  %7086 = vmatprep.mubr.msk.bf16.mxu1 %vm472_vm0, %v8916_v0 }
 0x125   : > { %v587_v12 = vpop.f32.mrb[16].mxu0  ;;  %v994_v15 = vpop.f32.mrb[16].mxu1 }
 0x126   : > { %v589_v5 = vpop.f32.mrb[17].mxu0  ;;  %v8926_v20 = vadd.f32 %v994_v15, %v587_v12  ;;  %v996_v21 = vpop.f32.mrb[17].mxu1 }
 0x127   : > { %v590_v22 = vpop.f32.mrb[18].mxu0  ;;  %v997_v27 = vpop.f32.mrb[18].mxu1  ;;  %v8087_v5 = vld [vmem:[%s10412_s1 + $0x50] sm:$0xff]   ;;  %v8088_v21 = vld [vmem:[%s10412_s1 + $0x8] sm:$0xff]  }
 0x128   : > { %v592_v28 = vpop.f32.mrb[19].mxu0  ;;  %v8931_v32 = vadd.f32 %v997_v27, %v590_v22  ;;  %v999_v33 = vpop.f32.mrb[19].mxu1 }
 0x12a   : > { %1540 = vmatmul.mubr.bf16.gmra.mrb[124].mxu0 %v8685_v17  ;;  %2184 = vmatmul.mubr.bf16.gmra.mrb[124].mxu1 %v8929_v25 }
 0x12b   : > { %7128 = vmatprep.mubr.msk.bf16.mxu0 %vm472_vm0, %v8626_v6  ;;  %7235 = vmatprep.mubr.msk.bf16.mxu1 %vm472_vm0, %v8688_v18  ;;  %v8086_v6 = vld [vmem:[%s10412_s1] sm:$0xff]  }
 0x12d   : > { %v595_v38 = vpop.f32.mrb[20].mxu0  ;;  %v1002_v51 = vpop.f32.mrb[20].mxu1 }
 0x12e   : > { %v597_v52 = vpop.f32.mrb[21].mxu0  ;;  %v8939_v53 = vadd.f32 %v1002_v51, %v595_v38  ;;  %v1004_v56 = vpop.f32.mrb[21].mxu1 }
 0x12f   : > { %v598_v58 = vpop.f32.mrb[22].mxu0  ;;  %v1005_v63 = vpop.f32.mrb[22].mxu1  ;;  %v8089_v52 = vld [vmem:[%s10412_s1 + $0x58] sm:$0xff]  }
 0x130   : > { %v600_v4 = vpop.f32.mrb[23].mxu0  ;;  %v8947_v12 = vadd.f32 %v1005_v63, %v598_v58  ;;  %v1007_v15 = vpop.f32.mrb[23].mxu1  ;;  %v8091_v63 = vld [vmem:[%s10412_s1 + $0x60] sm:$0xff]  }
 0x132   : > { %2471 = vmatmul.mubr.bf16.vlgmr.msra.gmra.mrb[128].mxu0 %v8635_v7  ;;  %2929 = vmatmul.mubr.bf16.vlgmr.msra.gmra.mrb[128].mxu1 %v8713_v23 }
 0x133   : > { %3542 = vmatpush1.bf16.msra.mxu0 %v8085_v62  ;;  %3949 = vmatpush1.bf16.msra.mxu1 %v8086_v6  ;;  %v8090_v62 = vld [vmem:[%s10412_s1 + $0x10] sm:$0xff]  }
 0x134   : > { %7129 = vmatprep.mubr.msk.bf16.mxu0 %vm472_vm0, %v8638_v8  ;;  %7236 = vmatprep.mubr.msk.bf16.mxu1 %vm472_vm0, %v8716_v24 }
 0x135   : > { %v603_v22 = vpop.f32.mrb[24].mxu0  ;;  %3543 = vmatprep.subr.bf16.mxu0 %v10415_v1  ;;  %v1010_v7 = vpop.f32.mrb[24].mxu1  ;;  %3950 = vmatprep.subr.bf16.mxu1 %v10415_v1 }
 0x136   : > { %v605_v27 = vpop.f32.mrb[25].mxu0  ;;  %v8963_v28 = vadd.f32 %v1010_v7, %v603_v22  ;;  %v1012_v33 = vpop.f32.mrb[25].mxu1 }
 0x137   : > { %v606_v38 = vpop.f32.mrb[26].mxu0  ;;  %3544 = vmatpush1.bf16.msra.mxu0 %v8087_v5  ;;  %v1013_v8 = vpop.f32.mrb[26].mxu1  ;;  %3951 = vmatpush1.bf16.msra.mxu1 %v8088_v21  ;;  %v8093_v27 = vld [vmem:[%s10412_s1 + $0x68] sm:$0xff]  }
 0x138   : > { %v608_v51 = vpop.f32.mrb[27].mxu0  ;;  %3545 = vmatprep.subr.bf16.mxu0 %v10415_v1  ;;  %v8969_v56 = vadd.f32 %v1013_v8, %v606_v38  ;;  %v1015_v58 = vpop.f32.mrb[27].mxu1  ;;  %3952 = vmatprep.subr.bf16.mxu1 %v10415_v1  ;;  %v8094_v8 = vld [vmem:[%s10412_s1 + $0x20] sm:$0xff]  }
 0x139   : > { %v8095_v51 = vld [vmem:[%s10412_s1 + $0x70] sm:$0xff]  }
 0x13a   : > { %2479 = vmatmul.mubr.bf16.gmra.mrb[132].mxu0 %v8647_v9  ;;  %2937 = vmatmul.mubr.bf16.gmra.mrb[132].mxu1 %v8741_v29  ;;  %v8092_v9 = vld [vmem:[%s10412_s1 + $0x18] sm:$0xff]  }
 0x13b   : > { %7130 = vmatprep.mubr.msk.bf16.mxu0 %vm472_vm0, %v8650_v10  ;;  %7237 = vmatprep.mubr.msk.bf16.mxu1 %vm472_vm0, %v8744_v30 }
 0x13c   : > { %3546 = vmatpush1.bf16.msra.mxu0 %v8089_v52  ;;  %3953 = vmatpush1.bf16.msra.mxu1 %v8090_v62 }
 0x13d   : > { %v611_v4 = vpop.f32.mrb[28].mxu0  ;;  %3547 = vmatprep.subr.bf16.mxu0 %v10415_v1  ;;  %v1018_v6 = vpop.f32.mrb[28].mxu1  ;;  %3954 = vmatprep.subr.bf16.mxu1 %v10415_v1 }
 0x13e   : > { %v613_v15 = vpop.f32.mrb[29].mxu0  ;;  %v8989_v10 = vadd.f32 %v1018_v6, %v611_v4  ;;  %v1020_v5 = vpop.f32.mrb[29].mxu1 }
 0x13f   : > { %v614_v21 = vpop.f32.mrb[30].mxu0  ;;  %v1021_v22 = vpop.f32.mrb[30].mxu1  ;;  %v8097_v15 = vld [vmem:[%s10412_s1 + $0x78] sm:$0xff]  }
 0x140   : > { %v616_v7 = vpop.f32.mrb[31].mxu0  ;;  %3548 = vmatpush1.bf16.msra.mxu0 %v8091_v63  ;;  %v8994_v33 = vadd.f32 %v1021_v22, %v614_v21  ;;  %v1023_v38 = vpop.f32.mrb[31].mxu1  ;;  %3955 = vmatpush1.bf16.msra.mxu1 %v8092_v9  ;;  %v8098_v22 = vld [vmem:[%s10412_s1 + $0x30] sm:$0xff]  }
 0x141   : > { %3549 = vmatprep.subr.bf16.mxu0 %v10415_v1  ;;  %3956 = vmatprep.subr.bf16.mxu1 %v10415_v1  ;;  %v8099_v7 = vld [vmem:[%s10412_s1 + $0x80] sm:$0xff]  }
 0x142   : > { %2487 = vmatmul.mubr.bf16.gmra.mrb[136].mxu0 %v8659_v11  ;;  %2945 = vmatmul.mubr.bf16.gmra.mrb[136].mxu1 %v8769_v35  ;;  %v8096_v11 = vld [vmem:[%s10412_s1 + $0x28] sm:$0xff]  }
 0x143   : > { %7131 = vmatprep.mubr.msk.bf16.mxu0 %vm472_vm0, %v8668_v14  ;;  %7238 = vmatprep.mubr.msk.bf16.mxu1 %vm472_vm0, %v8772_v36 }
 0x144   : > { %3550 = vmatpush1.bf16.msra.mxu0 %v8093_v27  ;;  %3957 = vmatpush1.bf16.msra.mxu1 %v8094_v8 }
 0x145   : > { %v619_v52 = vpop.f32.mrb[32].mxu0  ;;  %3551 = vmatprep.subr.bf16.mxu0 %v10415_v1  ;;  %v1026_v58 = vpop.f32.mrb[32].mxu1  ;;  %3958 = vmatprep.subr.bf16.mxu1 %v10415_v1 }
 0x146   : > { %v621_v62 = vpop.f32.mrb[33].mxu0  ;;  %v9015_v14 = vadd.f32 %v1026_v58, %v619_v52  ;;  %v1028_v63 = vpop.f32.mrb[33].mxu1 }
 0x147   : > { %v622_v4 = vpop.f32.mrb[34].mxu0  ;;  %v1029_v9 = vpop.f32.mrb[34].mxu1  ;;  %v8110_v62 = vld [vmem:[%s10412_s1 + $0x88] sm:$0xff]  }
 0x148   : > { %v624_v6 = vpop.f32.mrb[35].mxu0  ;;  %3552 = vmatpush1.bf16.msra.mxu0 %v8095_v51  ;;  %v9020_v5 = vadd.f32 %v1029_v9, %v622_v4  ;;  %v1031_v21 = vpop.f32.mrb[35].mxu1  ;;  %3959 = vmatpush1.bf16.msra.mxu1 %v8096_v11  ;;  %v8111_v9 = vld [vmem:[%s10412_s1 + $0x40] sm:$0xff]  }
 0x149   : > { %3553 = vmatprep.subr.bf16.mxu0 %v10415_v1  ;;  %3960 = vmatprep.subr.bf16.mxu1 %v10415_v1 }
 0x14a   : > { %2495 = vmatmul.mubr.bf16.gmra.mrb[140].mxu0 %v8685_v17  ;;  %2953 = vmatmul.mubr.bf16.gmra.mrb[140].mxu1 %v8791_v39  ;;  %v8100_v17 = vld [vmem:[%s10412_s1 + $0x38] sm:$0xff]  }
 0x14b   : > { %7132 = vmatprep.mubr.msk.bf16.mxu0 %vm472_vm0, %v8688_v18  ;;  %7239 = vmatprep.mubr.msk.bf16.mxu1 %vm472_vm0, %v8794_v40 }
 0x14c   : > { %3554 = vmatpush1.bf16.msra.mxu0 %v8097_v15  ;;  %3961 = vmatpush1.bf16.msra.mxu1 %v8098_v22 }
 0x14d   : > { %v627_v27 = vpop.f32.mrb[36].mxu0  ;;  %3555 = vmatprep.subr.bf16.mxu0 %v10415_v1  ;;  %v1034_v38 = vpop.f32.mrb[36].mxu1  ;;  %3962 = vmatprep.subr.bf16.mxu1 %v10415_v1 }
 0x14e   : > { %v629_v8 = vpop.f32.mrb[37].mxu0  ;;  %v9041_v18 = vadd.f32 %v1034_v38, %v627_v27  ;;  %v1036_v51 = vpop.f32.mrb[37].mxu1 }
 0x14f   : > { %v630_v52 = vpop.f32.mrb[38].mxu0  ;;  %v1037_v11 = vpop.f32.mrb[38].mxu1 }
 0x150   : > { %v632_v58 = vpop.f32.mrb[39].mxu0  ;;  %3556 = vmatpush1.bf16.msra.mxu0 %v8099_v7  ;;  %v9046_v63 = vadd.f32 %v1037_v11, %v630_v52  ;;  %v1039_v4 = vpop.f32.mrb[39].mxu1  ;;  %3963 = vmatpush1.bf16.msra.mxu1 %v8100_v17 }
 0x151   : > { %3557 = vmatprep.subr.bf16.mxu0 %v10415_v1  ;;  %3964 = vmatprep.subr.bf16.mxu1 %v10415_v1 }
 0x152   : > { %2503 = vmatmul.mubr.bf16.gmra.mrb[144].mxu0 %v8713_v23  ;;  %2961 = vmatmul.mubr.bf16.gmra.mrb[144].mxu1 %v8803_v41 }
 0x153   : > { %7133 = vmatprep.mubr.msk.bf16.mxu0 %vm472_vm0, %v8716_v24  ;;  %7240 = vmatprep.mubr.msk.bf16.mxu1 %vm472_vm0, %v8806_v42 }
 0x154   : > { %3558 = vmatpush1.bf16.msra.mxu0 %v8110_v62  ;;  %3965 = vmatpush1.bf16.msra.mxu1 %v8111_v9 }
 0x155   : > { %v635_v6 = vpop.f32.mrb[40].mxu0  ;;  %4406 = vmatprep.subr.bf16.mxu0 %v10415_v1  ;;  %v1042_v15 = vpop.f32.mrb[40].mxu1  ;;  %5051 = vmatprep.subr.bf16.mxu1 %v10415_v1 }
 0x156   : > { %v637_v21 = vpop.f32.mrb[41].mxu0  ;;  %v9061_v23 = vadd.f32 %v1042_v15, %v635_v6  ;;  %v1044_v22 = vpop.f32.mrb[41].mxu1 }
 0x157   : > { %v638_v7 = vpop.f32.mrb[42].mxu0  ;;  %v1045_v27 = vpop.f32.mrb[42].mxu1 }
 0x158   : > { %v640_v17 = vpop.f32.mrb[43].mxu0  ;;  %v9063_v38 = vadd.f32 %v1045_v27, %v638_v7  ;;  %v1047_v24 = vpop.f32.mrb[43].mxu1 }
 0x15a   : > { %2511 = vmatmul.mubr.bf16.gmra.mrb[148].mxu0 %v8741_v29  ;;  %2969 = vmatmul.mubr.bf16.gmra.mrb[148].mxu1 %v8815_v43 }
 0x15b   : > { %7134 = vmatprep.mubr.msk.bf16.mxu0 %vm472_vm0, %v8744_v30  ;;  %7241 = vmatprep.mubr.msk.bf16.mxu1 %vm472_vm0, %v8818_v44 }
 0x15d   : > { %v643_v8 = vpop.f32.mrb[44].mxu0  ;;  %v1050_v51 = vpop.f32.mrb[44].mxu1 }
 0x15e   : > { %v645_v52 = vpop.f32.mrb[45].mxu0  ;;  %v9071_v11 = vadd.f32 %v1050_v51, %v643_v8  ;;  %v1052_v58 = vpop.f32.mrb[45].mxu1 }
 0x15f   : > { %v646_v62 = vpop.f32.mrb[46].mxu0  ;;  %v1053_v4 = vpop.f32.mrb[46].mxu1 }
 0x160   : > { %v648_v9 = vpop.f32.mrb[47].mxu0  ;;  %v9073_v6 = vadd.f32 %v1053_v4, %v646_v62  ;;  %v1055_v29 = vpop.f32.mrb[47].mxu1 }
 0x162   : > { %2519 = vmatmul.mubr.bf16.gmra.mrb[152].mxu0 %v8769_v35  ;;  %2977 = vmatmul.mubr.bf16.gmra.mrb[152].mxu1 %v8827_v45 }
 0x163   : > { %7135 = vmatprep.mubr.msk.bf16.mxu0 %vm472_vm0, %v8772_v36  ;;  %7242 = vmatprep.mubr.msk.bf16.mxu1 %vm472_vm0, %v8830_v46 }
 0x165   : > { %v651_v30 = vpop.f32.mrb[48].mxu0  ;;  %v1058_v15 = vpop.f32.mrb[48].mxu1 }
 0x166   : > { %v653_v21 = vpop.f32.mrb[49].mxu0  ;;  %v9081_v22 = vadd.f32 %v1058_v15, %v651_v30  ;;  %v1060_v7 = vpop.f32.mrb[49].mxu1 }
 0x167   : > { %v654_v27 = vpop.f32.mrb[50].mxu0  ;;  %v1061_v17 = vpop.f32.mrb[50].mxu1 }
 0x168   : > { %v656_v24 = vpop.f32.mrb[51].mxu0  ;;  %v9083_v8 = vadd.f32 %v1061_v17, %v654_v27  ;;  %v1063_v35 = vpop.f32.mrb[51].mxu1 }
 0x16a   : > { %2527 = vmatmul.mubr.bf16.gmra.mrb[156].mxu0 %v8791_v39  ;;  %2985 = vmatmul.mubr.bf16.gmra.mrb[156].mxu1 %v8839_v47 }
 0x16b   : > { %7136 = vmatprep.mubr.msk.bf16.mxu0 %vm472_vm0, %v8794_v40  ;;  %7243 = vmatprep.mubr.msk.bf16.mxu1 %vm472_vm0, %v8842_v48 }
 0x16d   : > { %v659_v36 = vpop.f32.mrb[52].mxu0  ;;  %v1066_v51 = vpop.f32.mrb[52].mxu1 }
 0x16e   : > { %v661_v52 = vpop.f32.mrb[53].mxu0  ;;  %v9091_v58 = vadd.f32 %v1066_v51, %v659_v36  ;;  %v1068_v62 = vpop.f32.mrb[53].mxu1 }
 0x16f   : > { %v662_v4 = vpop.f32.mrb[54].mxu0  ;;  %v1069_v9 = vpop.f32.mrb[54].mxu1 }
 0x170   : > { %v664_v29 = vpop.f32.mrb[55].mxu0  ;;  %v9093_v30 = vadd.f32 %v1069_v9, %v662_v4  ;;  %v1071_v39 = vpop.f32.mrb[55].mxu1 }
 0x172   : > { %2535 = vmatmul.mubr.bf16.gmra.mrb[160].mxu0 %v8803_v41  ;;  %2993 = vmatmul.mubr.bf16.gmra.mrb[160].mxu1 %v8851_v49 }
 0x173   : > { %7137 = vmatprep.mubr.msk.bf16.mxu0 %vm472_vm0, %v8806_v42  ;;  %7244 = vmatprep.mubr.msk.bf16.mxu1 %vm472_vm0, %v8854_v50 }
 0x175   : > { %v667_v40 = vpop.f32.mrb[56].mxu0  ;;  %v1074_v15 = vpop.f32.mrb[56].mxu1 }
 0x176   : > { %v669_v21 = vpop.f32.mrb[57].mxu0  ;;  %v9101_v7 = vadd.f32 %v1074_v15, %v667_v40  ;;  %v1076_v27 = vpop.f32.mrb[57].mxu1 }
 0x177   : > { %v670_v17 = vpop.f32.mrb[58].mxu0  ;;  %v1077_v24 = vpop.f32.mrb[58].mxu1 }
 0x178   : > { %v672_v35 = vpop.f32.mrb[59].mxu0  ;;  %v9103_v36 = vadd.f32 %v1077_v24, %v670_v17  ;;  %v1079_v41 = vpop.f32.mrb[59].mxu1 }
 0x179   : > { %v8101_v41 = vld [vmem:[%s8367_s10 + $0x1d4] ss:$8 sps:$4 sm:$0xff]  }
 0x17a   : > { %2543 = vmatmul.mubr.bf16.gmra.mrb[164].mxu0 %v8815_v43  ;;  %3001 = vmatmul.mubr.bf16.gmra.mrb[164].mxu1 %v8865_v57 }
 0x17b   : > { %7138 = vmatprep.mubr.msk.bf16.mxu0 %vm472_vm0, %v8818_v44  ;;  %7245 = vmatprep.mubr.msk.bf16.mxu1 %vm472_vm0, %v8868_v60 }
 0x17d   : > { %v675_v42 = vpop.f32.mrb[60].mxu0  ;;  %v1082_v50 = vpop.f32.mrb[60].mxu1 }
 0x17e   : > { %v677_v51 = vpop.f32.mrb[61].mxu0  ;;  %v9111_v52 = vadd.f32 %v1082_v50, %v675_v42  ;;  %v1084_v62 = vpop.f32.mrb[61].mxu1 }
 0x17f   : > { %v678_v4 = vpop.f32.mrb[62].mxu0  ;;  %v1085_v9 = vpop.f32.mrb[62].mxu1  ;;  %v8103_v62 = vld [vmem:[%s8367_s10 + $0x1d0] ss:$8 sps:$4 sm:$0xff]  }
 0x180   : > { %v680_v29 = vpop.f32.mrb[63].mxu0  ;;  %v9113_v39 = vadd.f32 %v1085_v9, %v678_v4  ;;  %v1087_v43 = vpop.f32.mrb[63].mxu1 }
 0x181   : > { %v8104_v29 = vld [vmem:[%s8367_s10 + $0x1e4] ss:$8 sps:$4 sm:$0xff]  }
 0x182   : > { %2551 = vmatmul.mubr.bf16.gmra.mrb[168].mxu0 %v8827_v45  ;;  %3009 = vmatmul.mubr.bf16.gmra.mrb[168].mxu1 %v8881_v13 }
 0x183   : > { %7139 = vmatprep.mubr.msk.bf16.mxu0 %vm472_vm0, %v8830_v46  ;;  %7246 = vmatprep.mubr.msk.bf16.mxu1 %vm472_vm0, %v8884_v16 }
 0x185   : > { %v1421_v44 = vpop.f32.mrb[64].mxu0  ;;  %v9122_v60 = vpop.f32.mrb[64].mxu1 }
 0x186   : > { %v1548_v57 = vadd.f32 %v1421_v44, %v8862_v54  ;;  %v1423_v40 = vpop.f32.mrb[65].mxu0  ;;  %v2067_v15 = vpop.f32.mrb[65].mxu1 }
 0x187   : > { %v1424_v21 = vpop.f32.mrb[66].mxu0  ;;  %v9125_v45 = vpop.f32.mrb[66].mxu1  ;;  %v9162_v15 = vld [vmem:[%s8367_s10 + $0x224] ss:$8 sps:$4 sm:$0xff]  }
 0x188   : > { %v1549_v27 = vadd.f32 %v1424_v21, %v8870_v61  ;;  %v1426_v13 = vpop.f32.mrb[67].mxu0  ;;  %v2070_v17 = vpop.f32.mrb[67].mxu1 }
 0x18a   : > { %2559 = vmatmul.mubr.bf16.gmra.mrb[172].mxu0 %v8839_v47  ;;  %3017 = vmatmul.mubr.bf16.gmra.mrb[172].mxu1 %v8897_v31 }
 0x18b   : > { %7140 = vmatprep.mubr.msk.bf16.mxu0 %vm472_vm0, %v8842_v48  ;;  %7247 = vmatprep.mubr.msk.bf16.mxu1 %vm472_vm0, %v8900_v34 }
 0x18d   : > { %v1429_v46 = vpop.f32.mrb[68].mxu0  ;;  %v9134_v16 = vpop.f32.mrb[68].mxu1 }
 0x18e   : > { %v1550_v54 = vadd.f32 %v1429_v46, %v8878_v3  ;;  %v1431_v61 = vpop.f32.mrb[69].mxu0  ;;  %v2075_v24 = vpop.f32.mrb[69].mxu1  ;;  %v9144_v3 = vld [vmem:[%s10413_s2] ss:$0 sm:$0xff] }
 0x18f   : > { %v1432_v35 = vpop.f32.mrb[70].mxu0  ;;  %v9138_v42 = vpop.f32.mrb[70].mxu1  ;;  %v1587_v34 = vadd.f32 %v9144_v3, %v1548_v57 }
 0x190   : > { %v1551_v47 = vadd.f32 %v1432_v35, %v8886_v19  ;;  %v1434_v31 = vpop.f32.mrb[71].mxu0  ;;  %v2078_v48 = vpop.f32.mrb[71].mxu1  ;;  %v1589_v61 = vadd.f32 %v9144_v3, %v1550_v54 }
 0x192   : > { %2567 = vmatmul.mubr.bf16.gmra.mrb[176].mxu0 %v8851_v49  ;;  %3025 = vmatmul.mubr.bf16.gmra.mrb[176].mxu1 %v8913_v59  ;;  %v1588_v59 = vadd.f32 %v9144_v3, %v1549_v27 }
 0x193   : > { %7141 = vmatprep.mubr.msk.bf16.mxu0 %vm472_vm0, %v8101_v41  ;;  %7248 = vmatprep.mubr.msk.bf16.mxu1 %vm472_vm0, %v8916_v0 }
 0x194   : > { %v1620_v27 = vmax.f32 %v1588_v59, 0.0  ;;  %v1621_v59 = vmax.f32 %v1589_v61, 0.0 }
 0x195   : > { %v1437_v19 = vpop.f32.mrb[72].mxu0  ;;  %v9152_v51 = vpop.f32.mrb[72].mxu1 }
 0x196   : > { %v1552_v50 = vadd.f32 %v1437_v19, %v8894_v26  ;;  %v1439_v49 = vpop.f32.mrb[73].mxu0  ;;  %v2083_v4 = vpop.f32.mrb[73].mxu1  ;;  %v1619_v26 = vmax.f32 %v1587_v34, 0.0  ;;  %v9175_v34 = vld [vmem:[%s8367_s10 + $0x220] ss:$8 sps:$4 sm:$0xff]  }
 0x197   : > { %v1440_v9 = vpop.f32.mrb[74].mxu0  ;;  %v9159_v40 = vpop.f32.mrb[74].mxu1  ;;  %v1590_v49 = vadd.f32 %v9144_v3, %v1551_v47 }
 0x198   : > { %v1591_v43 = vadd.f32 %v9144_v3, %v1552_v50  ;;  %v1553_v44 = vadd.f32 %v1440_v9, %v8902_v37  ;;  %v1442_v0 = vpop.f32.mrb[75].mxu0  ;;  %v2086_v57 = vpop.f32.mrb[75].mxu1  ;;  %v8112_v50 = vld [vmem:[%s8367_s10 + $0x1f4] ss:$8 sps:$4 sm:$0xff]  }
 0x199   : > { %v1622_v47 = vmax.f32 %v1590_v49, 0.0 }
 0x19a   : > { %v1623_v21 = vmax.f32 %v1591_v43, 0.0  ;;  %v1592_v13 = vadd.f32 %v9144_v3, %v1553_v44  ;;  %2575 = vmatmul.mubr.bf16.gmra.mrb[180].mxu0 %v8103_v62  ;;  %3033 = vmatmul.mubr.bf16.gmra.mrb[180].mxu1 %v8929_v25  ;;  %v8108_v25 = vld [vmem:[%s8367_s10 + $0x1e0] ss:$8 sps:$4 sm:$0xff]  }
 0x19b   : > { %7142 = vmatprep.mubr.msk.bf16.mxu0 %vm472_vm0, %v8104_v29  ;;  %7249 = vmatprep.mubr.msk.bf16.mxu1 %vm472_vm0, %v9162_v15  ;;  %v9184_v29 = vld [vmem:[%s8367_s10 + $0x234] ss:$8 sps:$4 sm:$0xff]  }
 0x19c   : > { %v6222_v37 = vmax.f32 %v1619_v26, %v1623_v21  ;;  %v1624_v17 = vmax.f32 %v1592_v13, 0.0 }
 0x19d   : > { %v1445_v46 = vpop.f32.mrb[76].mxu0  ;;  %v9171_v41 = vpop.f32.mrb[76].mxu1 }
 0x19e   : > { %v6223_v24 = vmax.f32 %v1620_v27, %v1624_v17  ;;  %v1554_v35 = vadd.f32 %v1445_v46, %v8910_v55  ;;  %v1447_v31 = vpop.f32.mrb[77].mxu0  ;;  %v2091_v48 = vpop.f32.mrb[77].mxu1  ;;  %v8116_v17 = vld [vmem:[%s8367_s10 + $0x1f0] ss:$8 sps:$4 sm:$0xff]  }
 0x19f   : > { %v1448_v19 = vpop.f32.mrb[78].mxu0  ;;  %v9181_v9 = vpop.f32.mrb[78].mxu1 }
 0x1a0   : > { %v1593_v62 = vadd.f32 %v9144_v3, %v1554_v35  ;;  %v1555_v4 = vadd.f32 %v1448_v19, %v8918_v2  ;;  %v1450_v54 = vpop.f32.mrb[79].mxu0  ;;  %v2094_v55 = vpop.f32.mrb[79].mxu1  ;;  %v9197_v35 = vld [vmem:[%s8367_s10 + $0x230] ss:$8 sps:$4 sm:$0xff]  }
 0x1a2   : > { %v1625_v43 = vmax.f32 %v1593_v62, 0.0  ;;  %v1594_v44 = vadd.f32 %v9144_v3, %v1555_v4  ;;  %2583 = vmatmul.mubr.bf16.gmra.mrb[184].mxu0 %v8108_v25  ;;  %3041 = vmatmul.mubr.bf16.gmra.mrb[184].mxu1 %v9175_v34 }
 0x1a3   : > { %7143 = vmatprep.mubr.msk.bf16.mxu0 %vm472_vm0, %v8112_v50  ;;  %7250 = vmatprep.mubr.msk.bf16.mxu1 %vm472_vm0, %v9184_v29  ;;  %v8120_v50 = vld [vmem:[%s8367_s10 + $0x204] ss:$8 sps:$4 sm:$0xff]  }
 0x1a4   : > { %v6224_v2 = vmax.f32 %v1621_v59, %v1625_v43  ;;  %v1626_v0 = vmax.f32 %v1594_v44, 0.0 }
 0x1a5   : > { %v1453_v57 = vpop.f32.mrb[80].mxu0  ;;  %v9192_v13 = vpop.f32.mrb[80].mxu1 }
 0x1a6   : > { %v6225_v26 = vmax.f32 %v1622_v47, %v1626_v0  ;;  %v1556_v21 = vadd.f32 %v1453_v57, %v8926_v20  ;;  %v1455_v27 = vpop.f32.mrb[81].mxu0  ;;  %v2099_v46 = vpop.f32.mrb[81].mxu1  ;;  %v8118_v57 = vld [vmem:[%s8367_s10 + $0x200] ss:$8 sps:$4 sm:$0xff]  }
 0x1a7   : > { %v1456_v61 = vpop.f32.mrb[82].mxu0  ;;  %v9203_v48 = vpop.f32.mrb[82].mxu1 }
 0x1a8   : > { %v9200_v31 = vadd.f32 %v9144_v3, %v1556_v21  ;;  %v1557_v25 = vadd.f32 %v1456_v61, %v8931_v32  ;;  %v1458_v19 = vpop.f32.mrb[83].mxu0  ;;  %v2102_v49 = vpop.f32.mrb[83].mxu1  ;;  %v8123_v61 = vld [vmem:[%s8367_s10 + $0x214] ss:$8 sps:$4 sm:$0xff]  }
 0x1aa   : > { %v1627_v20 = vmax.f32 %v9200_v31, 0.0  ;;  %v9208_v62 = vadd.f32 %v9144_v3, %v1557_v25  ;;  %2591 = vmatmul.mubr.bf16.gmra.mrb[188].mxu0 %v8116_v17  ;;  %3049 = vmatmul.mubr.bf16.gmra.mrb[188].mxu1 %v9197_v35  ;;  %v8143_v31 = vld [vmem:[%s10412_s1 + $0x60] sm:$0xff]  }
 0x1ab   : > { %7375 = vmatprep.mubr.msk.bf16.mxu0 %vm472_vm0, %v9162_v15  ;;  %7432 = vmatprep.mubr.msk.bf16.mxu1 %vm472_vm0, %v8120_v50 }
 0x1ac   : > { %v6231_v32 = vmax.f32 %v6222_v37, %v1627_v20  ;;  %v1628_v4 = vmax.f32 %v9208_v62, 0.0  ;;  %v8121_v37 = vld [vmem:[%s10412_s1 + $0x90] sm:$0xff]  }
 0x1ad   : > { %v1461_v54 = vpop.f32.mrb[84].mxu0  ;;  %v9226_v43 = vpop.f32.mrb[84].mxu1 }
 0x1ae   : > { %6235 = vst [vmem:[%s9213_s21] sm:$0xff] %v6231_v32  ;;  %v6232_v55 = vmax.f32 %v6223_v24, %v1628_v4  ;;  %v1558_v59 = vadd.f32 %v1461_v54, %v8939_v53  ;;  %v1463_v44 = vpop.f32.mrb[85].mxu0  ;;  %v2107_v47 = vpop.f32.mrb[85].mxu1  ;;  %v8122_v53 = vld [vmem:[%s10412_s1 + $0x48] sm:$0xff]   ;;  %v8130_v32 = vld [vmem:[%s10412_s1 + $0x50] sm:$0xff]  }
 0x1af   : > { %v1464_v0 = vpop.f32.mrb[86].mxu0  ;;  %v9237_v17 = vpop.f32.mrb[86].mxu1 }
 0x1b0   : > { %6236 = vst [vmem:[%s9213_s21 + $0x8] sm:$0xff] %v6232_v55  ;;  %v9234_v21 = vadd.f32 %v9144_v3, %v1558_v59  ;;  %v1559_v27 = vadd.f32 %v1464_v0, %v8947_v12  ;;  %v1466_v24 = vpop.f32.mrb[87].mxu0  ;;  %v2110_v46 = vpop.f32.mrb[87].mxu1  ;;  %v8129_v12 = vld [vmem:[%s10412_s1 + $0x98] sm:$0xff]  }
 0x1b2   : > { %v1629_v25 = vmax.f32 %v9234_v21, 0.0  ;;  %v9245_v19 = vadd.f32 %v9144_v3, %v1559_v27  ;;  %3574 = vmatmul.mubr.bf16.vlgmr.msra.gmra.mrb[192].mxu0 %v9175_v34  ;;  %3981 = vmatmul.mubr.bf16.vlgmr.msra.gmra.mrb[192].mxu1 %v8118_v57  ;;  %v8125_v57 = vld [vmem:[%s8367_s10 + $0x210] ss:$8 sps:$4 sm:$0xff]  }
 0x1b3   : > { %4407 = vmatpush1.bf16.msra.mxu0 %v8121_v37  ;;  %5052 = vmatpush1.bf16.msra.mxu1 %v8122_v53  ;;  %v9270_v37 = vld [vmem:[%s8367_s10 + $0x244] ss:$8 sps:$4 sm:$0xff]  }
 0x1b4   : > { %v6233_v50 = vmax.f32 %v6224_v2, %v1629_v25  ;;  %v1630_v49 = vmax.f32 %v9245_v19, 0.0  ;;  %7376 = vmatprep.mubr.msk.bf16.mxu0 %vm472_vm0, %v9184_v29  ;;  %7433 = vmatprep.mubr.msk.bf16.mxu1 %vm472_vm0, %v8123_v61  ;;  %v8135_v61 = vld [vmem:[%s10412_s1 + $0x58] sm:$0xff]  }
 0x1b5   : > { %v1469_v54 = vpop.f32.mrb[88].mxu0  ;;  %4408 = vmatprep.subr.bf16.mxu0 %v10415_v1  ;;  %v9265_v59 = vpop.f32.mrb[88].mxu1  ;;  %5053 = vmatprep.subr.bf16.mxu1 %v10415_v1 }
 0x1b6   : > { %6237 = vst [vmem:[%s9213_s21 + $0x10] sm:$0xff] %v6233_v50  ;;  %v6234_v2 = vmax.f32 %v6225_v26, %v1630_v49  ;;  %v1560_v55 = vadd.f32 %v1469_v54, %v8963_v28  ;;  %v1471_v44 = vpop.f32.mrb[89].mxu0  ;;  %v2115_v47 = vpop.f32.mrb[89].mxu1  ;;  %v8134_v28 = vld [vmem:[%s10412_s1 + $0xa0] sm:$0xff]   ;;  %v8142_v54 = vld [vmem:[%s10412_s1 + $0xa8] sm:$0xff]  }
 0x1b7   : > { %v1472_v0 = vpop.f32.mrb[90].mxu0  ;;  %4409 = vmatpush1.bf16.msra.mxu0 %v8129_v12  ;;  %v9275_v53 = vpop.f32.mrb[90].mxu1  ;;  %5054 = vmatpush1.bf16.msra.mxu1 %v8130_v32  ;;  %v9310_v47 = vld [vmem:[%s8367_s10 + $0x240] ss:$8 sps:$4 sm:$0xff]  }
 0x1b8   : > { %6238 = vst [vmem:[%s9213_s21 + $0x18] sm:$0xff] %v6234_v2  ;;  %v1599_v27 = vadd.f32 %v9144_v3, %v1560_v55  ;;  %v1561_v24 = vadd.f32 %v1472_v0, %v8969_v56  ;;  %v1474_v26 = vpop.f32.mrb[91].mxu0  ;;  %4410 = vmatprep.subr.bf16.mxu0 %v10415_v1  ;;  %v2118_v46 = vpop.f32.mrb[91].mxu1  ;;  %5055 = vmatprep.subr.bf16.mxu1 %v10415_v1 }
 0x1b9   : > { %v8151_v46 = vld [vmem:[%s10412_s1 + $0x68] sm:$0xff]  }
 0x1ba   : > { %v1631_v12 = vmax.f32 %v1599_v27, 0.0  ;;  %v1600_v56 = vadd.f32 %v9144_v3, %v1561_v24  ;;  %3582 = vmatmul.mubr.bf16.gmra.mrb[196].mxu0 %v9197_v35  ;;  %3989 = vmatmul.mubr.bf16.gmra.mrb[196].mxu1 %v8125_v57  ;;  %v9314_v27 = vld [vmem:[%s8367_s10 + $0x254] ss:$8 sps:$4 sm:$0xff]  }
 0x1bb   : > { %7377 = vmatprep.mubr.msk.bf16.mxu0 %vm472_vm0, %v9270_v37  ;;  %7434 = vmatprep.mubr.msk.bf16.mxu1 %vm472_vm0, %v9162_v15 }
 0x1bc   : > { %v9291_v50 = vmax.f32 %v1627_v20, %v1631_v12  ;;  %v1632_v32 = vmax.f32 %v1600_v56, 0.0  ;;  %4411 = vmatpush1.bf16.msra.mxu0 %v8134_v28  ;;  %5056 = vmatpush1.bf16.msra.mxu1 %v8135_v61 }
 0x1bd   : > { %v1477_v2 = vpop.f32.mrb[92].mxu0  ;;  %4412 = vmatprep.subr.bf16.mxu0 %v10415_v1  ;;  %v9307_v15 = vpop.f32.mrb[92].mxu1  ;;  %5057 = vmatprep.subr.bf16.mxu1 %v10415_v1 }
 0x1be   : > { %v9304_v20 = vmax.f32 %v1628_v4, %v1632_v32  ;;  %v1562_v55 = vadd.f32 %v1477_v2, %v8989_v10  ;;  %v1479_v44 = vpop.f32.mrb[93].mxu0  ;;  %v2123_v0 = vpop.f32.mrb[93].mxu1  ;;  %v8150_v10 = vld [vmem:[%s10412_s1 + $0xb0] sm:$0xff]   ;;  %v8158_v32 = vld [vmem:[%s10412_s1 + $0xb8] sm:$0xff]  }
 0x1bf   : > { %v1480_v57 = vpop.f32.mrb[94].mxu0  ;;  %v9318_v62 = vpop.f32.mrb[94].mxu1  ;;  %v9358_v0 = vld [vmem:[%s8367_s10 + $0x264] ss:$8 sps:$4 sm:$0xff]  }
 0x1c0   : > { %v1601_v24 = vadd.f32 %v9144_v3, %v1562_v55  ;;  %v1563_v26 = vadd.f32 %v1480_v57, %v8994_v33  ;;  %v1482_v4 = vpop.f32.mrb[95].mxu0  ;;  %4413 = vmatpush1.bf16.msra.mxu0 %v8142_v54  ;;  %v2126_v28 = vpop.f32.mrb[95].mxu1  ;;  %5058 = vmatpush1.bf16.msra.mxu1 %v8143_v31  ;;  %v9354_v31 = vld [vmem:[%s8367_s10 + $0x250] ss:$8 sps:$4 sm:$0xff]  }
 0x1c1   : > { %4414 = vmatprep.subr.bf16.mxu0 %v10415_v1  ;;  %5059 = vmatprep.subr.bf16.mxu1 %v10415_v1  ;;  %v8166_v4 = vld [vmem:[%s10412_s1 + $0x78] sm:$0xff]  }
 0x1c2   : > { %v1633_v61 = vmax.f32 %v1601_v24, 0.0  ;;  %v1602_v12 = vadd.f32 %v9144_v3, %v1563_v26  ;;  %3590 = vmatmul.mubr.bf16.gmra.mrb[200].mxu0 %v9310_v47  ;;  %3997 = vmatmul.mubr.bf16.gmra.mrb[200].mxu1 %v9175_v34  ;;  %v8159_v34 = vld [vmem:[%s10412_s1 + $0x70] sm:$0xff]  }
 0x1c3   : > { %7378 = vmatprep.mubr.msk.bf16.mxu0 %vm472_vm0, %v9314_v27  ;;  %7435 = vmatprep.mubr.msk.bf16.mxu1 %vm472_vm0, %v9184_v29 }
 0x1c4   : > { %v9335_v33 = vmax.f32 %v1629_v25, %v1633_v61  ;;  %v1634_v56 = vmax.f32 %v1602_v12, 0.0  ;;  %4415 = vmatpush1.bf16.msra.mxu0 %v8150_v10  ;;  %5060 = vmatpush1.bf16.msra.mxu1 %v8151_v46 }
 0x1c5   : > { %v1485_v54 = vpop.f32.mrb[96].mxu0  ;;  %4416 = vmatprep.subr.bf16.mxu0 %v10415_v1  ;;  %v9351_v29 = vpop.f32.mrb[96].mxu1  ;;  %5061 = vmatprep.subr.bf16.mxu1 %v10415_v1 }
 0x1c6   : > { %v9348_v21 = vmax.f32 %v1630_v49, %v1634_v56  ;;  %v1564_v25 = vadd.f32 %v1485_v54, %v9015_v14  ;;  %v1487_v2 = vpop.f32.mrb[97].mxu0  ;;  %v2131_v55 = vpop.f32.mrb[97].mxu1  ;;  %v8165_v14 = vld [vmem:[%s10412_s1 + $0xc0] sm:$0xff]  }
 0x1c7   : > { %v1488_v44 = vpop.f32.mrb[98].mxu0  ;;  %v9364_v49 = vpop.f32.mrb[98].mxu1  ;;  %v9407_v55 = vld [vmem:[%s8367_s10 + $0x274] ss:$8 sps:$4 sm:$0xff]  }
 0x1c8   : > { %v9361_v57 = vadd.f32 %v9144_v3, %v1564_v25  ;;  %v1565_v19 = vadd.f32 %v1488_v44, %v9020_v5  ;;  %v1490_v24 = vpop.f32.mrb[99].mxu0  ;;  %4417 = vmatpush1.bf16.msra.mxu0 %v8158_v32  ;;  %v2134_v26 = vpop.f32.mrb[99].mxu1  ;;  %5062 = vmatpush1.bf16.msra.mxu1 %v8159_v34  ;;  %v9403_v34 = vld [vmem:[%s8367_s10 + $0x260] ss:$8 sps:$4 sm:$0xff]  }
 0x1c9   : > { %4418 = vmatprep.subr.bf16.mxu0 %v10415_v1  ;;  %5063 = vmatprep.subr.bf16.mxu1 %v10415_v1  ;;  %v8178_v24 = vld [vmem:[%s10412_s1 + $0xd0] sm:$0xff]   ;;  %v8179_v26 = vld [vmem:[%s10412_s1 + $0x88] sm:$0xff]  }
 0x1ca   : > { %v1635_v10 = vmax.f32 %v9361_v57, 0.0  ;;  %v9375_v5 = vadd.f32 %v9144_v3, %v1565_v19  ;;  %3598 = vmatmul.mubr.bf16.gmra.mrb[204].mxu0 %v9354_v31  ;;  %4005 = vmatmul.mubr.bf16.gmra.mrb[204].mxu1 %v9197_v35  ;;  %v8170_v35 = vld [vmem:[%s10412_s1 + $0xc8] sm:$0xff]  }
 0x1cb   : > { %7379 = vmatprep.mubr.msk.bf16.mxu0 %vm472_vm0, %v9358_v0  ;;  %7436 = vmatprep.mubr.msk.bf16.mxu1 %vm472_vm0, %v9270_v37 }
 0x1cc   : > { %v6257_v28 = vmax.f32 %v9291_v50, %v1635_v10  ;;  %v1636_v46 = vmax.f32 %v9375_v5, 0.0  ;;  %4419 = vmatpush1.bf16.msra.mxu0 %v8165_v14  ;;  %5064 = vmatpush1.bf16.msra.mxu1 %v8166_v4  ;;  %v8171_v50 = vld [vmem:[%s10412_s1 + $0x80] sm:$0xff]  }
 0x1cd   : > { %v1493_v61 = vpop.f32.mrb[100].mxu0  ;;  %4420 = vmatprep.subr.bf16.mxu0 %v10415_v1  ;;  %v9400_v32 = vpop.f32.mrb[100].mxu1  ;;  %5065 = vmatprep.subr.bf16.mxu1 %v10415_v1 }
 0x1ce   : > { %7860 = vst [vmem:[%s9213_s21 + $0x20] sm:$0xff] %v6257_v28  ;;  %v6258_v12 = vmax.f32 %v9304_v20, %v1636_v46  ;;  %v1566_v56 = vadd.f32 %v1493_v61, %v9041_v18  ;;  %v1495_v54 = vpop.f32.mrb[101].mxu0  ;;  %v2139_v25 = vpop.f32.mrb[101].mxu1 }
 0x1cf   : > { %v1496_v2 = vpop.f32.mrb[102].mxu0  ;;  %v9414_v20 = vpop.f32.mrb[102].mxu1 }
 0x1d0   : > { %7861 = vst [vmem:[%s9213_s21 + $0x28] sm:$0xff] %v6258_v12  ;;  %v9411_v44 = vadd.f32 %v9144_v3, %v1566_v56  ;;  %v1567_v19 = vadd.f32 %v1496_v2, %v9046_v63  ;;  %v1498_v18 = vpop.f32.mrb[103].mxu0  ;;  %4421 = vmatpush1.bf16.msra.mxu0 %v8170_v35  ;;  %v2142_v14 = vpop.f32.mrb[103].mxu1  ;;  %5066 = vmatpush1.bf16.msra.mxu1 %v8171_v50 }
 0x1d1   : > { %4422 = vmatprep.subr.bf16.mxu0 %v10415_v1  ;;  %5067 = vmatprep.subr.bf16.mxu1 %v10415_v1 }
 0x1d2   : > { %v1637_v4 = vmax.f32 %v9411_v44, 0.0  ;;  %v1606_v63 = vadd.f32 %v9144_v3, %v1567_v19  ;;  %3606 = vmatmul.mubr.bf16.gmra.mrb[208].mxu0 %v9403_v34  ;;  %4013 = vmatmul.mubr.bf16.gmra.mrb[208].mxu1 %v9310_v47  ;;  %v9444_v44 = vld [vmem:[%s8367_s10 + $0x284] ss:$8 sps:$4 sm:$0xff]  }
 0x1d3   : > { %7380 = vmatprep.mubr.msk.bf16.mxu0 %vm472_vm0, %v9407_v55  ;;  %7437 = vmatprep.mubr.msk.bf16.mxu1 %vm472_vm0, %v9314_v27 }
 0x1d4   : > { %v6259_v28 = vmax.f32 %v9335_v33, %v1637_v4  ;;  %v1638_v35 = vmax.f32 %v1606_v63, 0.0  ;;  %4423 = vmatpush1.bf16.msra.mxu0 %v8178_v24  ;;  %5068 = vmatpush1.bf16.msra.mxu1 %v8179_v26  ;;  %v9440_v33 = vld [vmem:[%s8367_s10 + $0x270] ss:$8 sps:$4 sm:$0xff]  }
 0x1d5   : > { %v1501_v61 = vpop.f32.mrb[104].mxu0  ;;  %5458 = vmatprep.subr.bf16.mxu0 %v10415_v1  ;;  %v9437_v56 = vpop.f32.mrb[104].mxu1  ;;  %5916 = vmatprep.subr.bf16.mxu1 %v10415_v1 }
 0x1d6   : > { %7862 = vst [vmem:[%s9213_s21 + $0x30] sm:$0xff] %v6259_v28  ;;  %v6260_v50 = vmax.f32 %v9348_v21, %v1638_v35  ;;  %v1568_v12 = vadd.f32 %v1501_v61, %v9061_v23  ;;  %v1503_v54 = vpop.f32.mrb[105].mxu0  ;;  %v2147_v25 = vpop.f32.mrb[105].mxu1 }
 0x1d7   : > { %v1504_v2 = vpop.f32.mrb[106].mxu0  ;;  %v9449_v24 = vpop.f32.mrb[106].mxu1  ;;  %v9466_v25 = vld [vmem:[%s8367_s10 + $0x280] ss:$8 sps:$4 sm:$0xff]  }
 0x1d8   : > { %7863 = vst [vmem:[%s9213_s21 + $0x38] sm:$0xff] %v6260_v50  ;;  %v1607_v19 = vadd.f32 %v9144_v3, %v1568_v12  ;;  %v1569_v18 = vadd.f32 %v1504_v2, %v9063_v38  ;;  %v1506_v23 = vpop.f32.mrb[107].mxu0  ;;  %v2150_v21 = vpop.f32.mrb[107].mxu1 }
 0x1da   : > { %v1639_v14 = vmax.f32 %v1607_v19, 0.0  ;;  %v1608_v26 = vadd.f32 %v9144_v3, %v1569_v18  ;;  %3614 = vmatmul.mubr.bf16.gmra.mrb[212].mxu0 %v9440_v33  ;;  %4021 = vmatmul.mubr.bf16.gmra.mrb[212].mxu1 %v9354_v31  ;;  %v9469_v18 = vld [vmem:[%s8367_s10 + $0x294] ss:$8 sps:$4 sm:$0xff]  }
 0x1db   : > { %7381 = vmatprep.mubr.msk.bf16.mxu0 %vm472_vm0, %v9444_v44  ;;  %7438 = vmatprep.mubr.msk.bf16.mxu1 %vm472_vm0, %v9358_v0 }
 0x1dc   : > { %v6275_v63 = vmax.f32 %v1635_v10, %v1639_v14  ;;  %v1640_v38 = vmax.f32 %v1608_v26, 0.0 }
 0x1dd   : > { %v1509_v28 = vpop.f32.mrb[108].mxu0  ;;  %v9463_v12 = vpop.f32.mrb[108].mxu1 }
 0x1de   : > { %v6276_v61 = vmax.f32 %v1636_v46, %v1640_v38  ;;  %v1570_v50 = vadd.f32 %v1509_v28, %v9071_v11  ;;  %v1511_v54 = vpop.f32.mrb[109].mxu0  ;;  %v2155_v2 = vpop.f32.mrb[109].mxu1 }
 0x1df   : > { %v1512_v19 = vpop.f32.mrb[110].mxu0  ;;  %v9473_v23 = vpop.f32.mrb[110].mxu1  ;;  %v9486_v2 = vld [vmem:[%s8367_s10 + $0x290] ss:$8 sps:$4 sm:$0xff]  }
 0x1e0   : > { %v1609_v57 = vadd.f32 %v9144_v3, %v1570_v50  ;;  %v1571_v10 = vadd.f32 %v1512_v19, %v9073_v6  ;;  %v1514_v5 = vpop.f32.mrb[111].mxu0  ;;  %v2158_v46 = vpop.f32.mrb[111].mxu1 }
 0x1e2   : > { %v1641_v21 = vmax.f32 %v1609_v57, 0.0  ;;  %v1610_v11 = vadd.f32 %v9144_v3, %v1571_v10  ;;  %3622 = vmatmul.mubr.bf16.gmra.mrb[216].mxu0 %v9466_v25  ;;  %4029 = vmatmul.mubr.bf16.gmra.mrb[216].mxu1 %v9403_v34  ;;  %v9489_v10 = vld [vmem:[%s8367_s10 + $0x2a4] ss:$8 sps:$4 sm:$0xff]  }
 0x1e3   : > { %7382 = vmatprep.mubr.msk.bf16.mxu0 %vm472_vm0, %v9469_v18  ;;  %7439 = vmatprep.mubr.msk.bf16.mxu1 %vm472_vm0, %v9407_v55 }
 0x1e4   : > { %v6277_v14 = vmax.f32 %v1637_v4, %v1641_v21  ;;  %v1642_v26 = vmax.f32 %v1610_v11, 0.0 }
 0x1e5   : > { %v1517_v6 = vpop.f32.mrb[112].mxu0  ;;  %v9483_v50 = vpop.f32.mrb[112].mxu1 }
 0x1e6   : > { %v6278_v38 = vmax.f32 %v1638_v35, %v1642_v26  ;;  %v1572_v28 = vadd.f32 %v1517_v6, %v9081_v22  ;;  %10417 = vst [vmem:[#allocation3_spill] sm:$0xff] %v9483_v50  ;;  %v1519_v54 = vpop.f32.mrb[113].mxu0  ;;  %v2163_v19 = vpop.f32.mrb[113].mxu1 }
 0x1e7   : > { %v1520_v57 = vpop.f32.mrb[114].mxu0  ;;  %v9493_v46 = vpop.f32.mrb[114].mxu1 }
 0x1e8   : > { %v1611_v4 = vadd.f32 %v9144_v3, %v1572_v28  ;;  %v1573_v5 = vadd.f32 %v1520_v57, %v9083_v8  ;;  %10418 = vst [vmem:[#allocation4_spill] sm:$0xff] %v9493_v46  ;;  %v1522_v21 = vpop.f32.mrb[115].mxu0  ;;  %v2166_v35 = vpop.f32.mrb[115].mxu1 }
 0x1e9   : > { %v8155_v35 = vld [vmem:[%s8367_s10 + $0x2b4] ss:$8 sps:$4 sm:$0xff]  }
 0x1ea   : > { %v1643_v22 = vmax.f32 %v1611_v4, 0.0  ;;  %v1612_v11 = vadd.f32 %v9144_v3, %v1573_v5  ;;  %3630 = vmatmul.mubr.bf16.gmra.mrb[220].mxu0 %v9486_v2  ;;  %4037 = vmatmul.mubr.bf16.gmra.mrb[220].mxu1 %v9440_v33  ;;  %v9507_v4 = vld [vmem:[%s8367_s10 + $0x2a0] ss:$8 sps:$4 sm:$0xff]  }
 0x1eb   : > { %7383 = vmatprep.mubr.msk.bf16.mxu0 %vm472_vm0, %v9489_v10  ;;  %7440 = vmatprep.mubr.msk.bf16.mxu1 %vm472_vm0, %v9444_v44 }
 0x1ec   : > { %v6284_v26 = vmax.f32 %v6275_v63, %v1643_v22  ;;  %v1644_v6 = vmax.f32 %v1612_v11, 0.0 }
 0x1ed   : > { %v1525_v8 = vpop.f32.mrb[116].mxu0  ;;  %v9504_v19 = vpop.f32.mrb[116].mxu1 }
 0x1ee   : > { %7864 = vst [vmem:[%s9213_s21 + $0x40] sm:$0xff] %v6284_v26  ;;  %v6285_v28 = vmax.f32 %v6276_v61, %v1644_v6  ;;  %v1574_v54 = vadd.f32 %v1525_v8, %v9091_v58  ;;  %10419 = vst [vmem:[#allocation5_spill] sm:$0xff] %v9504_v19  ;;  %v1527_v57 = vpop.f32.mrb[117].mxu0  ;;  %v2171_v5 = vpop.f32.mrb[117].mxu1 }
 0x1ef   : > { %v1528_v21 = vpop.f32.mrb[118].mxu0  ;;  %v9513_v1 = vpop.f32.mrb[118].mxu1 }
 0x1f0   : > { %7865 = vst [vmem:[%s9213_s21 + $0x48] sm:$0xff] %v6285_v28  ;;  %v1613_v63 = vadd.f32 %v9144_v3, %v1574_v54  ;;  %v1575_v11 = vadd.f32 %v1528_v21, %v9093_v30  ;;  %10420 = vst [vmem:[#allocation6_spill] sm:$0xff] %v9513_v1  ;;  %v1530_v26 = vpop.f32.mrb[119].mxu0  ;;  %v2174_v61 = vpop.f32.mrb[119].mxu1  ;;  %v8160_v1 = vld [vmem:[%s8367_s10 + $0x2c4] ss:$8 sps:$4 sm:$0xff]  }
 0x1f2   : > { %v1645_v58 = vmax.f32 %v1613_v63, 0.0  ;;  %v1614_v8 = vadd.f32 %v9144_v3, %v1575_v11  ;;  %3638 = vmatmul.mubr.bf16.gmra.mrb[224].mxu0 %v9507_v4  ;;  %4045 = vmatmul.mubr.bf16.gmra.mrb[224].mxu1 %v9466_v25  ;;  %v8157_v11 = vld [vmem:[%s8367_s10 + $0x2b0] ss:$8 sps:$4 sm:$0xff]  }
 0x1f3   : > { %7384 = vmatprep.mubr.msk.bf16.mxu0 %vm472_vm0, %v8155_v35  ;;  %7441 = vmatprep.mubr.msk.bf16.mxu1 %vm472_vm0, %v9469_v18 }
 0x1f4   : > { %v6286_v28 = vmax.f32 %v6277_v14, %v1645_v58  ;;  %v1646_v54 = vmax.f32 %v1614_v8, 0.0 }
 0x1f5   : > { %v1533_v30 = vpop.f32.mrb[120].mxu0  ;;  %v9523_v21 = vpop.f32.mrb[120].mxu1 }
 0x1f6   : > { %7866 = vst [vmem:[%s9213_s21 + $0x50] sm:$0xff] %v6286_v28  ;;  %v6287_v57 = vmax.f32 %v6278_v38, %v1646_v54  ;;  %v1576_v5 = vadd.f32 %v1533_v30, %v9101_v7  ;;  %10421 = vst [vmem:[#allocation7_spill] sm:$0xff] %v9523_v21  ;;  %v1535_v63 = vpop.f32.mrb[121].mxu0  ;;  %v2179_v26 = vpop.f32.mrb[121].mxu1 }
 0x1f7   : > { %v1536_v61 = vpop.f32.mrb[122].mxu0  ;;  %v9530_v8 = vpop.f32.mrb[122].mxu1 }
 0x1f8   : > { %7867 = vst [vmem:[%s9213_s21 + $0x58] sm:$0xff] %v6287_v57  ;;  %v1615_v19 = vadd.f32 %v9144_v3, %v1576_v5  ;;  %v1577_v14 = vadd.f32 %v1536_v61, %v9103_v36  ;;  %10422 = vst [vmem:[#allocation8_spill] sm:$0xff] %v9530_v8  ;;  %v1538_v46 = vpop.f32.mrb[123].mxu0  ;;  %v2182_v28 = vpop.f32.mrb[123].mxu1 }
 0x1f9   : > { %v9544_v28 = vld [vmem:[%s8367_s10 + $0x2d4] ss:$8 sps:$4 sm:$0xff]  }
 0x1fa   : > { %v1647_v38 = vmax.f32 %v1615_v19, 0.0  ;;  %v1616_v7 = vadd.f32 %v9144_v3, %v1577_v14  ;;  %3646 = vmatmul.mubr.bf16.gmra.mrb[228].mxu0 %v8157_v11  ;;  %4053 = vmatmul.mubr.bf16.gmra.mrb[228].mxu1 %v9486_v2  ;;  %v9541_v19 = vld [vmem:[%s8367_s10 + $0x2c0] ss:$8 sps:$4 sm:$0xff]  }
 0x1fb   : > { %7385 = vmatprep.mubr.msk.bf16.mxu0 %vm472_vm0, %v8160_v1  ;;  %7442 = vmatprep.mubr.msk.bf16.mxu1 %vm472_vm0, %v9489_v10 }
 0x1fc   : > { %v1648_v30 = vmax.f32 %v1616_v7, 0.0  ;;  %v6302_v57 = vmax.f32 %v1643_v22, %v1647_v38 }
 0x1fd   : > { %v1541_v36 = vpop.f32.mrb[124].mxu0  ;;  %v9538_v63 = vpop.f32.mrb[124].mxu1 }
 0x1fe   : > { %v1578_v5 = vadd.f32 %v1541_v36, %v9111_v52  ;;  %10423 = vst [vmem:[#allocation9_spill] sm:$0xff] %v9538_v63  ;;  %v1543_v46 = vpop.f32.mrb[125].mxu0  ;;  %v6303_v26 = vmax.f32 %v1644_v6, %v1648_v30  ;;  %v2187_v61 = vpop.f32.mrb[125].mxu1 }
 0x1ff   : > { %v1544_v14 = vpop.f32.mrb[126].mxu0  ;;  %v9548_v22 = vpop.f32.mrb[126].mxu1 }
 0x200   : > { %v1617_v7 = vadd.f32 %v9144_v3, %v1578_v5  ;;  %v1579_v8 = vadd.f32 %v1544_v14, %v9113_v39  ;;  %10424 = vst [vmem:[#allocation10_spill] sm:$0xff] %v9548_v22  ;;  %v1546_v38 = vpop.f32.mrb[127].mxu0  ;;  %v2190_v52 = vpop.f32.mrb[127].mxu1  ;;  %v7308_v39 = vld [vmem:[%s8367_s10 + $0x2e0] sm:$0xff]  ;;  %v7309_v5 = vld [vmem:[%s8367_s10 + $0x2e8] sm:$0xff] }
 0x201   : > { %v9560_v52 = vld [vmem:[%s8367_s10 + $0x2d0] ss:$8 sps:$4 sm:$0xff]   ;;  %v9567_v63 = vcombine.high %v7308_v39, %v7309_v5 }
 0x202   : > { %v1649_v36 = vmax.f32 %v1617_v7, 0.0  ;;  %v1618_v46 = vadd.f32 %v9144_v3, %v1579_v8  ;;  %3654 = vmatmul.mubr.bf16.gmra.mrb[232].mxu0 %v9541_v19  ;;  %4061 = vmatmul.mubr.bf16.gmra.mrb[232].mxu1 %v9507_v4  ;;  %v9565_v8 = vld [vmem:[%s10413_s2] ss:$0 sm:$0xff] }
 0x203   : > { %7386 = vmatprep.mubr.msk.bf16.mxu0 %vm472_vm0, %v9544_v28  ;;  %7443 = vmatprep.mubr.msk.bf16.mxu1 %vm472_vm0, %v8155_v35 }
 0x204   : > { %v1650_v6 = vmax.f32 %v1618_v46, 0.0  ;;  %v6304_v30 = vmax.f32 %v1645_v58, %v1649_v36 }
 0x205   : > { %v2472_v61 = vpop.f32.mrb[128].mxu0  ;;  %v2930_v38 = vpop.f32.mrb[128].mxu1 }
 0x206   : > { %v2473_v14 = vadd.f32 %v2472_v61, %v9122_v60  ;;  %v2474_v7 = vpop.f32.mrb[129].mxu0  ;;  %v6305_v3 = vmax.f32 %v1646_v54, %v1650_v6  ;;  %v2932_v22 = vpop.f32.mrb[129].mxu1 }
 0x207   : > { %v2475_v46 = vpop.f32.mrb[130].mxu0  ;;  %v2933_v36 = vpop.f32.mrb[130].mxu1 }
 0x208   : > { %v3057_v35 = vadd.f32 %v2930_v38, %v2473_v14  ;;  %v2476_v58 = vadd.f32 %v2475_v46, %v9125_v45  ;;  %v2477_v21 = vpop.f32.mrb[131].mxu0  ;;  %v2935_v60 = vpop.f32.mrb[131].mxu1 }
 0x20a   : > { %v3096_v61 = vadd.f32 %v9565_v8, %v3057_v35  ;;  %v3058_v7 = vadd.f32 %v2933_v36, %v2476_v58  ;;  %3662 = vmatmul.mubr.bf16.gmra.mrb[236].mxu0 %v9560_v52  ;;  %4069 = vmatmul.mubr.bf16.gmra.mrb[236].mxu1 %v8157_v11  ;;  %v9580_v35 = vcombine.low %v7308_v39, %v7309_v5  ;;  %v9583_v36 = vld [vmem:[%s8367_s10 + $0x2f4] ss:$8 sps:$4 sm:$0xff]  }
 0x20b   : > { %7387 = vmatprep.mubr.msk.bf16.mxu0 %vm472_vm0, %v9567_v63  ;;  %7444 = vmatprep.mubr.msk.bf16.mxu1 %vm472_vm0, %v8160_v1 }
 0x20c   : > { %v3128_v54 = vmax.f32 %v3096_v61, 0.0  ;;  %v9575_v22 = vadd.f32 %v9565_v8, %v3058_v7 }
 0x20d   : > { %v2480_v45 = vpop.f32.mrb[132].mxu0  ;;  %v2938_v38 = vpop.f32.mrb[132].mxu1 }
 0x20e   : > { %v6310_v21 = vmax.f32 %v6302_v57, %v3128_v54  ;;  %v3129_v6 = vmax.f32 %v9575_v22, 0.0  ;;  %v2481_v14 = vadd.f32 %v2480_v45, %v9134_v16  ;;  %v2482_v46 = vpop.f32.mrb[133].mxu0  ;;  %v2940_v11 = vpop.f32.mrb[133].mxu1 }
 0x20f   : > { %v2483_v58 = vpop.f32.mrb[134].mxu0  ;;  %v2941_v7 = vpop.f32.mrb[134].mxu1  ;;  %v9601_v11 = vld [vmem:[%s8367_s10 + $0x304] ss:$8 sps:$4 sm:$0xff]  }
 0x210   : > { %7868 = vst [vmem:[%s9213_s21 + $0x60] sm:$0xff] %v6310_v21  ;;  %v6311_v60 = vmax.f32 %v6303_v26, %v3129_v6  ;;  %v3059_v61 = vadd.f32 %v2938_v38, %v2481_v14  ;;  %v2484_v1 = vadd.f32 %v2483_v58, %v9138_v42  ;;  %v2485_v57 = vpop.f32.mrb[135].mxu0  ;;  %v2943_v50 = vpop.f32.mrb[135].mxu1  ;;  %v9598_v38 = vld [vmem:[%s8367_s10 + $0x2f0] ss:$8 sps:$4 sm:$0xff]  }
 0x212   : > { %7869 = vst [vmem:[%s9213_s21 + $0x68] sm:$0xff] %v6311_v60  ;;  %v3098_v16 = vadd.f32 %v9565_v8, %v3059_v61  ;;  %v3060_v22 = vadd.f32 %v2941_v7, %v2484_v1  ;;  %3670 = vmatmul.mubr.bf16.gmra.mrb[240].mxu0 %v9580_v35  ;;  %4077 = vmatmul.mubr.bf16.gmra.mrb[240].mxu1 %v9541_v19 }
 0x213   : > { %7388 = vmatprep.mubr.msk.bf16.mxu0 %vm472_vm0, %v9583_v36  ;;  %7445 = vmatprep.mubr.msk.bf16.mxu1 %vm472_vm0, %v9544_v28 }
 0x214   : > { %v3130_v26 = vmax.f32 %v3098_v16, 0.0  ;;  %v3099_v42 = vadd.f32 %v9565_v8, %v3060_v22 }
 0x215   : > { %v2488_v50 = vpop.f32.mrb[136].mxu0  ;;  %v2946_v21 = vpop.f32.mrb[136].mxu1 }
 0x216   : > { %v6312_v39 = vmax.f32 %v6304_v30, %v3130_v26  ;;  %v3131_v5 = vmax.f32 %v3099_v42, 0.0  ;;  %v2489_v45 = vadd.f32 %v2488_v50, %v9152_v51  ;;  %v2490_v14 = vpop.f32.mrb[137].mxu0  ;;  %v2948_v19 = vpop.f32.mrb[137].mxu1 }
 0x217   : > { %v2491_v46 = vpop.f32.mrb[138].mxu0  ;;  %v2949_v28 = vpop.f32.mrb[138].mxu1  ;;  %v9619_v14 = vld [vmem:[%s8367_s10 + $0x314] ss:$8 sps:$4 sm:$0xff]  }
 0x218   : > { %7870 = vst [vmem:[%s9213_s21 + $0x70] sm:$0xff] %v6312_v39  ;;  %v6313_v58 = vmax.f32 %v6305_v3, %v3131_v5  ;;  %v3061_v60 = vadd.f32 %v2946_v21, %v2489_v45  ;;  %v2492_v61 = vadd.f32 %v2491_v46, %v9159_v40  ;;  %v2493_v1 = vpop.f32.mrb[139].mxu0  ;;  %v2951_v30 = vpop.f32.mrb[139].mxu1  ;;  %v9616_v45 = vld [vmem:[%s8367_s10 + $0x300] ss:$8 sps:$4 sm:$0xff]  }
 0x21a   : > { %7871 = vst [vmem:[%s9213_s21 + $0x78] sm:$0xff] %v6313_v58  ;;  %v3100_v51 = vadd.f32 %v9565_v8, %v3061_v60  ;;  %v3062_v7 = vadd.f32 %v2949_v28, %v2492_v61  ;;  %3678 = vmatmul.mubr.bf16.gmra.mrb[244].mxu0 %v9598_v38  ;;  %4085 = vmatmul.mubr.bf16.gmra.mrb[244].mxu1 %v9560_v52 }
 0x21b   : > { %7389 = vmatprep.mubr.msk.bf16.mxu0 %vm472_vm0, %v9601_v11  ;;  %7446 = vmatprep.mubr.msk.bf16.mxu1 %vm472_vm0, %v9567_v63 }
 0x21c   : > { %v3132_v3 = vmax.f32 %v3100_v51, 0.0  ;;  %v3101_v57 = vadd.f32 %v9565_v8, %v3062_v7 }
 0x21d   : > { %v2496_v40 = vpop.f32.mrb[140].mxu0  ;;  %v2954_v50 = vpop.f32.mrb[140].mxu1 }
 0x21e   : > { %v6328_v16 = vmax.f32 %v3128_v54, %v3132_v3  ;;  %v3133_v22 = vmax.f32 %v3101_v57, 0.0  ;;  %v2497_v42 = vadd.f32 %v2496_v40, %v9171_v41  ;;  %v2498_v39 = vpop.f32.mrb[141].mxu0  ;;  %v2956_v21 = vpop.f32.mrb[141].mxu1  ;;  %v9632_v40 = vld [vmem:[%s8367_s10 + $0x310] ss:$8 sps:$4 sm:$0xff]  }
 0x21f   : > { %v2499_v52 = vpop.f32.mrb[142].mxu0  ;;  %v2957_v60 = vpop.f32.mrb[142].mxu1 }
 0x220   : > { %v6329_v19 = vmax.f32 %v3129_v6, %v3133_v22  ;;  %v3063_v46 = vadd.f32 %v2954_v50, %v2497_v42  ;;  %v2500_v58 = vadd.f32 %v2499_v52, %v9181_v9  ;;  %v2501_v61 = vpop.f32.mrb[143].mxu0  ;;  %v2959_v28 = vpop.f32.mrb[143].mxu1 }
 0x222   : > { %v3102_v54 = vadd.f32 %v9565_v8, %v3063_v46  ;;  %v3064_v1 = vadd.f32 %v2957_v60, %v2500_v58  ;;  %3686 = vmatmul.mubr.bf16.gmra.mrb[248].mxu0 %v9616_v45  ;;  %4093 = vmatmul.mubr.bf16.gmra.mrb[248].mxu1 %v9580_v35  ;;  %v9636_v58 = vld [vmem:[%s8367_s10 + $0x324] ss:$8 sps:$4 sm:$0xff]  }
 0x223   : > { %7390 = vmatprep.mubr.msk.bf16.mxu0 %vm472_vm0, %v9619_v14  ;;  %7447 = vmatprep.mubr.msk.bf16.mxu1 %vm472_vm0, %v9583_v36 }
 0x224   : > { %v3134_v41 = vmax.f32 %v3102_v54, 0.0  ;;  %v3103_v6 = vadd.f32 %v9565_v8, %v3064_v1 }
 0x225   : > { %v2504_v9 = vpop.f32.mrb[144].mxu0  ;;  %v2962_v3 = vpop.f32.mrb[144].mxu1 }
 0x226   : > { %v6330_v30 = vmax.f32 %v3130_v26, %v3134_v41  ;;  %v3135_v51 = vmax.f32 %v3103_v6, 0.0  ;;  %v2505_v7 = vadd.f32 %v2504_v9, %v9192_v13  ;;  %v2506_v57 = vpop.f32.mrb[145].mxu0  ;;  %v2964_v22 = vpop.f32.mrb[145].mxu1 }
 0x227   : > { %v2507_v42 = vpop.f32.mrb[146].mxu0  ;;  %v2965_v52 = vpop.f32.mrb[146].mxu1 }
 0x228   : > { %v6331_v50 = vmax.f32 %v3131_v5, %v3135_v51  ;;  %v3065_v39 = vadd.f32 %v2962_v3, %v2505_v7  ;;  %v2508_v21 = vadd.f32 %v2507_v42, %v9203_v48  ;;  %v2509_v46 = vpop.f32.mrb[147].mxu0  ;;  %v2967_v60 = vpop.f32.mrb[147].mxu1  ;;  %v9656_v51 = vld [vmem:[%s8367_s10 + $0x320] ss:$8 sps:$4 sm:$0xff]   ;;  %v8187_v42 = vld [vmem:[%s10412_s1 + $0x90] sm:$0xff]  }
 0x229   : > { %v8186_v7 = vld [vmem:[%s10412_s1] sm:$0xff]  }
 0x22a   : > { %v9639_v26 = vadd.f32 %v9565_v8, %v3065_v39  ;;  %v3066_v13 = vadd.f32 %v2965_v52, %v2508_v21  ;;  %3694 = vmatmul.mubr.bf16.gmra.mrb[252].mxu0 %v9632_v40  ;;  %4101 = vmatmul.mubr.bf16.gmra.mrb[252].mxu1 %v9598_v38  ;;  %v9669_v21 = vld [vmem:[%s8367_s10 + $0x334] ss:$8 sps:$4 sm:$0xff]  }
 0x22b   : > { %7539 = vmatprep.mubr.msk.bf16.mxu0 %vm472_vm0, %v9270_v37  ;;  %7679 = vmatprep.mubr.msk.bf16.mxu1 %vm472_vm0, %v9636_v58 }
 0x22c   : > { %v3136_v48 = vmax.f32 %v9639_v26, 0.0  ;;  %v9647_v5 = vadd.f32 %v9565_v8, %v3066_v13 }
 0x22d   : > { %v2512_v61 = vpop.f32.mrb[148].mxu0  ;;  %v2970_v41 = vpop.f32.mrb[148].mxu1 }
 0x22e   : > { %v6337_v28 = vmax.f32 %v6328_v16, %v3136_v48  ;;  %v3137_v54 = vmax.f32 %v9647_v5, 0.0  ;;  %v2513_v1 = vadd.f32 %v2512_v61, %v9226_v43  ;;  %v2514_v37 = vpop.f32.mrb[149].mxu0  ;;  %v2972_v6 = vpop.f32.mrb[149].mxu1  ;;  %v10425_v61 = vmov 0   ;;  %v8219_v5 = vld [vmem:[%s10412_s1 + $0xb0] sm:$0xff]  }
 0x22f   : > { %v2515_v9 = vpop.f32.mrb[150].mxu0  ;;  %v2973_v22 = vpop.f32.mrb[150].mxu1 }
 0x230   : > { %7872 = vst [vmem:[%s9213_s21 + $0x80] sm:$0xff] %v6337_v28  ;;  %v6338_v16 = vmax.f32 %v6329_v19, %v3137_v54  ;;  %v3067_v3 = vadd.f32 %v2970_v41, %v2513_v1  ;;  %v2516_v57 = vadd.f32 %v2515_v9, %v9237_v17  ;;  %v2517_v43 = vpop.f32.mrb[151].mxu0  ;;  %v2975_v39 = vpop.f32.mrb[151].mxu1  ;;  %v8194_v17 = vld [vmem:[%s10412_s1 + $0x8] sm:$0xff]  }
 0x231   : > { %v8199_v43 = vld [vmem:[%s10412_s1 + $0x10] sm:$0xff]  }
 0x232   : > { %7873 = vst [vmem:[%s9213_s21 + $0x88] sm:$0xff] %v6338_v16  ;;  %v9673_v52 = vadd.f32 %v9565_v8, %v3067_v3  ;;  %v3068_v46 = vadd.f32 %v2973_v22, %v2516_v57  ;;  %4439 = vmatmul.mubr.bf16.vlgmr.msra.gmra.mrb[0].mxu0 %v9310_v47  ;;  %5084 = vmatmul.mubr.bf16.vlgmr.msra.gmra.mrb[0].mxu1 %v9656_v51  ;;  %v8195_v47 = vld [vmem:[%s10412_s1 + $0x98] sm:$0xff]  }
 0x233   : > { %5459 = vmatpush1.bf16.msra.mxu0 %v8186_v7  ;;  %5917 = vmatpush1.bf16.msra.mxu1 %v8187_v42  ;;  %v9698_v7 = vld [vmem:[%s8367_s10 + $0x330] ss:$8 sps:$4 sm:$0xff]  }
 0x234   : > { %v3138_v19 = vmax.f32 %v9673_v52, 0.0  ;;  %v9682_v60 = vadd.f32 %v9565_v8, %v3068_v46  ;;  %7540 = vmatprep.mubr.msk.bf16.mxu0 %vm472_vm0, %v9314_v27  ;;  %7680 = vmatprep.mubr.msk.bf16.mxu1 %vm472_vm0, %v9669_v21 }
 0x235   : > { %v2520_v13 = vpop.f32.mrb[152].mxu0  ;;  %5460 = vmatprep.subr.bf16.mxu0 %v10425_v61  ;;  %v2978_v37 = vpop.f32.mrb[152].mxu1  ;;  %5918 = vmatprep.subr.bf16.mxu1 %v10425_v61 }
 0x236   : > { %v6339_v28 = vmax.f32 %v6330_v30, %v3138_v19  ;;  %v3139_v1 = vmax.f32 %v9682_v60, 0.0  ;;  %v2521_v41 = vadd.f32 %v2520_v13, %v9265_v59  ;;  %v2522_v27 = vpop.f32.mrb[153].mxu0  ;;  %v2980_v6 = vpop.f32.mrb[153].mxu1  ;;  %v9705_v59 = vld [vmem:[%s8367_s10 + $0x344] ss:$8 sps:$4 sm:$0xff]  }
 0x237   : > { %v2523_v9 = vpop.f32.mrb[154].mxu0  ;;  %5461 = vmatpush1.bf16.msra.mxu0 %v8194_v17  ;;  %v2981_v57 = vpop.f32.mrb[154].mxu1  ;;  %5919 = vmatpush1.bf16.msra.mxu1 %v8195_v47  ;;  %v8207_v47 = vld [vmem:[%s10412_s1 + $0x18] sm:$0xff]   ;;  %v8242_v60 = vld [vmem:[%s10412_s1 + $0xc0] sm:$0xff]  }
 0x238   : > { %7874 = vst [vmem:[%s9213_s21 + $0x90] sm:$0xff] %v6339_v28  ;;  %v6340_v16 = vmax.f32 %v6331_v50, %v3139_v1  ;;  %v3069_v30 = vadd.f32 %v2978_v37, %v2521_v41  ;;  %v2524_v3 = vadd.f32 %v2523_v9, %v9275_v53  ;;  %v2525_v22 = vpop.f32.mrb[155].mxu0  ;;  %5462 = vmatprep.subr.bf16.mxu0 %v10425_v61  ;;  %v2983_v42 = vpop.f32.mrb[155].mxu1  ;;  %v8200_v50 = vld [vmem:[%s10412_s1 + $0xa0] sm:$0xff]  }
 0x239   : > { %5920 = vmatprep.subr.bf16.mxu1 %v10425_v61  ;;  %v9746_v22 = vld [vmem:[%s8367_s10 + $0x354] ss:$8 sps:$4 sm:$0xff]  }
 0x23a   : > { %7875 = vst [vmem:[%s9213_s21 + $0x98] sm:$0xff] %v6340_v16  ;;  %v3108_v53 = vadd.f32 %v9565_v8, %v3069_v30  ;;  %v3070_v39 = vadd.f32 %v2981_v57, %v2524_v3  ;;  %4447 = vmatmul.mubr.bf16.gmra.mrb[4].mxu0 %v9354_v31  ;;  %5092 = vmatmul.mubr.bf16.gmra.mrb[4].mxu1 %v9698_v7  ;;  %v8208_v31 = vld [vmem:[%s10412_s1 + $0xa8] sm:$0xff]  }
 0x23b   : > { %7541 = vmatprep.mubr.msk.bf16.mxu0 %vm472_vm0, %v9358_v0  ;;  %7681 = vmatprep.mubr.msk.bf16.mxu1 %vm472_vm0, %v9705_v59  ;;  %v9738_v16 = vld [vmem:[%s8367_s10 + $0x340] ss:$8 sps:$4 sm:$0xff]  }
 0x23c   : > { %v3140_v46 = vmax.f32 %v3108_v53, 0.0  ;;  %v3109_v17 = vadd.f32 %v9565_v8, %v3070_v39  ;;  %5463 = vmatpush1.bf16.msra.mxu0 %v8199_v43  ;;  %5921 = vmatpush1.bf16.msra.mxu1 %v8200_v50  ;;  %v8232_v53 = vld [vmem:[%s10412_s1 + $0x28] sm:$0xff]  }
 0x23d   : > { %v2528_v13 = vpop.f32.mrb[156].mxu0  ;;  %5464 = vmatprep.subr.bf16.mxu0 %v10425_v61  ;;  %v2986_v37 = vpop.f32.mrb[156].mxu1  ;;  %5922 = vmatprep.subr.bf16.mxu1 %v10425_v61 }
 0x23e   : > { %v9733_v0 = vmax.f32 %v3136_v48, %v3140_v46  ;;  %v3141_v28 = vmax.f32 %v3109_v17, 0.0  ;;  %v2529_v41 = vadd.f32 %v2528_v13, %v9307_v15  ;;  %v2530_v27 = vpop.f32.mrb[157].mxu0  ;;  %v2988_v6 = vpop.f32.mrb[157].mxu1  ;;  %v8218_v15 = vld [vmem:[%s10412_s1 + $0x20] sm:$0xff]  }
 0x23f   : > { %v2531_v9 = vpop.f32.mrb[158].mxu0  ;;  %v2989_v48 = vpop.f32.mrb[158].mxu1 }
 0x240   : > { %v9742_v30 = vmax.f32 %v3137_v54, %v3141_v28  ;;  %v3071_v3 = vadd.f32 %v2986_v37, %v2529_v41  ;;  %v2532_v26 = vadd.f32 %v2531_v9, %v9318_v62  ;;  %v2533_v57 = vpop.f32.mrb[159].mxu0  ;;  %5465 = vmatpush1.bf16.msra.mxu0 %v8207_v47  ;;  %v2991_v43 = vpop.f32.mrb[159].mxu1  ;;  %5923 = vmatpush1.bf16.msra.mxu1 %v8208_v31  ;;  %v9778_v41 = vld [vmem:[%s8367_s10 + $0x350] ss:$8 sps:$4 sm:$0xff]   ;;  %v9786_v9 = vld [vmem:[%s8367_s10 + $0x364] ss:$8 sps:$4 sm:$0xff]  }
 0x241   : > { %5466 = vmatprep.subr.bf16.mxu0 %v10425_v61  ;;  %5924 = vmatprep.subr.bf16.mxu1 %v10425_v61 }
 0x242   : > { %v3110_v54 = vadd.f32 %v9565_v8, %v3071_v3  ;;  %v3072_v62 = vadd.f32 %v2989_v48, %v2532_v26  ;;  %4455 = vmatmul.mubr.bf16.gmra.mrb[8].mxu0 %v9403_v34  ;;  %5100 = vmatmul.mubr.bf16.gmra.mrb[8].mxu1 %v9738_v16 }
 0x243   : > { %7542 = vmatprep.mubr.msk.bf16.mxu0 %vm472_vm0, %v9407_v55  ;;  %7682 = vmatprep.mubr.msk.bf16.mxu1 %vm472_vm0, %v9746_v22  ;;  %v8233_v55 = vld [vmem:[%s10412_s1 + $0xb8] sm:$0xff]  }
 0x244   : > { %v3142_v42 = vmax.f32 %v3110_v54, 0.0  ;;  %v3111_v50 = vadd.f32 %v9565_v8, %v3072_v62  ;;  %5467 = vmatpush1.bf16.msra.mxu0 %v8218_v15  ;;  %5925 = vmatpush1.bf16.msra.mxu1 %v8219_v5 }
 0x245   : > { %v2536_v34 = vpop.f32.mrb[160].mxu0  ;;  %5468 = vmatprep.subr.bf16.mxu0 %v10425_v61  ;;  %v2994_v47 = vpop.f32.mrb[160].mxu1  ;;  %5926 = vmatprep.subr.bf16.mxu1 %v10425_v61 }
 0x246   : > { %v9773_v39 = vmax.f32 %v3138_v19, %v3142_v42  ;;  %v3143_v46 = vmax.f32 %v3111_v50, 0.0  ;;  %v2537_v17 = vadd.f32 %v2536_v34, %v9351_v29  ;;  %v2538_v13 = vpop.f32.mrb[161].mxu0  ;;  %v2996_v31 = vpop.f32.mrb[161].mxu1  ;;  %v8241_v29 = vld [vmem:[%s10412_s1 + $0x30] sm:$0xff]  }
 0x247   : > { %v2539_v28 = vpop.f32.mrb[162].mxu0  ;;  %v2997_v19 = vpop.f32.mrb[162].mxu1 }
 0x248   : > { %v9782_v37 = vmax.f32 %v3139_v1, %v3143_v46  ;;  %v3073_v27 = vadd.f32 %v2994_v47, %v2537_v17  ;;  %v2540_v52 = vadd.f32 %v2539_v28, %v9364_v49  ;;  %v2541_v6 = vpop.f32.mrb[163].mxu0  ;;  %5469 = vmatpush1.bf16.msra.mxu0 %v8232_v53  ;;  %v2999_v3 = vpop.f32.mrb[163].mxu1  ;;  %5927 = vmatpush1.bf16.msra.mxu1 %v8233_v55  ;;  %v9823_v53 = vld [vmem:[%s8367_s10 + $0x360] ss:$8 sps:$4 sm:$0xff]  }
 0x249   : > { %5470 = vmatprep.subr.bf16.mxu0 %v10425_v61  ;;  %5928 = vmatprep.subr.bf16.mxu1 %v10425_v61  ;;  %v8254_v47 = vld [vmem:[%s10412_s1 + $0x40] sm:$0xff]  }
 0x24a   : > { %v9796_v1 = vadd.f32 %v9565_v8, %v3073_v27  ;;  %v3074_v49 = vadd.f32 %v2997_v19, %v2540_v52  ;;  %4463 = vmatmul.mubr.bf16.gmra.mrb[12].mxu0 %v9440_v33  ;;  %5108 = vmatmul.mubr.bf16.gmra.mrb[12].mxu1 %v9778_v41  ;;  %v8246_v33 = vld [vmem:[%s10412_s1 + $0x38] sm:$0xff]  }
 0x24b   : > { %7543 = vmatprep.mubr.msk.bf16.mxu0 %vm472_vm0, %v9444_v44  ;;  %7683 = vmatprep.mubr.msk.bf16.mxu1 %vm472_vm0, %v9786_v9  ;;  %v8247_v44 = vld [vmem:[%s10412_s1 + $0xc8] sm:$0xff]  }
 0x24c   : > { %v3144_v26 = vmax.f32 %v9796_v1, 0.0  ;;  %v9805_v48 = vadd.f32 %v9565_v8, %v3074_v49  ;;  %5471 = vmatpush1.bf16.msra.mxu0 %v8241_v29  ;;  %5929 = vmatpush1.bf16.msra.mxu1 %v8242_v60  ;;  %v9859_v60 = vld [vmem:[%s8367_s10 + $0x370] ss:$8 sps:$4 sm:$0xff]   ;;  %v9887_v1 = vld [vmem:[%s8367_s10 + $0x394] ss:$8 sps:$4 sm:$0xff]  }
 0x24d   : > { %v2544_v57 = vpop.f32.mrb[164].mxu0  ;;  %5472 = vmatprep.subr.bf16.mxu0 %v10425_v61  ;;  %v3002_v54 = vpop.f32.mrb[164].mxu1  ;;  %5930 = vmatprep.subr.bf16.mxu1 %v10425_v61 }
 0x24e   : > { %v6364_v15 = vmax.f32 %v9733_v0, %v3144_v26  ;;  %v3145_v43 = vmax.f32 %v9805_v48, 0.0  ;;  %v2545_v5 = vadd.f32 %v2544_v57, %v9400_v32  ;;  %v2546_v62 = vpop.f32.mrb[165].mxu0  ;;  %v3004_v42 = vpop.f32.mrb[165].mxu1  ;;  %v9831_v32 = vld [vmem:[%s8367_s10 + $0x374] ss:$8 sps:$4 sm:$0xff]  }
 0x24f   : > { %v2547_v50 = vpop.f32.mrb[166].mxu0  ;;  %v3005_v46 = vpop.f32.mrb[166].mxu1 }
 0x250   : > { %7876 = vst [vmem:[%s9213_s21 + $0xa0] sm:$0xff] %v6364_v15  ;;  %v6365_v34 = vmax.f32 %v9742_v30, %v3145_v43  ;;  %v3075_v55 = vadd.f32 %v3002_v54, %v2545_v5  ;;  %v2548_v0 = vadd.f32 %v2547_v50, %v9414_v20  ;;  %v2549_v17 = vpop.f32.mrb[167].mxu0  ;;  %5473 = vmatpush1.bf16.msra.mxu0 %v8246_v33  ;;  %v3007_v13 = vpop.f32.mrb[167].mxu1  ;;  %v8255_v30 = vld [vmem:[%s10412_s1 + $0xd0] sm:$0xff]  }
 0x251   : > { %5931 = vmatpush1.bf16.msra.mxu1 %v8247_v44  ;;  %5474 = vmatprep.subr.bf16.mxu0 %v10425_v61  ;;  %v9880_v17 = vld [vmem:[%s8367_s10 + $0x380] ss:$8 sps:$4 sm:$0xff]  }
 0x252   : > { %7877 = vst [vmem:[%s9213_s21 + $0xa8] sm:$0xff] %v6365_v34  ;;  %v9842_v20 = vadd.f32 %v9565_v8, %v3075_v55  ;;  %v3076_v31 = vadd.f32 %v3005_v46, %v2548_v0  ;;  %4471 = vmatmul.mubr.bf16.gmra.mrb[16].mxu0 %v9466_v25  ;;  %5932 = vmatprep.subr.bf16.mxu1 %v10425_v61 }
 0x253   : > { %5116 = vmatmul.mubr.bf16.gmra.mrb[16].mxu1 %v9823_v53  ;;  %7544 = vmatprep.mubr.msk.bf16.mxu0 %vm472_vm0, %v9469_v18 }
 0x254   : > { %v3146_v28 = vmax.f32 %v9842_v20, 0.0  ;;  %v9851_v27 = vadd.f32 %v9565_v8, %v3076_v31  ;;  %7684 = vmatprep.mubr.msk.bf16.mxu1 %vm472_vm0, %v9831_v32  ;;  %5475 = vmatpush1.bf16.msra.mxu0 %v8254_v47 }
 0x255   : > { %v2552_v52 = vpop.f32.mrb[168].mxu0  ;;  %5933 = vmatpush1.bf16.msra.mxu1 %v8255_v30  ;;  %v3010_v18 = vpop.f32.mrb[168].mxu1 }
 0x256   : > { %v6366_v25 = vmax.f32 %v9773_v39, %v3146_v28  ;;  %v3147_v61 = vmax.f32 %v9851_v27, 0.0  ;;  %v2553_v19 = vadd.f32 %v2552_v52, %v9437_v56  ;;  %v2554_v6 = vpop.f32.mrb[169].mxu0  ;;  %v3012_v29 = vpop.f32.mrb[169].mxu1  ;;  %v9865_v39 = vld [vmem:[%s8367_s10 + $0x384] ss:$8 sps:$4 sm:$0xff]  }
 0x257   : > { %v2555_v3 = vpop.f32.mrb[170].mxu0  ;;  %v3013_v44 = vpop.f32.mrb[170].mxu1 }
 0x258   : > { %7878 = vst [vmem:[%s9213_s21 + $0xb0] sm:$0xff] %v6366_v25  ;;  %v6367_v49 = vmax.f32 %v9782_v37, %v3147_v61  ;;  %v3077_v33 = vadd.f32 %v3010_v18, %v2553_v19  ;;  %v2556_v57 = vadd.f32 %v2555_v3, %v9449_v24  ;;  %v2557_v15 = vpop.f32.mrb[171].mxu0  ;;  %v3015_v5 = vpop.f32.mrb[171].mxu1  ;;  %v10426_v19 = vld [vmem:[#allocation3_spill] sm:$0xff] }
 0x259   : > { %v10427_v5 = vld [vmem:[#allocation4_spill] sm:$0xff] }
 0x25a   : > { %7879 = vst [vmem:[%s9213_s21 + $0xb8] sm:$0xff] %v6367_v49  ;;  %v3116_v56 = vadd.f32 %v9565_v8, %v3077_v33  ;;  %v3078_v54 = vadd.f32 %v3013_v44, %v2556_v57  ;;  %4479 = vmatmul.mubr.bf16.gmra.mrb[20].mxu0 %v9486_v2  ;;  %v9899_v33 = vld [vmem:[%s8367_s10 + $0x390] ss:$8 sps:$4 sm:$0xff]   ;;  %v8222_v57 = vld [vmem:[%s8367_s10 + $0x2c4] ss:$8 sps:$4 sm:$0xff]  }
 0x25b   : > { %5124 = vmatmul.mubr.bf16.gmra.mrb[20].mxu1 %v9859_v60  ;;  %7545 = vmatprep.mubr.msk.bf16.mxu0 %vm472_vm0, %v9489_v10  ;;  %v8214_v10 = vld [vmem:[%s8367_s10 + $0x2b4] ss:$8 sps:$4 sm:$0xff]  }
 0x25c   : > { %v3148_v37 = vmax.f32 %v3116_v56, 0.0  ;;  %v3117_v24 = vadd.f32 %v9565_v8, %v3078_v54  ;;  %7685 = vmatprep.mubr.msk.bf16.mxu1 %vm472_vm0, %v9865_v39 }
 0x25d   : > { %v2560_v62 = vpop.f32.mrb[172].mxu0  ;;  %v3018_v2 = vpop.f32.mrb[172].mxu1 }
 0x25e   : > { %v6382_v42 = vmax.f32 %v3144_v26, %v3148_v37  ;;  %v3149_v50 = vmax.f32 %v3117_v24, 0.0  ;;  %v2561_v34 = vadd.f32 %v2560_v62, %v9463_v12  ;;  %v2562_v55 = vpop.f32.mrb[173].mxu0  ;;  %v3020_v0 = vpop.f32.mrb[173].mxu1  ;;  %v9904_v24 = vld [vmem:[%s8367_s10 + $0x3a4] ss:$8 sps:$4 sm:$0xff]  }
 0x25f   : > { %v2563_v46 = vpop.f32.mrb[174].mxu0  ;;  %v3021_v20 = vpop.f32.mrb[174].mxu1 }
 0x260   : > { %v6383_v47 = vmax.f32 %v3145_v43, %v3149_v50  ;;  %v3079_v13 = vadd.f32 %v3018_v2, %v2561_v34  ;;  %v2564_v30 = vadd.f32 %v2563_v46, %v9473_v23  ;;  %v2565_v31 = vpop.f32.mrb[175].mxu0  ;;  %v3023_v26 = vpop.f32.mrb[175].mxu1  ;;  %v10428_v46 = vld [vmem:[#allocation5_spill] sm:$0xff] }
 0x262   : > { %v3118_v12 = vadd.f32 %v9565_v8, %v3079_v13  ;;  %v3080_v27 = vadd.f32 %v3021_v20, %v2564_v30  ;;  %4487 = vmatmul.mubr.bf16.gmra.mrb[24].mxu0 %v9507_v4  ;;  %v8212_v4 = vld [vmem:[%s8367_s10 + $0x2b0] ss:$8 sps:$4 sm:$0xff]   ;;  %v8220_v20 = vld [vmem:[%s8367_s10 + $0x2c0] ss:$8 sps:$4 sm:$0xff]  }
 0x263   : > { %5132 = vmatmul.mubr.bf16.gmra.mrb[24].mxu1 %v9880_v17  ;;  %7546 = vmatprep.mubr.msk.bf16.mxu0 %vm472_vm0, %v8214_v10 }
 0x264   : > { %v3150_v48 = vmax.f32 %v3118_v12, 0.0  ;;  %v3119_v23 = vadd.f32 %v9565_v8, %v3080_v27  ;;  %7686 = vmatprep.mubr.msk.bf16.mxu1 %vm472_vm0, %v9887_v1  ;;  %v9921_v12 = vld [vmem:[%s8367_s10 + $0x3a0] ss:$8 sps:$4 sm:$0xff]   ;;  %v8228_v27 = vld [vmem:[%s8367_s10 + $0x2d4] ss:$8 sps:$4 sm:$0xff]  }
 0x265   : > { %v2568_v43 = vpop.f32.mrb[176].mxu0  ;;  %v3026_v6 = vpop.f32.mrb[176].mxu1 }
 0x266   : > { %v6384_v52 = vmax.f32 %v3146_v28, %v3150_v48  ;;  %v3151_v25 = vmax.f32 %v3119_v23, 0.0  ;;  %v2569_v18 = vadd.f32 %v2568_v43, %v10426_v19  ;;  %v2570_v29 = vpop.f32.mrb[177].mxu0  ;;  %v3028_v3 = vpop.f32.mrb[177].mxu1  ;;  %v10429_v43 = vld [vmem:[#allocation6_spill] sm:$0xff] }
 0x267   : > { %v2571_v49 = vpop.f32.mrb[178].mxu0  ;;  %v3029_v54 = vpop.f32.mrb[178].mxu1 }
 0x268   : > { %v6385_v44 = vmax.f32 %v3147_v61, %v3151_v25  ;;  %v3081_v15 = vadd.f32 %v3026_v6, %v2569_v18  ;;  %v2572_v56 = vadd.f32 %v2571_v49, %v10427_v5  ;;  %v2573_v37 = vpop.f32.mrb[179].mxu0  ;;  %v3031_v28 = vpop.f32.mrb[179].mxu1  ;;  %v9927_v18 = vld [vmem:[%s8367_s10 + $0x3b4] ss:$8 sps:$4 sm:$0xff]   ;;  %v10430_v5 = vld [vmem:[#allocation7_spill] sm:$0xff] }
 0x269   : > { %v8226_v28 = vld [vmem:[%s8367_s10 + $0x2d0] ss:$8 sps:$4 sm:$0xff]  }
 0x26a   : > { %v9907_v62 = vadd.f32 %v9565_v8, %v3081_v15  ;;  %v3082_v50 = vadd.f32 %v3029_v54, %v2572_v56  ;;  %4495 = vmatmul.mubr.bf16.gmra.mrb[28].mxu0 %v8212_v4 }
 0x26b   : > { %5140 = vmatmul.mubr.bf16.gmra.mrb[28].mxu1 %v9899_v33  ;;  %7547 = vmatprep.mubr.msk.bf16.mxu0 %vm472_vm0, %v8222_v57 }
 0x26c   : > { %v3152_v61 = vmax.f32 %v9907_v62, 0.0  ;;  %v9913_v34 = vadd.f32 %v9565_v8, %v3082_v50  ;;  %7687 = vmatprep.mubr.msk.bf16.mxu1 %vm472_vm0, %v9904_v24 }
 0x26d   : > { %v2576_v2 = vpop.f32.mrb[180].mxu0  ;;  %v3034_v13 = vpop.f32.mrb[180].mxu1 }
 0x26e   : > { %v6391_v55 = vmax.f32 %v6382_v42, %v3152_v61  ;;  %v3153_v0 = vmax.f32 %v9913_v34, 0.0  ;;  %v2577_v10 = vadd.f32 %v2576_v2, %v10428_v46  ;;  %v2578_v30 = vpop.f32.mrb[181].mxu0  ;;  %v3036_v31 = vpop.f32.mrb[181].mxu1  ;;  %v9942_v34 = vld [vmem:[%s8367_s10 + $0x3b0] ss:$8 sps:$4 sm:$0xff]   ;;  %v10431_v46 = vld [vmem:[#allocation8_spill] sm:$0xff] }
 0x26f   : > { %v2579_v26 = vpop.f32.mrb[182].mxu0  ;;  %v3037_v42 = vpop.f32.mrb[182].mxu1 }
 0x270   : > { %7880 = vst [vmem:[%s9213_s21 + $0xc0] sm:$0xff] %v6391_v55  ;;  %v6392_v48 = vmax.f32 %v6383_v47, %v3153_v0  ;;  %v3083_v23 = vadd.f32 %v3034_v13, %v2577_v10  ;;  %v2580_v25 = vadd.f32 %v2579_v26, %v10429_v43  ;;  %v2581_v19 = vpop.f32.mrb[183].mxu0  ;;  %v3039_v6 = vpop.f32.mrb[183].mxu1 }
 0x272   : > { %7881 = vst [vmem:[%s9213_s21 + $0xc8] sm:$0xff] %v6392_v48  ;;  %v3122_v29 = vadd.f32 %v9565_v8, %v3083_v23  ;;  %v3084_v4 = vadd.f32 %v3037_v42, %v2580_v25  ;;  %4503 = vmatmul.mubr.bf16.gmra.mrb[32].mxu0 %v8220_v20  ;;  %v10432_v25 = vld [vmem:[#allocation9_spill] sm:$0xff] }
 0x273   : > { %5148 = vmatmul.mubr.bf16.gmra.mrb[32].mxu1 %v9921_v12  ;;  %7548 = vmatprep.mubr.msk.bf16.mxu0 %vm472_vm0, %v8228_v27 }
 0x274   : > { %v3154_v47 = vmax.f32 %v3122_v29, 0.0  ;;  %v9934_v3 = vadd.f32 %v9565_v8, %v3084_v4  ;;  %7688 = vmatprep.mubr.msk.bf16.mxu1 %vm472_vm0, %v9927_v18 }
 0x275   : > { %v2584_v49 = vpop.f32.mrb[184].mxu0  ;;  %v3042_v54 = vpop.f32.mrb[184].mxu1 }
 0x276   : > { %v6393_v57 = vmax.f32 %v6384_v52, %v3154_v47  ;;  %v3155_v15 = vmax.f32 %v9934_v3, 0.0  ;;  %v2585_v56 = vadd.f32 %v2584_v49, %v10430_v5  ;;  %v2586_v37 = vpop.f32.mrb[185].mxu0  ;;  %v3044_v62 = vpop.f32.mrb[185].mxu1  ;;  %v9947_v52 = vld [vmem:[%s8367_s10 + $0x3c4] ss:$8 sps:$4 sm:$0xff]  }
 0x277   : > { %v2587_v50 = vpop.f32.mrb[186].mxu0  ;;  %v3045_v13 = vpop.f32.mrb[186].mxu1  ;;  %v9961_v3 = vld [vmem:[%s8367_s10 + $0x3c0] ss:$8 sps:$4 sm:$0xff]   ;;  %v9967_v37 = vld [vmem:[%s8367_s10 + $0x3d4] ss:$8 sps:$4 sm:$0xff]  }
 0x278   : > { %7882 = vst [vmem:[%s9213_s21 + $0xd0] sm:$0xff] %v6393_v57  ;;  %v6394_v2 = vmax.f32 %v6385_v44, %v3155_v15  ;;  %v3085_v55 = vadd.f32 %v3042_v54, %v2585_v56  ;;  %v2588_v10 = vadd.f32 %v2587_v50, %v10431_v46  ;;  %v2589_v30 = vpop.f32.mrb[187].mxu0  ;;  %v3047_v20 = vpop.f32.mrb[187].mxu1  ;;  %v10433_v57 = vld [vmem:[#allocation10_spill] sm:$0xff] }
 0x27a   : > { %7883 = vst [vmem:[%s9213_s21 + $0xd8] sm:$0xff] %v6394_v2  ;;  %v3124_v31 = vadd.f32 %v9565_v8, %v3085_v55  ;;  %v3086_v26 = vadd.f32 %v3045_v13, %v2588_v10  ;;  %4511 = vmatmul.mubr.bf16.gmra.mrb[36].mxu0 %v8226_v28 }
 0x27b   : > { %5156 = vmatmul.mubr.bf16.gmra.mrb[36].mxu1 %v9942_v34  ;;  %7549 = vmatprep.mubr.msk.bf16.mxu0 %vm472_vm0, %v9567_v63 }
 0x27c   : > { %v3156_v44 = vmax.f32 %v3124_v31, 0.0  ;;  %v3125_v27 = vadd.f32 %v9565_v8, %v3086_v26  ;;  %7689 = vmatprep.mubr.msk.bf16.mxu1 %vm472_vm0, %v9947_v52  ;;  %v9982_v31 = vld [vmem:[%s8367_s10 + $0x3d0] ss:$8 sps:$4 sm:$0xff]  }
 0x27d   : > { %v2592_v48 = vpop.f32.mrb[188].mxu0  ;;  %v3050_v19 = vpop.f32.mrb[188].mxu1 }
 0x27e   : > { %v9957_v23 = vmax.f32 %v3152_v61, %v3156_v44  ;;  %v3157_v43 = vmax.f32 %v3125_v27, 0.0  ;;  %v2593_v42 = vadd.f32 %v2592_v48, %v10432_v25  ;;  %v2594_v6 = vpop.f32.mrb[189].mxu0  ;;  %v3052_v29 = vpop.f32.mrb[189].mxu1  ;;  %v9987_v44 = vld [vmem:[%s8367_s10 + $0x3e4] ss:$8 sps:$4 sm:$0xff]  }
 0x27f   : > { %v2595_v4 = vpop.f32.mrb[190].mxu0  ;;  %v3053_v56 = vpop.f32.mrb[190].mxu1  ;;  %v10000_v6 = vld [vmem:[%s8367_s10 + $0x3e0] ss:$8 sps:$4 sm:$0xff]  }
 0x280   : > { %v9963_v63 = vmax.f32 %v3153_v0, %v3157_v43  ;;  %v3087_v49 = vadd.f32 %v3050_v19, %v2593_v42  ;;  %v2596_v5 = vadd.f32 %v2595_v4, %v10433_v57  ;;  %v2597_v54 = vpop.f32.mrb[191].mxu0  ;;  %v3055_v61 = vpop.f32.mrb[191].mxu1  ;;  %v10003_v4 = vld [vmem:[%s8367_s10 + $0x3f4] ss:$8 sps:$4 sm:$0xff]  }
 0x282   : > { %v3126_v28 = vadd.f32 %v9565_v8, %v3087_v49  ;;  %v3088_v62 = vadd.f32 %v3053_v56, %v2596_v5  ;;  %4519 = vmatmul.mubr.bf16.gmra.mrb[40].mxu0 %v9580_v35 }
 0x283   : > { %5164 = vmatmul.mubr.bf16.gmra.mrb[40].mxu1 %v9961_v3  ;;  %7550 = vmatprep.mubr.msk.bf16.mxu0 %vm472_vm0, %v9583_v36 }
 0x284   : > { %v3158_v0 = vmax.f32 %v3126_v28, 0.0  ;;  %v3127_v50 = vadd.f32 %v9565_v8, %v3088_v62  ;;  %7690 = vmatprep.mubr.msk.bf16.mxu1 %vm472_vm0, %v9967_v37  ;;  %v10016_v62 = vld [vmem:[%s8367_s10 + $0x3f0] ss:$8 sps:$4 sm:$0xff]  }
 0x285   : > { %v3575_v2 = vpop.f32.mrb[192].mxu0  ;;  %v3982_v10 = vpop.f32.mrb[192].mxu1 }
 0x286   : > { %v9977_v55 = vmax.f32 %v3154_v47, %v3158_v0  ;;  %v3159_v46 = vmax.f32 %v3127_v50, 0.0  ;;  %v3577_v13 = vpop.f32.mrb[193].mxu0  ;;  %v9979_v30 = vadd.f32 %v3982_v10, %v3575_v2  ;;  %v3984_v35 = vpop.f32.mrb[193].mxu1  ;;  %v10019_v50 = vld [vmem:[%s8367_s10 + $0x404] ss:$8 sps:$4 sm:$0xff]  }
 0x287   : > { %v3578_v20 = vpop.f32.mrb[194].mxu0  ;;  %v3985_v26 = vpop.f32.mrb[194].mxu1 }
 0x288   : > { %v9984_v36 = vmax.f32 %v3155_v15, %v3159_v46  ;;  %v3580_v8 = vpop.f32.mrb[195].mxu0  ;;  %v9989_v27 = vadd.f32 %v3985_v26, %v3578_v20  ;;  %v3987_v47 = vpop.f32.mrb[195].mxu1 }
 0x289   : > { %v10032_v8 = vld [vmem:[%s8367_s10 + $0x400] ss:$8 sps:$4 sm:$0xff]  }
 0x28a   : > { %4527 = vmatmul.mubr.bf16.gmra.mrb[44].mxu0 %v9598_v38 }
 0x28b   : > { %5172 = vmatmul.mubr.bf16.gmra.mrb[44].mxu1 %v9982_v31  ;;  %7551 = vmatprep.mubr.msk.bf16.mxu0 %vm472_vm0, %v9601_v11 }
 0x28c   : > { %7691 = vmatprep.mubr.msk.bf16.mxu1 %vm472_vm0, %v9987_v44 }
 0x28d   : > { %v3583_v15 = vpop.f32.mrb[196].mxu0  ;;  %v3990_v48 = vpop.f32.mrb[196].mxu1 }
 0x28e   : > { %v3585_v43 = vpop.f32.mrb[197].mxu0  ;;  %v9997_v25 = vadd.f32 %v3990_v48, %v3583_v15  ;;  %v3992_v42 = vpop.f32.mrb[197].mxu1  ;;  %v10035_v15 = vld [vmem:[%s8367_s10 + $0x414] ss:$8 sps:$4 sm:$0xff]  }
 0x28f   : > { %v3586_v19 = vpop.f32.mrb[198].mxu0  ;;  %v3993_v29 = vpop.f32.mrb[198].mxu1 }
 0x290   : > { %v3588_v38 = vpop.f32.mrb[199].mxu0  ;;  %v10005_v49 = vadd.f32 %v3993_v29, %v3586_v19  ;;  %v3995_v11 = vpop.f32.mrb[199].mxu1 }
 0x292   : > { %4535 = vmatmul.mubr.bf16.gmra.mrb[48].mxu0 %v9616_v45 }
 0x293   : > { %5180 = vmatmul.mubr.bf16.gmra.mrb[48].mxu1 %v10000_v6  ;;  %7552 = vmatprep.mubr.msk.bf16.mxu0 %vm472_vm0, %v9619_v14 }
 0x294   : > { %7692 = vmatprep.mubr.msk.bf16.mxu1 %vm472_vm0, %v10003_v4 }
 0x295   : > { %v3591_v57 = vpop.f32.mrb[200].mxu0  ;;  %v3998_v5 = vpop.f32.mrb[200].mxu1 }
 0x296   : > { %v3593_v56 = vpop.f32.mrb[201].mxu0  ;;  %v10013_v54 = vadd.f32 %v3998_v5, %v3591_v57  ;;  %v4000_v61 = vpop.f32.mrb[201].mxu1  ;;  %v10048_v57 = vld [vmem:[%s8367_s10 + $0x410] ss:$8 sps:$4 sm:$0xff]   ;;  %v8261_v5 = vld [vmem:[%s8367_s10 + $0x304] ss:$8 sps:$4 sm:$0xff]  }
 0x297   : > { %v3594_v28 = vpop.f32.mrb[202].mxu0  ;;  %v4001_v0 = vpop.f32.mrb[202].mxu1 }
 0x298   : > { %v3596_v45 = vpop.f32.mrb[203].mxu0  ;;  %v10021_v2 = vadd.f32 %v4001_v0, %v3594_v28  ;;  %v4003_v14 = vpop.f32.mrb[203].mxu1 }
 0x299   : > { %v8259_v14 = vld [vmem:[%s8367_s10 + $0x300] ss:$8 sps:$4 sm:$0xff]  }
 0x29a   : > { %4543 = vmatmul.mubr.bf16.gmra.mrb[52].mxu0 %v9632_v40 }
 0x29b   : > { %5188 = vmatmul.mubr.bf16.gmra.mrb[52].mxu1 %v10016_v62  ;;  %7553 = vmatprep.mubr.msk.bf16.mxu0 %vm472_vm0, %v9636_v58 }
 0x29c   : > { %7693 = vmatprep.mubr.msk.bf16.mxu1 %vm472_vm0, %v10019_v50 }
 0x29d   : > { %v3599_v46 = vpop.f32.mrb[204].mxu0  ;;  %v4006_v10 = vpop.f32.mrb[204].mxu1 }
 0x29e   : > { %v3601_v13 = vpop.f32.mrb[205].mxu0  ;;  %v10029_v35 = vadd.f32 %v4006_v10, %v3599_v46  ;;  %v4008_v20 = vpop.f32.mrb[205].mxu1 }
 0x29f   : > { %v3602_v26 = vpop.f32.mrb[206].mxu0  ;;  %v4009_v47 = vpop.f32.mrb[206].mxu1  ;;  %v8264_v20 = vld [vmem:[%s8367_s10 + $0x314] ss:$8 sps:$4 sm:$0xff]  }
 0x2a0   : > { %v3604_v40 = vpop.f32.mrb[207].mxu0  ;;  %v10037_v48 = vadd.f32 %v4009_v47, %v3602_v26  ;;  %v4011_v58 = vpop.f32.mrb[207].mxu1 }
 0x2a2   : > { %4551 = vmatmul.mubr.bf16.gmra.mrb[56].mxu0 %v9656_v51 }
 0x2a3   : > { %5196 = vmatmul.mubr.bf16.gmra.mrb[56].mxu1 %v10032_v8  ;;  %7554 = vmatprep.mubr.msk.bf16.mxu0 %vm472_vm0, %v9669_v21 }
 0x2a4   : > { %7694 = vmatprep.mubr.msk.bf16.mxu1 %vm472_vm0, %v10035_v15 }
 0x2a5   : > { %v3607_v43 = vpop.f32.mrb[208].mxu0  ;;  %v4014_v42 = vpop.f32.mrb[208].mxu1 }
 0x2a6   : > { %v3609_v19 = vpop.f32.mrb[209].mxu0  ;;  %v10045_v29 = vadd.f32 %v4014_v42, %v3607_v43  ;;  %v4016_v38 = vpop.f32.mrb[209].mxu1  ;;  %v8262_v42 = vld [vmem:[%s8367_s10 + $0x310] ss:$8 sps:$4 sm:$0xff]  }
 0x2a7   : > { %v3610_v11 = vpop.f32.mrb[210].mxu0  ;;  %v4017_v51 = vpop.f32.mrb[210].mxu1 }
 0x2a8   : > { %v3612_v56 = vpop.f32.mrb[211].mxu0  ;;  %v10051_v61 = vadd.f32 %v4017_v51, %v3610_v11  ;;  %v4019_v21 = vpop.f32.mrb[211].mxu1 }
 0x2aa   : > { %4559 = vmatmul.mubr.bf16.gmra.mrb[60].mxu0 %v9698_v7 }
 0x2ab   : > { %5204 = vmatmul.mubr.bf16.gmra.mrb[60].mxu1 %v10048_v57  ;;  %7736 = vmatprep.mubr.msk.bf16.mxu0 %vm472_vm0, %v8261_v5  ;;  %v8267_v5 = vld [vmem:[%s8367_s10 + $0x324] ss:$8 sps:$4 sm:$0xff]  }
 0x2ac   : > { %7843 = vmatprep.mubr.msk.bf16.mxu1 %vm472_vm0, %v9705_v59 }
 0x2ad   : > { %v3615_v28 = vpop.f32.mrb[212].mxu0  ;;  %v4022_v0 = vpop.f32.mrb[212].mxu1 }
 0x2ae   : > { %v3617_v45 = vpop.f32.mrb[213].mxu0  ;;  %v10059_v46 = vadd.f32 %v4022_v0, %v3615_v28  ;;  %v4024_v10 = vpop.f32.mrb[213].mxu1 }
 0x2af   : > { %v3618_v13 = vpop.f32.mrb[214].mxu0  ;;  %v4025_v26 = vpop.f32.mrb[214].mxu1  ;;  %v8265_v45 = vld [vmem:[%s8367_s10 + $0x320] ss:$8 sps:$4 sm:$0xff]  }
 0x2b0   : > { %v3620_v7 = vpop.f32.mrb[215].mxu0  ;;  %v10062_v47 = vadd.f32 %v4025_v26, %v3618_v13  ;;  %v4027_v40 = vpop.f32.mrb[215].mxu1 }
 0x2b2   : > { %5491 = vmatmul.mubr.bf16.vlgmr.msra.gmra.mrb[64].mxu0 %v8259_v14 }
 0x2b3   : > { %5949 = vmatmul.mubr.bf16.vlgmr.msra.gmra.mrb[64].mxu1 %v9738_v16  ;;  %7737 = vmatprep.mubr.msk.bf16.mxu0 %vm472_vm0, %v8264_v20  ;;  %v8270_v20 = vld [vmem:[%s8367_s10 + $0x334] ss:$8 sps:$4 sm:$0xff]  }
 0x2b4   : > { %7844 = vmatprep.mubr.msk.bf16.mxu1 %vm472_vm0, %v9746_v22 }
 0x2b5   : > { %v3623_v59 = vpop.f32.mrb[216].mxu0  ;;  %v4030_v58 = vpop.f32.mrb[216].mxu1 }
 0x2b6   : > { %v3625_v43 = vpop.f32.mrb[217].mxu0  ;;  %v10069_v19 = vadd.f32 %v4030_v58, %v3623_v59  ;;  %v4032_v38 = vpop.f32.mrb[217].mxu1 }
 0x2b7   : > { %v3626_v11 = vpop.f32.mrb[218].mxu0  ;;  %v4033_v51 = vpop.f32.mrb[218].mxu1 }
 0x2b8   : > { %v3628_v56 = vpop.f32.mrb[219].mxu0  ;;  %v10072_v21 = vadd.f32 %v4033_v51, %v3626_v11  ;;  %v4035_v16 = vpop.f32.mrb[219].mxu1  ;;  %v8273_v51 = vld [vmem:[%s8367_s10 + $0x344] ss:$8 sps:$4 sm:$0xff]  }
 0x2ba   : > { %5499 = vmatmul.mubr.bf16.gmra.mrb[68].mxu0 %v8262_v42  ;;  %v8268_v42 = vld [vmem:[%s8367_s10 + $0x330] ss:$8 sps:$4 sm:$0xff]  }
 0x2bb   : > { %5957 = vmatmul.mubr.bf16.gmra.mrb[68].mxu1 %v9778_v41  ;;  %7738 = vmatprep.mubr.msk.bf16.mxu0 %vm472_vm0, %v8267_v5 }
 0x2bc   : > { %7845 = vmatprep.mubr.msk.bf16.mxu1 %vm472_vm0, %v9786_v9 }
 0x2bd   : > { %v3631_v22 = vpop.f32.mrb[220].mxu0  ;;  %v4038_v28 = vpop.f32.mrb[220].mxu1 }
 0x2be   : > { %v3633_v0 = vpop.f32.mrb[221].mxu0  ;;  %v10079_v14 = vadd.f32 %v4038_v28, %v3631_v22  ;;  %v4040_v10 = vpop.f32.mrb[221].mxu1 }
 0x2bf   : > { %v3634_v13 = vpop.f32.mrb[222].mxu0  ;;  %v4041_v26 = vpop.f32.mrb[222].mxu1 }
 0x2c0   : > { %v3636_v7 = vpop.f32.mrb[223].mxu0  ;;  %v10082_v40 = vadd.f32 %v4041_v26, %v3634_v13  ;;  %v4043_v41 = vpop.f32.mrb[223].mxu1  ;;  %v8271_v13 = vld [vmem:[%s8367_s10 + $0x340] ss:$8 sps:$4 sm:$0xff]  }
 0x2c1   : > { %v8276_v41 = vld [vmem:[%s8367_s10 + $0x354] ss:$8 sps:$4 sm:$0xff]  }
 0x2c2   : > { %5507 = vmatmul.mubr.bf16.gmra.mrb[72].mxu0 %v8265_v45 }
 0x2c3   : > { %5965 = vmatmul.mubr.bf16.gmra.mrb[72].mxu1 %v9823_v53  ;;  %7739 = vmatprep.mubr.msk.bf16.mxu0 %vm472_vm0, %v8270_v20 }
 0x2c4   : > { %7846 = vmatprep.mubr.msk.bf16.mxu1 %vm472_vm0, %v9831_v32 }
 0x2c5   : > { %v3639_v59 = vpop.f32.mrb[224].mxu0  ;;  %v4046_v58 = vpop.f32.mrb[224].mxu1 }
 0x2c6   : > { %v3641_v43 = vpop.f32.mrb[225].mxu0  ;;  %v10089_v38 = vadd.f32 %v4046_v58, %v3639_v59  ;;  %v4048_v11 = vpop.f32.mrb[225].mxu1 }
 0x2c7   : > { %v3642_v5 = vpop.f32.mrb[226].mxu0  ;;  %v4049_v56 = vpop.f32.mrb[226].mxu1 }
 0x2c8   : > { %v3644_v16 = vpop.f32.mrb[227].mxu0  ;;  %v10092_v22 = vadd.f32 %v4049_v56, %v3642_v5  ;;  %v4051_v28 = vpop.f32.mrb[227].mxu1  ;;  %v8274_v56 = vld [vmem:[%s8367_s10 + $0x350] ss:$8 sps:$4 sm:$0xff]  }
 0x2ca   : > { %5515 = vmatmul.mubr.bf16.gmra.mrb[76].mxu0 %v8268_v42 }
 0x2cb   : > { %5973 = vmatmul.mubr.bf16.gmra.mrb[76].mxu1 %v9859_v60  ;;  %7740 = vmatprep.mubr.msk.bf16.mxu0 %vm472_vm0, %v8273_v51 }
 0x2cc   : > { %7847 = vmatprep.mubr.msk.bf16.mxu1 %vm472_vm0, %v9865_v39 }
 0x2cd   : > { %v3647_v0 = vpop.f32.mrb[228].mxu0  ;;  %v4054_v45 = vpop.f32.mrb[228].mxu1 }
 0x2ce   : > { %v3649_v10 = vpop.f32.mrb[229].mxu0  ;;  %v10099_v20 = vadd.f32 %v4054_v45, %v3647_v0  ;;  %v4056_v26 = vpop.f32.mrb[229].mxu1 }
 0x2cf   : > { %v3650_v7 = vpop.f32.mrb[230].mxu0  ;;  %v4057_v59 = vpop.f32.mrb[230].mxu1 }
 0x2d0   : > { %v3652_v58 = vpop.f32.mrb[231].mxu0  ;;  %v10102_v43 = vadd.f32 %v4057_v59, %v3650_v7  ;;  %v4059_v42 = vpop.f32.mrb[231].mxu1 }
 0x2d2   : > { %5523 = vmatmul.mubr.bf16.gmra.mrb[80].mxu0 %v8271_v13 }
 0x2d3   : > { %5981 = vmatmul.mubr.bf16.gmra.mrb[80].mxu1 %v9880_v17  ;;  %7741 = vmatprep.mubr.msk.bf16.mxu0 %vm472_vm0, %v8276_v41 }
 0x2d4   : > { %7848 = vmatprep.mubr.msk.bf16.mxu1 %vm472_vm0, %v9887_v1 }
 0x2d5   : > { %v3655_v11 = vpop.f32.mrb[232].mxu0  ;;  %v4062_v5 = vpop.f32.mrb[232].mxu1 }
 0x2d6   : > { %v3657_v51 = vpop.f32.mrb[233].mxu0  ;;  %v10109_v16 = vadd.f32 %v4062_v5, %v3655_v11  ;;  %v4064_v28 = vpop.f32.mrb[233].mxu1 }
 0x2d7   : > { %v3658_v0 = vpop.f32.mrb[234].mxu0  ;;  %v4065_v45 = vpop.f32.mrb[234].mxu1 }
 0x2d8   : > { %v3660_v10 = vpop.f32.mrb[235].mxu0  ;;  %v10111_v26 = vadd.f32 %v4065_v45, %v3658_v0  ;;  %v4067_v13 = vpop.f32.mrb[235].mxu1 }
 0x2da   : > { %5531 = vmatmul.mubr.bf16.gmra.mrb[84].mxu0 %v8274_v56 }
 0x2db   : > { %5989 = vmatmul.mubr.bf16.gmra.mrb[84].mxu1 %v9899_v33  ;;  %7742 = vmatprep.mubr.msk.bf16.mxu0 %vm472_vm0, %v9786_v9 }
 0x2dc   : > { %7849 = vmatprep.mubr.msk.bf16.mxu1 %vm472_vm0, %v9904_v24 }
 0x2dd   : > { %v3663_v7 = vpop.f32.mrb[236].mxu0  ;;  %v4070_v41 = vpop.f32.mrb[236].mxu1 }
 0x2de   : > { %v3665_v59 = vpop.f32.mrb[237].mxu0  ;;  %v10118_v58 = vadd.f32 %v4070_v41, %v3663_v7  ;;  %v4072_v42 = vpop.f32.mrb[237].mxu1 }
 0x2df   : > { %v3666_v11 = vpop.f32.mrb[238].mxu0  ;;  %v4073_v5 = vpop.f32.mrb[238].mxu1 }
 0x2e0   : > { %v3668_v51 = vpop.f32.mrb[239].mxu0  ;;  %v10120_v28 = vadd.f32 %v4073_v5, %v3666_v11  ;;  %v4075_v56 = vpop.f32.mrb[239].mxu1 }
 0x2e2   : > { %5539 = vmatmul.mubr.bf16.gmra.mrb[88].mxu0 %v9823_v53 }
 0x2e3   : > { %5997 = vmatmul.mubr.bf16.gmra.mrb[88].mxu1 %v9921_v12  ;;  %7743 = vmatprep.mubr.msk.bf16.mxu0 %vm472_vm0, %v9831_v32 }
 0x2e4   : > { %7850 = vmatprep.mubr.msk.bf16.mxu1 %vm472_vm0, %v9927_v18 }
 0x2e5   : > { %v3671_v9 = vpop.f32.mrb[240].mxu0  ;;  %v4078_v0 = vpop.f32.mrb[240].mxu1 }
 0x2e6   : > { %v3673_v45 = vpop.f32.mrb[241].mxu0  ;;  %v10128_v10 = vadd.f32 %v4078_v0, %v3671_v9  ;;  %v4080_v13 = vpop.f32.mrb[241].mxu1 }
 0x2e7   : > { %v3674_v7 = vpop.f32.mrb[242].mxu0  ;;  %v4081_v41 = vpop.f32.mrb[242].mxu1 }
 0x2e8   : > { %v3676_v59 = vpop.f32.mrb[243].mxu0  ;;  %v10130_v42 = vadd.f32 %v4081_v41, %v3674_v7  ;;  %v4083_v53 = vpop.f32.mrb[243].mxu1 }
 0x2ea   : > { %5547 = vmatmul.mubr.bf16.gmra.mrb[92].mxu0 %v9859_v60 }
 0x2eb   : > { %6005 = vmatmul.mubr.bf16.gmra.mrb[92].mxu1 %v9942_v34  ;;  %7744 = vmatprep.mubr.msk.bf16.mxu0 %vm472_vm0, %v9865_v39 }
 0x2ec   : > { %7851 = vmatprep.mubr.msk.bf16.mxu1 %vm472_vm0, %v9947_v52 }
 0x2ed   : > { %v3679_v32 = vpop.f32.mrb[244].mxu0  ;;  %v4086_v11 = vpop.f32.mrb[244].mxu1 }
 0x2ee   : > { %v3681_v5 = vpop.f32.mrb[245].mxu0  ;;  %v10138_v51 = vadd.f32 %v4086_v11, %v3679_v32  ;;  %v4088_v56 = vpop.f32.mrb[245].mxu1 }
 0x2ef   : > { %v3682_v9 = vpop.f32.mrb[246].mxu0  ;;  %v4089_v0 = vpop.f32.mrb[246].mxu1 }
 0x2f0   : > { %v3684_v45 = vpop.f32.mrb[247].mxu0  ;;  %v10140_v13 = vadd.f32 %v4089_v0, %v3682_v9  ;;  %v4091_v60 = vpop.f32.mrb[247].mxu1 }
 0x2f2   : > { %5555 = vmatmul.mubr.bf16.gmra.mrb[96].mxu0 %v9880_v17 }
 0x2f3   : > { %6013 = vmatmul.mubr.bf16.gmra.mrb[96].mxu1 %v9961_v3  ;;  %7745 = vmatprep.mubr.msk.bf16.mxu0 %vm472_vm0, %v9887_v1 }
 0x2f4   : > { %7852 = vmatprep.mubr.msk.bf16.mxu1 %vm472_vm0, %v9967_v37 }
 0x2f5   : > { %v3687_v39 = vpop.f32.mrb[248].mxu0  ;;  %v4094_v7 = vpop.f32.mrb[248].mxu1 }
 0x2f6   : > { %v3689_v41 = vpop.f32.mrb[249].mxu0  ;;  %v10148_v59 = vadd.f32 %v4094_v7, %v3687_v39  ;;  %v4096_v53 = vpop.f32.mrb[249].mxu1 }
 0x2f7   : > { %v3690_v32 = vpop.f32.mrb[250].mxu0  ;;  %v4097_v11 = vpop.f32.mrb[250].mxu1 }
 0x2f8   : > { %v3692_v5 = vpop.f32.mrb[251].mxu0  ;;  %v10150_v56 = vadd.f32 %v4097_v11, %v3690_v32  ;;  %v4099_v17 = vpop.f32.mrb[251].mxu1  ;;  %v10171_v32 = vld [vmem:[%s10413_s2] ss:$0 sm:$0xff] }
 0x2fa   : > { %5563 = vmatmul.mubr.bf16.gmra.mrb[100].mxu0 %v9899_v33 }
 0x2fb   : > { %6021 = vmatmul.mubr.bf16.gmra.mrb[100].mxu1 %v9982_v31  ;;  %7746 = vmatprep.mubr.msk.bf16.mxu0 %vm472_vm0, %v9904_v24 }
 0x2fc   : > { %7853 = vmatprep.mubr.msk.bf16.mxu1 %vm472_vm0, %v9987_v44 }
 0x2fd   : > { %v3695_v1 = vpop.f32.mrb[252].mxu0  ;;  %v4102_v9 = vpop.f32.mrb[252].mxu1 }
 0x2fe   : > { %v3697_v0 = vpop.f32.mrb[253].mxu0  ;;  %v10158_v45 = vadd.f32 %v4102_v9, %v3695_v1  ;;  %v4104_v60 = vpop.f32.mrb[253].mxu1 }
 0x2ff   : > { %v3698_v39 = vpop.f32.mrb[254].mxu0  ;;  %v4105_v7 = vpop.f32.mrb[254].mxu1 }
 0x300   : > { %v3700_v41 = vpop.f32.mrb[255].mxu0  ;;  %v10160_v53 = vadd.f32 %v4105_v7, %v3698_v39  ;;  %v4107_v33 = vpop.f32.mrb[255].mxu1 }
 0x302   : > { %5571 = vmatmul.mubr.bf16.gmra.mrb[104].mxu0 %v9921_v12 }
 0x303   : > { %6029 = vmatmul.mubr.bf16.gmra.mrb[104].mxu1 %v10000_v6  ;;  %7747 = vmatprep.mubr.msk.bf16.mxu0 %vm472_vm0, %v9927_v18 }
 0x304   : > { %7854 = vmatprep.mubr.msk.bf16.mxu1 %vm472_vm0, %v10003_v4 }
 0x305   : > { %v4440_v24 = vpop.f32.mrb[0].mxu0  ;;  %v10174_v5 = vpop.f32.mrb[0].mxu1 }
 0x306   : > { %v4567_v11 = vadd.f32 %v4440_v24, %v9979_v30  ;;  %v4442_v17 = vpop.f32.mrb[1].mxu0  ;;  %v5087_v12 = vpop.f32.mrb[1].mxu1 }
 0x307   : > { %v4443_v1 = vpop.f32.mrb[2].mxu0  ;;  %v10178_v0 = vpop.f32.mrb[2].mxu1 }
 0x308   : > { %v4606_v9 = vadd.f32 %v10171_v32, %v4567_v11  ;;  %v4568_v18 = vadd.f32 %v4443_v1, %v9989_v27  ;;  %v4445_v60 = vpop.f32.mrb[3].mxu0  ;;  %v5090_v39 = vpop.f32.mrb[3].mxu1 }
 0x30a   : > { %v4638_v7 = vmax.f32 %v4606_v9, 0.0  ;;  %v4607_v41 = vadd.f32 %v10171_v32, %v4568_v18  ;;  %5579 = vmatmul.mubr.bf16.gmra.mrb[108].mxu0 %v9942_v34 }
 0x30b   : > { %6037 = vmatmul.mubr.bf16.gmra.mrb[108].mxu1 %v10016_v62  ;;  %7748 = vmatprep.mubr.msk.bf16.mxu0 %vm472_vm0, %v9947_v52 }
 0x30c   : > { %v6417_v30 = vmax.f32 %v9957_v23, %v4638_v7  ;;  %v4639_v33 = vmax.f32 %v4607_v41, 0.0  ;;  %7855 = vmatprep.mubr.msk.bf16.mxu1 %vm472_vm0, %v10019_v50 }
 0x30d   : > { %v4448_v27 = vpop.f32.mrb[4].mxu0  ;;  %v10191_v17 = vpop.f32.mrb[4].mxu1 }
 0x30e   : > { %7884 = vst [vmem:[%s9213_s21 + $0xe0] sm:$0xff] %v6417_v30  ;;  %v6418_v24 = vmax.f32 %v9963_v63, %v4639_v33  ;;  %v4569_v11 = vadd.f32 %v4448_v27, %v9997_v25  ;;  %v4450_v34 = vpop.f32.mrb[5].mxu0  ;;  %v5095_v12 = vpop.f32.mrb[5].mxu1 }
 0x30f   : > { %v4451_v1 = vpop.f32.mrb[6].mxu0  ;;  %v10196_v9 = vpop.f32.mrb[6].mxu1 }
 0x310   : > { %7885 = vst [vmem:[%s9213_s21 + $0xe8] sm:$0xff] %v6418_v24  ;;  %v4608_v52 = vadd.f32 %v10171_v32, %v4569_v11  ;;  %v4570_v23 = vadd.f32 %v4451_v1, %v10005_v49  ;;  %v4453_v50 = vpop.f32.mrb[7].mxu0  ;;  %v5098_v18 = vpop.f32.mrb[7].mxu1 }
 0x312   : > { %v4640_v60 = vmax.f32 %v4608_v52, 0.0  ;;  %v4609_v63 = vadd.f32 %v10171_v32, %v4570_v23  ;;  %5587 = vmatmul.mubr.bf16.gmra.mrb[112].mxu0 %v9961_v3 }
 0x313   : > { %6045 = vmatmul.mubr.bf16.gmra.mrb[112].mxu1 %v10032_v8  ;;  %7749 = vmatprep.mubr.msk.bf16.mxu0 %vm472_vm0, %v9967_v37 }
 0x314   : > { %v6419_v25 = vmax.f32 %v9977_v55, %v4640_v60  ;;  %v4641_v39 = vmax.f32 %v4609_v63, 0.0  ;;  %7856 = vmatprep.mubr.msk.bf16.mxu1 %vm472_vm0, %v10035_v15  ;;  %v8279_v15 = vld [vmem:[%s8367_s10 + $0x424] ss:$8 sps:$4 sm:$0xff]  }
 0x315   : > { %v4456_v49 = vpop.f32.mrb[8].mxu0  ;;  %v10209_v27 = vpop.f32.mrb[8].mxu1 }
 0x316   : > { %7886 = vst [vmem:[%s9213_s21 + $0xf0] sm:$0xff] %v6419_v25  ;;  %v6420_v41 = vmax.f32 %v9984_v36, %v4641_v39  ;;  %v4571_v30 = vadd.f32 %v4456_v49, %v10013_v54  ;;  %v4458_v3 = vpop.f32.mrb[9].mxu0  ;;  %v5103_v8 = vpop.f32.mrb[9].mxu1 }
 0x317   : > { %v4459_v24 = vpop.f32.mrb[10].mxu0  ;;  %v10214_v11 = vpop.f32.mrb[10].mxu1 }
 0x318   : > { %7887 = vst [vmem:[%s9213_s21 + $0xf8] sm:$0xff] %v6420_v41  ;;  %v4610_v37 = vadd.f32 %v10171_v32, %v4571_v30  ;;  %v4572_v55 = vadd.f32 %v4459_v24, %v10021_v2  ;;  %v4461_v34 = vpop.f32.mrb[11].mxu0  ;;  %v5106_v12 = vpop.f32.mrb[11].mxu1  ;;  %v8282_v30 = vld [vmem:[%s8367_s10 + $0x434] ss:$8 sps:$4 sm:$0xff]  }
 0x31a   : > { %v4642_v1 = vmax.f32 %v4610_v37, 0.0  ;;  %v4611_v36 = vadd.f32 %v10171_v32, %v4572_v55  ;;  %5595 = vmatmul.mubr.bf16.gmra.mrb[116].mxu0 %v9982_v31  ;;  %v8277_v31 = vld [vmem:[%s8367_s10 + $0x420] ss:$8 sps:$4 sm:$0xff]  }
 0x31b   : > { %6053 = vmatmul.mubr.bf16.gmra.mrb[116].mxu1 %v10048_v57  ;;  %7750 = vmatprep.mubr.msk.bf16.mxu0 %vm472_vm0, %v9987_v44 }
 0x31c   : > { %v6435_v54 = vmax.f32 %v4638_v7, %v4642_v1  ;;  %v4643_v52 = vmax.f32 %v4611_v36, 0.0  ;;  %7857 = vmatprep.mubr.msk.bf16.mxu1 %vm472_vm0, %v8279_v15  ;;  %v8280_v36 = vld [vmem:[%s8367_s10 + $0x430] ss:$8 sps:$4 sm:$0xff]  }
 0x31d   : > { %v4464_v2 = vpop.f32.mrb[12].mxu0  ;;  %v10224_v18 = vpop.f32.mrb[12].mxu1 }
 0x31e   : > { %v6436_v23 = vmax.f32 %v4639_v33, %v4643_v52  ;;  %v4573_v50 = vadd.f32 %v4464_v2, %v10029_v35  ;;  %v4466_v63 = vpop.f32.mrb[13].mxu0  ;;  %v5111_v25 = vpop.f32.mrb[13].mxu1 }
 0x31f   : > { %v4467_v49 = vpop.f32.mrb[14].mxu0  ;;  %v10229_v44 = vpop.f32.mrb[14].mxu1 }
 0x320   : > { %v4612_v57 = vadd.f32 %v10171_v32, %v4573_v50  ;;  %v4574_v41 = vadd.f32 %v4467_v49, %v10037_v48  ;;  %v4469_v7 = vpop.f32.mrb[15].mxu0  ;;  %v5114_v3 = vpop.f32.mrb[15].mxu1 }
 0x322   : > { %v4644_v8 = vmax.f32 %v4612_v57, 0.0  ;;  %v4613_v33 = vadd.f32 %v10171_v32, %v4574_v41  ;;  %5603 = vmatmul.mubr.bf16.gmra.mrb[120].mxu0 %v10000_v6 }
 0x323   : > { %6061 = vmatmul.mubr.bf16.gmra.mrb[120].mxu1 %v8277_v31  ;;  %7751 = vmatprep.mubr.msk.bf16.mxu0 %vm472_vm0, %v10003_v4 }
 0x324   : > { %v6437_v35 = vmax.f32 %v4640_v60, %v4644_v8  ;;  %v4645_v24 = vmax.f32 %v4613_v33, 0.0  ;;  %7858 = vmatprep.mubr.msk.bf16.mxu1 %vm472_vm0, %v8282_v30 }
 0x325   : > { %v4472_v48 = vpop.f32.mrb[16].mxu0 }
 0x326   : > { %v6438_v37 = vmax.f32 %v4641_v39, %v4645_v24  ;;  %v4575_v55 = vadd.f32 %v4472_v48, %v10045_v29  ;;  %v10238_v34 = vpop.f32.mrb[16].mxu1  ;;  %v4474_v15 = vpop.f32.mrb[17].mxu0 }
 0x327   : > { %v5119_v12 = vpop.f32.mrb[17].mxu1  ;;  %v4475_v1 = vpop.f32.mrb[18].mxu0 }
 0x328   : > { %v4614_v6 = vadd.f32 %v10171_v32, %v4575_v55  ;;  %v4576_v52 = vadd.f32 %v4475_v1, %v10051_v61  ;;  %v10243_v4 = vpop.f32.mrb[18].mxu1  ;;  %v4477_v60 = vpop.f32.mrb[19].mxu0 }
 0x329   : > { %v5122_v2 = vpop.f32.mrb[19].mxu1 }
 0x32a   : > { %v4646_v50 = vmax.f32 %v4614_v6, 0.0  ;;  %v4615_v39 = vadd.f32 %v10171_v32, %v4576_v52  ;;  %5611 = vmatmul.mubr.bf16.gmra.mrb[124].mxu0 %v10016_v62 }
 0x32b   : > { %6069 = vmatmul.mubr.bf16.gmra.mrb[124].mxu1 %v8280_v36 }
 0x32c   : > { %v6444_v29 = vmax.f32 %v6435_v54, %v4646_v50  ;;  %v4647_v63 = vmax.f32 %v4615_v39, 0.0 }
 0x32d   : > { %v4480_v25 = vpop.f32.mrb[20].mxu0 }
 0x32e   : > { %7888 = vst [vmem:[%s9213_s21 + $0x100] sm:$0xff] %v6444_v29  ;;  %v6445_v49 = vmax.f32 %v6436_v23, %v4647_v63  ;;  %v4577_v31 = vadd.f32 %v4480_v25, %v10059_v46  ;;  %v10249_v61 = vpop.f32.mrb[20].mxu1  ;;  %v4482_v57 = vpop.f32.mrb[21].mxu0 }
 0x32f   : > { %v5127_v41 = vpop.f32.mrb[21].mxu1  ;;  %v4483_v7 = vpop.f32.mrb[22].mxu0 }
 0x330   : > { %7889 = vst [vmem:[%s9213_s21 + $0x108] sm:$0xff] %v6445_v49  ;;  %v4616_v30 = vadd.f32 %v10171_v32, %v4577_v31  ;;  %v4578_v3 = vadd.f32 %v4483_v7, %v10062_v47  ;;  %v10254_v62 = vpop.f32.mrb[22].mxu1  ;;  %v4485_v54 = vpop.f32.mrb[23].mxu0 }
 0x331   : > { %v5130_v8 = vpop.f32.mrb[23].mxu1 }
 0x332   : > { %v4648_v33 = vmax.f32 %v4616_v30, 0.0  ;;  %v4617_v23 = vadd.f32 %v10171_v32, %v4578_v3 }
 0x334   : > { %v6446_v46 = vmax.f32 %v6437_v35, %v4648_v33  ;;  %v4649_v24 = vmax.f32 %v4617_v23, 0.0 }
 0x335   : > { %v4488_v48 = vpop.f32.mrb[24].mxu0 }
 0x336   : > { %7890 = vst [vmem:[%s9213_s21 + $0x110] sm:$0xff] %v6446_v46  ;;  %v6447_v55 = vmax.f32 %v6438_v37, %v4649_v24  ;;  %v4579_v15 = vadd.f32 %v4488_v48, %v10069_v19  ;;  %v10259_v12 = vpop.f32.mrb[24].mxu1  ;;  %v4490_v1 = vpop.f32.mrb[25].mxu0 }
 0x337   : > { %v5135_v36 = vpop.f32.mrb[25].mxu1  ;;  %v4491_v47 = vpop.f32.mrb[26].mxu0 }
 0x338   : > { %7891 = vst [vmem:[%s9213_s21 + $0x118] sm:$0xff] %v6447_v55  ;;  %v4618_v6 = vadd.f32 %v10171_v32, %v4579_v15  ;;  %v4580_v52 = vadd.f32 %v4491_v47, %v10072_v21  ;;  %v10264_v60 = vpop.f32.mrb[26].mxu1  ;;  %v4493_v2 = vpop.f32.mrb[27].mxu0 }
 0x339   : > { %v5138_v35 = vpop.f32.mrb[27].mxu1 }
 0x33a   : > { %v4650_v39 = vmax.f32 %v4618_v6, 0.0  ;;  %v4619_v29 = vadd.f32 %v10171_v32, %v4580_v52 }
 0x33c   : > { %v6462_v37 = vmax.f32 %v4646_v50, %v4650_v39  ;;  %v4651_v25 = vmax.f32 %v4619_v29, 0.0 }
 0x33d   : > { %v4496_v19 = vpop.f32.mrb[28].mxu0 }
 0x33e   : > { %v6463_v49 = vmax.f32 %v4647_v63, %v4651_v25  ;;  %v4581_v31 = vadd.f32 %v4496_v19, %v10079_v14  ;;  %v10268_v57 = vpop.f32.mrb[28].mxu1  ;;  %v4498_v41 = vpop.f32.mrb[29].mxu0 }
 0x33f   : > { %v5143_v7 = vpop.f32.mrb[29].mxu1  ;;  %v4499_v30 = vpop.f32.mrb[30].mxu0 }
 0x340   : > { %v4620_v21 = vadd.f32 %v10171_v32, %v4581_v31  ;;  %v4582_v3 = vadd.f32 %v4499_v30, %v10082_v40  ;;  %v10272_v54 = vpop.f32.mrb[30].mxu1  ;;  %v4501_v8 = vpop.f32.mrb[31].mxu0 }
 0x341   : > { %v5146_v23 = vpop.f32.mrb[31].mxu1 }
 0x342   : > { %v4652_v46 = vmax.f32 %v4620_v21, 0.0  ;;  %v4621_v50 = vadd.f32 %v10171_v32, %v4582_v3 }
 0x344   : > { %v6464_v48 = vmax.f32 %v4648_v33, %v4652_v46  ;;  %v4653_v63 = vmax.f32 %v4621_v50, 0.0 }
 0x345   : > { %v4504_v55 = vpop.f32.mrb[32].mxu0 }
 0x346   : > { %v6465_v14 = vmax.f32 %v4649_v24, %v4653_v63  ;;  %v4583_v15 = vadd.f32 %v4504_v55, %v10089_v38  ;;  %v10276_v1 = vpop.f32.mrb[32].mxu1  ;;  %v4506_v36 = vpop.f32.mrb[33].mxu0 }
 0x347   : > { %v5151_v47 = vpop.f32.mrb[33].mxu1  ;;  %v4507_v6 = vpop.f32.mrb[34].mxu0 }
 0x348   : > { %v4622_v40 = vadd.f32 %v10171_v32, %v4583_v15  ;;  %v4584_v52 = vadd.f32 %v4507_v6, %v10092_v22  ;;  %v10280_v2 = vpop.f32.mrb[34].mxu1  ;;  %v4509_v35 = vpop.f32.mrb[35].mxu0 }
 0x349   : > { %v5154_v33 = vpop.f32.mrb[35].mxu1 }
 0x34a   : > { %v4654_v39 = vmax.f32 %v4622_v40, 0.0  ;;  %v4623_v24 = vadd.f32 %v10171_v32, %v4584_v52 }
 0x34c   : > { %v6471_v29 = vmax.f32 %v6462_v37, %v4654_v39  ;;  %v4655_v25 = vmax.f32 %v4623_v24, 0.0 }
 0x34d   : > { %v4512_v38 = vpop.f32.mrb[36].mxu0 }
 0x34e   : > { %7892 = vst [vmem:[%s9213_s21 + $0x120] sm:$0xff] %v6471_v29  ;;  %v6472_v19 = vmax.f32 %v6463_v49, %v4655_v25  ;;  %v4585_v31 = vadd.f32 %v4512_v38, %v10099_v20  ;;  %v10285_v41 = vpop.f32.mrb[36].mxu1  ;;  %v4514_v7 = vpop.f32.mrb[37].mxu0 }
 0x34f   : > { %v5159_v22 = vpop.f32.mrb[37].mxu1  ;;  %v4515_v30 = vpop.f32.mrb[38].mxu0 }
 0x350   : > { %7893 = vst [vmem:[%s9213_s21 + $0x128] sm:$0xff] %v6472_v19  ;;  %v4624_v21 = vadd.f32 %v10171_v32, %v4585_v31  ;;  %v4586_v3 = vadd.f32 %v4515_v30, %v10102_v43  ;;  %v10290_v8 = vpop.f32.mrb[38].mxu1  ;;  %v4517_v37 = vpop.f32.mrb[39].mxu0 }
 0x351   : > { %v5162_v23 = vpop.f32.mrb[39].mxu1 }
 0x352   : > { %v4656_v46 = vmax.f32 %v4624_v21, 0.0  ;;  %v4625_v49 = vadd.f32 %v10171_v32, %v4586_v3 }
 0x354   : > { %v6473_v20 = vmax.f32 %v6464_v48, %v4656_v46  ;;  %v4657_v50 = vmax.f32 %v4625_v49, 0.0 }
 0x355   : > { %v4520_v63 = vpop.f32.mrb[40].mxu0 }
 0x356   : > { %7894 = vst [vmem:[%s9213_s21 + $0x130] sm:$0xff] %v6473_v20  ;;  %v6474_v55 = vmax.f32 %v6465_v14, %v4657_v50  ;;  %v4587_v15 = vadd.f32 %v4520_v63, %v10109_v16  ;;  %v10295_v36 = vpop.f32.mrb[40].mxu1  ;;  %v4522_v47 = vpop.f32.mrb[41].mxu0 }
 0x357   : > { %v5167_v6 = vpop.f32.mrb[41].mxu1  ;;  %v4523_v43 = vpop.f32.mrb[42].mxu0 }
 0x358   : > { %7895 = vst [vmem:[%s9213_s21 + $0x138] sm:$0xff] %v6474_v55  ;;  %v4626_v40 = vadd.f32 %v10171_v32, %v4587_v15  ;;  %v4588_v52 = vadd.f32 %v4523_v43, %v10111_v26  ;;  %v10300_v35 = vpop.f32.mrb[42].mxu1  ;;  %v4525_v33 = vpop.f32.mrb[43].mxu0 }
 0x359   : > { %v5170_v48 = vpop.f32.mrb[43].mxu1 }
 0x35a   : > { %v4658_v24 = vmax.f32 %v4626_v40, 0.0  ;;  %v4627_v29 = vadd.f32 %v10171_v32, %v4588_v52 }
 0x35c   : > { %v6489_v14 = vmax.f32 %v4654_v39, %v4658_v24  ;;  %v4659_v38 = vmax.f32 %v4627_v29, 0.0 }
 0x35d   : > { %v4528_v16 = vpop.f32.mrb[44].mxu0 }
 0x35e   : > { %v6490_v19 = vmax.f32 %v4655_v25, %v4659_v38  ;;  %v4589_v31 = vadd.f32 %v4528_v16, %v10118_v58  ;;  %v10304_v7 = vpop.f32.mrb[44].mxu1  ;;  %v4530_v22 = vpop.f32.mrb[45].mxu0 }
 0x35f   : > { %v5175_v30 = vpop.f32.mrb[45].mxu1  ;;  %v4531_v21 = vpop.f32.mrb[46].mxu0 }
 0x360   : > { %v4628_v26 = vadd.f32 %v10171_v32, %v4589_v31  ;;  %v4590_v3 = vadd.f32 %v4531_v21, %v10120_v28  ;;  %v10308_v37 = vpop.f32.mrb[46].mxu1  ;;  %v4533_v23 = vpop.f32.mrb[47].mxu0 }
 0x361   : > { %v5178_v49 = vpop.f32.mrb[47].mxu1 }
 0x362   : > { %v4660_v20 = vmax.f32 %v4628_v26, 0.0  ;;  %v4629_v39 = vadd.f32 %v10171_v32, %v4590_v3 }
 0x364   : > { %v6491_v63 = vmax.f32 %v4656_v46, %v4660_v20  ;;  %v4661_v25 = vmax.f32 %v4629_v39, 0.0 }
 0x365   : > { %v4536_v55 = vpop.f32.mrb[48].mxu0 }
 0x366   : > { %v6492_v58 = vmax.f32 %v4657_v50, %v4661_v25  ;;  %v4591_v15 = vadd.f32 %v4536_v55, %v10128_v10  ;;  %v10312_v47 = vpop.f32.mrb[48].mxu1  ;;  %v4538_v6 = vpop.f32.mrb[49].mxu0 }
 0x367   : > { %v5183_v43 = vpop.f32.mrb[49].mxu1  ;;  %v4539_v40 = vpop.f32.mrb[50].mxu0 }
 0x368   : > { %v4630_v28 = vadd.f32 %v10171_v32, %v4591_v15  ;;  %v4592_v52 = vadd.f32 %v4539_v40, %v10130_v42  ;;  %v10316_v33 = vpop.f32.mrb[50].mxu1  ;;  %v4541_v48 = vpop.f32.mrb[51].mxu0 }
 0x369   : > { %v5186_v46 = vpop.f32.mrb[51].mxu1 }
 0x36a   : > { %v4662_v24 = vmax.f32 %v4630_v28, 0.0  ;;  %v4631_v50 = vadd.f32 %v10171_v32, %v4592_v52 }
 0x36c   : > { %v6498_v29 = vmax.f32 %v6489_v14, %v4662_v24  ;;  %v4663_v38 = vmax.f32 %v4631_v50, 0.0 }
 0x36d   : > { %v4544_v10 = vpop.f32.mrb[52].mxu0 }
 0x36e   : > { %7896 = vst [vmem:[%s9213_s21 + $0x140] sm:$0xff] %v6498_v29  ;;  %v6499_v16 = vmax.f32 %v6490_v19, %v4663_v38  ;;  %v4593_v31 = vadd.f32 %v4544_v10, %v10138_v51  ;;  %v10321_v22 = vpop.f32.mrb[52].mxu1  ;;  %v4546_v30 = vpop.f32.mrb[53].mxu0 }
 0x36f   : > { %v5191_v42 = vpop.f32.mrb[53].mxu1  ;;  %v4547_v21 = vpop.f32.mrb[54].mxu0 }
 0x370   : > { %7897 = vst [vmem:[%s9213_s21 + $0x148] sm:$0xff] %v6499_v16  ;;  %v4632_v26 = vadd.f32 %v10171_v32, %v4593_v31  ;;  %v4594_v3 = vadd.f32 %v4547_v21, %v10140_v13  ;;  %v10326_v23 = vpop.f32.mrb[54].mxu1  ;;  %v4549_v14 = vpop.f32.mrb[55].mxu0 }
 0x371   : > { %v5194_v49 = vpop.f32.mrb[55].mxu1 }
 0x372   : > { %v4664_v20 = vmax.f32 %v4632_v26, 0.0  ;;  %v4633_v19 = vadd.f32 %v10171_v32, %v4594_v3 }
 0x374   : > { %v6500_v51 = vmax.f32 %v6491_v63, %v4664_v20  ;;  %v4665_v39 = vmax.f32 %v4633_v19, 0.0 }
 0x375   : > { %v4552_v25 = vpop.f32.mrb[56].mxu0 }
 0x376   : > { %7898 = vst [vmem:[%s9213_s21 + $0x150] sm:$0xff] %v6500_v51  ;;  %v6501_v55 = vmax.f32 %v6492_v58, %v4665_v39  ;;  %v4595_v15 = vadd.f32 %v4552_v25, %v10148_v59  ;;  %v5197_v6 = vpop.f32.mrb[56].mxu1  ;;  %v4554_v43 = vpop.f32.mrb[57].mxu0 }
 0x377   : > { %v5199_v40 = vpop.f32.mrb[57].mxu1  ;;  %v4555_v28 = vpop.f32.mrb[58].mxu0 }
 0x378   : > { %7899 = vst [vmem:[%s9213_s21 + $0x158] sm:$0xff] %v6501_v55  ;;  %v4634_v13 = vadd.f32 %v10171_v32, %v4595_v15  ;;  %v4596_v52 = vadd.f32 %v4555_v28, %v10150_v56  ;;  %v5200_v48 = vpop.f32.mrb[58].mxu1  ;;  %v4557_v46 = vpop.f32.mrb[59].mxu0 }
 0x379   : > { %v5202_v50 = vpop.f32.mrb[59].mxu1 }
 0x37a   : > { %v4666_v29 = vmax.f32 %v4634_v13, 0.0  ;;  %v4635_v63 = vadd.f32 %v10171_v32, %v4596_v52 }
 0x37c   : > { %v6516_v10 = vmax.f32 %v4662_v24, %v4666_v29  ;;  %v4667_v16 = vmax.f32 %v4635_v63, 0.0 }
 0x37d   : > { %v4560_v58 = vpop.f32.mrb[60].mxu0 }
 0x37e   : > { %v6517_v31 = vmax.f32 %v4663_v38, %v4667_v16  ;;  %v4597_v59 = vadd.f32 %v4560_v58, %v10158_v45  ;;  %v5205_v30 = vpop.f32.mrb[60].mxu1  ;;  %v4562_v42 = vpop.f32.mrb[61].mxu0 }
 0x37f   : > { %v5207_v21 = vpop.f32.mrb[61].mxu1  ;;  %v4563_v26 = vpop.f32.mrb[62].mxu0 }
 0x380   : > { %v4636_v3 = vadd.f32 %v10171_v32, %v4597_v59  ;;  %v4598_v56 = vadd.f32 %v4563_v26, %v10160_v53  ;;  %v5208_v14 = vpop.f32.mrb[62].mxu1  ;;  %v4565_v49 = vpop.f32.mrb[63].mxu0 }
 0x381   : > { %v5210_v19 = vpop.f32.mrb[63].mxu1 }
 0x382   : > { %v4668_v51 = vmax.f32 %v4636_v3, 0.0  ;;  %v4637_v25 = vadd.f32 %v10171_v32, %v4598_v56 }
 0x384   : > { %v6518_v24 = vmax.f32 %v4664_v20, %v4668_v51  ;;  %v4669_v55 = vmax.f32 %v4637_v25, 0.0 }
 0x385   : > { %v5492_v15 = vpop.f32.mrb[64].mxu0 }
 0x386   : > { %v6519_v38 = vmax.f32 %v4665_v39, %v4669_v55  ;;  %v5493_v45 = vadd.f32 %v5492_v15, %v10174_v5  ;;  %v5950_v6 = vpop.f32.mrb[64].mxu1  ;;  %v5494_v43 = vpop.f32.mrb[65].mxu0 }
 0x387   : > { %v5952_v40 = vpop.f32.mrb[65].mxu1  ;;  %v5495_v28 = vpop.f32.mrb[66].mxu0 }
 0x388   : > { %v6077_v13 = vadd.f32 %v5950_v6, %v5493_v45  ;;  %v5496_v52 = vadd.f32 %v5495_v28, %v10178_v0  ;;  %v5953_v53 = vpop.f32.mrb[66].mxu1  ;;  %v5497_v48 = vpop.f32.mrb[67].mxu0 }
 0x389   : > { %v5955_v46 = vpop.f32.mrb[67].mxu1 }
 0x38a   : > { %v6116_v50 = vadd.f32 %v10171_v32, %v6077_v13  ;;  %v6078_v29 = vadd.f32 %v5953_v53, %v5496_v52 }
 0x38c   : > { %v6148_v20 = vmax.f32 %v6116_v50, 0.0  ;;  %v6117_v63 = vadd.f32 %v10171_v32, %v6078_v29 }
 0x38d   : > { %v5500_v39 = vpop.f32.mrb[68].mxu0 }
 0x38e   : > { %v6524_v5 = vmax.f32 %v6516_v10, %v6148_v20  ;;  %v6149_v16 = vmax.f32 %v6117_v63, 0.0  ;;  %v5501_v58 = vadd.f32 %v5500_v39, %v10191_v17  ;;  %v5958_v59 = vpop.f32.mrb[68].mxu1  ;;  %v5502_v30 = vpop.f32.mrb[69].mxu0 }
 0x38f   : > { %v5960_v42 = vpop.f32.mrb[69].mxu1  ;;  %v5503_v0 = vpop.f32.mrb[70].mxu0 }
 0x390   : > { %7900 = vst [vmem:[%s9213_s21 + $0x160] sm:$0xff] %v6524_v5  ;;  %v6525_v21 = vmax.f32 %v6517_v31, %v6149_v16  ;;  %v6079_v26 = vadd.f32 %v5958_v59, %v5501_v58  ;;  %v5504_v3 = vadd.f32 %v5503_v0, %v10196_v9  ;;  %v5961_v56 = vpop.f32.mrb[70].mxu1  ;;  %v5505_v14 = vpop.f32.mrb[71].mxu0 }
 0x391   : > { %v5963_v49 = vpop.f32.mrb[71].mxu1 }
 0x392   : > { %7901 = vst [vmem:[%s9213_s21 + $0x168] sm:$0xff] %v6525_v21  ;;  %v6118_v19 = vadd.f32 %v10171_v32, %v6079_v26  ;;  %v6080_v10 = vadd.f32 %v5961_v56, %v5504_v3 }
 0x394   : > { %v6150_v51 = vmax.f32 %v6118_v19, 0.0  ;;  %v6119_v17 = vadd.f32 %v10171_v32, %v6080_v10 }
 0x395   : > { %v5508_v25 = vpop.f32.mrb[72].mxu0 }
 0x396   : > { %v6526_v55 = vmax.f32 %v6518_v24, %v6150_v51  ;;  %v6151_v15 = vmax.f32 %v6119_v17, 0.0  ;;  %v5509_v31 = vadd.f32 %v5508_v25, %v10209_v27  ;;  %v5966_v45 = vpop.f32.mrb[72].mxu1  ;;  %v5510_v6 = vpop.f32.mrb[73].mxu0 }
 0x397   : > { %v5968_v9 = vpop.f32.mrb[73].mxu1  ;;  %v5511_v43 = vpop.f32.mrb[74].mxu0 }
 0x398   : > { %7902 = vst [vmem:[%s9213_s21 + $0x170] sm:$0xff] %v6526_v55  ;;  %v6527_v40 = vmax.f32 %v6519_v38, %v6151_v15  ;;  %v6081_v28 = vadd.f32 %v5966_v45, %v5509_v31  ;;  %v5512_v13 = vadd.f32 %v5511_v43, %v10214_v11  ;;  %v5969_v52 = vpop.f32.mrb[74].mxu1  ;;  %v5513_v53 = vpop.f32.mrb[75].mxu0 }
 0x399   : > { %v5971_v48 = vpop.f32.mrb[75].mxu1 }
 0x39a   : > { %7903 = vst [vmem:[%s9213_s21 + $0x178] sm:$0xff] %v6527_v40  ;;  %v6120_v46 = vadd.f32 %v10171_v32, %v6081_v28  ;;  %v6082_v50 = vadd.f32 %v5969_v52, %v5512_v13 }
 0x39c   : > { %v6152_v24 = vmax.f32 %v6120_v46, 0.0  ;;  %v6121_v29 = vadd.f32 %v10171_v32, %v6082_v50 }
 0x39d   : > { %v5516_v27 = vpop.f32.mrb[76].mxu0 }
 0x39e   : > { %v6542_v63 = vmax.f32 %v6148_v20, %v6152_v24  ;;  %v6153_v39 = vmax.f32 %v6121_v29, 0.0  ;;  %v5517_v5 = vadd.f32 %v5516_v27, %v10224_v18  ;;  %v5974_v58 = vpop.f32.mrb[76].mxu1  ;;  %v5518_v38 = vpop.f32.mrb[77].mxu0 }
 0x39f   : > { %v5976_v59 = vpop.f32.mrb[77].mxu1  ;;  %v5519_v30 = vpop.f32.mrb[78].mxu0 }
 0x3a0   : > { %v6543_v11 = vmax.f32 %v6149_v16, %v6153_v39  ;;  %v6083_v42 = vadd.f32 %v5974_v58, %v5517_v5  ;;  %v5520_v0 = vadd.f32 %v5519_v30, %v10229_v44  ;;  %v5977_v21 = vpop.f32.mrb[78].mxu1  ;;  %v5521_v26 = vpop.f32.mrb[79].mxu0 }
 0x3a1   : > { %v5979_v3 = vpop.f32.mrb[79].mxu1 }
 0x3a2   : > { %v6122_v56 = vadd.f32 %v10171_v32, %v6083_v42  ;;  %v6084_v14 = vadd.f32 %v5977_v21, %v5520_v0 }
 0x3a4   : > { %v6154_v49 = vmax.f32 %v6122_v56, 0.0  ;;  %v6123_v20 = vadd.f32 %v10171_v32, %v6084_v14 }
 0x3a5   : > { %v5524_v19 = vpop.f32.mrb[80].mxu0 }
 0x3a6   : > { %v6544_v10 = vmax.f32 %v6150_v51, %v6154_v49  ;;  %v6155_v18 = vmax.f32 %v6123_v20, 0.0  ;;  %v5525_v17 = vadd.f32 %v5524_v19, %v10238_v34  ;;  %v5982_v25 = vpop.f32.mrb[80].mxu1  ;;  %v5526_v55 = vpop.f32.mrb[81].mxu0 }
 0x3a7   : > { %v5984_v16 = vpop.f32.mrb[81].mxu1  ;;  %v5527_v31 = vpop.f32.mrb[82].mxu0 }
 0x3a8   : > { %v6545_v45 = vmax.f32 %v6151_v15, %v6155_v18  ;;  %v6085_v44 = vadd.f32 %v5982_v25, %v5525_v17  ;;  %v5528_v6 = vadd.f32 %v5527_v31, %v10243_v4  ;;  %v5985_v9 = vpop.f32.mrb[82].mxu1  ;;  %v5529_v43 = vpop.f32.mrb[83].mxu0 }
 0x3a9   : > { %v5987_v40 = vpop.f32.mrb[83].mxu1 }
 0x3aa   : > { %v6124_v28 = vadd.f32 %v10171_v32, %v6085_v44  ;;  %v6086_v13 = vadd.f32 %v5985_v9, %v5528_v6 }
 0x3ac   : > { %v6156_v52 = vmax.f32 %v6124_v28, 0.0  ;;  %v6125_v51 = vadd.f32 %v10171_v32, %v6086_v13 }
 0x3ad   : > { %v5532_v34 = vpop.f32.mrb[84].mxu0 }
 0x3ae   : > { %v6551_v53 = vmax.f32 %v6542_v63, %v6156_v52  ;;  %v6157_v48 = vmax.f32 %v6125_v51, 0.0  ;;  %v5533_v46 = vadd.f32 %v5532_v34, %v10249_v61  ;;  %v5990_v15 = vpop.f32.mrb[84].mxu1  ;;  %v5534_v50 = vpop.f32.mrb[85].mxu0 }
 0x3af   : > { %v5992_v24 = vpop.f32.mrb[85].mxu1  ;;  %v5535_v4 = vpop.f32.mrb[86].mxu0 }
 0x3b0   : > { %7904 = vst [vmem:[%s9213_s21 + $0x180] sm:$0xff] %v6551_v53  ;;  %v6552_v29 = vmax.f32 %v6543_v11, %v6157_v48  ;;  %v6087_v27 = vadd.f32 %v5990_v15, %v5533_v46  ;;  %v5536_v39 = vadd.f32 %v5535_v4, %v10254_v62  ;;  %v5993_v5 = vpop.f32.mrb[86].mxu1  ;;  %v5537_v58 = vpop.f32.mrb[87].mxu0 }
 0x3b1   : > { %v5995_v38 = vpop.f32.mrb[87].mxu1 }
 0x3b2   : > { %7905 = vst [vmem:[%s9213_s21 + $0x188] sm:$0xff] %v6552_v29  ;;  %v6126_v59 = vadd.f32 %v10171_v32, %v6087_v27  ;;  %v6088_v63 = vadd.f32 %v5993_v5, %v5536_v39 }
 0x3b4   : > { %v6158_v30 = vmax.f32 %v6126_v59, 0.0  ;;  %v6127_v61 = vadd.f32 %v10171_v32, %v6088_v63 }
 0x3b5   : > { %v5540_v42 = vpop.f32.mrb[88].mxu0 }
 0x3b6   : > { %v6553_v0 = vmax.f32 %v6544_v10, %v6158_v30  ;;  %v6159_v21 = vmax.f32 %v6127_v61, 0.0  ;;  %v5541_v11 = vadd.f32 %v5540_v42, %v10259_v12  ;;  %v5998_v26 = vpop.f32.mrb[88].mxu1  ;;  %v5542_v3 = vpop.f32.mrb[89].mxu0 }
 0x3b7   : > { %v6000_v62 = vpop.f32.mrb[89].mxu1  ;;  %v5543_v56 = vpop.f32.mrb[90].mxu0 }
 0x3b8   : > { %7906 = vst [vmem:[%s9213_s21 + $0x190] sm:$0xff] %v6553_v0  ;;  %v6554_v14 = vmax.f32 %v6545_v45, %v6159_v21  ;;  %v6089_v49 = vadd.f32 %v5998_v26, %v5541_v11  ;;  %v5544_v20 = vadd.f32 %v5543_v56, %v10264_v60  ;;  %v6001_v19 = vpop.f32.mrb[90].mxu1  ;;  %v5545_v18 = vpop.f32.mrb[91].mxu0 }
 0x3b9   : > { %v6003_v17 = vpop.f32.mrb[91].mxu1 }
 0x3ba   : > { %7907 = vst [vmem:[%s9213_s21 + $0x198] sm:$0xff] %v6554_v14  ;;  %v6128_v25 = vadd.f32 %v10171_v32, %v6089_v49  ;;  %v6090_v55 = vadd.f32 %v6001_v19, %v5544_v20 }
 0x3bc   : > { %v6160_v10 = vmax.f32 %v6128_v25, 0.0  ;;  %v6129_v16 = vadd.f32 %v10171_v32, %v6090_v55 }
 0x3bd   : > { %v5548_v12 = vpop.f32.mrb[92].mxu0 }
 0x3be   : > { %v6569_v31 = vmax.f32 %v6156_v52, %v6160_v10  ;;  %v6161_v44 = vmax.f32 %v6129_v16, 0.0  ;;  %v5549_v6 = vadd.f32 %v5548_v12, %v10268_v57  ;;  %v6006_v9 = vpop.f32.mrb[92].mxu1  ;;  %v5550_v45 = vpop.f32.mrb[93].mxu0 }
 0x3bf   : > { %v6008_v43 = vpop.f32.mrb[93].mxu1  ;;  %v5551_v40 = vpop.f32.mrb[94].mxu0 }
 0x3c0   : > { %v6570_v60 = vmax.f32 %v6157_v48, %v6161_v44  ;;  %v6091_v28 = vadd.f32 %v6006_v9, %v5549_v6  ;;  %v5552_v13 = vadd.f32 %v5551_v40, %v10272_v54  ;;  %v6009_v51 = vpop.f32.mrb[94].mxu1  ;;  %v5553_v34 = vpop.f32.mrb[95].mxu0 }
 0x3c1   : > { %v6011_v53 = vpop.f32.mrb[95].mxu1 }
 0x3c2   : > { %v6130_v46 = vadd.f32 %v10171_v32, %v6091_v28  ;;  %v6092_v15 = vadd.f32 %v6009_v51, %v5552_v13 }
 0x3c4   : > { %v6162_v50 = vmax.f32 %v6130_v46, 0.0  ;;  %v6131_v52 = vadd.f32 %v10171_v32, %v6092_v15 }
 0x3c5   : > { %v5556_v24 = vpop.f32.mrb[96].mxu0 }
 0x3c6   : > { %v6571_v4 = vmax.f32 %v6158_v30, %v6162_v50  ;;  %v6163_v57 = vmax.f32 %v6131_v52, 0.0  ;;  %v5557_v29 = vadd.f32 %v5556_v24, %v10276_v1  ;;  %v6014_v27 = vpop.f32.mrb[96].mxu1  ;;  %v5558_v39 = vpop.f32.mrb[97].mxu0 }
 0x3c7   : > { %v6016_v48 = vpop.f32.mrb[97].mxu1  ;;  %v5559_v5 = vpop.f32.mrb[98].mxu0 }
 0x3c8   : > { %v6572_v58 = vmax.f32 %v6159_v21, %v6163_v57  ;;  %v6093_v54 = vadd.f32 %v6014_v27, %v5557_v29  ;;  %v5560_v38 = vadd.f32 %v5559_v5, %v10280_v2  ;;  %v6017_v59 = vpop.f32.mrb[98].mxu1  ;;  %v5561_v63 = vpop.f32.mrb[99].mxu0 }
 0x3c9   : > { %v6019_v61 = vpop.f32.mrb[99].mxu1 }
 0x3ca   : > { %v6132_v42 = vadd.f32 %v10171_v32, %v6093_v54  ;;  %v6094_v0 = vadd.f32 %v6017_v59, %v5560_v38 }
 0x3cc   : > { %v6164_v11 = vmax.f32 %v6132_v42, 0.0  ;;  %v6133_v30 = vadd.f32 %v10171_v32, %v6094_v0 }
 0x3cd   : > { %v5564_v1 = vpop.f32.mrb[100].mxu0 }
 0x3ce   : > { %v6578_v26 = vmax.f32 %v6569_v31, %v6164_v11  ;;  %v6165_v3 = vmax.f32 %v6133_v30, 0.0  ;;  %v5565_v62 = vadd.f32 %v5564_v1, %v10285_v41  ;;  %v6022_v21 = vpop.f32.mrb[100].mxu1  ;;  %v5566_v56 = vpop.f32.mrb[101].mxu0 }
 0x3cf   : > { %v6024_v14 = vpop.f32.mrb[101].mxu1  ;;  %v5567_v2 = vpop.f32.mrb[102].mxu0 }
 0x3d0   : > { %7908 = vst [vmem:[%s9213_s21 + $0x1a0] sm:$0xff] %v6578_v26  ;;  %v6579_v49 = vmax.f32 %v6570_v60, %v6165_v3  ;;  %v6095_v20 = vadd.f32 %v6022_v21, %v5565_v62  ;;  %v5568_v19 = vadd.f32 %v5567_v2, %v10290_v8  ;;  %v6025_v18 = vpop.f32.mrb[102].mxu1  ;;  %v5569_v17 = vpop.f32.mrb[103].mxu0 }
 0x3d1   : > { %v6027_v25 = vpop.f32.mrb[103].mxu1 }
 0x3d2   : > { %7909 = vst [vmem:[%s9213_s21 + $0x1a8] sm:$0xff] %v6579_v49  ;;  %v6134_v55 = vadd.f32 %v10171_v32, %v6095_v20  ;;  %v6096_v10 = vadd.f32 %v6025_v18, %v5568_v19 }
 0x3d4   : > { %v6166_v16 = vmax.f32 %v6134_v55, 0.0  ;;  %v6135_v41 = vadd.f32 %v10171_v32, %v6096_v10 }
 0x3d5   : > { %v5572_v12 = vpop.f32.mrb[104].mxu0 }
 0x3d6   : > { %v6580_v31 = vmax.f32 %v6571_v4, %v6166_v16  ;;  %v6167_v44 = vmax.f32 %v6135_v41, 0.0  ;;  %v5573_v6 = vadd.f32 %v5572_v12, %v10295_v36  ;;  %v6030_v9 = vpop.f32.mrb[104].mxu1  ;;  %v5574_v45 = vpop.f32.mrb[105].mxu0 }
 0x3d7   : > { %v6032_v8 = vpop.f32.mrb[105].mxu1  ;;  %v5575_v43 = vpop.f32.mrb[106].mxu0 }
 0x3d8   : > { %7910 = vst [vmem:[%s9213_s21 + $0x1b0] sm:$0xff] %v6580_v31  ;;  %v6581_v40 = vmax.f32 %v6572_v58, %v6167_v44  ;;  %v6097_v60 = vadd.f32 %v6030_v9, %v5573_v6  ;;  %v5576_v28 = vadd.f32 %v5575_v43, %v10300_v35  ;;  %v6033_v13 = vpop.f32.mrb[106].mxu1  ;;  %v5577_v51 = vpop.f32.mrb[107].mxu0 }
 0x3d9   : > { %v6035_v34 = vpop.f32.mrb[107].mxu1 }
 0x3da   : > { %7911 = vst [vmem:[%s9213_s21 + $0x1b8] sm:$0xff] %v6581_v40  ;;  %v6136_v53 = vadd.f32 %v10171_v32, %v6097_v60  ;;  %v6098_v46 = vadd.f32 %v6033_v13, %v5576_v28 }
 0x3dc   : > { %v6168_v15 = vmax.f32 %v6136_v53, 0.0  ;;  %v6137_v50 = vadd.f32 %v10171_v32, %v6098_v46  ;;  %v8283_v32 = vld [vmem:[%s10413_s2] ss:$0 sm:$0xff] }
 0x3dd   : > { %v5580_v36 = vpop.f32.mrb[108].mxu0 }
 0x3de   : > { %v6596_v52 = vmax.f32 %v6164_v11, %v6168_v15  ;;  %v6169_v24 = vmax.f32 %v6137_v50, 0.0  ;;  %v5581_v4 = vadd.f32 %v5580_v36, %v10304_v7  ;;  %v6038_v57 = vpop.f32.mrb[108].mxu1  ;;  %v5582_v29 = vpop.f32.mrb[109].mxu0 }
 0x3df   : > { %v6040_v27 = vpop.f32.mrb[109].mxu1  ;;  %v5583_v39 = vpop.f32.mrb[110].mxu0 }
 0x3e0   : > { %v6597_v35 = vmax.f32 %v6165_v3, %v6169_v24  ;;  %v6099_v48 = vadd.f32 %v6038_v57, %v5581_v4  ;;  %v5584_v5 = vadd.f32 %v5583_v39, %v10308_v37  ;;  %v6041_v58 = vpop.f32.mrb[110].mxu1  ;;  %v5585_v54 = vpop.f32.mrb[111].mxu0 }
 0x3e1   : > { %v6043_v38 = vpop.f32.mrb[111].mxu1 }
 0x3e2   : > { %v6138_v59 = vadd.f32 %v8283_v32, %v6099_v48  ;;  %v6100_v63 = vadd.f32 %v6041_v58, %v5584_v5 }
 0x3e4   : > { %v6170_v61 = vmax.f32 %v6138_v59, 0.0  ;;  %v6139_v42 = vadd.f32 %v8283_v32, %v6100_v63 }
 0x3e5   : > { %v5588_v7 = vpop.f32.mrb[112].mxu0 }
 0x3e6   : > { %v6598_v0 = vmax.f32 %v6166_v16, %v6170_v61  ;;  %v6171_v11 = vmax.f32 %v6139_v42, 0.0  ;;  %v5589_v30 = vadd.f32 %v5588_v7, %v10312_v47  ;;  %v6046_v1 = vpop.f32.mrb[112].mxu1  ;;  %v5590_v26 = vpop.f32.mrb[113].mxu0 }
 0x3e7   : > { %v6048_v3 = vpop.f32.mrb[113].mxu1  ;;  %v5591_v37 = vpop.f32.mrb[114].mxu0 }
 0x3e8   : > { %v6599_v62 = vmax.f32 %v6167_v44, %v6171_v11  ;;  %v6101_v21 = vadd.f32 %v6046_v1, %v5589_v30  ;;  %v5592_v56 = vadd.f32 %v5591_v37, %v10316_v33  ;;  %v6049_v14 = vpop.f32.mrb[114].mxu1  ;;  %v5593_v2 = vpop.f32.mrb[115].mxu0 }
 0x3e9   : > { %v6051_v49 = vpop.f32.mrb[115].mxu1 }
 0x3ea   : > { %v6140_v20 = vadd.f32 %v8283_v32, %v6101_v21  ;;  %v6102_v19 = vadd.f32 %v6049_v14, %v5592_v56 }
 0x3ec   : > { %v6172_v18 = vmax.f32 %v6140_v20, 0.0  ;;  %v6141_v17 = vadd.f32 %v8283_v32, %v6102_v19 }
 0x3ed   : > { %v5596_v25 = vpop.f32.mrb[116].mxu0 }
 0x3ee   : > { %v6605_v55 = vmax.f32 %v6596_v52, %v6172_v18  ;;  %v6173_v47 = vmax.f32 %v6141_v17, 0.0  ;;  %v5597_v10 = vadd.f32 %v5596_v25, %v10321_v22  ;;  %v6054_v16 = vpop.f32.mrb[116].mxu1  ;;  %v5598_v41 = vpop.f32.mrb[117].mxu0 }
 0x3ef   : > { %v6056_v12 = vpop.f32.mrb[117].mxu1  ;;  %v5599_v31 = vpop.f32.mrb[118].mxu0 }
 0x3f0   : > { %7912 = vst [vmem:[%s9213_s21 + $0x1c0] sm:$0xff] %v6605_v55  ;;  %v6606_v33 = vmax.f32 %v6597_v35, %v6173_v47  ;;  %v6103_v44 = vadd.f32 %v6054_v16, %v5597_v10  ;;  %v5600_v6 = vadd.f32 %v5599_v31, %v10326_v23  ;;  %v6057_v9 = vpop.f32.mrb[118].mxu1  ;;  %v5601_v45 = vpop.f32.mrb[119].mxu0 }
 0x3f1   : > { %v6059_v8 = vpop.f32.mrb[119].mxu1 }
 0x3f2   : > { %7913 = vst [vmem:[%s9213_s21 + $0x1c8] sm:$0xff] %v6606_v33  ;;  %v6142_v43 = vadd.f32 %v8283_v32, %v6103_v44  ;;  %v6104_v40 = vadd.f32 %v6057_v9, %v5600_v6 }
 0x3f4   : > { %v6174_v60 = vmax.f32 %v6142_v43, 0.0  ;;  %v6143_v28 = vadd.f32 %v8283_v32, %v6104_v40 }
 0x3f5   : > { %v5604_v22 = vpop.f32.mrb[120].mxu0 }
 0x3f6   : > { %v6607_v13 = vmax.f32 %v6598_v0, %v6174_v60  ;;  %v6175_v51 = vmax.f32 %v6143_v28, 0.0  ;;  %v6062_v34 = vpop.f32.mrb[120].mxu1  ;;  %v5606_v53 = vpop.f32.mrb[121].mxu0 }
 0x3f7   : > { %v6064_v46 = vpop.f32.mrb[121].mxu1  ;;  %v5607_v15 = vpop.f32.mrb[122].mxu0 }
 0x3f8   : > { %7914 = vst [vmem:[%s9213_s21 + $0x1d0] sm:$0xff] %v6607_v13  ;;  %v6608_v50 = vmax.f32 %v6599_v62, %v6175_v51  ;;  %v6065_v23 = vpop.f32.mrb[122].mxu1  ;;  %v5609_v36 = vpop.f32.mrb[123].mxu0 }
 0x3f9   : > { %v6067_v52 = vpop.f32.mrb[123].mxu1 }
 0x3fa   : > { %7915 = vst [vmem:[%s9213_s21 + $0x1d8] sm:$0xff] %v6608_v50 }
 0x3fd   : > { %v5612_v24 = vpop.f32.mrb[124].mxu0 }
 0x3fe   : > { %v6070_v4 = vpop.f32.mrb[124].mxu1  ;;  %v5614_v57 = vpop.f32.mrb[125].mxu0 }
 0x3ff   : > { %v6072_v29 = vpop.f32.mrb[125].mxu1  ;;  %v5615_v27 = vpop.f32.mrb[126].mxu0 }
 0x400   : > { %v6073_v39 = vpop.f32.mrb[126].mxu1  ;;  %v5617_v35 = vpop.f32.mrb[127].mxu0 }
 0x401   : > { %v6075_v48 = vpop.f32.mrb[127].mxu1 }
 0x402 PF: > { %s13_s12 = sadd.s32 1, %s8290_s12  }
 0x403   : > { %p10_p4 = scmp.ge.s32.totalorder %s13_s12, 4  }
 0x405   :  { %12 = sbr.rel (!%p10_p4) target bundleno = 1 (0x1), region = 119 }

// kernel: alexnet_forward.9
= control target key start
LH: loop header
LB: loop body
LE: loop exit
PB: predicated region body
PF: predicated region fallthrough
CT: control target
= control target key end

     0   :  { %s10925_s12 = smov 0   ;;  %s12932_s0 = inlined_call_operand.vmem [shape: bf16[2,20,16,640], index: 0, kind: input, shape index: {}]   ;;  %s12933_s1 = inlined_call_operand.vmem [shape: bf16[5,640,128], index: 1, kind: input, shape index: {}]   ;;  %s12934_s2 = inlined_call_operand.vmem [shape: f32[1,128], index: 2, kind: input, shape index: {}]   ;;  %s12935_s3 = inlined_call_operand.vmem [shape: f32[2,7,16,128], index: 3, kind: output, shape index: {}]  }
   0x1 LB: > { %s7113_s13 = sadd.s32 4294967295, %s10903_s12   ;;  %p7117_p0 = scmp.ge.s32.totalorder %s10903_s12, 1  ;;  %s10903_s12 = sphi %s10925_s12, %s13_s12  }
   0x2   : > { %p137_p1 = scmp.lt.s32.totalorder %s10903_s12, 3 }
   0x4   : > { %p138_p2 = pnand %p7117_p0, %p137_p1 }
   0x6   : > { %141 = sbr.rel (%p138_p2) target bundleno = 1064 (0x428), region = 32 }
   0xd   : > { %v10225_v0 = vld [vmem:[%s12933_s1 + $0x180] sm:$0xff]   ;;  %v10227_v2 = vld [vmem:[%s12933_s1 + $0x188] sm:$0xff]   ;;  %p161_p3 = scmp.lt.s32.totalorder %s7113_s13, 1  ;;  %v10229_v4 = vld [vmem:[%s12933_s1 + $0x190] sm:$0xff]  }
   0xe   : > { %v10226_v1 = vld [vmem:[%s12933_s1 + $0x140] sm:$0xff]   ;;  %8439 = vmatprep.subr.bf16.mxu0 %v10225_v0  ;;  %9919 = vmatprep.subr.bf16.mxu1 %v10225_v0  ;;  %v10228_v3 = vld [vmem:[%s12933_s1 + $0x148] sm:$0xff]   ;;  %v10230_v5 = vld [vmem:[%s12933_s1 + $0x150] sm:$0xff]  }
   0xf   : > { %8440 = vmatpush3.bf16.msra.mxu0 %v10226_v1  ;;  %9927 = vmatpush3.bf16.msra.mxu1 %v10226_v1  ;;  %s12991_s13 = smov (!%p161_p3, %s7113_s13), 1  ;;  %v10231_v6 = vld [vmem:[%s12933_s1 + $0x198] sm:$0xff]   ;;  %v10233_v8 = vld [vmem:[%s12933_s1 + $0x1a0] sm:$0xff]   ;;  %v10235_v10 = vld [vmem:[%s12933_s1 + $0x1a8] sm:$0xff]  }
  0x10   : > { %8441 = vmatprep.subr.bf16.mxu0 %v10227_v2  ;;  %9920 = vmatprep.subr.bf16.mxu1 %v10227_v2  ;;  %s10215_s28 = smul.u32 800, %s12991_s13  ;;  %v10232_v7 = vld [vmem:[%s12933_s1 + $0x158] sm:$0xff]   ;;  %v10234_v9 = vld [vmem:[%s12933_s1 + $0x160] sm:$0xff]   ;;  %v10236_v13 = vld [vmem:[%s12933_s1 + $0x168] sm:$0xff]  }
  0x11   : > { %v10237_v14 = vld [vmem:[%s12933_s1 + $0x1b0] sm:$0xff]   ;;  %v10239_v16 = vld [vmem:[%s12933_s1 + $0x1b8] sm:$0xff]   ;;  %v10247_v18 = vld [vmem:[%s12933_s1 + $0x200] sm:$0xff]   ;;  %s10216_s7 = smul.u32 112, %s12991_s13 }
  0x12   : > { %s10966_s8 = scalar_lea.vmem %s12932_s0, %s10215_s28  ;;  %v10238_v15 = vld [vmem:[%s12933_s1 + $0x170] sm:$0xff]   ;;  %v10240_v17 = vld [vmem:[%s12933_s1 + $0x178] sm:$0xff]   ;;  %v10248_v20 = vld [vmem:[%s12933_s1 + $0x240] sm:$0xff]  }
  0x13   : > { %8442 = vmatpush3.bf16.msra.mxu0 %v10228_v3  ;;  %9928 = vmatpush3.bf16.msra.mxu1 %v10228_v3  ;;  %v10243_v11 = vld [vmem:[%s10966_s8 + $0x2c] ss:$20 sps:$4 sm:$0xff]   ;;  %v10241_v19 = vld [vmem:[%s10966_s8 + $0x28] ss:$20 sps:$4 sm:$0xff]   ;;  %v10256_v28 = vld [vmem:[%s10966_s8 + $0x50] ss:$20 sps:$4 sm:$0xff]   ;;  %s12850_s10 = scalar_lea.vmem %s12935_s3, %s10216_s7 }
  0x14   : > { %8443 = vmatprep.subr.bf16.mxu0 %v10229_v4  ;;  %9921 = vmatprep.subr.bf16.mxu1 %v10229_v4  ;;  %v10246_v12 = vld [vmem:[%s10966_s8 + $0x20c] ss:$20 sps:$4 sm:$0xff]   ;;  %v10244_v21 = vld [vmem:[%s10966_s8 + $0x208] ss:$20 sps:$4 sm:$0xff]   ;;  %v10258_v29 = vld [vmem:[%s12933_s1 + $0x210] sm:$0xff]  }
  0x15   : > { %1214 = vmatprep.mubr.bf16.mxu0 %v10243_v11  ;;  %1310 = vmatprep.mubr.bf16.mxu1 %v10246_v12  ;;  %v10249_v22 = vld [vmem:[%s12933_s1 + $0x1c0] sm:$0xff]   ;;  %v10250_v23 = vld [vmem:[%s12933_s1 + $0x208] sm:$0xff]   ;;  %v10259_v31 = vld [vmem:[%s12933_s1 + $0x1d0] sm:$0xff]  }
  0x16   : > { %v10252_v24 = vld [vmem:[%s10966_s8 + $0x54] ss:$20 sps:$4 sm:$0xff]   ;;  %v10257_v30 = vld [vmem:[%s10966_s8 + $0x230] ss:$20 sps:$4 sm:$0xff]   ;;  %v10260_v33 = vld [vmem:[%s12933_s1 + $0x218] sm:$0xff]  }
  0x17   : > { %8444 = vmatpush3.bf16.msra.mxu0 %v10230_v5  ;;  %9929 = vmatpush3.bf16.msra.mxu1 %v10230_v5  ;;  %v10254_v25 = vld [vmem:[%s10966_s8 + $0x234] ss:$20 sps:$4 sm:$0xff]   ;;  %v10263_v32 = vld [vmem:[%s10966_s8 + $0x7c] ss:$20 sps:$4 sm:$0xff]   ;;  %v10267_v37 = vld [vmem:[%s10966_s8 + $0x78] ss:$20 sps:$4 sm:$0xff]  }
  0x18   : > { %8445 = vmatprep.subr.bf16.mxu0 %v10231_v6  ;;  %9922 = vmatprep.subr.bf16.mxu1 %v10231_v6  ;;  %v10261_v26 = vld [vmem:[%s12933_s1 + $0x248] sm:$0xff]   ;;  %v10265_v34 = vld [vmem:[%s10966_s8 + $0x25c] ss:$20 sps:$4 sm:$0xff]   ;;  %v10269_v38 = vld [vmem:[%s12933_s1 + $0x220] sm:$0xff]  }
  0x19   : > { %v10251_v27 = vld [vmem:[%s12933_s1 + $0x1c8] sm:$0xff]   ;;  %v10280_v35 = vld [vmem:[%s12933_s1 + $0x250] sm:$0xff]   ;;  %v10262_v36 = vld [vmem:[%s12933_s1 + $0x1d8] sm:$0xff]  }
  0x1a   : > { %v10268_v39 = vld [vmem:[%s10966_s8 + $0x258] ss:$20 sps:$4 sm:$0xff]   ;;  %v10270_v40 = vld [vmem:[%s12933_s1 + $0x1e0] sm:$0xff]   ;;  %v10279_v46 = vld [vmem:[%s12933_s1 + $0x230] sm:$0xff]  }
  0x1b   : > { %8446 = vmatpush3.bf16.msra.mxu0 %v10232_v7  ;;  %9930 = vmatpush3.bf16.msra.mxu1 %v10232_v7  ;;  %v10271_v41 = vld [vmem:[%s12933_s1 + $0x228] sm:$0xff]   ;;  %v10273_v42 = vld [vmem:[%s10966_s8 + $0xa4] ss:$20 sps:$4 sm:$0xff]   ;;  %v10277_v47 = vld [vmem:[%s10966_s8 + $0xa0] ss:$20 sps:$4 sm:$0xff]  }
  0x1c   : > { %8447 = vmatprep.subr.bf16.mxu0 %v10233_v8  ;;  %9923 = vmatprep.subr.bf16.mxu1 %v10233_v8  ;;  %v10275_v43 = vld [vmem:[%s10966_s8 + $0x284] ss:$20 sps:$4 sm:$0xff]   ;;  %v10272_v45 = vld [vmem:[%s12933_s1 + $0x1e8] sm:$0xff]   ;;  %v10278_v48 = vld [vmem:[%s10966_s8 + $0x280] ss:$20 sps:$4 sm:$0xff]  }
  0x1d   : > { %v10290_v44 = vld [vmem:[%s12933_s1 + $0x258] sm:$0xff]   ;;  %v10281_v49 = vld [vmem:[%s12933_s1 + $0x1f0] sm:$0xff]   ;;  %v10284_v50 = vld [vmem:[%s10966_s8 + $0xcc] ss:$20 sps:$4 sm:$0xff]  }
  0x1e   : > { %v10282_v51 = vld [vmem:[%s12933_s1 + $0x238] sm:$0xff]   ;;  %v10288_v52 = vld [vmem:[%s10966_s8 + $0x34] ss:$20 sps:$4 sm:$0xff]   ;;  %v10305_v53 = vld [vmem:[%s12933_s1 + $0x260] sm:$0xff]  }
  0x1f   : > { %8448 = vmatpush3.bf16.msra.mxu0 %v10234_v9  ;;  %9931 = vmatpush3.bf16.msra.mxu1 %v10234_v9  ;;  %v10283_v54 = vld [vmem:[%s12933_s1 + $0x1f8] sm:$0xff]   ;;  %v10286_v55 = vld [vmem:[%s10966_s8 + $0x30] ss:$20 sps:$4 sm:$0xff]   ;;  %v10293_v59 = vld [vmem:[%s10966_s8 + $0xf4] ss:$20 sps:$4 sm:$0xff]  }
  0x20   : > { %8449 = vmatprep.subr.bf16.mxu0 %v10235_v10  ;;  %9924 = vmatprep.subr.bf16.mxu1 %v10235_v10  ;;  %v10289_v56 = vld [vmem:[%s10966_s8 + $0xc8] ss:$20 sps:$4 sm:$0xff]   ;;  %v10291_v57 = vld [vmem:[%s12933_s1 + $0x40] sm:$0xff]   ;;  %v10321_v1 = vld [vmem:[%s12933_s1 + $0x50] sm:$0xff]  }
  0x21   : > { %v10292_v58 = vld [vmem:[%s12933_s1] sm:$0xff]   ;;  %v10295_v60 = vld [vmem:[%s10966_s8 + $0x5c] ss:$20 sps:$4 sm:$0xff]   ;;  %v10314_v61 = vld [vmem:[%s12933_s1 + $0x268] sm:$0xff]  }
  0x22   : > { %v10306_v62 = vld [vmem:[%s12933_s1 + $0x48] sm:$0xff]   ;;  %v10297_v0 = vld [vmem:[%s10966_s8 + $0xf0] ss:$20 sps:$4 sm:$0xff]   ;;  %v10336_v7 = vld [vmem:[%s12933_s1 + $0x278] sm:$0xff]  }
  0x23   : > { %8450 = vmatpush3.bf16.msra.mxu0 %v10236_v13  ;;  %9932 = vmatpush3.bf16.msra.mxu1 %v10236_v13  ;;  %v10307_v63 = vld [vmem:[%s12933_s1 + $0x8] sm:$0xff]   ;;  %v10299_v3 = vld [vmem:[%s10966_s8 + $0x11c] ss:$20 sps:$4 sm:$0xff]   ;;  %v10301_v4 = vld [vmem:[%s10966_s8 + $0x84] ss:$20 sps:$4 sm:$0xff]  }
  0x24   : > { %8451 = vmatprep.subr.bf16.mxu0 %v10237_v14  ;;  %9925 = vmatprep.subr.bf16.mxu1 %v10237_v14  ;;  %v10298_v2 = vld [vmem:[%s10966_s8 + $0x58] ss:$20 sps:$4 sm:$0xff]   ;;  %v10329_v5 = vld [vmem:[%s12933_s1 + $0x270] sm:$0xff]  }
  0x25   : > { %v10322_v6 = vld [vmem:[%s12933_s1 + $0x10] sm:$0xff]   ;;  %v10303_v8 = vld [vmem:[%s10966_s8 + $0x118] ss:$20 sps:$4 sm:$0xff]  }
  0x26   : > { %v10337_v9 = vld [vmem:[%s12933_s1 + $0x58] sm:$0xff]   ;;  %v10304_v11 = vld [vmem:[%s10966_s8 + $0x80] ss:$20 sps:$4 sm:$0xff]  }
  0x27   : > { %8452 = vmatpush3.bf16.msra.mxu0 %v10238_v15  ;;  %9933 = vmatpush3.bf16.msra.mxu1 %v10238_v15  ;;  %v10338_v10 = vld [vmem:[%s12933_s1 + $0x18] sm:$0xff]   ;;  %v10310_v13 = vld [vmem:[%s10966_s8 + $0xac] ss:$20 sps:$4 sm:$0xff]  }
  0x28   : > { %8453 = vmatprep.subr.bf16.mxu0 %v10239_v16  ;;  %9926 = vmatprep.subr.bf16.mxu1 %v10239_v16  ;;  %v10308_v12 = vld [vmem:[%s10966_s8 + $0x144] ss:$20 sps:$4 sm:$0xff]   ;;  %v10312_v14 = vld [vmem:[%s10966_s8 + $0x140] ss:$20 sps:$4 sm:$0xff]   ;;  %v10313_v15 = vld [vmem:[%s10966_s8 + $0xa8] ss:$20 sps:$4 sm:$0xff]  }
  0x29   : > { %v10350_v16 = vld [vmem:[%s12933_s1 + $0xc0] sm:$0xff]  }
  0x2b   : > { %8454 = vmatpush3.bf16.msra.mxu0 %v10240_v17  ;;  %9934 = vmatpush3.bf16.msra.mxu1 %v10240_v17  ;;  %v10315_v17 = vld [vmem:[%s10966_s8 + $0x16c] ss:$20 sps:$4 sm:$0xff]  }
  0x2c   : > { %8551 = vmatprep.subr.bf16.mxu1 %v10247_v18  ;;  %9679 = vmatprep.subr.bf16.mxu0 %v10248_v20  ;;  %v10317_v18 = vld [vmem:[%s10966_s8 + $0xd4] ss:$20 sps:$4 sm:$0xff]  }
  0x2e   : > { %1215 = vmatmul.mubr.bf16.vlgmr.msra.gmra.mrb[0].mxu0 %v10241_v19  ;;  %1311 = vmatmul.mubr.bf16.vlgmr.msra.gmra.mrb[0].mxu1 %v10244_v21  ;;  %v10352_v19 = vld [vmem:[%s12933_s1 + $0x60] sm:$0xff]   ;;  %v10319_v21 = vld [vmem:[%s10966_s8 + $0x168] ss:$20 sps:$4 sm:$0xff]  }
  0x2f   : > { %8552 = vmatpush3.bf16.msra.mxu1 %v10249_v22  ;;  %9680 = vmatpush3.bf16.msra.mxu0 %v10248_v20  ;;  %v10353_v20 = vld [vmem:[%s12933_s1 + $0x20] sm:$0xff]  }
  0x30   : > { %8553 = vmatprep.subr.bf16.mxu1 %v10250_v23  ;;  %1222 = vmatprep.mubr.bf16.mxu0 %v10252_v24  ;;  %v10320_v22 = vld [vmem:[%s10966_s8 + $0xd0] ss:$20 sps:$4 sm:$0xff]   ;;  %v10323_v23 = vld [vmem:[%s10966_s8 + $0x194] ss:$20 sps:$4 sm:$0xff]  }
  0x31   : > { %1318 = vmatprep.mubr.bf16.mxu1 %v10254_v25  ;;  %9681 = vmatprep.subr.bf16.mxu0 %v10261_v26  ;;  %v10325_v24 = vld [vmem:[%s10966_s8 + $0xfc] ss:$20 sps:$4 sm:$0xff]   ;;  %v10368_v25 = vld [vmem:[%s12933_s1 + $0x68] sm:$0xff]  }
  0x33   : > { %8554 = vmatpush3.bf16.msra.mxu1 %v10251_v27  ;;  %9682 = vmatpush3.bf16.msra.mxu0 %v10261_v26  ;;  %v10369_v26 = vld [vmem:[%s12933_s1 + $0x28] sm:$0xff]   ;;  %v10327_v27 = vld [vmem:[%s10966_s8 + $0x190] ss:$20 sps:$4 sm:$0xff]  }
  0x34   : > { %8555 = vmatprep.subr.bf16.mxu1 %v10258_v29  ;;  %9683 = vmatprep.subr.bf16.mxu0 %v10280_v35  ;;  %v10330_v29 = vld [vmem:[%s10966_s8 + $0x1bc] ss:$20 sps:$4 sm:$0xff]  }
  0x36   : > { %1223 = vmatmul.mubr.bf16.gmra.mrb[4].mxu0 %v10256_v28  ;;  %1319 = vmatmul.mubr.bf16.gmra.mrb[4].mxu1 %v10257_v30  ;;  %v10328_v28 = vld [vmem:[%s10966_s8 + $0xf8] ss:$20 sps:$4 sm:$0xff]  }
  0x37   : > { %8556 = vmatpush3.bf16.msra.mxu1 %v10259_v31  ;;  %1230 = vmatprep.mubr.bf16.mxu0 %v10263_v32  ;;  %v10332_v30 = vld [vmem:[%s10966_s8 + $0x124] ss:$20 sps:$4 sm:$0xff]   ;;  %v10335_v32 = vld [vmem:[%s10966_s8 + $0x120] ss:$20 sps:$4 sm:$0xff]  }
  0x38   : > { %8557 = vmatprep.subr.bf16.mxu1 %v10260_v33  ;;  %1326 = vmatprep.mubr.bf16.mxu1 %v10265_v34  ;;  %v10334_v31 = vld [vmem:[%s10966_s8 + $0x1b8] ss:$20 sps:$4 sm:$0xff]  }
  0x39   : > { %9684 = vmatpush3.bf16.msra.mxu0 %v10280_v35  ;;  %v10339_v33 = vld [vmem:[%s10966_s8 + $0x1e4] ss:$20 sps:$4 sm:$0xff]   ;;  %v10341_v34 = vld [vmem:[%s10966_s8 + $0x14c] ss:$20 sps:$4 sm:$0xff]   ;;  %v10384_v35 = vld [vmem:[%s12933_s1 + $0x70] sm:$0xff]  }
  0x3a   : > { %9685 = vmatprep.subr.bf16.mxu0 %v10290_v44 }
  0x3b   : > { %8558 = vmatpush3.bf16.msra.mxu1 %v10262_v36  ;;  %v10385_v36 = vld [vmem:[%s12933_s1 + $0x30] sm:$0xff]  }
  0x3c   : > { %8559 = vmatprep.subr.bf16.mxu1 %v10269_v38  ;;  %v10344_v38 = vld [vmem:[%s10966_s8 + $0x148] ss:$20 sps:$4 sm:$0xff]  }
  0x3d   : > { %9686 = vmatpush3.bf16.msra.mxu0 %v10290_v44  ;;  %v10401_v44 = vld [vmem:[%s12933_s1 + $0x38] sm:$0xff]  }
  0x3e   : > { %1231 = vmatmul.mubr.bf16.gmra.mrb[8].mxu0 %v10267_v37  ;;  %1327 = vmatmul.mubr.bf16.gmra.mrb[8].mxu1 %v10268_v39  ;;  %v10343_v37 = vld [vmem:[%s10966_s8 + $0x1e0] ss:$20 sps:$4 sm:$0xff]  }
  0x3f   : > { %8560 = vmatpush3.bf16.msra.mxu1 %v10270_v40  ;;  %1238 = vmatprep.mubr.bf16.mxu0 %v10273_v42  ;;  %v10345_v39 = vld [vmem:[%s10966_s8 + $0x174] ss:$20 sps:$4 sm:$0xff]   ;;  %v10347_v40 = vld [vmem:[%s10966_s8 + $0x38] ss:$20 sps:$4 sm:$0xff]  }
  0x40   : > { %8561 = vmatprep.subr.bf16.mxu1 %v10271_v41  ;;  %1334 = vmatprep.mubr.bf16.mxu1 %v10275_v43  ;;  %v10348_v41 = vld [vmem:[%s10966_s8 + $0x170] ss:$20 sps:$4 sm:$0xff]   ;;  %v10349_v42 = vld [vmem:[%s10966_s8 + $0x60] ss:$20 sps:$4 sm:$0xff]   ;;  %v10400_v43 = vld [vmem:[%s12933_s1 + $0x78] sm:$0xff]  }
  0x41   : > { %9687 = vmatprep.subr.bf16.mxu0 %v10305_v53 }
  0x42   : > { %9688 = vmatpush3.bf16.msra.mxu0 %v10305_v53  ;;  %v10361_v53 = vld [vmem:[%s10966_s8 + $0x1c4] ss:$20 sps:$4 sm:$0xff]  }
  0x43   : > { %8562 = vmatpush3.bf16.msra.mxu1 %v10272_v45  ;;  %9689 = vmatprep.subr.bf16.mxu0 %v10314_v61  ;;  %v10351_v45 = vld [vmem:[%s12933_s1 + $0x80] sm:$0xff]  }
  0x44   : > { %8563 = vmatprep.subr.bf16.mxu1 %v10279_v46  ;;  %v10354_v46 = vld [vmem:[%s10966_s8 + $0x19c] ss:$20 sps:$4 sm:$0xff]  }
  0x46   : > { %1239 = vmatmul.mubr.bf16.gmra.mrb[12].mxu0 %v10277_v47  ;;  %1335 = vmatmul.mubr.bf16.gmra.mrb[12].mxu1 %v10278_v48  ;;  %v10356_v47 = vld [vmem:[%s10966_s8 + $0x88] ss:$20 sps:$4 sm:$0xff]  }
  0x47   : > { %8564 = vmatpush3.bf16.msra.mxu1 %v10281_v49  ;;  %1246 = vmatprep.mubr.bf16.mxu0 %v10284_v50  ;;  %v10359_v48 = vld [vmem:[%s12933_s1 + $0xc8] sm:$0xff]  }
  0x48   : > { %8565 = vmatprep.subr.bf16.mxu1 %v10282_v51  ;;  %1375 = vmatprep.mubr.bf16.mxu1 %v10288_v52  ;;  %v10360_v49 = vld [vmem:[%s12933_s1 + $0x88] sm:$0xff]   ;;  %v10358_v51 = vld [vmem:[%s10966_s8 + $0xb0] ss:$20 sps:$4 sm:$0xff]  }
  0x49   : > { %9690 = vmatpush3.bf16.msra.mxu0 %v10314_v61  ;;  %v10357_v50 = vld [vmem:[%s10966_s8 + $0x198] ss:$20 sps:$4 sm:$0xff]   ;;  %v10366_v52 = vld [vmem:[%s12933_s1 + $0xd0] sm:$0xff]   ;;  %v10382_v61 = vld [vmem:[%s12933_s1 + $0xe0] sm:$0xff]  }
  0x4a   : > { %9691 = vmatprep.subr.bf16.mxu0 %v10329_v5 }
  0x4b   : > { %8566 = vmatpush3.bf16.msra.mxu1 %v10283_v54  ;;  %v10363_v54 = vld [vmem:[%s10966_s8 + $0xd8] ss:$20 sps:$4 sm:$0xff]  }
  0x4c   : > { %8687 = vmatprep.subr.bf16.mxu1 %v10291_v57  ;;  %v10375_v57 = vld [vmem:[%s12933_s1 + $0xd8] sm:$0xff]  }
  0x4d   : > { %9692 = vmatpush3.bf16.msra.mxu0 %v10329_v5  ;;  %v10377_v5 = vld [vmem:[%s10966_s8 + $0x214] ss:$20 sps:$4 sm:$0xff]  }
  0x4e   : > { %1247 = vmatmul.mubr.bf16.gmra.mrb[16].mxu0 %v10289_v56  ;;  %1376 = vmatmul.mubr.bf16.vlgmr.msra.gmra.mrb[16].mxu1 %v10286_v55  ;;  %v10416_v55 = vld [vmem:[%s12933_s1 + $0x2c0] sm:$0xff]   ;;  %v10367_v56 = vld [vmem:[%s12933_s1 + $0x90] sm:$0xff]  }
  0x4f   : > { %8688 = vmatpush3.bf16.msra.mxu1 %v10292_v58  ;;  %1254 = vmatprep.mubr.bf16.mxu0 %v10293_v59  ;;  %v10364_v58 = vld [vmem:[%s10966_s8 + $0x1c0] ss:$20 sps:$4 sm:$0xff]  }
  0x50   : > { %1383 = vmatprep.mubr.bf16.mxu1 %v10295_v60  ;;  %8689 = vmatprep.subr.bf16.mxu1 %v10306_v62  ;;  %v10365_v59 = vld [vmem:[%s10966_s8 + $0x100] ss:$20 sps:$4 sm:$0xff]   ;;  %v10376_v60 = vld [vmem:[%s12933_s1 + $0x98] sm:$0xff]  }
  0x51   : > { %9693 = vmatprep.subr.bf16.mxu0 %v10336_v7  ;;  %v10370_v62 = vld [vmem:[%s10966_s8 + $0x1ec] ss:$20 sps:$4 sm:$0xff]  }
  0x52   : > { %9694 = vmatpush3.bf16.msra.mxu0 %v10336_v7  ;;  %v10379_v7 = vld [vmem:[%s10966_s8 + $0x178] ss:$20 sps:$4 sm:$0xff]  }
  0x53   : > { %8690 = vmatpush3.bf16.msra.mxu1 %v10307_v63  ;;  %8799 = vmatprep.subr.bf16.mxu0 %v10350_v16  ;;  %v10372_v63 = vld [vmem:[%s10966_s8 + $0x128] ss:$20 sps:$4 sm:$0xff]   ;;  %v10389_v16 = vld [vmem:[%s10966_s8 + $0x238] ss:$20 sps:$4 sm:$0xff]  }
  0x54   : > { %8691 = vmatprep.subr.bf16.mxu1 %v10321_v1  ;;  %v10391_v1 = vld [vmem:[%s12933_s1 + $0xe8] sm:$0xff]  }
  0x56   : > { %1255 = vmatmul.mubr.bf16.gmra.mrb[20].mxu0 %v10297_v0  ;;  %1384 = vmatmul.mubr.bf16.gmra.mrb[20].mxu1 %v10298_v2  ;;  %v10383_v0 = vld [vmem:[%s12933_s1 + $0xa0] sm:$0xff]   ;;  %v10373_v2 = vld [vmem:[%s10966_s8 + $0x1e8] ss:$20 sps:$4 sm:$0xff]  }
  0x57   : > { %1262 = vmatprep.mubr.bf16.mxu0 %v10299_v3  ;;  %1391 = vmatprep.mubr.bf16.mxu1 %v10301_v4  ;;  %v10374_v3 = vld [vmem:[%s10966_s8 + $0x150] ss:$20 sps:$4 sm:$0xff]   ;;  %v10392_v4 = vld [vmem:[%s12933_s1 + $0xa8] sm:$0xff]  }
  0x58   : > { %8692 = vmatpush3.bf16.msra.mxu1 %v10322_v6  ;;  %v10398_v6 = vld [vmem:[%s12933_s1 + $0xf0] sm:$0xff]  }
  0x59   : > { %8693 = vmatprep.subr.bf16.mxu1 %v10337_v9  ;;  %v10407_v9 = vld [vmem:[%s12933_s1 + $0xf8] sm:$0xff]  }
  0x5c   : > { %8694 = vmatpush3.bf16.msra.mxu1 %v10338_v10  ;;  %v10408_v10 = vld [vmem:[%s12933_s1 + $0xb8] sm:$0xff]  }
  0x5d   : > { %8695 = vmatprep.subr.bf16.mxu1 %v10352_v19  ;;  %v10395_v19 = vld [vmem:[%s10966_s8 + $0x218] ss:$20 sps:$4 sm:$0xff]  }
  0x5e   : > { %1263 = vmatmul.mubr.bf16.gmra.mrb[24].mxu0 %v10303_v8  ;;  %1392 = vmatmul.mubr.bf16.gmra.mrb[24].mxu1 %v10304_v11  ;;  %v10399_v8 = vld [vmem:[%s12933_s1 + $0xb0] sm:$0xff]   ;;  %v10415_v11 = vld [vmem:[%s12933_s1 + $0x100] sm:$0xff]  }
  0x5f   : > { %1270 = vmatprep.mubr.bf16.mxu0 %v10308_v12  ;;  %1399 = vmatprep.mubr.bf16.mxu1 %v10310_v13  ;;  %v10380_v12 = vld [vmem:[%s10966_s8 + $0x210] ss:$20 sps:$4 sm:$0xff]   ;;  %v10381_v13 = vld [vmem:[%s10966_s8 + $0x1a0] ss:$20 sps:$4 sm:$0xff]  }
  0x60   : > { %8696 = vmatpush3.bf16.msra.mxu1 %v10353_v20  ;;  %v10396_v20 = vld [vmem:[%s10966_s8 + $0x260] ss:$20 sps:$4 sm:$0xff]  }
  0x61   : > { %8697 = vmatprep.subr.bf16.mxu1 %v10368_v25  ;;  %v10406_v25 = vld [vmem:[%s10966_s8 + $0x290] ss:$20 sps:$4 sm:$0xff]  }
  0x64   : > { %8698 = vmatpush3.bf16.msra.mxu1 %v10369_v26  ;;  %v10411_v26 = vld [vmem:[%s10966_s8 + $0x4] ss:$20 sps:$4 sm:$0xff]  }
  0x65   : > { %8699 = vmatprep.subr.bf16.mxu1 %v10384_v35  ;;  %v10424_v35 = vld [vmem:[%s12933_s1 + $0x110] sm:$0xff]  }
  0x66   : > { %1271 = vmatmul.mubr.bf16.gmra.mrb[28].mxu0 %v10312_v14  ;;  %1400 = vmatmul.mubr.bf16.gmra.mrb[28].mxu1 %v10313_v15  ;;  %v10386_v14 = vld [vmem:[%s10966_s8 + $0x23c] ss:$20 sps:$4 sm:$0xff]  }
  0x67   : > { %1278 = vmatprep.mubr.bf16.mxu0 %v10315_v17  ;;  %1407 = vmatprep.mubr.bf16.mxu1 %v10317_v18  ;;  %v10388_v15 = vld [vmem:[%s10966_s8 + $0x1c8] ss:$20 sps:$4 sm:$0xff]   ;;  %v10390_v17 = vld [vmem:[%s10966_s8 + $0x1f0] ss:$20 sps:$4 sm:$0xff]  }
  0x68   : > { %8700 = vmatpush3.bf16.msra.mxu1 %v10385_v36  ;;  %v10393_v18 = vld [vmem:[%s10966_s8 + $0x264] ss:$20 sps:$4 sm:$0xff]   ;;  %v10425_v36 = vld [vmem:[%s12933_s1 + $0x2d0] sm:$0xff]  }
  0x69   : > { %8701 = vmatprep.subr.bf16.mxu1 %v10400_v43  ;;  %v10429_v43 = vld [vmem:[%s12933_s1 + $0x298] sm:$0xff]  }
  0x6c   : > { %8702 = vmatpush3.bf16.msra.mxu1 %v10401_v44  ;;  %v10840_v44 = vld [vmem:[%s10966_s8 + $0x54] ss:$20 sps:$4 sm:$0xff]  }
  0x6d   : > { %8935 = vmatprep.subr.bf16.mxu1 %v10416_v55  ;;  %v10845_v55 = vld [vmem:[%s10966_s8 + $0x84] ss:$20 sps:$4 sm:$0xff]  }
  0x6e   : > { %1279 = vmatmul.mubr.bf16.gmra.mrb[32].mxu0 %v10319_v21  ;;  %1408 = vmatmul.mubr.bf16.gmra.mrb[32].mxu1 %v10320_v22  ;;  %v10397_v21 = vld [vmem:[%s10966_s8 + $0x240] ss:$20 sps:$4 sm:$0xff]  }
  0x6f   : > { %1286 = vmatprep.mubr.bf16.mxu0 %v10323_v23  ;;  %1415 = vmatprep.mubr.bf16.mxu1 %v10325_v24  ;;  %v10402_v22 = vld [vmem:[%s10966_s8 + $0x28c] ss:$20 sps:$4 sm:$0xff]   ;;  %v10404_v23 = vld [vmem:[%s10966_s8 + $0x268] ss:$20 sps:$4 sm:$0xff]  }
  0x70   : > { %v10405_v24 = vld [vmem:[%s10966_s8 + $0x288] ss:$20 sps:$4 sm:$0xff]  }
  0x76   : > { %1287 = vmatmul.mubr.bf16.gmra.mrb[36].mxu0 %v10327_v27  ;;  %1416 = vmatmul.mubr.bf16.gmra.mrb[36].mxu1 %v10328_v28  ;;  %v10414_v27 = vld [vmem:[%s10966_s8 + $0xc] ss:$20 sps:$4 sm:$0xff]  }
  0x77   : > { %1294 = vmatprep.mubr.bf16.mxu0 %v10330_v29  ;;  %1423 = vmatprep.mubr.bf16.mxu1 %v10332_v30  ;;  %v10409_v28 = vld [vmem:[%s10966_s8] ss:$20 sps:$4 sm:$0xff]   ;;  %v10412_v29 = vld [vmem:[%s10966_s8 + $0x8] ss:$20 sps:$4 sm:$0xff]  }
  0x78   : > { %v10417_v30 = vld [vmem:[%s12933_s1 + $0x280] sm:$0xff]  }
  0x7e   : > { %1295 = vmatmul.mubr.bf16.gmra.mrb[40].mxu0 %v10334_v31  ;;  %1424 = vmatmul.mubr.bf16.gmra.mrb[40].mxu1 %v10335_v32  ;;  %v10418_v31 = vld [vmem:[%s10966_s8 + $0x2c] ss:$20 sps:$4 sm:$0xff]  }
  0x7f   : > { %1302 = vmatprep.mubr.bf16.mxu0 %v10339_v33  ;;  %1431 = vmatprep.mubr.bf16.mxu1 %v10341_v34  ;;  %v10421_v32 = vld [vmem:[%s12933_s1 + $0x108] sm:$0xff]  }
  0x80   : > { %v10422_v33 = vld [vmem:[%s12933_s1 + $0x2c8] sm:$0xff]  }
  0x81   : > { %v10423_v34 = vld [vmem:[%s12933_s1 + $0x288] sm:$0xff]  }
  0x86   : > { %1303 = vmatmul.mubr.bf16.gmra.mrb[44].mxu0 %v10343_v37  ;;  %1432 = vmatmul.mubr.bf16.gmra.mrb[44].mxu1 %v10344_v38  ;;  %v10838_v37 = vld [vmem:[%s10966_s8 + $0x34] ss:$20 sps:$4 sm:$0xff]  }
  0x87   : > { %1439 = vmatprep.mubr.bf16.mxu1 %v10345_v39  ;;  %9695 = vmatprep.mubr.bf16.mxu0 %v10347_v40  ;;  %v10420_v38 = vld [vmem:[%s10966_s8 + $0x28] ss:$20 sps:$4 sm:$0xff]   ;;  %v10426_v39 = vld [vmem:[%s12933_s1 + $0x290] sm:$0xff]  }
  0x88   : > { %v10427_v40 = vld [vmem:[%s12933_s1 + $0x118] sm:$0xff]  }
  0x8e   : > { %1440 = vmatmul.mubr.bf16.gmra.mrb[48].mxu1 %v10348_v41  ;;  %9696 = vmatmul.mubr.bf16.vlgmr.msra.gmra.mrb[48].mxu0 %v10349_v42  ;;  %v10428_v41 = vld [vmem:[%s12933_s1 + $0x2d8] sm:$0xff]   ;;  %v10839_v42 = vld [vmem:[%s10966_s8 + $0x30] ss:$20 sps:$4 sm:$0xff]  }
  0x8f   : > { %8800 = vmatpush3.bf16.msra.mxu0 %v10351_v45  ;;  %1447 = vmatprep.mubr.bf16.mxu1 %v10354_v46  ;;  %v10841_v45 = vld [vmem:[%s10966_s8 + $0x5c] ss:$20 sps:$4 sm:$0xff]   ;;  %v10430_v46 = vld [vmem:[%s12933_s1 + $0x120] sm:$0xff]  }
  0x90   : > { %9699 = vmatprep.mubr.bf16.mxu0 %v10356_v47  ;;  %8801 = vmatprep.subr.bf16.mxu0 %v10359_v48  ;;  %v10431_v47 = vld [vmem:[%s12933_s1 + $0x2e0] sm:$0xff]  }
  0x91   : > { %v10432_v48 = vld [vmem:[%s12933_s1 + $0x2a0] sm:$0xff]  }
  0x93   : > { %8802 = vmatpush3.bf16.msra.mxu0 %v10360_v49  ;;  %v10433_v49 = vld [vmem:[%s12933_s1 + $0x128] sm:$0xff]  }
  0x94   : > { %8803 = vmatprep.subr.bf16.mxu0 %v10366_v52  ;;  %v10843_v52 = vld [vmem:[%s10966_s8 + $0x58] ss:$20 sps:$4 sm:$0xff]  }
  0x96   : > { %1448 = vmatmul.mubr.bf16.gmra.mrb[52].mxu1 %v10357_v50  ;;  %9700 = vmatmul.mubr.bf16.gmra.mrb[52].mxu0 %v10358_v51  ;;  %v10434_v50 = vld [vmem:[%s12933_s1 + $0x2e8] sm:$0xff]   ;;  %v10842_v51 = vld [vmem:[%s10966_s8 + $0x50] ss:$20 sps:$4 sm:$0xff]  }
  0x97   : > { %1455 = vmatprep.mubr.bf16.mxu1 %v10361_v53  ;;  %9703 = vmatprep.mubr.bf16.mxu0 %v10363_v54  ;;  %v10435_v53 = vld [vmem:[%s12933_s1 + $0x2a8] sm:$0xff]   ;;  %v10844_v54 = vld [vmem:[%s10966_s8 + $0x7c] ss:$20 sps:$4 sm:$0xff]  }
  0x98   : > { %8804 = vmatpush3.bf16.msra.mxu0 %v10367_v56  ;;  %v10442_v56 = vld [vmem:[%s12933_s1 + $0x130] sm:$0xff]  }
  0x99   : > { %8805 = vmatprep.subr.bf16.mxu0 %v10375_v57  ;;  %v10443_v57 = vld [vmem:[%s12933_s1 + $0x2f0] sm:$0xff]  }
  0x9c   : > { %8806 = vmatpush3.bf16.msra.mxu0 %v10376_v60  ;;  %v10452_v60 = vld [vmem:[%s12933_s1 + $0x2f8] sm:$0xff]  }
  0x9d   : > { %8807 = vmatprep.subr.bf16.mxu0 %v10382_v61  ;;  %v10846_v61 = vld [vmem:[%s10966_s8 + $0x78] ss:$20 sps:$4 sm:$0xff]  }
  0x9e   : > { %1456 = vmatmul.mubr.bf16.gmra.mrb[56].mxu1 %v10364_v58  ;;  %9704 = vmatmul.mubr.bf16.gmra.mrb[56].mxu0 %v10365_v59  ;;  %v10444_v58 = vld [vmem:[%s12933_s1 + $0x2b0] sm:$0xff]   ;;  %v10451_v59 = vld [vmem:[%s12933_s1 + $0x138] sm:$0xff]  }
  0x9f   : > { %1463 = vmatprep.mubr.bf16.mxu1 %v10370_v62  ;;  %9707 = vmatprep.mubr.bf16.mxu0 %v10372_v63  ;;  %v10847_v62 = vld [vmem:[%s10966_s8 + $0x80] ss:$20 sps:$4 sm:$0xff]   ;;  %v10453_v63 = vld [vmem:[%s12933_s1 + $0x2b8] sm:$0xff]  }
  0xa0   : > { %8808 = vmatpush3.bf16.msra.mxu0 %v10383_v0  ;;  %v10848_v0 = vld [vmem:[%s10966_s8 + $0xa4] ss:$20 sps:$4 sm:$0xff]  }
  0xa1   : > { %8809 = vmatprep.subr.bf16.mxu0 %v10391_v1  ;;  %v10849_v1 = vld [vmem:[%s10966_s8 + $0xac] ss:$20 sps:$4 sm:$0xff]  }
  0xa4   : > { %8810 = vmatpush3.bf16.msra.mxu0 %v10392_v4  ;;  %v10850_v4 = vld [vmem:[%s10966_s8 + $0xa0] ss:$20 sps:$4 sm:$0xff]  }
  0xa5   : > { %8811 = vmatprep.subr.bf16.mxu0 %v10398_v6  ;;  %v10852_v6 = vld [vmem:[%s10966_s8 + $0xcc] ss:$20 sps:$4 sm:$0xff]  }
  0xa6   : > { %1464 = vmatmul.mubr.bf16.gmra.mrb[60].mxu1 %v10373_v2  ;;  %9708 = vmatmul.mubr.bf16.gmra.mrb[60].mxu0 %v10374_v3  ;;  %v10462_v2 = vld [vmem:[%s12933_s1 + $0x340] sm:$0xff]  }
  0xa7   : > { %1471 = vmatprep.mubr.bf16.mxu1 %v10377_v5  ;;  %9711 = vmatprep.mubr.bf16.mxu0 %v10379_v7  ;;  %v10464_v3 = vld [vmem:[%s12933_s1 + $0x400] sm:$0xff]   ;;  %v10851_v5 = vld [vmem:[%s10966_s8 + $0xa8] ss:$20 sps:$4 sm:$0xff]  }
  0xa8   : > { %8812 = vmatpush3.bf16.msra.mxu0 %v10399_v8  ;;  %v10853_v7 = vld [vmem:[%s10966_s8 + $0xd4] ss:$20 sps:$4 sm:$0xff]  }
  0xa9   : > { %8813 = vmatprep.subr.bf16.mxu0 %v10407_v9  ;;  %v10854_v8 = vld [vmem:[%s10966_s8 + $0xc8] ss:$20 sps:$4 sm:$0xff]   ;;  %v10855_v9 = vld [vmem:[%s10966_s8 + $0xd0] ss:$20 sps:$4 sm:$0xff]  }
  0xac   : > { %8814 = vmatpush3.bf16.msra.mxu0 %v10408_v10  ;;  %v10856_v10 = vld [vmem:[%s10966_s8 + $0xf4] ss:$20 sps:$4 sm:$0xff]  }
  0xad   : > { %9727 = vmatprep.subr.bf16.mxu0 %v10415_v11 }
  0xae   : > { %1472 = vmatmul.mubr.bf16.gmra.mrb[64].mxu1 %v10380_v12  ;;  %9712 = vmatmul.mubr.bf16.gmra.mrb[64].mxu0 %v10381_v13  ;;  %v10858_v12 = vld [vmem:[%s10966_s8 + $0xf0] ss:$20 sps:$4 sm:$0xff]   ;;  %v10859_v13 = vld [vmem:[%s10966_s8 + $0xf8] ss:$20 sps:$4 sm:$0xff]  }
  0xaf   : > { %1479 = vmatprep.mubr.bf16.mxu1 %v10386_v14  ;;  %9715 = vmatprep.mubr.bf16.mxu0 %v10388_v15  ;;  %v10860_v14 = vld [vmem:[%s10966_s8 + $0x11c] ss:$20 sps:$4 sm:$0xff]   ;;  %v10861_v15 = vld [vmem:[%s10966_s8 + $0x124] ss:$20 sps:$4 sm:$0xff]  }
  0xb6   : > { %1480 = vmatmul.mubr.bf16.gmra.mrb[68].mxu1 %v10389_v16  ;;  %9716 = vmatmul.mubr.bf16.gmra.mrb[68].mxu0 %v10390_v17 }
  0xb7   : > { %1487 = vmatprep.mubr.bf16.mxu1 %v10393_v18  ;;  %9719 = vmatprep.mubr.bf16.mxu0 %v10395_v19 }
  0xbe   : > { %1488 = vmatmul.mubr.bf16.gmra.mrb[72].mxu1 %v10396_v20  ;;  %9720 = vmatmul.mubr.bf16.gmra.mrb[72].mxu0 %v10397_v21 }
  0xbf   : > { %1495 = vmatprep.mubr.bf16.mxu1 %v10402_v22  ;;  %9723 = vmatprep.mubr.bf16.mxu0 %v10404_v23 }
  0xc6   : > { %1496 = vmatmul.mubr.bf16.gmra.mrb[76].mxu1 %v10405_v24  ;;  %9724 = vmatmul.mubr.bf16.gmra.mrb[76].mxu0 %v10406_v25 }
  0xc7   : > { %2353 = vmatprep.mubr.bf16.mxu1 %v10411_v26  ;;  %2514 = vmatprep.mubr.bf16.mxu0 %v10414_v27 }
  0xce   : > { %2354 = vmatmul.mubr.bf16.vlgmr.msra.gmra.mrb[80].mxu1 %v10409_v28  ;;  %2515 = vmatmul.mubr.bf16.vlgmr.msra.gmra.mrb[80].mxu0 %v10412_v29  ;;  %v10862_v28 = vld [vmem:[%s10966_s8 + $0x118] ss:$20 sps:$4 sm:$0xff]   ;;  %v10863_v29 = vld [vmem:[%s10966_s8 + $0x120] ss:$20 sps:$4 sm:$0xff]  }
  0xcf   : > { %9728 = vmatpush3.bf16.msra.mxu0 %v10415_v11  ;;  %8936 = vmatpush3.bf16.msra.mxu1 %v10417_v30  ;;  %v10857_v11 = vld [vmem:[%s10966_s8 + $0xfc] ss:$20 sps:$4 sm:$0xff]   ;;  %v10864_v30 = vld [vmem:[%s10966_s8 + $0x144] ss:$20 sps:$4 sm:$0xff]  }
  0xd0   : > { %2361 = vmatprep.mubr.bf16.mxu1 %v10418_v31  ;;  %2522 = vmatprep.mubr.bf16.mxu0 %v10838_v37  ;;  %v10865_v31 = vld [vmem:[%s10966_s8 + $0x14c] ss:$20 sps:$4 sm:$0xff]  }
  0xd1   : > { %9729 = vmatprep.subr.bf16.mxu0 %v10421_v32  ;;  %8937 = vmatprep.subr.bf16.mxu1 %v10422_v33 }
  0xd3   : > { %9730 = vmatpush3.bf16.msra.mxu0 %v10421_v32  ;;  %8938 = vmatpush3.bf16.msra.mxu1 %v10423_v34 }
  0xd4   : > { %9731 = vmatprep.subr.bf16.mxu0 %v10424_v35  ;;  %8939 = vmatprep.subr.bf16.mxu1 %v10425_v36 }
  0xd6   : > { %2362 = vmatmul.mubr.bf16.gmra.mrb[84].mxu1 %v10420_v38  ;;  %2523 = vmatmul.mubr.bf16.gmra.mrb[84].mxu0 %v10839_v42 }
  0xd7   : > { %2369 = vmatprep.mubr.bf16.mxu1 %v10840_v44  ;;  %2530 = vmatprep.mubr.bf16.mxu0 %v10841_v45  ;;  %v10866_v44 = vld [vmem:[%s10966_s8 + $0x140] ss:$20 sps:$4 sm:$0xff]   ;;  %v10867_v45 = vld [vmem:[%s10966_s8 + $0x148] ss:$20 sps:$4 sm:$0xff]  }
  0xd8   : > { %9732 = vmatpush3.bf16.msra.mxu0 %v10424_v35  ;;  %8940 = vmatpush3.bf16.msra.mxu1 %v10426_v39 }
  0xd9   : > { %9733 = vmatprep.subr.bf16.mxu0 %v10427_v40  ;;  %8941 = vmatprep.subr.bf16.mxu1 %v10428_v41 }
  0xdc   : > { %9734 = vmatpush3.bf16.msra.mxu0 %v10427_v40  ;;  %8942 = vmatpush3.bf16.msra.mxu1 %v10429_v43 }
  0xdd   : > { %9735 = vmatprep.subr.bf16.mxu0 %v10430_v46  ;;  %8943 = vmatprep.subr.bf16.mxu1 %v10431_v47  ;;  %v10869_v47 = vld [vmem:[%s10966_s8 + $0x174] ss:$20 sps:$4 sm:$0xff]  }
  0xde   : > { %2370 = vmatmul.mubr.bf16.gmra.mrb[88].mxu1 %v10842_v51  ;;  %2531 = vmatmul.mubr.bf16.gmra.mrb[88].mxu0 %v10843_v52 }
  0xdf   : > { %2377 = vmatprep.mubr.bf16.mxu1 %v10844_v54  ;;  %2538 = vmatprep.mubr.bf16.mxu0 %v10845_v55 }
  0xe0   : > { %9736 = vmatpush3.bf16.msra.mxu0 %v10430_v46  ;;  %8944 = vmatpush3.bf16.msra.mxu1 %v10432_v48  ;;  %v10868_v46 = vld [vmem:[%s10966_s8 + $0x16c] ss:$20 sps:$4 sm:$0xff]  }
  0xe1   : > { %9737 = vmatprep.subr.bf16.mxu0 %v10433_v49  ;;  %8945 = vmatprep.subr.bf16.mxu1 %v10434_v50 }
  0xe4   : > { %9738 = vmatpush3.bf16.msra.mxu0 %v10433_v49  ;;  %8946 = vmatpush3.bf16.msra.mxu1 %v10435_v53 }
  0xe5   : > { %9739 = vmatprep.subr.bf16.mxu0 %v10442_v56  ;;  %8947 = vmatprep.subr.bf16.mxu1 %v10443_v57 }
  0xe6   : > { %2378 = vmatmul.mubr.bf16.gmra.mrb[92].mxu1 %v10846_v61  ;;  %2539 = vmatmul.mubr.bf16.gmra.mrb[92].mxu0 %v10847_v62  ;;  %v10871_v61 = vld [vmem:[%s10966_s8 + $0x170] ss:$20 sps:$4 sm:$0xff]   ;;  %v10872_v62 = vld [vmem:[%s10966_s8 + $0x194] ss:$20 sps:$4 sm:$0xff]  }
  0xe7   : > { %2385 = vmatprep.mubr.bf16.mxu1 %v10848_v0  ;;  %2546 = vmatprep.mubr.bf16.mxu0 %v10849_v1 }
  0xe8   : > { %9740 = vmatpush3.bf16.msra.mxu0 %v10442_v56  ;;  %8948 = vmatpush3.bf16.msra.mxu1 %v10444_v58 }
  0xe9   : > { %9741 = vmatprep.subr.bf16.mxu0 %v10451_v59  ;;  %8949 = vmatprep.subr.bf16.mxu1 %v10452_v60  ;;  %v10870_v60 = vld [vmem:[%s10966_s8 + $0x168] ss:$20 sps:$4 sm:$0xff]  }
  0xec   : > { %9742 = vmatpush3.bf16.msra.mxu0 %v10451_v59  ;;  %8950 = vmatpush3.bf16.msra.mxu1 %v10453_v63  ;;  %v10873_v63 = vld [vmem:[%s10966_s8 + $0x19c] ss:$20 sps:$4 sm:$0xff]  }
  0xed   : > { %9047 = vmatprep.subr.bf16.mxu0 %v10462_v2  ;;  %9183 = vmatprep.subr.bf16.mxu1 %v10464_v3 }
  0xee   : > { %2386 = vmatmul.mubr.bf16.gmra.mrb[96].mxu1 %v10850_v4  ;;  %2547 = vmatmul.mubr.bf16.gmra.mrb[96].mxu0 %v10851_v5 }
  0xef   : > { %2393 = vmatprep.mubr.bf16.mxu1 %v10852_v6  ;;  %2554 = vmatprep.mubr.bf16.mxu0 %v10853_v7  ;;  %v10436_v7 = vld [vmem:[%s10966_s8 + $0x1bc] ss:$20 sps:$4 sm:$0xff]  }
  0xf6   : > { %2394 = vmatmul.mubr.bf16.gmra.mrb[100].mxu1 %v10854_v8  ;;  %2555 = vmatmul.mubr.bf16.gmra.mrb[100].mxu0 %v10855_v9 }
  0xf7   : > { %2401 = vmatprep.mubr.bf16.mxu1 %v10856_v10  ;;  %2562 = vmatprep.mubr.bf16.mxu0 %v10857_v11  ;;  %v10874_v11 = vld [vmem:[%s10966_s8 + $0x190] ss:$20 sps:$4 sm:$0xff]  }
  0xfe   : > { %2402 = vmatmul.mubr.bf16.gmra.mrb[104].mxu1 %v10858_v12  ;;  %2563 = vmatmul.mubr.bf16.gmra.mrb[104].mxu0 %v10859_v13  ;;  %v10875_v12 = vld [vmem:[%s10966_s8 + $0x198] ss:$20 sps:$4 sm:$0xff]  }
  0xff   : > { %2409 = vmatprep.mubr.bf16.mxu1 %v10860_v14  ;;  %2570 = vmatprep.mubr.bf16.mxu0 %v10861_v15  ;;  %v10876_v13 = vld [vmem:[%s10966_s8 + $0x1c4] ss:$20 sps:$4 sm:$0xff]  }
 0x100   : > { %v10438_v14 = vld [vmem:[%s10966_s8 + $0x1b8] ss:$20 sps:$4 sm:$0xff]  }
 0x101   : > { %v8455_v16 = vpop.f32.mrb[0].mxu0  ;;  %v8527_v17 = vpop.f32.mrb[0].mxu1 }
 0x102   : > { %v8456_v18 = vpop.f32.mrb[1].mxu0  ;;  %v8528_v19 = vpop.f32.mrb[1].mxu1 }
 0x103   : > { %v11345_v20 = vadd.f32 %v8456_v18, %v8455_v16  ;;  %v8458_v21 = vpop.f32.mrb[2].mxu0  ;;  %v11347_v22 = vadd.f32 %v8528_v19, %v8527_v17  ;;  %v8530_v23 = vpop.f32.mrb[2].mxu1 }
 0x104   : > { %v8459_v24 = vpop.f32.mrb[3].mxu0  ;;  %v8531_v25 = vpop.f32.mrb[3].mxu1 }
 0x105   : > { %v11349_v26 = vadd.f32 %v8459_v24, %v8458_v21  ;;  %v11351_v27 = vadd.f32 %v8531_v25, %v8530_v23  ;;  %v10439_v25 = vld [vmem:[%s10966_s8 + $0x1e4] ss:$20 sps:$4 sm:$0xff]  }
 0x106   : > { %2410 = vmatmul.mubr.bf16.gmra.mrb[108].mxu1 %v10862_v28  ;;  %2571 = vmatmul.mubr.bf16.gmra.mrb[108].mxu0 %v10863_v29 }
 0x107   : > { %2417 = vmatprep.mubr.bf16.mxu1 %v10864_v30  ;;  %2578 = vmatprep.mubr.bf16.mxu0 %v10865_v31 }
 0x109   : > { %v8461_v32 = vpop.f32.mrb[4].mxu0  ;;  %v8533_v33 = vpop.f32.mrb[4].mxu1 }
 0x10a   : > { %v8462_v34 = vpop.f32.mrb[5].mxu0  ;;  %v8534_v35 = vpop.f32.mrb[5].mxu1 }
 0x10b   : > { %v11357_v36 = vadd.f32 %v8462_v34, %v8461_v32  ;;  %v8464_v37 = vpop.f32.mrb[6].mxu0  ;;  %v11359_v38 = vadd.f32 %v8534_v35, %v8533_v33  ;;  %v8536_v39 = vpop.f32.mrb[6].mxu1  ;;  %v10877_v33 = vld [vmem:[%s10966_s8 + $0x1c0] ss:$20 sps:$4 sm:$0xff]  }
 0x10c   : > { %v8465_v40 = vpop.f32.mrb[7].mxu0  ;;  %v8537_v41 = vpop.f32.mrb[7].mxu1  ;;  %v10878_v35 = vld [vmem:[%s10966_s8 + $0x1ec] ss:$20 sps:$4 sm:$0xff]  }
 0x10d   : > { %v11361_v42 = vadd.f32 %v8465_v40, %v8464_v37  ;;  %v11363_v43 = vadd.f32 %v8537_v41, %v8536_v39  ;;  %v10441_v37 = vld [vmem:[%s10966_s8 + $0x1e0] ss:$20 sps:$4 sm:$0xff]  }
 0x10e   : > { %2418 = vmatmul.mubr.bf16.gmra.mrb[112].mxu1 %v10866_v44  ;;  %2579 = vmatmul.mubr.bf16.gmra.mrb[112].mxu0 %v10867_v45 }
 0x10f   : > { %2425 = vmatprep.mubr.bf16.mxu1 %v10868_v46  ;;  %2586 = vmatprep.mubr.bf16.mxu0 %v10869_v47 }
 0x111   : > { %v8467_v48 = vpop.f32.mrb[8].mxu0  ;;  %v8539_v49 = vpop.f32.mrb[8].mxu1 }
 0x112   : > { %v8468_v50 = vpop.f32.mrb[9].mxu0  ;;  %v8540_v51 = vpop.f32.mrb[9].mxu1 }
 0x113   : > { %v11369_v52 = vadd.f32 %v8468_v50, %v8467_v48  ;;  %v8470_v53 = vpop.f32.mrb[10].mxu0  ;;  %v11371_v54 = vadd.f32 %v8540_v51, %v8539_v49  ;;  %v8542_v55 = vpop.f32.mrb[10].mxu1  ;;  %v10445_v48 = vld [vmem:[%s10966_s8 + $0x20c] ss:$20 sps:$4 sm:$0xff]  }
 0x114   : > { %v8471_v56 = vpop.f32.mrb[11].mxu0  ;;  %v8543_v57 = vpop.f32.mrb[11].mxu1 }
 0x115   : > { %v11373_v58 = vadd.f32 %v8471_v56, %v8470_v53  ;;  %v11375_v59 = vadd.f32 %v8543_v57, %v8542_v55  ;;  %v10879_v55 = vld [vmem:[%s10966_s8 + $0x1e8] ss:$20 sps:$4 sm:$0xff]  }
 0x116   : > { %2426 = vmatmul.mubr.bf16.gmra.mrb[116].mxu1 %v10870_v60  ;;  %2587 = vmatmul.mubr.bf16.gmra.mrb[116].mxu0 %v10871_v61  ;;  %v10880_v57 = vld [vmem:[%s10966_s8 + $0x214] ss:$20 sps:$4 sm:$0xff]  }
 0x117   : > { %2433 = vmatprep.mubr.bf16.mxu1 %v10872_v62  ;;  %2594 = vmatprep.mubr.bf16.mxu0 %v10873_v63  ;;  %v10447_v60 = vld [vmem:[%s10966_s8 + $0x208] ss:$20 sps:$4 sm:$0xff]  }
 0x119   : > { %v8473_v0 = vpop.f32.mrb[12].mxu0  ;;  %v8545_v1 = vpop.f32.mrb[12].mxu1 }
 0x11a   : > { %v8474_v2 = vpop.f32.mrb[13].mxu0  ;;  %v8546_v3 = vpop.f32.mrb[13].mxu1 }
 0x11b   : > { %v11381_v4 = vadd.f32 %v8474_v2, %v8473_v0  ;;  %v8476_v5 = vpop.f32.mrb[14].mxu0  ;;  %v8548_v6 = vpop.f32.mrb[14].mxu1 }
 0x11c   : > { %v8477_v8 = vpop.f32.mrb[15].mxu0  ;;  %v8549_v9 = vpop.f32.mrb[15].mxu1 }
 0x11d   : > { %v11384_v10 = vadd.f32 %v8477_v8, %v8476_v5  ;;  %v10448_v5 = vld [vmem:[%s10966_s8 + $0x234] ss:$20 sps:$4 sm:$0xff]  }
 0x11e   : > { %2434 = vmatmul.mubr.bf16.gmra.mrb[120].mxu1 %v10874_v11  ;;  %2595 = vmatmul.mubr.bf16.gmra.mrb[120].mxu0 %v10875_v12  ;;  %v10881_v11 = vld [vmem:[%s10966_s8 + $0x210] ss:$20 sps:$4 sm:$0xff]  }
 0x11f   : > { %2441 = vmatprep.mubr.bf16.mxu1 %v10436_v7  ;;  %2602 = vmatprep.mubr.bf16.mxu0 %v10876_v13  ;;  %v10882_v13 = vld [vmem:[%s10966_s8 + $0x23c] ss:$20 sps:$4 sm:$0xff]  }
 0x121   : > { %v8479_v15 = vpop.f32.mrb[16].mxu0  ;;  %v8567_v16 = vpop.f32.mrb[16].mxu1 }
 0x122   : > { %v8480_v17 = vpop.f32.mrb[17].mxu0  ;;  %v8568_v18 = vpop.f32.mrb[17].mxu1 }
 0x123   : > { %v11390_v19 = vadd.f32 %v8480_v17, %v8479_v15  ;;  %v8569_v21 = vadd.f32 %v8568_v18, %v8567_v16  ;;  %v8482_v23 = vpop.f32.mrb[18].mxu0  ;;  %v8570_v24 = vpop.f32.mrb[18].mxu1 }
 0x124   : > { %v8483_v28 = vpop.f32.mrb[19].mxu0  ;;  %v8571_v29 = vpop.f32.mrb[19].mxu1 }
 0x125   : > { %v11394_v30 = vadd.f32 %v8569_v21, %v11345_v20  ;;  %v11396_v31 = vadd.f32 %v8483_v28, %v8482_v23  ;;  %v8572_v32 = vadd.f32 %v8571_v29, %v8570_v24 }
 0x126   : > { %2442 = vmatmul.mubr.bf16.gmra.mrb[124].mxu1 %v10438_v14  ;;  %2603 = vmatmul.mubr.bf16.gmra.mrb[124].mxu0 %v10877_v33  ;;  %v10450_v14 = vld [vmem:[%s10966_s8 + $0x230] ss:$20 sps:$4 sm:$0xff]  }
 0x127   : > { %v11400_v34 = vadd.f32 %v8572_v32, %v11349_v26  ;;  %2449 = vmatprep.mubr.bf16.mxu1 %v10439_v25  ;;  %2610 = vmatprep.mubr.bf16.mxu0 %v10878_v35  ;;  %v10454_v25 = vld [vmem:[%s10966_s8 + $0x25c] ss:$20 sps:$4 sm:$0xff]   ;;  %v10883_v35 = vld [vmem:[%s10966_s8 + $0x238] ss:$20 sps:$4 sm:$0xff]  }
 0x129   : > { %v8485_v39 = vpop.f32.mrb[20].mxu0  ;;  %v8573_v40 = vpop.f32.mrb[20].mxu1 }
 0x12a   : > { %v8486_v41 = vpop.f32.mrb[21].mxu0  ;;  %v8574_v20 = vpop.f32.mrb[21].mxu1 }
 0x12b   : > { %v11404_v44 = vadd.f32 %v8486_v41, %v8485_v39  ;;  %v8575_v45 = vadd.f32 %v8574_v20, %v8573_v40  ;;  %v8488_v46 = vpop.f32.mrb[22].mxu0  ;;  %v8576_v47 = vpop.f32.mrb[22].mxu1  ;;  %v10884_v39 = vld [vmem:[%s10966_s8 + $0x264] ss:$20 sps:$4 sm:$0xff]  }
 0x12c   : > { %v8489_v49 = vpop.f32.mrb[23].mxu0  ;;  %v8577_v26 = vpop.f32.mrb[23].mxu1  ;;  %v10456_v40 = vld [vmem:[%s10966_s8 + $0x258] ss:$20 sps:$4 sm:$0xff]  }
 0x12d   : > { %v11408_v50 = vadd.f32 %v8575_v45, %v11357_v36  ;;  %v11410_v51 = vadd.f32 %v8489_v49, %v8488_v46  ;;  %v8578_v53 = vadd.f32 %v8577_v26, %v8576_v47  ;;  %v10457_v26 = vld [vmem:[%s10966_s8 + $0x10] ss:$20 sps:$4 sm:$0xff]  }
 0x12e   : > { %2450 = vmatmul.mubr.bf16.gmra.mrb[128].mxu1 %v10441_v37  ;;  %2611 = vmatmul.mubr.bf16.gmra.mrb[128].mxu0 %v10879_v55 }
 0x12f   : > { %v11414_v56 = vadd.f32 %v8578_v53, %v11361_v42  ;;  %2457 = vmatprep.mubr.bf16.mxu1 %v10445_v48  ;;  %2618 = vmatprep.mubr.bf16.mxu0 %v10880_v57  ;;  %v10460_v53 = vld [vmem:[%s10966_s8 + $0x54] ss:$20 sps:$4 sm:$0xff]  }
 0x131   : > { %v8491_v61 = vpop.f32.mrb[24].mxu0  ;;  %v8579_v62 = vpop.f32.mrb[24].mxu1 }
 0x132   : > { %v8492_v63 = vpop.f32.mrb[25].mxu0  ;;  %v8580_v36 = vpop.f32.mrb[25].mxu1 }
 0x133   : > { %v11418_v0 = vadd.f32 %v8492_v63, %v8491_v61  ;;  %v8581_v1 = vadd.f32 %v8580_v36, %v8579_v62  ;;  %v8494_v2 = vpop.f32.mrb[26].mxu0  ;;  %v8582_v3 = vpop.f32.mrb[26].mxu1  ;;  %v10885_v62 = vld [vmem:[%s10966_s8 + $0x260] ss:$20 sps:$4 sm:$0xff]   ;;  %v10458_v36 = vld [vmem:[%s10966_s8 + $0x50] ss:$20 sps:$4 sm:$0xff]  }
 0x134   : > { %v8495_v6 = vpop.f32.mrb[27].mxu0  ;;  %v8583_v42 = vpop.f32.mrb[27].mxu1 }
 0x135   : > { %v11422_v7 = vadd.f32 %v8581_v1, %v11369_v52  ;;  %v11424_v8 = vadd.f32 %v8495_v6, %v8494_v2  ;;  %v8584_v9 = vadd.f32 %v8583_v42, %v8582_v3  ;;  %v10461_v1 = vld [vmem:[%s10966_s8 + $0x38] ss:$20 sps:$4 sm:$0xff]   ;;  %v10467_v42 = vld [vmem:[%s10966_s8 + $0x7c] ss:$20 sps:$4 sm:$0xff]  }
 0x136   : > { %2458 = vmatmul.mubr.bf16.gmra.mrb[132].mxu1 %v10447_v60  ;;  %2619 = vmatmul.mubr.bf16.gmra.mrb[132].mxu0 %v10881_v11 }
 0x137   : > { %v11428_v12 = vadd.f32 %v8584_v9, %v11373_v58  ;;  %2465 = vmatprep.mubr.bf16.mxu1 %v10448_v5  ;;  %2626 = vmatprep.mubr.bf16.mxu0 %v10882_v13 }
 0x139   : > { %v8497_v15 = vpop.f32.mrb[28].mxu0  ;;  %v8585_v16 = vpop.f32.mrb[28].mxu1 }
 0x13a   : > { %v8498_v17 = vpop.f32.mrb[29].mxu0  ;;  %v8586_v52 = vpop.f32.mrb[29].mxu1 }
 0x13b   : > { %v11432_v18 = vadd.f32 %v8498_v17, %v8497_v15  ;;  %v8587_v21 = vadd.f32 %v8586_v52, %v8585_v16  ;;  %v8500_v23 = vpop.f32.mrb[30].mxu0  ;;  %v8588_v24 = vpop.f32.mrb[30].mxu1  ;;  %v10465_v15 = vld [vmem:[%s12933_s1 + $0x3c0] sm:$0xff]   ;;  %v10471_v52 = vld [vmem:[%s12933_s1 + $0x348] sm:$0xff]  }
 0x13c   : > { %v8501_v28 = vpop.f32.mrb[31].mxu0  ;;  %v8589_v58 = vpop.f32.mrb[31].mxu1 }
 0x13d   : > { %v11436_v29 = vadd.f32 %v8587_v21, %v11381_v4  ;;  %v11438_v32 = vadd.f32 %v8501_v28, %v8500_v23  ;;  %v8590_v33 = vadd.f32 %v8589_v58, %v8588_v24  ;;  %v10480_v21 = vld [vmem:[%s12933_s1 + $0x408] sm:$0xff]  }
 0x13e   : > { %2466 = vmatmul.mubr.bf16.gmra.mrb[136].mxu1 %v10450_v14  ;;  %2627 = vmatmul.mubr.bf16.gmra.mrb[136].mxu0 %v10883_v35  ;;  %v10472_v28 = vld [vmem:[%s12933_s1 + $0x308] sm:$0xff]  }
 0x13f   : > { %v11442_v37 = vadd.f32 %v8590_v33, %v11384_v10  ;;  %2473 = vmatprep.mubr.bf16.mxu1 %v10454_v25  ;;  %2634 = vmatprep.mubr.bf16.mxu0 %v10884_v39  ;;  %v10481_v58 = vld [vmem:[%s12933_s1 + $0x3c8] sm:$0xff]   ;;  %v10496_v33 = vld [vmem:[%s12933_s1 + $0x410] sm:$0xff]  }
 0x140   : > { %v10469_v39 = vld [vmem:[%s10966_s8 + $0x88] ss:$20 sps:$4 sm:$0xff]  }
 0x141   : > { %v8503_v41 = vpop.f32.mrb[32].mxu0  ;;  %v8591_v20 = vpop.f32.mrb[32].mxu1 }
 0x142   : > { %v8504_v4 = vpop.f32.mrb[33].mxu0  ;;  %v8592_v45 = vpop.f32.mrb[33].mxu1 }
 0x143   : > { %v11446_v46 = vadd.f32 %v8504_v4, %v8503_v41  ;;  %v8593_v47 = vadd.f32 %v8592_v45, %v8591_v20  ;;  %v8506_v48 = vpop.f32.mrb[34].mxu0  ;;  %v8594_v49 = vpop.f32.mrb[34].mxu1  ;;  %v10473_v4 = vld [vmem:[%s10966_s8 + $0xb0] ss:$20 sps:$4 sm:$0xff]  }
 0x144   : > { %v8507_v10 = vpop.f32.mrb[35].mxu0  ;;  %v8595_v55 = vpop.f32.mrb[35].mxu1  ;;  %v11503_v45 = vld [vmem:[%s10966_s8 + $0xa4] ss:$20 sps:$4 sm:$0xff]  }
 0x145   : > { %v11451_v57 = vadd.f32 %v8593_v47, %v11390_v19  ;;  %v11453_v60 = vadd.f32 %v8507_v10, %v8506_v48  ;;  %v8596_v61 = vadd.f32 %v8595_v55, %v8594_v49  ;;  %v10466_v19 = vld [vmem:[%s10966_s8 + $0x60] ss:$20 sps:$4 sm:$0xff]   ;;  %v10487_v55 = vld [vmem:[%s12933_s1 + $0x358] sm:$0xff]  }
 0x146   : > { %2474 = vmatmul.mubr.bf16.gmra.mrb[140].mxu1 %v10456_v40  ;;  %2635 = vmatmul.mubr.bf16.gmra.mrb[140].mxu0 %v10885_v62  ;;  %v11499_v40 = vld [vmem:[%s10966_s8 + $0x78] ss:$20 sps:$4 sm:$0xff]   ;;  %v10479_v10 = vld [vmem:[%s12933_s1 + $0x310] sm:$0xff]  }
 0x147   : > { %v11457_v63 = vadd.f32 %v8596_v61, %v11396_v31  ;;  %9743 = vmatprep.mubr.bf16.mxu0 %v10457_v26  ;;  %3670 = vmatprep.mubr.bf16.mxu1 %v10460_v53  ;;  %v10463_v31 = vld [vmem:[%s12933_s1 + $0x300] sm:$0xff]  }
 0x149   : > { %v8509_v2 = vpop.f32.mrb[36].mxu0  ;;  %v8597_v3 = vpop.f32.mrb[36].mxu1 }
 0x14a   : > { %v8510_v5 = vpop.f32.mrb[37].mxu0  ;;  %v8598_v6 = vpop.f32.mrb[37].mxu1 }
 0x14b   : > { %v11463_v9 = vadd.f32 %v8510_v5, %v8509_v2  ;;  %v8599_v11 = vadd.f32 %v8598_v6, %v8597_v3  ;;  %v8512_v13 = vpop.f32.mrb[38].mxu0  ;;  %v8600_v14 = vpop.f32.mrb[38].mxu1  ;;  %v10488_v6 = vld [vmem:[%s12933_s1 + $0x318] sm:$0xff]  }
 0x14c   : > { %v8513_v16 = vpop.f32.mrb[39].mxu0  ;;  %v8601_v17 = vpop.f32.mrb[39].mxu1 }
 0x14d   : > { %v11478_v23 = vadd.f32 %v8599_v11, %v11404_v44  ;;  %v11480_v24 = vadd.f32 %v8513_v16, %v8512_v13  ;;  %v8602_v25 = vadd.f32 %v8601_v17, %v8600_v14  ;;  %v10478_v44 = vld [vmem:[%s12933_s1 + $0x350] sm:$0xff]   ;;  %v10528_v11 = vld [vmem:[%s12933_s1 + $0x420] sm:$0xff]   ;;  %v10476_v13 = vld [vmem:[%s10966_s8 + $0xd8] ss:$20 sps:$4 sm:$0xff]  }
 0x14e   : > { %9744 = vmatmul.mubr.bf16.vlgmr.msra.gmra.mrb[48].mxu0 %v10461_v1  ;;  %3671 = vmatmul.mubr.bf16.vlgmr.msra.gmra.mrb[144].mxu1 %v10458_v36  ;;  %v10497_v36 = vld [vmem:[%s12933_s1 + $0x3d0] sm:$0xff]   ;;  %v10512_v1 = vld [vmem:[%s12933_s1 + $0x418] sm:$0xff]   ;;  %v11547_v16 = vld [vmem:[%s10966_s8 + $0xcc] ss:$20 sps:$4 sm:$0xff]  }
 0x14f   : > { %v11495_v35 = vadd.f32 %v8602_v25, %v11410_v51  ;;  %9048 = vmatpush3.bf16.msra.mxu0 %v10463_v31  ;;  %9184 = vmatpush3.bf16.msra.mxu1 %v10465_v15  ;;  %v11543_v14 = vld [vmem:[%s10966_s8 + $0xa0] ss:$20 sps:$4 sm:$0xff]  }
 0x150   : > { %9747 = vmatprep.mubr.bf16.mxu0 %v10466_v19  ;;  %3678 = vmatprep.mubr.bf16.mxu1 %v10467_v42  ;;  %v10513_v42 = vld [vmem:[%s12933_s1 + $0x3d8] sm:$0xff]   ;;  %v10482_v15 = vld [vmem:[%s10966_s8 + $0x100] ss:$20 sps:$4 sm:$0xff]  }
 0x151   : > { %v8515_v41 = vpop.f32.mrb[40].mxu0  ;;  %v8603_v20 = vpop.f32.mrb[40].mxu1  ;;  %9049 = vmatprep.subr.bf16.mxu0 %v10471_v52  ;;  %9185 = vmatprep.subr.bf16.mxu1 %v10480_v21 }
 0x152   : > { %v8516_v47 = vpop.f32.mrb[41].mxu0  ;;  %v8604_v48 = vpop.f32.mrb[41].mxu1 }
 0x153   : > { %v11505_v49 = vadd.f32 %v8516_v47, %v8515_v41  ;;  %v8605_v51 = vadd.f32 %v8604_v48, %v8603_v20  ;;  %v8518_v26 = vpop.f32.mrb[42].mxu0  ;;  %v8606_v53 = vpop.f32.mrb[42].mxu1  ;;  %9050 = vmatpush3.bf16.msra.mxu0 %v10472_v28  ;;  %9186 = vmatpush3.bf16.msra.mxu1 %v10481_v58  ;;  %v10529_v20 = vld [vmem:[%s12933_s1 + $0x3e0] sm:$0xff]  }
 0x154   : > { %v8519_v61 = vpop.f32.mrb[43].mxu0  ;;  %v8607_v62 = vpop.f32.mrb[43].mxu1  ;;  %9051 = vmatprep.subr.bf16.mxu0 %v10478_v44  ;;  %9187 = vmatprep.subr.bf16.mxu1 %v10496_v33  ;;  %v10495_v44 = vld [vmem:[%s12933_s1 + $0x320] sm:$0xff]   ;;  %v10503_v33 = vld [vmem:[%s12933_s1 + $0x368] sm:$0xff]  }
 0x155   : > { %v11520_v2 = vadd.f32 %v8605_v51, %v11418_v0  ;;  %v11522_v3 = vadd.f32 %v8519_v61, %v8518_v26  ;;  %v8608_v5 = vadd.f32 %v8607_v62, %v8606_v53  ;;  %v10494_v0 = vld [vmem:[%s12933_s1 + $0x360] sm:$0xff]   ;;  %v10504_v26 = vld [vmem:[%s12933_s1 + $0x328] sm:$0xff]  }
 0x156   : > { %9748 = vmatmul.mubr.bf16.gmra.mrb[52].mxu0 %v10469_v39  ;;  %3679 = vmatmul.mubr.bf16.gmra.mrb[148].mxu1 %v11499_v40  ;;  %v10538_v53 = vld [vmem:[%s12933_s1 + $0x3e8] sm:$0xff]  }
 0x157   : > { %v11529_v19 = vadd.f32 %v8608_v5, %v11424_v8  ;;  %9751 = vmatprep.mubr.bf16.mxu0 %v10473_v4  ;;  %3686 = vmatprep.mubr.bf16.mxu1 %v11503_v45  ;;  %v10537_v4 = vld [vmem:[%s12933_s1 + $0x428] sm:$0xff]  }
 0x158   : > { %9052 = vmatpush3.bf16.msra.mxu0 %v10479_v10  ;;  %9188 = vmatpush3.bf16.msra.mxu1 %v10497_v36  ;;  %v10510_v10 = vld [vmem:[%s12933_s1 + $0x370] sm:$0xff]   ;;  %v11584_v61 = vld [vmem:[%s10966_s8 + $0xc8] ss:$20 sps:$4 sm:$0xff]  }
 0x159   : > { %v8521_v8 = vpop.f32.mrb[44].mxu0  ;;  %v8609_v31 = vpop.f32.mrb[44].mxu1  ;;  %9053 = vmatprep.subr.bf16.mxu0 %v10487_v55  ;;  %9189 = vmatprep.subr.bf16.mxu1 %v10512_v1  ;;  %v10485_v55 = vld [vmem:[%s10966_s8 + $0x128] ss:$20 sps:$4 sm:$0xff]   ;;  %v10489_v36 = vld [vmem:[%s10966_s8 + $0x150] ss:$20 sps:$4 sm:$0xff]  }
 0x15a   : > { %v8522_v17 = vpop.f32.mrb[45].mxu0  ;;  %v8610_v52 = vpop.f32.mrb[45].mxu1  ;;  %v11588_v1 = vld [vmem:[%s10966_s8 + $0xf4] ss:$20 sps:$4 sm:$0xff]  }
 0x15b   : > { %v11549_v21 = vadd.f32 %v8522_v17, %v8521_v8  ;;  %v8611_v25 = vadd.f32 %v8610_v52, %v8609_v31  ;;  %v8524_v28 = vpop.f32.mrb[46].mxu0  ;;  %v8612_v58 = vpop.f32.mrb[46].mxu1  ;;  %v10558_v31 = vld [vmem:[%s12933_s1 + $0x438] sm:$0xff]  }
 0x15c   : > { %v8525_v39 = vpop.f32.mrb[47].mxu0  ;;  %v8613_v41 = vpop.f32.mrb[47].mxu1  ;;  %9054 = vmatpush3.bf16.msra.mxu0 %v10488_v6  ;;  %9190 = vmatpush3.bf16.msra.mxu1 %v10513_v42  ;;  %v10511_v6 = vld [vmem:[%s12933_s1 + $0x330] sm:$0xff]   ;;  %v10520_v52 = vld [vmem:[%s12933_s1 + $0x338] sm:$0xff]  }
 0x15d   : > { %v11564_v47 = vadd.f32 %v8611_v25, %v11432_v18  ;;  %v11566_v48 = vadd.f32 %v8525_v39, %v8524_v28  ;;  %v8614_v51 = vadd.f32 %v8613_v41, %v8612_v58  ;;  %9055 = vmatprep.subr.bf16.mxu0 %v10494_v0  ;;  %9191 = vmatprep.subr.bf16.mxu1 %v10528_v11  ;;  %v10519_v11 = vld [vmem:[%s12933_s1 + $0x378] sm:$0xff]   ;;  %v10570_v58 = vld [vmem:[%s12933_s1 + $0x480] sm:$0xff]  }
 0x15e   : > { %9752 = vmatmul.mubr.bf16.gmra.mrb[56].mxu0 %v10476_v13  ;;  %3687 = vmatmul.mubr.bf16.gmra.mrb[152].mxu1 %v11543_v14  ;;  %v10547_v13 = vld [vmem:[%s12933_s1 + $0x3f0] sm:$0xff]   ;;  %v10559_v28 = vld [vmem:[%s12933_s1 + $0x3f8] sm:$0xff]  }
 0x15f   : > { %v11576_v18 = vadd.f32 %v8614_v51, %v11438_v32  ;;  %9755 = vmatprep.mubr.bf16.mxu0 %v10482_v15  ;;  %3694 = vmatprep.mubr.bf16.mxu1 %v11547_v16  ;;  %v10546_v32 = vld [vmem:[%s12933_s1 + $0x430] sm:$0xff]  }
 0x160   : > { %9056 = vmatpush3.bf16.msra.mxu0 %v10495_v44  ;;  %9192 = vmatpush3.bf16.msra.mxu1 %v10529_v20  ;;  %v10492_v44 = vld [vmem:[%s10966_s8 + $0x178] ss:$20 sps:$4 sm:$0xff]   ;;  %v10498_v39 = vld [vmem:[%s10966_s8 + $0x1a0] ss:$20 sps:$4 sm:$0xff]   ;;  %v11633_v51 = vld [vmem:[%s10966_s8 + $0x11c] ss:$20 sps:$4 sm:$0xff]  }
 0x161   : > { %v8615_v62 = vpop.f32.mrb[48].mxu1  ;;  %9057 = vmatprep.subr.bf16.mxu0 %v10503_v33  ;;  %9193 = vmatprep.subr.bf16.mxu1 %v10537_v4 }
 0x162   : > { %v8616_v5 = vpop.f32.mrb[49].mxu1 }
 0x163   : > { %v8617_v0 = vadd.f32 %v8616_v5, %v8615_v62  ;;  %v8618_v42 = vpop.f32.mrb[50].mxu1  ;;  %v10501_v62 = vld [vmem:[%s10966_s8 + $0x1c8] ss:$20 sps:$4 sm:$0xff]  }
 0x164   : > { %v8619_v8 = vpop.f32.mrb[51].mxu1  ;;  %9058 = vmatpush3.bf16.msra.mxu0 %v10504_v26  ;;  %9194 = vmatpush3.bf16.msra.mxu1 %v10538_v53 }
 0x165   : > { %v11606_v15 = vadd.f32 %v8617_v0, %v11446_v46  ;;  %v8620_v17 = vadd.f32 %v8619_v8, %v8618_v42  ;;  %9059 = vmatprep.subr.bf16.mxu0 %v10510_v10  ;;  %9195 = vmatprep.subr.bf16.mxu1 %v10546_v32  ;;  %v11619_v46 = vld [vmem:[%s12933_s1 + $0x380] sm:$0xff]  }
 0x166   : > { %9756 = vmatmul.mubr.bf16.gmra.mrb[60].mxu0 %v10485_v55  ;;  %3695 = vmatmul.mubr.bf16.gmra.mrb[156].mxu1 %v11584_v61  ;;  %v10505_v32 = vld [vmem:[%s10966_s8 + $0x1f0] ss:$20 sps:$4 sm:$0xff]  }
 0x167   : > { %v11613_v25 = vadd.f32 %v8620_v17, %v11453_v60  ;;  %9759 = vmatprep.mubr.bf16.mxu0 %v10489_v36  ;;  %3702 = vmatprep.mubr.bf16.mxu1 %v11588_v1  ;;  %v11629_v60 = vld [vmem:[%s10966_s8 + $0xf0] ss:$20 sps:$4 sm:$0xff]   ;;  %v11646_v36 = vld [vmem:[%s10966_s8 + $0x118] ss:$20 sps:$4 sm:$0xff]   ;;  %v11662_v17 = vld [vmem:[%s10966_s8 + $0x140] ss:$20 sps:$4 sm:$0xff]  }
 0x168   : > { %9060 = vmatpush3.bf16.msra.mxu0 %v10511_v6  ;;  %9196 = vmatpush3.bf16.msra.mxu1 %v10547_v13  ;;  %v11650_v42 = vld [vmem:[%s10966_s8 + $0x144] ss:$20 sps:$4 sm:$0xff]  }
 0x169   : > { %v8621_v33 = vpop.f32.mrb[52].mxu1  ;;  %9061 = vmatprep.subr.bf16.mxu0 %v10519_v11  ;;  %9197 = vmatprep.subr.bf16.mxu1 %v10558_v31  ;;  %v10508_v31 = vld [vmem:[%s10966_s8 + $0x218] ss:$20 sps:$4 sm:$0xff]  }
 0x16a   : > { %v8622_v41 = vpop.f32.mrb[53].mxu1 }
 0x16b   : > { %v8623_v20 = vadd.f32 %v8622_v41, %v8621_v33  ;;  %v8624_v4 = vpop.f32.mrb[54].mxu1  ;;  %v11666_v33 = vld [vmem:[%s10966_s8 + $0x16c] ss:$20 sps:$4 sm:$0xff]  }
 0x16c   : > { %v8625_v26 = vpop.f32.mrb[55].mxu1  ;;  %9062 = vmatpush3.bf16.msra.mxu0 %v10520_v52  ;;  %9198 = vmatpush3.bf16.msra.mxu1 %v10559_v28  ;;  %v10514_v28 = vld [vmem:[%s10966_s8 + $0x240] ss:$20 sps:$4 sm:$0xff]  }
 0x16d   : > { %v11636_v53 = vadd.f32 %v8623_v20, %v11463_v9  ;;  %v8626_v10 = vadd.f32 %v8625_v26, %v8624_v4  ;;  %9775 = vmatprep.subr.bf16.mxu0 %v11619_v46  ;;  %9295 = vmatprep.subr.bf16.mxu1 %v10570_v58  ;;  %v10517_v4 = vld [vmem:[%s10966_s8 + $0x268] ss:$20 sps:$4 sm:$0xff]  }
 0x16e   : > { %9760 = vmatmul.mubr.bf16.gmra.mrb[64].mxu0 %v10492_v44  ;;  %3703 = vmatmul.mubr.bf16.gmra.mrb[160].mxu1 %v11629_v60  ;;  %v11678_v26 = vld [vmem:[%s10966_s8 + $0x168] ss:$20 sps:$4 sm:$0xff]  }
 0x16f   : > { %v11641_v55 = vadd.f32 %v8626_v10, %v11480_v24  ;;  %9763 = vmatprep.mubr.bf16.mxu0 %v10498_v39  ;;  %3710 = vmatprep.mubr.bf16.mxu1 %v11633_v51 }
 0x171   : > { %v8627_v9 = vpop.f32.mrb[56].mxu1 }
 0x172   : > { %v8628_v5 = vpop.f32.mrb[57].mxu1 }
 0x173   : > { %v8629_v6 = vadd.f32 %v8628_v5, %v8627_v9  ;;  %v8630_v0 = vpop.f32.mrb[58].mxu1  ;;  %v10525_v5 = vld [vmem:[%s10966_s8 + $0x5c] ss:$20 sps:$4 sm:$0xff]  }
 0x174   : > { %v8631_v11 = vpop.f32.mrb[59].mxu1 }
 0x175   : > { %v11653_v24 = vadd.f32 %v8629_v6, %v11505_v49  ;;  %v8632_v13 = vadd.f32 %v8631_v11, %v8630_v0 }
 0x176   : > { %9764 = vmatmul.mubr.bf16.gmra.mrb[68].mxu0 %v10501_v62  ;;  %3711 = vmatmul.mubr.bf16.gmra.mrb[164].mxu1 %v11646_v36 }
 0x177   : > { %v11657_v8 = vadd.f32 %v8632_v13, %v11522_v3  ;;  %9767 = vmatprep.mubr.bf16.mxu0 %v10505_v32  ;;  %3718 = vmatprep.mubr.bf16.mxu1 %v11650_v42  ;;  %v10521_v32 = vld [vmem:[%s10966_s8 + $0x194] ss:$20 sps:$4 sm:$0xff]  }
 0x179   : > { %v8633_v52 = vpop.f32.mrb[60].mxu1 }
 0x17a   : > { %v8634_v58 = vpop.f32.mrb[61].mxu1 }
 0x17b   : > { %v8635_v49 = vadd.f32 %v8634_v58, %v8633_v52  ;;  %v8636_v44 = vpop.f32.mrb[62].mxu1  ;;  %v10523_v52 = vld [vmem:[%s10966_s8 + $0x58] ss:$20 sps:$4 sm:$0xff]  }
 0x17c   : > { %v8637_v39 = vpop.f32.mrb[63].mxu1 }
 0x17d   : > { %v11669_v3 = vadd.f32 %v8635_v49, %v11549_v21  ;;  %v8638_v41 = vadd.f32 %v8637_v39, %v8636_v44  ;;  %v10536_v39 = vld [vmem:[%s12933_s1 + $0x388] sm:$0xff]  }
 0x17e   : > { %9768 = vmatmul.mubr.bf16.gmra.mrb[72].mxu0 %v10508_v31  ;;  %3719 = vmatmul.mubr.bf16.gmra.mrb[168].mxu1 %v11662_v17 }
 0x17f   : > { %v11673_v20 = vadd.f32 %v8638_v41, %v11566_v48  ;;  %9771 = vmatprep.mubr.bf16.mxu0 %v10514_v28  ;;  %3726 = vmatprep.mubr.bf16.mxu1 %v11666_v33  ;;  %v10526_v28 = vld [vmem:[%s10966_s8 + $0x190] ss:$20 sps:$4 sm:$0xff]  }
 0x181   : > { %v8639_v10 = vpop.f32.mrb[64].mxu1 }
 0x182   : > { %v8640_v62 = vpop.f32.mrb[65].mxu1 }
 0x183   : > { %v8641_v9 = vadd.f32 %v8640_v62, %v8639_v10  ;;  %v8642_v21 = vpop.f32.mrb[66].mxu1  ;;  %v10886_v10 = vld [vmem:[%s10966_s8 + $0x1bc] ss:$20 sps:$4 sm:$0xff]  }
 0x184   : > { %v8643_v6 = vpop.f32.mrb[67].mxu1  ;;  %v10545_v62 = vld [vmem:[%s12933_s1 + $0x390] sm:$0xff]  }
 0x185   : > { %v11683_v0 = vadd.f32 %v8641_v9, %v11347_v22  ;;  %v8644_v48 = vadd.f32 %v8643_v6, %v8642_v21  ;;  %v10530_v22 = vld [vmem:[%s10966_s8 + $0x84] ss:$20 sps:$4 sm:$0xff]   ;;  %v10532_v21 = vld [vmem:[%s10966_s8 + $0x80] ss:$20 sps:$4 sm:$0xff]  }
 0x186   : > { %9772 = vmatmul.mubr.bf16.gmra.mrb[144].mxu0 %v10517_v4  ;;  %3727 = vmatmul.mubr.bf16.gmra.mrb[172].mxu1 %v11678_v26  ;;  %v10533_v6 = vld [vmem:[%s10966_s8 + $0xac] ss:$20 sps:$4 sm:$0xff]  }
 0x187   : > { %v11687_v11 = vadd.f32 %v8644_v48, %v11351_v27  ;;  %3734 = vmatprep.mubr.bf16.mxu1 %v10521_v32  ;;  %3831 = vmatprep.mubr.bf16.mxu0 %v10525_v5 }
 0x189   : > { %v8645_v13 = vpop.f32.mrb[68].mxu1 }
 0x18a   : > { %v8646_v31 = vpop.f32.mrb[69].mxu1 }
 0x18b   : > { %v8647_v58 = vadd.f32 %v8646_v31, %v8645_v13  ;;  %v8648_v49 = vpop.f32.mrb[70].mxu1  ;;  %v10557_v13 = vld [vmem:[%s12933_s1 + $0x398] sm:$0xff]  }
 0x18c   : > { %v8649_v44 = vpop.f32.mrb[71].mxu1  ;;  %v10887_v31 = vld [vmem:[%s10966_s8 + $0x1b8] ss:$20 sps:$4 sm:$0xff]  }
 0x18d   : > { %v11696_v41 = vadd.f32 %v8647_v58, %v11359_v38  ;;  %v8650_v27 = vadd.f32 %v8649_v44, %v8648_v49 }
 0x18e   : > { %3735 = vmatmul.mubr.bf16.gmra.mrb[176].mxu1 %v10526_v28  ;;  %3832 = vmatmul.mubr.bf16.vlgmr.msra.gmra.mrb[148].mxu0 %v10523_v52  ;;  %v10888_v28 = vld [vmem:[%s10966_s8 + $0x1e4] ss:$20 sps:$4 sm:$0xff]  }
 0x18f   : > { %v11699_v4 = vadd.f32 %v8650_v27, %v11363_v43  ;;  %9776 = vmatpush3.bf16.msra.mxu0 %v11619_v46  ;;  %3742 = vmatprep.mubr.bf16.mxu1 %v10886_v10 }
 0x190   : > { %3839 = vmatprep.mubr.bf16.mxu0 %v10530_v22  ;;  %9777 = vmatprep.subr.bf16.mxu0 %v10536_v39 }
 0x191   : > { %v8651_v38 = vpop.f32.mrb[72].mxu1 }
 0x192   : > { %v8652_v9 = vpop.f32.mrb[73].mxu1 }
 0x193   : > { %v8653_v32 = vadd.f32 %v8652_v9, %v8651_v38  ;;  %v8654_v5 = vpop.f32.mrb[74].mxu1  ;;  %9778 = vmatpush3.bf16.msra.mxu0 %v10536_v39  ;;  %v10535_v39 = vld [vmem:[%s10966_s8 + $0xa8] ss:$20 sps:$4 sm:$0xff]  }
 0x194   : > { %v8655_v43 = vpop.f32.mrb[75].mxu1  ;;  %9779 = vmatprep.subr.bf16.mxu0 %v10545_v62  ;;  %v10539_v38 = vld [vmem:[%s10966_s8 + $0xd4] ss:$20 sps:$4 sm:$0xff]  }
 0x195   : > { %v8656_v46 = vadd.f32 %v8655_v43, %v8654_v5  ;;  %v1490_v48 = vadd.f32 %v8653_v32, %v11371_v54  ;;  %v10569_v54 = vld [vmem:[%s12933_s1 + $0x3a0] sm:$0xff]   ;;  %v10578_v32 = vld [vmem:[%s12933_s1 + $0x3a8] sm:$0xff]  }
 0x196   : > { %3743 = vmatmul.mubr.bf16.gmra.mrb[180].mxu1 %v10887_v31  ;;  %3840 = vmatmul.mubr.bf16.gmra.mrb[152].mxu0 %v10532_v21  ;;  %v10889_v5 = vld [vmem:[%s10966_s8 + $0x1e0] ss:$20 sps:$4 sm:$0xff]  }
 0x197   : > { %v1493_v52 = vadd.f32 %v8656_v46, %v11375_v59  ;;  %3750 = vmatprep.mubr.bf16.mxu1 %v10888_v28  ;;  %3847 = vmatprep.mubr.bf16.mxu0 %v10533_v6  ;;  %v10890_v6 = vld [vmem:[%s10966_s8 + $0x20c] ss:$20 sps:$4 sm:$0xff]  }
 0x198   : > { %9780 = vmatpush3.bf16.msra.mxu0 %v10545_v62 }
 0x199   : > { %v9725_v58 = vpop.f32.mrb[76].mxu0  ;;  %v8657_v49 = vpop.f32.mrb[76].mxu1  ;;  %9781 = vmatprep.subr.bf16.mxu0 %v10557_v13 }
 0x19a   : > { %v1650_v44 = vpop.f32.mrb[77].mxu0  ;;  %v8658_v22 = vpop.f32.mrb[77].mxu1 }
 0x19b   : > { %v11719_v27 = vadd.f32 %v1650_v44, %v1490_v48  ;;  %v9726_v10 = vpop.f32.mrb[78].mxu0  ;;  %v8660_v59 = vpop.f32.mrb[78].mxu1  ;;  %v10587_v48 = vld [vmem:[%s12933_s1 + $0x3b0] sm:$0xff]  }
 0x19c   : > { %v1653_v9 = vpop.f32.mrb[79].mxu0  ;;  %v8661_v21 = vpop.f32.mrb[79].mxu1  ;;  %9782 = vmatpush3.bf16.msra.mxu0 %v10557_v13  ;;  %v10542_v22 = vld [vmem:[%s10966_s8 + $0xfc] ss:$20 sps:$4 sm:$0xff]  }
 0x19d   : > { %v11722_v62 = vadd.f32 %v1653_v9, %v1493_v52  ;;  %9783 = vmatprep.subr.bf16.mxu0 %v10569_v54  ;;  %v10541_v52 = vld [vmem:[%s10966_s8 + $0xd0] ss:$20 sps:$4 sm:$0xff]   ;;  %v10596_v9 = vld [vmem:[%s12933_s1 + $0x3b8] sm:$0xff]  }
 0x19e   : > { %3751 = vmatmul.mubr.bf16.gmra.mrb[184].mxu1 %v10889_v5  ;;  %3848 = vmatmul.mubr.bf16.gmra.mrb[156].mxu0 %v10535_v39  ;;  %v10891_v21 = vld [vmem:[%s10966_s8 + $0x208] ss:$20 sps:$4 sm:$0xff]  }
 0x19f   : > { %3758 = vmatprep.mubr.bf16.mxu1 %v10890_v6  ;;  %3855 = vmatprep.mubr.bf16.mxu0 %v10539_v38 }
 0x1a0   : > { %9784 = vmatpush3.bf16.msra.mxu0 %v10569_v54 }
 0x1a1   : > { %v8703_v43 = vpop.f32.mrb[80].mxu1  ;;  %v8815_v46 = vpop.f32.mrb[80].mxu0  ;;  %9785 = vmatprep.subr.bf16.mxu0 %v10578_v32 }
 0x1a2   : > { %v8704_v13 = vpop.f32.mrb[81].mxu1  ;;  %v8816_v31 = vpop.f32.mrb[81].mxu0 }
 0x1a3   : > { %v8705_v28 = vadd.f32 %v8704_v13, %v8703_v43  ;;  %v8817_v58 = vadd.f32 %v8816_v31, %v8815_v46  ;;  %v8706_v49 = vpop.f32.mrb[82].mxu1  ;;  %v8818_v44 = vpop.f32.mrb[82].mxu0  ;;  %v10892_v43 = vld [vmem:[%s10966_s8 + $0x234] ss:$20 sps:$4 sm:$0xff]   ;;  %v11748_v13 = vld [vmem:[%s12933_s1 + $0x4c0] sm:$0xff]  }
 0x1a4   : > { %v8707_v39 = vpop.f32.mrb[83].mxu1  ;;  %v8819_v10 = vpop.f32.mrb[83].mxu0  ;;  %9786 = vmatpush3.bf16.msra.mxu0 %v10578_v32 }
 0x1a5   : > { %v9941_v54 = vadd.f32 %v8705_v28, %v11394_v30  ;;  %v8708_v59 = vadd.f32 %v8707_v39, %v8706_v49  ;;  %v8820_v38 = vadd.f32 %v8819_v10, %v8818_v44  ;;  %9787 = vmatprep.subr.bf16.mxu0 %v10587_v48  ;;  %v10544_v28 = vld [vmem:[%s10966_s8 + $0xf8] ss:$20 sps:$4 sm:$0xff]  }
 0x1a6   : > { %3759 = vmatmul.mubr.bf16.gmra.mrb[188].mxu1 %v10891_v21  ;;  %3856 = vmatmul.mubr.bf16.gmra.mrb[160].mxu0 %v10541_v52 }
 0x1a7   : > { %v11739_v5 = vadd.f32 %v9941_v54, %v8817_v58  ;;  %v9953_v6 = vadd.f32 %v8708_v59, %v11400_v34  ;;  %3766 = vmatprep.mubr.bf16.mxu1 %v10892_v43  ;;  %3863 = vmatprep.mubr.bf16.mxu0 %v10542_v22  ;;  %v10894_v43 = vld [vmem:[%s10966_s8 + $0x25c] ss:$20 sps:$4 sm:$0xff]  }
 0x1a8   : > { %9788 = vmatpush3.bf16.msra.mxu0 %v10587_v48  ;;  %v10548_v48 = vld [vmem:[%s10966_s8 + $0x124] ss:$20 sps:$4 sm:$0xff]  }
 0x1a9   : > { %v11743_v30 = vadd.f32 %v9953_v6, %v8820_v38  ;;  %v8709_v32 = vpop.f32.mrb[84].mxu1  ;;  %v8821_v46 = vpop.f32.mrb[84].mxu0  ;;  %9789 = vmatprep.subr.bf16.mxu0 %v10596_v9  ;;  %v10893_v38 = vld [vmem:[%s10966_s8 + $0x230] ss:$20 sps:$4 sm:$0xff]  }
 0x1aa   : > { %v8710_v31 = vpop.f32.mrb[85].mxu1  ;;  %v8822_v52 = vpop.f32.mrb[85].mxu0 }
 0x1ab   : > { %v8711_v34 = vadd.f32 %v8710_v31, %v8709_v32  ;;  %v8823_v58 = vadd.f32 %v8822_v52, %v8821_v46  ;;  %v8712_v49 = vpop.f32.mrb[86].mxu1  ;;  %v8824_v44 = vpop.f32.mrb[86].mxu0  ;;  %v10550_v52 = vld [vmem:[%s10966_s8 + $0x120] ss:$20 sps:$4 sm:$0xff]  }
 0x1ac   : > { %v8713_v22 = vpop.f32.mrb[87].mxu1  ;;  %v8825_v39 = vpop.f32.mrb[87].mxu0  ;;  %9790 = vmatpush3.bf16.msra.mxu0 %v10596_v9 }
 0x1ad   : > { %v9935_v10 = vadd.f32 %v8711_v34, %v11408_v50  ;;  %v8714_v54 = vadd.f32 %v8713_v22, %v8712_v49  ;;  %v8826_v59 = vadd.f32 %v8825_v39, %v8824_v44  ;;  %9823 = vmatprep.subr.bf16.mxu0 %v11748_v13  ;;  %v10553_v22 = vld [vmem:[%s10966_s8 + $0x14c] ss:$20 sps:$4 sm:$0xff]  }
 0x1ae   : > { %3767 = vmatmul.mubr.bf16.gmra.mrb[192].mxu1 %v10893_v38  ;;  %3864 = vmatmul.mubr.bf16.gmra.mrb[164].mxu0 %v10544_v28 }
 0x1af   : > { %v11755_v21 = vadd.f32 %v9935_v10, %v8823_v58  ;;  %v9947_v6 = vadd.f32 %v8714_v54, %v11414_v56  ;;  %3774 = vmatprep.mubr.bf16.mxu1 %v10894_v43  ;;  %3871 = vmatprep.mubr.bf16.mxu0 %v10548_v48  ;;  %v11763_v58 = vld [vmem:[%s10966_s8 + $0x284] ss:$20 sps:$4 sm:$0xff]  }
 0x1b1   : > { %v11759_v9 = vadd.f32 %v9947_v6, %v8826_v59  ;;  %v8715_v50 = vpop.f32.mrb[88].mxu1  ;;  %v8827_v32 = vpop.f32.mrb[88].mxu0  ;;  %v10895_v59 = vld [vmem:[%s10966_s8 + $0x258] ss:$20 sps:$4 sm:$0xff]  }
 0x1b2   : > { %v8716_v46 = vpop.f32.mrb[89].mxu1  ;;  %v8828_v31 = vpop.f32.mrb[89].mxu0 }
 0x1b3   : > { %v8717_v34 = vadd.f32 %v8716_v46, %v8715_v50  ;;  %v8829_v49 = vadd.f32 %v8828_v31, %v8827_v32  ;;  %v8718_v28 = vpop.f32.mrb[90].mxu1  ;;  %v8830_v44 = vpop.f32.mrb[90].mxu0  ;;  %v11775_v31 = vld [vmem:[%s10966_s8 + $0x280] ss:$20 sps:$4 sm:$0xff]  }
 0x1b4   : > { %v8719_v39 = vpop.f32.mrb[91].mxu1  ;;  %v8831_v56 = vpop.f32.mrb[91].mxu0 }
 0x1b5   : > { %v9965_v48 = vadd.f32 %v8717_v34, %v11422_v7  ;;  %v8720_v10 = vadd.f32 %v8719_v39, %v8718_v28  ;;  %v8832_v54 = vadd.f32 %v8831_v56, %v8830_v44  ;;  %v10556_v34 = vld [vmem:[%s10966_s8 + $0x148] ss:$20 sps:$4 sm:$0xff]   ;;  %v11779_v39 = vld [vmem:[%s10966_s8 + $0x2ac] ss:$20 sps:$4 sm:$0xff]  }
 0x1b6   : > { %3775 = vmatmul.mubr.bf16.gmra.mrb[196].mxu1 %v10895_v59  ;;  %3872 = vmatmul.mubr.bf16.gmra.mrb[168].mxu0 %v10550_v52  ;;  %v10562_v56 = vld [vmem:[%s10966_s8 + $0x174] ss:$20 sps:$4 sm:$0xff]  }
 0x1b7   : > { %v11768_v38 = vadd.f32 %v9965_v48, %v8829_v49  ;;  %v9977_v6 = vadd.f32 %v8720_v10, %v11428_v12  ;;  %3782 = vmatprep.mubr.bf16.mxu1 %v11763_v58  ;;  %3879 = vmatprep.mubr.bf16.mxu0 %v10553_v22 }
 0x1b9   : > { %v11772_v43 = vadd.f32 %v9977_v6, %v8832_v54  ;;  %v8721_v50 = vpop.f32.mrb[92].mxu1  ;;  %v8833_v32 = vpop.f32.mrb[92].mxu0 }
 0x1ba   : > { %v8722_v7 = vpop.f32.mrb[93].mxu1  ;;  %v8834_v46 = vpop.f32.mrb[93].mxu0 }
 0x1bb   : > { %12936 = vst [vmem:[#allocation3_spill] sm:$0xff] %v11772_v43  ;;  %v8723_v28 = vadd.f32 %v8722_v7, %v8721_v50  ;;  %v8835_v52 = vadd.f32 %v8834_v46, %v8833_v32  ;;  %v8724_v44 = vpop.f32.mrb[94].mxu1  ;;  %v8836_v49 = vpop.f32.mrb[94].mxu0 }
 0x1bc   : > { %v8725_v12 = vpop.f32.mrb[95].mxu1  ;;  %v8837_v48 = vpop.f32.mrb[95].mxu0 }
 0x1bd   : > { %v9959_v22 = vadd.f32 %v8723_v28, %v11436_v29  ;;  %v8726_v10 = vadd.f32 %v8725_v12, %v8724_v44  ;;  %v8838_v54 = vadd.f32 %v8837_v48, %v8836_v49  ;;  %v11791_v29 = vld [vmem:[%s10966_s8 + $0x2a8] ss:$20 sps:$4 sm:$0xff]   ;;  %v10565_v28 = vld [vmem:[%s10966_s8 + $0x170] ss:$20 sps:$4 sm:$0xff]  }
 0x1be   : > { %3783 = vmatmul.mubr.bf16.gmra.mrb[200].mxu1 %v11775_v31  ;;  %3880 = vmatmul.mubr.bf16.gmra.mrb[172].mxu0 %v10556_v34  ;;  %v10566_v12 = vld [vmem:[%s10966_s8 + $0x19c] ss:$20 sps:$4 sm:$0xff]  }
 0x1bf   : > { %v11784_v59 = vadd.f32 %v9959_v22, %v8835_v52  ;;  %v9971_v6 = vadd.f32 %v8726_v10, %v11442_v37  ;;  %3790 = vmatprep.mubr.bf16.mxu1 %v11779_v39  ;;  %3887 = vmatprep.mubr.bf16.mxu0 %v10562_v56 }
 0x1c1   : > { %12937 = vst [vmem:[#allocation4_spill] sm:$0xff] %v11784_v59  ;;  %v11788_v50 = vadd.f32 %v9971_v6, %v8838_v54  ;;  %v8727_v32 = vpop.f32.mrb[96].mxu1  ;;  %v8839_v7 = vpop.f32.mrb[96].mxu0 }
 0x1c2   : > { %v8728_v46 = vpop.f32.mrb[97].mxu1  ;;  %v8840_v43 = vpop.f32.mrb[97].mxu0 }
 0x1c3   : > { %12938 = vst [vmem:[#allocation5_spill] sm:$0xff] %v11788_v50  ;;  %v8729_v44 = vadd.f32 %v8728_v46, %v8727_v32  ;;  %v8841_v34 = vadd.f32 %v8840_v43, %v8839_v7  ;;  %v8730_v49 = vpop.f32.mrb[98].mxu1  ;;  %v8842_v52 = vpop.f32.mrb[98].mxu0  ;;  %v10896_v43 = vld [vmem:[%s10966_s8 + $0x7c] ss:$20 sps:$4 sm:$0xff]  }
 0x1c4   : > { %v8731_v48 = vpop.f32.mrb[99].mxu1  ;;  %v8843_v37 = vpop.f32.mrb[99].mxu0 }
 0x1c5   : > { %v9989_v56 = vadd.f32 %v8729_v44, %v11451_v57  ;;  %v8732_v22 = vadd.f32 %v8731_v48, %v8730_v49  ;;  %v8844_v10 = vadd.f32 %v8843_v37, %v8842_v52  ;;  %v10568_v57 = vld [vmem:[%s10966_s8 + $0x198] ss:$20 sps:$4 sm:$0xff]  }
 0x1c6   : > { %3791 = vmatmul.mubr.bf16.gmra.mrb[204].mxu1 %v11791_v29  ;;  %3888 = vmatmul.mubr.bf16.gmra.mrb[176].mxu0 %v10565_v28  ;;  %v10571_v28 = vld [vmem:[%s12933_s1 + $0x440] sm:$0xff]   ;;  %v10579_v37 = vld [vmem:[%s12933_s1 + $0x488] sm:$0xff]  }
 0x1c7   : > { %v11797_v54 = vadd.f32 %v9989_v56, %v8841_v34  ;;  %v10001_v6 = vadd.f32 %v8732_v22, %v11457_v63  ;;  %3895 = vmatprep.mubr.bf16.mxu0 %v10566_v12  ;;  %5019 = vmatprep.mubr.bf16.mxu1 %v10896_v43  ;;  %v10572_v34 = vld [vmem:[%s10966_s8 + $0x1c4] ss:$20 sps:$4 sm:$0xff]  }
 0x1c9   : > { %v11801_v32 = vadd.f32 %v10001_v6, %v8844_v10  ;;  %v8733_v7 = vpop.f32.mrb[100].mxu1  ;;  %v8845_v46 = vpop.f32.mrb[100].mxu0  ;;  %v10580_v6 = vld [vmem:[%s12933_s1 + $0x448] sm:$0xff]  }
 0x1ca   : > { %v8734_v50 = vpop.f32.mrb[101].mxu1  ;;  %v8846_v59 = vpop.f32.mrb[101].mxu0 }
 0x1cb   : > { %v8735_v44 = vadd.f32 %v8734_v50, %v8733_v7  ;;  %v8847_v49 = vadd.f32 %v8846_v59, %v8845_v46  ;;  %v8736_v52 = vpop.f32.mrb[102].mxu1  ;;  %v8848_v48 = vpop.f32.mrb[102].mxu0 }
 0x1cc   : > { %v8737_v63 = vpop.f32.mrb[103].mxu1  ;;  %v8849_v12 = vpop.f32.mrb[103].mxu0 }
 0x1cd   : > { %v9983_v56 = vadd.f32 %v8735_v44, %v11478_v23  ;;  %v8738_v22 = vadd.f32 %v8737_v63, %v8736_v52  ;;  %v8850_v10 = vadd.f32 %v8849_v12, %v8848_v48  ;;  %v10588_v23 = vld [vmem:[%s12933_s1 + $0x490] sm:$0xff]  }
 0x1ce   : > { %3896 = vmatmul.mubr.bf16.gmra.mrb[180].mxu0 %v10568_v57  ;;  %5020 = vmatmul.mubr.bf16.vlgmr.msra.gmra.mrb[208].mxu1 %v11499_v40  ;;  %v10574_v57 = vld [vmem:[%s10966_s8 + $0x1c0] ss:$20 sps:$4 sm:$0xff]  }
 0x1cf   : > { %v11813_v59 = vadd.f32 %v9983_v56, %v8847_v49  ;;  %v9995_v50 = vadd.f32 %v8738_v22, %v11495_v35  ;;  %9296 = vmatpush3.bf16.msra.mxu1 %v10571_v28  ;;  %3903 = vmatprep.mubr.bf16.mxu0 %v10572_v34  ;;  %v10575_v28 = vld [vmem:[%s10966_s8 + $0x1ec] ss:$20 sps:$4 sm:$0xff]   ;;  %v10589_v63 = vld [vmem:[%s12933_s1 + $0x450] sm:$0xff]   ;;  %v10597_v22 = vld [vmem:[%s12933_s1 + $0x498] sm:$0xff]  }
 0x1d0   : > { %5027 = vmatprep.mubr.bf16.mxu1 %v11503_v45  ;;  %9297 = vmatprep.subr.bf16.mxu1 %v10579_v37 }
 0x1d1   : > { %v11823_v43 = vadd.f32 %v9995_v50, %v8850_v10  ;;  %v8739_v40 = vpop.f32.mrb[104].mxu1  ;;  %v8851_v7 = vpop.f32.mrb[104].mxu0 }
 0x1d2   : > { %v8740_v46 = vpop.f32.mrb[105].mxu1  ;;  %v8852_v35 = vpop.f32.mrb[105].mxu0 }
 0x1d3   : > { %v8741_v44 = vadd.f32 %v8740_v46, %v8739_v40  ;;  %v8853_v49 = vadd.f32 %v8852_v35, %v8851_v7  ;;  %v8742_v52 = vpop.f32.mrb[106].mxu1  ;;  %v8854_v48 = vpop.f32.mrb[106].mxu0  ;;  %9298 = vmatpush3.bf16.msra.mxu1 %v10580_v6  ;;  %v10577_v46 = vld [vmem:[%s10966_s8 + $0x1e8] ss:$20 sps:$4 sm:$0xff]  }
 0x1d4   : > { %v8743_v34 = vpop.f32.mrb[107].mxu1  ;;  %v8855_v45 = vpop.f32.mrb[107].mxu0  ;;  %9299 = vmatprep.subr.bf16.mxu1 %v10588_v23 }
 0x1d5   : > { %v10013_v12 = vadd.f32 %v8741_v44, %v11520_v2  ;;  %v8744_v37 = vadd.f32 %v8743_v34, %v8742_v52  ;;  %v8856_v56 = vadd.f32 %v8855_v45, %v8854_v48  ;;  %v10598_v2 = vld [vmem:[%s12933_s1 + $0x458] sm:$0xff]  }
 0x1d6   : > { %3904 = vmatmul.mubr.bf16.gmra.mrb[184].mxu0 %v10574_v57  ;;  %5028 = vmatmul.mubr.bf16.gmra.mrb[212].mxu1 %v11543_v14  ;;  %v10611_v14 = vld [vmem:[%s12933_s1 + $0x4a0] sm:$0xff]  }
 0x1d7   : > { %v11835_v10 = vadd.f32 %v10013_v12, %v8853_v49  ;;  %v10025_v50 = vadd.f32 %v8744_v37, %v11529_v19  ;;  %3911 = vmatprep.mubr.bf16.mxu0 %v10575_v28  ;;  %5035 = vmatprep.mubr.bf16.mxu1 %v11547_v16  ;;  %v10581_v49 = vld [vmem:[%s10966_s8 + $0x214] ss:$20 sps:$4 sm:$0xff]   ;;  %v10612_v28 = vld [vmem:[%s12933_s1 + $0x460] sm:$0xff]  }
 0x1d8   : > { %9300 = vmatpush3.bf16.msra.mxu1 %v10589_v63  ;;  %v10625_v12 = vld [vmem:[%s12933_s1 + $0x4a8] sm:$0xff]  }
 0x1d9   : > { %v11842_v6 = vadd.f32 %v10025_v50, %v8856_v56  ;;  %v8745_v23 = vpop.f32.mrb[108].mxu1  ;;  %v8857_v40 = vpop.f32.mrb[108].mxu0  ;;  %9301 = vmatprep.subr.bf16.mxu1 %v10597_v22 }
 0x1da   : > { %v8746_v7 = vpop.f32.mrb[109].mxu1  ;;  %v8858_v19 = vpop.f32.mrb[109].mxu0 }
 0x1db   : > { %v8747_v35 = vadd.f32 %v8746_v7, %v8745_v23  ;;  %v8859_v57 = vadd.f32 %v8858_v19, %v8857_v40  ;;  %v8748_v16 = vpop.f32.mrb[110].mxu1  ;;  %v8860_v44 = vpop.f32.mrb[110].mxu0  ;;  %v10583_v40 = vld [vmem:[%s10966_s8 + $0x210] ss:$20 sps:$4 sm:$0xff]  }
 0x1dc   : > { %v8749_v52 = vpop.f32.mrb[111].mxu1  ;;  %v8861_v48 = vpop.f32.mrb[111].mxu0  ;;  %9302 = vmatpush3.bf16.msra.mxu1 %v10598_v2 }
 0x1dd   : > { %v10007_v34 = vadd.f32 %v8747_v35, %v11564_v47  ;;  %v8750_v45 = vadd.f32 %v8749_v52, %v8748_v16  ;;  %v8862_v63 = vadd.f32 %v8861_v48, %v8860_v44  ;;  %9303 = vmatprep.subr.bf16.mxu1 %v10611_v14  ;;  %v10626_v47 = vld [vmem:[%s12933_s1 + $0x468] sm:$0xff]   ;;  %v10640_v16 = vld [vmem:[%s12933_s1 + $0x470] sm:$0xff]   ;;  %v10647_v48 = vld [vmem:[%s12933_s1 + $0x4b8] sm:$0xff]  }
 0x1de   : > { %3912 = vmatmul.mubr.bf16.gmra.mrb[188].mxu0 %v10577_v46  ;;  %5036 = vmatmul.mubr.bf16.gmra.mrb[216].mxu1 %v11584_v61  ;;  %v10639_v61 = vld [vmem:[%s12933_s1 + $0x4b0] sm:$0xff]  }
 0x1df   : > { %v11857_v37 = vadd.f32 %v10007_v34, %v8859_v57  ;;  %v10019_v56 = vadd.f32 %v8750_v45, %v11576_v18  ;;  %3919 = vmatprep.mubr.bf16.mxu0 %v10581_v49  ;;  %5043 = vmatprep.mubr.bf16.mxu1 %v11588_v1  ;;  %v10584_v46 = vld [vmem:[%s10966_s8 + $0x23c] ss:$20 sps:$4 sm:$0xff]  }
 0x1e0   : > { %9304 = vmatpush3.bf16.msra.mxu1 %v10612_v28 }
 0x1e1   : > { %v11864_v22 = vadd.f32 %v10019_v56, %v8862_v63  ;;  %v8751_v50 = vpop.f32.mrb[112].mxu1  ;;  %v8863_v2 = vpop.f32.mrb[112].mxu0  ;;  %9305 = vmatprep.subr.bf16.mxu1 %v10625_v12 }
 0x1e2   : > { %v8752_v23 = vpop.f32.mrb[113].mxu1  ;;  %v8864_v18 = vpop.f32.mrb[113].mxu0 }
 0x1e3   : > { %v8753_v14 = vadd.f32 %v8752_v23, %v8751_v50  ;;  %v8865_v7 = vadd.f32 %v8864_v18, %v8863_v2  ;;  %v8754_v1 = vpop.f32.mrb[114].mxu1  ;;  %v8866_v19 = vpop.f32.mrb[114].mxu0  ;;  %v10590_v23 = vld [vmem:[%s10966_s8 + $0x264] ss:$20 sps:$4 sm:$0xff]  }
 0x1e4   : > { %v8755_v35 = vpop.f32.mrb[115].mxu1  ;;  %v8867_v57 = vpop.f32.mrb[115].mxu0  ;;  %9306 = vmatpush3.bf16.msra.mxu1 %v10626_v47  ;;  %v10586_v47 = vld [vmem:[%s10966_s8 + $0x238] ss:$20 sps:$4 sm:$0xff]  }
 0x1e5   : > { %v10037_v44 = vadd.f32 %v8753_v14, %v11606_v15  ;;  %v8756_v49 = vadd.f32 %v8755_v35, %v8754_v1  ;;  %v8868_v52 = vadd.f32 %v8867_v57, %v8866_v19  ;;  %9307 = vmatprep.subr.bf16.mxu1 %v10639_v61  ;;  %v10648_v15 = vld [vmem:[%s12933_s1 + $0x478] sm:$0xff]  }
 0x1e6   : > { %3920 = vmatmul.mubr.bf16.gmra.mrb[192].mxu0 %v10583_v40  ;;  %5044 = vmatmul.mubr.bf16.gmra.mrb[220].mxu1 %v11629_v60  ;;  %v10662_v60 = vld [vmem:[%s12933_s1 + $0x5c0] sm:$0xff]  }
 0x1e7   : > { %v11879_v28 = vadd.f32 %v10037_v44, %v8865_v7  ;;  %v10049_v34 = vadd.f32 %v8756_v49, %v11613_v25  ;;  %3927 = vmatprep.mubr.bf16.mxu0 %v10584_v46  ;;  %5051 = vmatprep.mubr.bf16.mxu1 %v11633_v51  ;;  %v10592_v49 = vld [vmem:[%s10966_s8 + $0x260] ss:$20 sps:$4 sm:$0xff]  }
 0x1e8   : > { %9308 = vmatpush3.bf16.msra.mxu1 %v10640_v16 }
 0x1e9   : > { %v11886_v45 = vadd.f32 %v10049_v34, %v8868_v52  ;;  %v8757_v63 = vpop.f32.mrb[116].mxu1  ;;  %v8869_v12 = vpop.f32.mrb[116].mxu0  ;;  %9309 = vmatprep.subr.bf16.mxu1 %v10647_v48 }
 0x1ea   : > { %v8758_v56 = vpop.f32.mrb[117].mxu1  ;;  %v8870_v25 = vpop.f32.mrb[117].mxu0 }
 0x1eb   : > { %v8759_v50 = vadd.f32 %v8758_v56, %v8757_v63  ;;  %v8871_v2 = vadd.f32 %v8870_v25, %v8869_v12  ;;  %v8760_v51 = vpop.f32.mrb[118].mxu1  ;;  %v8872_v61 = vpop.f32.mrb[118].mxu0  ;;  %v10593_v63 = vld [vmem:[%s10966_s8 + $0x28c] ss:$20 sps:$4 sm:$0xff]  }
 0x1ec   : > { %v8761_v18 = vpop.f32.mrb[119].mxu1  ;;  %v8873_v40 = vpop.f32.mrb[119].mxu0  ;;  %9310 = vmatpush3.bf16.msra.mxu1 %v10648_v15 }
 0x1ed   : > { %v10031_v14 = vadd.f32 %v8759_v50, %v11636_v53  ;;  %v8762_v7 = vadd.f32 %v8761_v18, %v8760_v51  ;;  %v8874_v1 = vadd.f32 %v8873_v40, %v8872_v61  ;;  %9543 = vmatprep.subr.bf16.mxu1 %v10662_v60  ;;  %v10595_v61 = vld [vmem:[%s10966_s8 + $0x288] ss:$20 sps:$4 sm:$0xff]  }
 0x1ee   : > { %3928 = vmatmul.mubr.bf16.gmra.mrb[196].mxu0 %v10586_v47  ;;  %5052 = vmatmul.mubr.bf16.gmra.mrb[224].mxu1 %v11646_v36 }
 0x1ef   : > { %v11895_v19 = vadd.f32 %v10031_v14, %v8871_v2  ;;  %v10043_v46 = vadd.f32 %v8762_v7, %v11641_v55  ;;  %3935 = vmatprep.mubr.bf16.mxu0 %v10590_v23  ;;  %5059 = vmatprep.mubr.bf16.mxu1 %v11650_v42  ;;  %v10601_v7 = vld [vmem:[%s10966_s8 + $0x194] ss:$20 sps:$4 sm:$0xff]  }
 0x1f1   : > { %v11899_v35 = vadd.f32 %v10043_v46, %v8874_v1  ;;  %v8763_v57 = vpop.f32.mrb[120].mxu1  ;;  %v8875_v16 = vpop.f32.mrb[120].mxu0 }
 0x1f2   : > { %v8764_v44 = vpop.f32.mrb[121].mxu1  ;;  %v8876_v53 = vpop.f32.mrb[121].mxu0 }
 0x1f3   : > { %v8765_v52 = vadd.f32 %v8764_v44, %v8763_v57  ;;  %v8877_v48 = vadd.f32 %v8876_v53, %v8875_v16  ;;  %v8766_v34 = vpop.f32.mrb[122].mxu1  ;;  %v8878_v15 = vpop.f32.mrb[122].mxu0 }
 0x1f4   : > { %v8767_v36 = vpop.f32.mrb[123].mxu1  ;;  %v8879_v12 = vpop.f32.mrb[123].mxu0 }
 0x1f5   : > { %v10061_v55 = vadd.f32 %v8765_v52, %v11653_v24  ;;  %v8768_v60 = vadd.f32 %v8767_v36, %v8766_v34  ;;  %v8880_v56 = vadd.f32 %v8879_v12, %v8878_v15  ;;  %v10604_v15 = vld [vmem:[%s10966_s8 + $0x190] ss:$20 sps:$4 sm:$0xff]  }
 0x1f6   : > { %3936 = vmatmul.mubr.bf16.gmra.mrb[200].mxu0 %v10592_v49  ;;  %5060 = vmatmul.mubr.bf16.gmra.mrb[228].mxu1 %v11662_v17  ;;  %v10599_v17 = vld [vmem:[%s10966_s8 + $0x2b4] ss:$20 sps:$4 sm:$0xff]  }
 0x1f7   : > { %v11905_v42 = vadd.f32 %v10061_v55, %v8877_v48  ;;  %v10073_v25 = vadd.f32 %v8768_v60, %v11657_v8  ;;  %3943 = vmatprep.mubr.bf16.mxu0 %v10593_v63  ;;  %5067 = vmatprep.mubr.bf16.mxu1 %v11666_v33  ;;  %v10605_v55 = vld [vmem:[%s10966_s8 + $0x60] ss:$20 sps:$4 sm:$0xff]   ;;  %v10606_v60 = vld [vmem:[%s10966_s8 + $0x1bc] ss:$20 sps:$4 sm:$0xff]  }
 0x1f9   : > { %v11909_v47 = vadd.f32 %v10073_v25, %v8880_v56  ;;  %v8769_v50 = vpop.f32.mrb[124].mxu1  ;;  %v8881_v2 = vpop.f32.mrb[124].mxu0 }
 0x1fa   : > { %v8770_v51 = vpop.f32.mrb[125].mxu1  ;;  %v8882_v24 = vpop.f32.mrb[125].mxu0 }
 0x1fb   : > { %v8771_v23 = vadd.f32 %v8770_v51, %v8769_v50  ;;  %v8883_v18 = vadd.f32 %v8882_v24, %v8881_v2  ;;  %v8772_v40 = vpop.f32.mrb[126].mxu1  ;;  %v8884_v14 = vpop.f32.mrb[126].mxu0 }
 0x1fc   : > { %v8773_v1 = vpop.f32.mrb[127].mxu1  ;;  %v8885_v46 = vpop.f32.mrb[127].mxu0 }
 0x1fd   : > { %v10055_v8 = vadd.f32 %v8771_v23, %v11669_v3  ;;  %v8774_v33 = vadd.f32 %v8773_v1, %v8772_v40  ;;  %v8886_v57 = vadd.f32 %v8885_v46, %v8884_v14  ;;  %v10603_v3 = vld [vmem:[%s10966_s8 + $0x2b0] ss:$20 sps:$4 sm:$0xff]  }
 0x1fe   : > { %3944 = vmatmul.mubr.bf16.gmra.mrb[204].mxu0 %v10595_v61  ;;  %5068 = vmatmul.mubr.bf16.gmra.mrb[232].mxu1 %v11678_v26 }
 0x1ff   : > { %v11916_v16 = vadd.f32 %v10055_v8, %v8883_v18  ;;  %v10067_v44 = vadd.f32 %v8774_v33, %v11673_v20  ;;  %3951 = vmatprep.mubr.bf16.mxu0 %v10599_v17  ;;  %5075 = vmatprep.mubr.bf16.mxu1 %v10601_v7  ;;  %v10608_v17 = vld [vmem:[%s10966_s8 + $0x88] ss:$20 sps:$4 sm:$0xff]   ;;  %v10613_v33 = vld [vmem:[%s10966_s8 + $0xb0] ss:$20 sps:$4 sm:$0xff]  }
 0x201   : > { %v11919_v53 = vadd.f32 %v10067_v44, %v8886_v57  ;;  %v8775_v49 = vpop.f32.mrb[128].mxu1  ;;  %v8887_v52 = vpop.f32.mrb[128].mxu0 }
 0x202   : > { %v8776_v48 = vpop.f32.mrb[129].mxu1  ;;  %v8888_v34 = vpop.f32.mrb[129].mxu0 }
 0x203   : > { %v8777_v63 = vadd.f32 %v8776_v48, %v8775_v49  ;;  %v8889_v36 = vadd.f32 %v8888_v34, %v8887_v52  ;;  %v8778_v12 = vpop.f32.mrb[130].mxu1  ;;  %v8890_v26 = vpop.f32.mrb[130].mxu0  ;;  %v10614_v49 = vld [vmem:[%s10966_s8 + $0x1e4] ss:$20 sps:$4 sm:$0xff]  }
 0x204   : > { %v8779_v56 = vpop.f32.mrb[131].mxu1  ;;  %v8891_v25 = vpop.f32.mrb[131].mxu0 }
 0x205   : > { %v10085_v20 = vadd.f32 %v8777_v63, %v11683_v0  ;;  %v8780_v50 = vadd.f32 %v8779_v56, %v8778_v12  ;;  %v8892_v2 = vadd.f32 %v8891_v25, %v8890_v26  ;;  %v10609_v0 = vld [vmem:[%s10966_s8 + $0x1b8] ss:$20 sps:$4 sm:$0xff]   ;;  %v10617_v56 = vld [vmem:[%s10966_s8 + $0x1e0] ss:$20 sps:$4 sm:$0xff]  }
 0x206   : > { %3952 = vmatmul.mubr.bf16.gmra.mrb[208].mxu0 %v10603_v3  ;;  %5076 = vmatmul.mubr.bf16.gmra.mrb[236].mxu1 %v10604_v15 }
 0x207   : > { %v11926_v51 = vadd.f32 %v10085_v20, %v8889_v36  ;;  %v10097_v24 = vadd.f32 %v8780_v50, %v11687_v11  ;;  %9791 = vmatprep.mubr.bf16.mxu0 %v10605_v55  ;;  %5083 = vmatprep.mubr.bf16.mxu1 %v10606_v60  ;;  %v10618_v11 = vld [vmem:[%s12933_s1 + $0x4c8] sm:$0xff]   ;;  %v10619_v50 = vld [vmem:[%s10966_s8 + $0x100] ss:$20 sps:$4 sm:$0xff]  }
 0x208   : > { %v10616_v60 = vld [vmem:[%s10966_s8 + $0xd8] ss:$20 sps:$4 sm:$0xff]  }
 0x209   : > { %v11929_v61 = vadd.f32 %v10097_v24, %v8892_v2  ;;  %v8781_v23 = vpop.f32.mrb[132].mxu1  ;;  %v8893_v18 = vpop.f32.mrb[132].mxu0  ;;  %v10620_v2 = vld [vmem:[%s10966_s8 + $0x20c] ss:$20 sps:$4 sm:$0xff]  }
 0x20a   : > { %v8782_v40 = vpop.f32.mrb[133].mxu1  ;;  %v8894_v14 = vpop.f32.mrb[133].mxu0 }
 0x20b   : > { %v8783_v7 = vadd.f32 %v8782_v40, %v8781_v23  ;;  %v8895_v1 = vadd.f32 %v8894_v14, %v8893_v18  ;;  %v8784_v46 = vpop.f32.mrb[134].mxu1  ;;  %v8896_v8 = vpop.f32.mrb[134].mxu0  ;;  %v10632_v14 = vld [vmem:[%s12933_s1 + $0x4d8] sm:$0xff]  }
 0x20c   : > { %v8785_v57 = vpop.f32.mrb[135].mxu1  ;;  %v8897_v44 = vpop.f32.mrb[135].mxu0 }
 0x20d   : > { %v10079_v52 = vadd.f32 %v8783_v7, %v11696_v41  ;;  %v8786_v48 = vadd.f32 %v8785_v57, %v8784_v46  ;;  %v8898_v34 = vadd.f32 %v8897_v44, %v8896_v8  ;;  %v10624_v41 = vld [vmem:[%s12933_s1 + $0x4d0] sm:$0xff]   ;;  %v10638_v8 = vld [vmem:[%s12933_s1 + $0x4e0] sm:$0xff]   ;;  %v10622_v44 = vld [vmem:[%s10966_s8 + $0x128] ss:$20 sps:$4 sm:$0xff]  }
 0x20e   : > { %9792 = vmatmul.mubr.bf16.vlgmr.msra.gmra.mrb[48].mxu0 %v10608_v17  ;;  %5084 = vmatmul.mubr.bf16.gmra.mrb[240].mxu1 %v10609_v0 }
 0x20f   : > { %v11939_v3 = vadd.f32 %v10079_v52, %v8895_v1  ;;  %v10091_v15 = vadd.f32 %v8786_v48, %v11699_v4  ;;  %9824 = vmatpush3.bf16.msra.mxu0 %v11748_v13  ;;  %9795 = vmatprep.mubr.bf16.mxu0 %v10613_v33  ;;  %v10627_v48 = vld [vmem:[%s10966_s8 + $0x150] ss:$20 sps:$4 sm:$0xff]  }
 0x210   : > { %5091 = vmatprep.mubr.bf16.mxu1 %v10614_v49  ;;  %9825 = vmatprep.subr.bf16.mxu0 %v10618_v11  ;;  %v10623_v49 = vld [vmem:[%s10966_s8 + $0x208] ss:$20 sps:$4 sm:$0xff]  }
 0x211   : > { %v11946_v63 = vadd.f32 %v10091_v15, %v8898_v34  ;;  %v8787_v36 = vpop.f32.mrb[136].mxu1  ;;  %v8899_v12 = vpop.f32.mrb[136].mxu0  ;;  %v10628_v34 = vld [vmem:[%s10966_s8 + $0x234] ss:$20 sps:$4 sm:$0xff]  }
 0x212   : > { %v8788_v26 = vpop.f32.mrb[137].mxu1  ;;  %v8900_v55 = vpop.f32.mrb[137].mxu0 }
 0x213   : > { %v8789_v4 = vadd.f32 %v8788_v26, %v8787_v36  ;;  %v8901_v25 = vadd.f32 %v8900_v55, %v8899_v12  ;;  %v8790_v13 = vpop.f32.mrb[138].mxu1  ;;  %v8902_v20 = vpop.f32.mrb[138].mxu0  ;;  %9826 = vmatpush3.bf16.msra.mxu0 %v10618_v11  ;;  %v10646_v12 = vld [vmem:[%s12933_s1 + $0x4f0] sm:$0xff]   ;;  %v10630_v55 = vld [vmem:[%s10966_s8 + $0x178] ss:$20 sps:$4 sm:$0xff]  }
 0x214   : > { %v8791_v24 = vpop.f32.mrb[139].mxu1  ;;  %v8903_v23 = vpop.f32.mrb[139].mxu0  ;;  %9827 = vmatprep.subr.bf16.mxu0 %v10624_v41 }
 0x215   : > { %v8792_v18 = vadd.f32 %v8791_v24, %v8790_v13  ;;  %v8904_v40 = vadd.f32 %v8903_v23, %v8902_v20  ;;  %v2468_v17 = vadd.f32 %v8789_v4, %v11719_v27  ;;  %v10636_v13 = vld [vmem:[%s10966_s8 + $0x25c] ss:$20 sps:$4 sm:$0xff]   ;;  %v10660_v23 = vld [vmem:[%s12933_s1 + $0x540] sm:$0xff]  }
 0x216   : > { %9796 = vmatmul.mubr.bf16.gmra.mrb[52].mxu0 %v10616_v60  ;;  %5092 = vmatmul.mubr.bf16.gmra.mrb[244].mxu1 %v10617_v56  ;;  %v10631_v60 = vld [vmem:[%s10966_s8 + $0x230] ss:$20 sps:$4 sm:$0xff]  }
 0x217   : > { %9799 = vmatprep.mubr.bf16.mxu0 %v10619_v50  ;;  %5099 = vmatprep.mubr.bf16.mxu1 %v10620_v2  ;;  %v11956_v0 = vadd.f32 %v8901_v25, %v2468_v17  ;;  %v2471_v7 = vadd.f32 %v8792_v18, %v11722_v62  ;;  %v10633_v25 = vld [vmem:[%s10966_s8 + $0x1a0] ss:$20 sps:$4 sm:$0xff]   ;;  %v10654_v2 = vld [vmem:[%s12933_s1 + $0x4f8] sm:$0xff]  }
 0x218   : > { %9828 = vmatpush3.bf16.msra.mxu0 %v10624_v41  ;;  %v10643_v41 = vld [vmem:[%s12933_s1 + $0x4e8] sm:$0xff]  }
 0x219   : > { %v8905_v1 = vpop.f32.mrb[140].mxu0  ;;  %v8793_v46 = vpop.f32.mrb[140].mxu1  ;;  %9829 = vmatprep.subr.bf16.mxu0 %v10632_v14  ;;  %v11962_v27 = vadd.f32 %v8904_v40, %v2471_v7  ;;  %v10634_v40 = vld [vmem:[%s10966_s8 + $0x258] ss:$20 sps:$4 sm:$0xff]  }
 0x21a   : > { %v8906_v33 = vpop.f32.mrb[141].mxu0  ;;  %v8794_v57 = vpop.f32.mrb[141].mxu1  ;;  %v10641_v1 = vld [vmem:[%s10966_s8 + $0x1f0] ss:$20 sps:$4 sm:$0xff]  }
 0x21b   : > { %v8908_v11 = vpop.f32.mrb[142].mxu0  ;;  %v8796_v52 = vpop.f32.mrb[142].mxu1 }
 0x21c   : > { %v8909_v62 = vpop.f32.mrb[143].mxu0  ;;  %v8797_v15 = vpop.f32.mrb[143].mxu1  ;;  %9830 = vmatpush3.bf16.msra.mxu0 %v10632_v14  ;;  %v10637_v14 = vld [vmem:[%s10966_s8 + $0x1c8] ss:$20 sps:$4 sm:$0xff]   ;;  %v10644_v52 = vld [vmem:[%s10966_s8 + $0x240] ss:$20 sps:$4 sm:$0xff]  }
 0x21d   : > { %9831 = vmatprep.subr.bf16.mxu0 %v10638_v8  ;;  %v10645_v15 = vld [vmem:[%s10966_s8 + $0x268] ss:$20 sps:$4 sm:$0xff]  }
 0x21e   : > { %9800 = vmatmul.mubr.bf16.gmra.mrb[56].mxu0 %v10622_v44  ;;  %5100 = vmatmul.mubr.bf16.gmra.mrb[248].mxu1 %v10623_v49  ;;  %v10642_v44 = vld [vmem:[%s10966_s8 + $0x218] ss:$20 sps:$4 sm:$0xff]  }
 0x21f   : > { %9803 = vmatprep.mubr.bf16.mxu0 %v10627_v48  ;;  %5107 = vmatprep.mubr.bf16.mxu1 %v10628_v34 }
 0x220   : > { %9832 = vmatpush3.bf16.msra.mxu0 %v10638_v8 }
 0x221   : > { %v8951_v36 = vpop.f32.mrb[144].mxu1  ;;  %9833 = vmatprep.subr.bf16.mxu0 %v10643_v41 }
 0x222   : > { %v8952_v26 = vpop.f32.mrb[145].mxu1 }
 0x223   : > { %v11976_v56 = vadd.f32 %v8952_v26, %v8951_v36  ;;  %v8954_v4 = vpop.f32.mrb[146].mxu1  ;;  %v10652_v26 = vld [vmem:[%s10966_s8 + $0x2d4] ss:$20 sps:$4 sm:$0xff]  }
 0x224   : > { %v8955_v20 = vpop.f32.mrb[147].mxu1  ;;  %9834 = vmatpush3.bf16.msra.mxu0 %v10643_v41 }
 0x225   : > { %v11980_v50 = vadd.f32 %v8955_v20, %v8954_v4  ;;  %9835 = vmatprep.subr.bf16.mxu0 %v10646_v12  ;;  %v10650_v4 = vld [vmem:[%s10966_s8 + $0x2d0] ss:$20 sps:$4 sm:$0xff]  }
 0x226   : > { %9804 = vmatmul.mubr.bf16.gmra.mrb[60].mxu0 %v10630_v55  ;;  %5108 = vmatmul.mubr.bf16.gmra.mrb[252].mxu1 %v10631_v60 }
 0x227   : > { %9807 = vmatprep.mubr.bf16.mxu0 %v10633_v25  ;;  %5115 = vmatprep.mubr.bf16.mxu1 %v10636_v13  ;;  %v10653_v25 = vld [vmem:[%s10966_s8 + $0x2b8] ss:$20 sps:$4 sm:$0xff]  }
 0x228   : > { %9836 = vmatpush3.bf16.msra.mxu0 %v10646_v12  ;;  %v10649_v12 = vld [vmem:[%s10966_s8 + $0x290] ss:$20 sps:$4 sm:$0xff]  }
 0x229   : > { %v8957_v24 = vpop.f32.mrb[148].mxu1  ;;  %9837 = vmatprep.subr.bf16.mxu0 %v10654_v2 }
 0x22a   : > { %v8958_v18 = vpop.f32.mrb[149].mxu1 }
 0x22b   : > { %v11990_v17 = vadd.f32 %v8958_v18, %v8957_v24  ;;  %v8960_v7 = vpop.f32.mrb[150].mxu1  ;;  %v10658_v24 = vld [vmem:[%s10966_s8 + $0x88] ss:$20 sps:$4 sm:$0xff]  }
 0x22c   : > { %v8961_v46 = vpop.f32.mrb[151].mxu1  ;;  %9838 = vmatpush3.bf16.msra.mxu0 %v10654_v2  ;;  %v10657_v2 = vld [vmem:[%s10966_s8 + $0x84] ss:$20 sps:$4 sm:$0xff]  }
 0x22d   : > { %v11993_v8 = vadd.f32 %v8961_v46, %v8960_v7  ;;  %9431 = vmatprep.subr.bf16.mxu0 %v10660_v23  ;;  %v10659_v7 = vld [vmem:[%s10966_s8 + $0xb0] ss:$20 sps:$4 sm:$0xff]  }
 0x22e   : > { %9808 = vmatmul.mubr.bf16.gmra.mrb[64].mxu0 %v10637_v14  ;;  %5116 = vmatmul.mubr.bf16.gmra.mrb[0].mxu1 %v10634_v40  ;;  %v10655_v14 = vld [vmem:[%s10966_s8 + $0x80] ss:$20 sps:$4 sm:$0xff]  }
 0x22f   : > { %9811 = vmatprep.mubr.bf16.mxu0 %v10641_v1  ;;  %5123 = vmatprep.mubr.bf16.mxu1 %v11763_v58 }
 0x231   : > { %v8963_v33 = vpop.f32.mrb[152].mxu1 }
 0x232   : > { %v8964_v57 = vpop.f32.mrb[153].mxu1 }
 0x233   : > { %v11997_v49 = vadd.f32 %v8964_v57, %v8963_v33  ;;  %v8966_v11 = vpop.f32.mrb[154].mxu1  ;;  %v10661_v33 = vld [vmem:[%s12933_s1 + $0x500] sm:$0xff]  }
 0x234   : > { %v8967_v48 = vpop.f32.mrb[155].mxu1  ;;  %v10663_v57 = vld [vmem:[%s12933_s1 + $0x580] sm:$0xff]  }
 0x235   : > { %v12000_v34 = vadd.f32 %v8967_v48, %v8966_v11  ;;  %v10666_v11 = vld [vmem:[%s10966_s8 + $0xac] ss:$20 sps:$4 sm:$0xff]  }
 0x236   : > { %9812 = vmatmul.mubr.bf16.gmra.mrb[68].mxu0 %v10642_v44  ;;  %5124 = vmatmul.mubr.bf16.gmra.mrb[4].mxu1 %v11775_v31 }
 0x237   : > { %9815 = vmatprep.mubr.bf16.mxu0 %v10644_v52  ;;  %5131 = vmatprep.mubr.bf16.mxu1 %v11779_v39  ;;  %v10667_v52 = vld [vmem:[%s10966_s8 + $0xd8] ss:$20 sps:$4 sm:$0xff]  }
 0x239   : > { %v8969_v58 = vpop.f32.mrb[156].mxu1 }
 0x23a   : > { %v8970_v62 = vpop.f32.mrb[157].mxu1 }
 0x23b   : > { %v12005_v41 = vadd.f32 %v8970_v62, %v8969_v58  ;;  %v8972_v36 = vpop.f32.mrb[158].mxu1  ;;  %v10669_v58 = vld [vmem:[%s12933_s1 + $0x548] sm:$0xff]  }
 0x23c   : > { %v8973_v55 = vpop.f32.mrb[159].mxu1  ;;  %v10678_v62 = vld [vmem:[%s12933_s1 + $0x5c8] sm:$0xff]  }
 0x23d   : > { %v12009_v60 = vadd.f32 %v8973_v55, %v8972_v36  ;;  %v10679_v36 = vld [vmem:[%s12933_s1 + $0x588] sm:$0xff]  }
 0x23e   : > { %9816 = vmatmul.mubr.bf16.gmra.mrb[72].mxu0 %v10645_v15  ;;  %5132 = vmatmul.mubr.bf16.gmra.mrb[8].mxu1 %v11791_v29  ;;  %v10670_v15 = vld [vmem:[%s12933_s1 + $0x508] sm:$0xff]  }
 0x23f   : > { %9819 = vmatprep.mubr.bf16.mxu0 %v10649_v12  ;;  %5139 = vmatprep.mubr.bf16.mxu1 %v10652_v26  ;;  %v10676_v12 = vld [vmem:[%s12933_s1 + $0x550] sm:$0xff]  }
 0x240   : > { %v10694_v26 = vld [vmem:[%s12933_s1 + $0x5d0] sm:$0xff]  }
 0x241   : > { %v8975_v31 = vpop.f32.mrb[160].mxu1 }
 0x242   : > { %v8976_v39 = vpop.f32.mrb[161].mxu1 }
 0x243   : > { %v12014_v13 = vadd.f32 %v8976_v39, %v8975_v31  ;;  %v8978_v20 = vpop.f32.mrb[162].mxu1  ;;  %v10664_v39 = vld [vmem:[%s10966_s8 + $0xa8] ss:$20 sps:$4 sm:$0xff]  }
 0x244   : > { %v8979_v23 = vpop.f32.mrb[163].mxu1 }
 0x245   : > { %v12018_v18 = vadd.f32 %v8979_v23, %v8978_v20 }
 0x246   : > { %9820 = vmatmul.mubr.bf16.gmra.mrb[212].mxu0 %v10653_v25  ;;  %5140 = vmatmul.mubr.bf16.gmra.mrb[12].mxu1 %v10650_v4  ;;  %v10668_v4 = vld [vmem:[%s10966_s8 + $0x100] ss:$20 sps:$4 sm:$0xff]  }
 0x247   : > { %5180 = vmatprep.mubr.bf16.mxu1 %v10657_v2  ;;  %9839 = vmatprep.mubr.bf16.mxu0 %v10658_v24  ;;  %v10673_v2 = vld [vmem:[%s10966_s8 + $0xd4] ss:$20 sps:$4 sm:$0xff]  }
 0x248   : > { %v10674_v24 = vld [vmem:[%s10966_s8 + $0x128] ss:$20 sps:$4 sm:$0xff]  }
 0x249   : > { %v8981_v29 = vpop.f32.mrb[164].mxu1 }
 0x24a   : > { %v8982_v40 = vpop.f32.mrb[165].mxu1 }
 0x24b   : > { %v12022_v1 = vadd.f32 %v8982_v40, %v8981_v29  ;;  %v8984_v46 = vpop.f32.mrb[166].mxu1  ;;  %v10677_v29 = vld [vmem:[%s12933_s1 + $0x510] sm:$0xff]  }
 0x24c   : > { %v8985_v44 = vpop.f32.mrb[167].mxu1  ;;  %v10695_v40 = vld [vmem:[%s12933_s1 + $0x590] sm:$0xff]  }
 0x24d   : > { %v12032_v48 = vadd.f32 %v8985_v44, %v8984_v46  ;;  %v10710_v46 = vld [vmem:[%s12933_s1 + $0x5d8] sm:$0xff]  }
 0x24e   : > { %5181 = vmatmul.mubr.bf16.vlgmr.msra.gmra.mrb[16].mxu1 %v10655_v14  ;;  %9840 = vmatmul.mubr.bf16.vlgmr.msra.gmra.mrb[48].mxu0 %v10659_v7  ;;  %v10685_v7 = vld [vmem:[%s12933_s1 + $0x558] sm:$0xff]  }
 0x24f   : > { %9432 = vmatpush3.bf16.msra.mxu0 %v10661_v33  ;;  %9544 = vmatpush3.bf16.msra.mxu1 %v10663_v57  ;;  %v10686_v33 = vld [vmem:[%s12933_s1 + $0x518] sm:$0xff]  }
 0x250   : > { %5188 = vmatprep.mubr.bf16.mxu1 %v10666_v11  ;;  %9843 = vmatprep.mubr.bf16.mxu0 %v10667_v52  ;;  %v10711_v57 = vld [vmem:[%s12933_s1 + $0x598] sm:$0xff]   ;;  %v10692_v52 = vld [vmem:[%s12933_s1 + $0x560] sm:$0xff]  }
 0x251   : > { %v8987_v55 = vpop.f32.mrb[168].mxu1  ;;  %9433 = vmatprep.subr.bf16.mxu0 %v10669_v58  ;;  %9545 = vmatprep.subr.bf16.mxu1 %v10678_v62  ;;  %v10726_v58 = vld [vmem:[%s12933_s1 + $0x5e0] sm:$0xff]  }
 0x252   : > { %v8988_v31 = vpop.f32.mrb[169].mxu1 }
 0x253   : > { %v12054_v25 = vadd.f32 %v8988_v31, %v8987_v55  ;;  %v8990_v20 = vpop.f32.mrb[170].mxu1  ;;  %9434 = vmatpush3.bf16.msra.mxu0 %v10670_v15  ;;  %9546 = vmatpush3.bf16.msra.mxu1 %v10679_v36  ;;  %v10671_v36 = vld [vmem:[%s10966_s8 + $0xd0] ss:$20 sps:$4 sm:$0xff]  }
 0x254   : > { %v8991_v23 = vpop.f32.mrb[171].mxu1  ;;  %9435 = vmatprep.subr.bf16.mxu0 %v10676_v12  ;;  %9547 = vmatprep.subr.bf16.mxu1 %v10694_v26  ;;  %v10675_v12 = vld [vmem:[%s10966_s8 + $0x150] ss:$20 sps:$4 sm:$0xff]  }
 0x255   : > { %v12064_v14 = vadd.f32 %v8991_v23, %v8990_v20  ;;  %v10683_v20 = vld [vmem:[%s10966_s8 + $0x178] ss:$20 sps:$4 sm:$0xff]   ;;  %v10693_v23 = vld [vmem:[%s12933_s1 + $0x520] sm:$0xff]  }
 0x256   : > { %5189 = vmatmul.mubr.bf16.gmra.mrb[20].mxu1 %v10664_v39  ;;  %9844 = vmatmul.mubr.bf16.gmra.mrb[52].mxu0 %v10668_v4  ;;  %v10682_v4 = vld [vmem:[%s10966_s8 + $0xfc] ss:$20 sps:$4 sm:$0xff]  }
 0x257   : > { %5196 = vmatprep.mubr.bf16.mxu1 %v10673_v2  ;;  %9847 = vmatprep.mubr.bf16.mxu0 %v10674_v24 }
 0x258   : > { %9436 = vmatpush3.bf16.msra.mxu0 %v10677_v29  ;;  %9548 = vmatpush3.bf16.msra.mxu1 %v10695_v40  ;;  %v10727_v29 = vld [vmem:[%s12933_s1 + $0x5a0] sm:$0xff]  }
 0x259   : > { %v9773_v44 = vpop.f32.mrb[144].mxu0  ;;  %v8993_v11 = vpop.f32.mrb[172].mxu1  ;;  %9437 = vmatprep.subr.bf16.mxu0 %v10685_v7  ;;  %9549 = vmatprep.subr.bf16.mxu1 %v10710_v46  ;;  %v10701_v7 = vld [vmem:[%s12933_s1 + $0x568] sm:$0xff]  }
 0x25a   : > { %v2789_v62 = vpop.f32.mrb[145].mxu0  ;;  %v8994_v15 = vpop.f32.mrb[173].mxu1  ;;  %v10741_v46 = vld [vmem:[%s12933_s1 + $0x5e8] sm:$0xff]  }
 0x25b   : > { %v12087_v26 = vadd.f32 %v2789_v62, %v11956_v0  ;;  %v9774_v55 = vpop.f32.mrb[146].mxu0  ;;  %v12089_v31 = vadd.f32 %v8994_v15, %v8993_v11  ;;  %v8996_v39 = vpop.f32.mrb[174].mxu1  ;;  %v10708_v11 = vld [vmem:[%s12933_s1 + $0x570] sm:$0xff]   ;;  %v10680_v15 = vld [vmem:[%s10966_s8 + $0xf8] ss:$20 sps:$4 sm:$0xff]  }
 0x25c   : > { %v2792_v2 = vpop.f32.mrb[147].mxu0  ;;  %v8997_v24 = vpop.f32.mrb[175].mxu1  ;;  %9438 = vmatpush3.bf16.msra.mxu0 %v10686_v33  ;;  %9550 = vmatpush3.bf16.msra.mxu1 %v10711_v57  ;;  %v10742_v33 = vld [vmem:[%s12933_s1 + $0x5a8] sm:$0xff]  }
 0x25d   : > { %v12100_v0 = vadd.f32 %v2792_v2, %v11962_v27  ;;  %v12102_v40 = vadd.f32 %v8997_v24, %v8996_v39  ;;  %9439 = vmatprep.subr.bf16.mxu0 %v10692_v52  ;;  %9551 = vmatprep.subr.bf16.mxu1 %v10726_v58  ;;  %v10702_v27 = vld [vmem:[%s12933_s1 + $0x528] sm:$0xff]   ;;  %v10756_v52 = vld [vmem:[%s12933_s1 + $0x5f0] sm:$0xff]  }
 0x25e   : > { %5197 = vmatmul.mubr.bf16.gmra.mrb[24].mxu1 %v10671_v36  ;;  %9848 = vmatmul.mubr.bf16.gmra.mrb[56].mxu0 %v10675_v12  ;;  %v10684_v36 = vld [vmem:[%s10966_s8 + $0x1a0] ss:$20 sps:$4 sm:$0xff]   ;;  %v10690_v2 = vld [vmem:[%s10966_s8 + $0x1c8] ss:$20 sps:$4 sm:$0xff]  }
 0x25f   : > { %5204 = vmatprep.mubr.bf16.mxu1 %v10682_v4  ;;  %9851 = vmatprep.mubr.bf16.mxu0 %v10683_v20  ;;  %v10689_v20 = vld [vmem:[%s10966_s8 + $0x124] ss:$20 sps:$4 sm:$0xff]  }
 0x260   : > { %9440 = vmatpush3.bf16.msra.mxu0 %v10693_v23  ;;  %9552 = vmatpush3.bf16.msra.mxu1 %v10727_v29  ;;  %v10709_v29 = vld [vmem:[%s12933_s1 + $0x530] sm:$0xff]  }
 0x261   : > { %v9063_v57 = vpop.f32.mrb[148].mxu0  ;;  %v8999_v44 = vpop.f32.mrb[176].mxu1  ;;  %9441 = vmatprep.subr.bf16.mxu0 %v10701_v7  ;;  %9553 = vmatprep.subr.bf16.mxu1 %v10741_v46  ;;  %v10757_v7 = vld [vmem:[%s12933_s1 + $0x5b0] sm:$0xff]  }
 0x262   : > { %v9064_v58 = vpop.f32.mrb[149].mxu0  ;;  %v9000_v62 = vpop.f32.mrb[177].mxu1 }
 0x263   : > { %v9065_v12 = vadd.f32 %v9064_v58, %v9063_v57  ;;  %v9066_v55 = vpop.f32.mrb[150].mxu0  ;;  %v12124_v39 = vadd.f32 %v9000_v62, %v8999_v44  ;;  %v9002_v4 = vpop.f32.mrb[178].mxu1  ;;  %v10717_v58 = vld [vmem:[%s12933_s1 + $0x578] sm:$0xff]  }
 0x264   : > { %v9067_v24 = vpop.f32.mrb[151].mxu0  ;;  %v9003_v23 = vpop.f32.mrb[179].mxu1  ;;  %9442 = vmatpush3.bf16.msra.mxu0 %v10702_v27  ;;  %9554 = vmatpush3.bf16.msra.mxu1 %v10742_v33  ;;  %v10771_v27 = vld [vmem:[%s12933_s1 + $0x5f8] sm:$0xff]  }
 0x265   : > { %v3834_v46 = vadd.f32 %v9065_v12, %v11976_v56  ;;  %v9068_v57 = vadd.f32 %v9067_v24, %v9066_v55  ;;  %v12135_v44 = vadd.f32 %v9003_v23, %v9002_v4  ;;  %9443 = vmatprep.subr.bf16.mxu0 %v10708_v11  ;;  %9555 = vmatprep.subr.bf16.mxu1 %v10756_v52  ;;  %v10718_v11 = vld [vmem:[%s12933_s1 + $0x538] sm:$0xff]   ;;  %v10687_v55 = vld [vmem:[%s10966_s8 + $0x120] ss:$20 sps:$4 sm:$0xff]   ;;  %v10691_v4 = vld [vmem:[%s10966_s8 + $0x1f0] ss:$20 sps:$4 sm:$0xff]  }
 0x266   : > { %5205 = vmatmul.mubr.bf16.gmra.mrb[28].mxu1 %v10680_v15  ;;  %9852 = vmatmul.mubr.bf16.gmra.mrb[60].mxu0 %v10684_v36  ;;  %v10772_v52 = vld [vmem:[%s12933_s1 + $0x5b8] sm:$0xff]   ;;  %v12159_v15 = vld [vmem:[%s12933_s1 + $0x600] sm:$0xff]  }
 0x267   : > { %v12144_v33 = vadd.f32 %v11739_v5, %v3834_v46  ;;  %v3837_v56 = vadd.f32 %v9068_v57, %v11980_v50  ;;  %5212 = vmatprep.mubr.bf16.mxu1 %v10689_v20  ;;  %9855 = vmatprep.mubr.bf16.mxu0 %v10690_v2 }
 0x268   : > { %9444 = vmatpush3.bf16.msra.mxu0 %v10709_v29  ;;  %9556 = vmatpush3.bf16.msra.mxu1 %v10757_v7  ;;  %v10699_v29 = vld [vmem:[%s10966_s8 + $0x218] ss:$20 sps:$4 sm:$0xff]  }
 0x269   : > { %v12154_v5 = vadd.f32 %v11743_v30, %v3837_v56  ;;  %v9069_v62 = vpop.f32.mrb[152].mxu0  ;;  %v9005_v50 = vpop.f32.mrb[180].mxu1  ;;  %9445 = vmatprep.subr.bf16.mxu0 %v10717_v58  ;;  %9557 = vmatprep.subr.bf16.mxu1 %v10771_v27  ;;  %v12166_v30 = vld [vmem:[%s10966_s8 + $0x14c] ss:$20 sps:$4 sm:$0xff]  }
 0x26a   : > { %v9070_v36 = vpop.f32.mrb[153].mxu0  ;;  %v9006_v12 = vpop.f32.mrb[181].mxu1 }
 0x26b   : > { %v9071_v20 = vadd.f32 %v9070_v36, %v9069_v62  ;;  %v9072_v2 = vpop.f32.mrb[154].mxu0  ;;  %v12163_v24 = vadd.f32 %v9006_v12, %v9005_v50  ;;  %v9008_v23 = vpop.f32.mrb[182].mxu1  ;;  %v12182_v12 = vld [vmem:[%s10966_s8 + $0x148] ss:$20 sps:$4 sm:$0xff]  }
 0x26c   : > { %v9073_v7 = vpop.f32.mrb[155].mxu0  ;;  %v9009_v46 = vpop.f32.mrb[183].mxu1  ;;  %9446 = vmatpush3.bf16.msra.mxu0 %v10718_v11  ;;  %9558 = vmatpush3.bf16.msra.mxu1 %v10772_v52 }
 0x26d   : > { %v3842_v57 = vadd.f32 %v9071_v20, %v11990_v17  ;;  %v9074_v58 = vadd.f32 %v9073_v7, %v9072_v2  ;;  %v12170_v27 = vadd.f32 %v9009_v46, %v9008_v23  ;;  %9871 = vmatprep.subr.bf16.mxu0 %v12159_v15  ;;  %v12188_v23 = vld [vmem:[%s10966_s8 + $0x174] ss:$20 sps:$4 sm:$0xff]  }
 0x26e   : > { %5213 = vmatmul.mubr.bf16.gmra.mrb[32].mxu1 %v10687_v55  ;;  %9856 = vmatmul.mubr.bf16.gmra.mrb[64].mxu0 %v10691_v4  ;;  %v10700_v55 = vld [vmem:[%s10966_s8 + $0x240] ss:$20 sps:$4 sm:$0xff]  }
 0x26f   : > { %v12174_v56 = vadd.f32 %v11755_v21, %v3842_v57  ;;  %v3845_v62 = vadd.f32 %v9074_v58, %v11993_v8  ;;  %5220 = vmatprep.mubr.bf16.mxu1 %v12166_v30  ;;  %9859 = vmatprep.mubr.bf16.mxu0 %v10699_v29  ;;  %v10706_v8 = vld [vmem:[%s10966_s8 + $0x268] ss:$20 sps:$4 sm:$0xff]  }
 0x271   : > { %12939 = vst [vmem:[#allocation6_spill] sm:$0xff] %v12174_v56  ;;  %v12179_v17 = vadd.f32 %v11759_v9, %v3845_v62  ;;  %v9075_v11 = vpop.f32.mrb[156].mxu0  ;;  %v9011_v52 = vpop.f32.mrb[184].mxu1 }
 0x272   : > { %v9076_v50 = vpop.f32.mrb[157].mxu0  ;;  %v9012_v36 = vpop.f32.mrb[185].mxu1 }
 0x273   : > { %12940 = vst [vmem:[#allocation7_spill] sm:$0xff] %v12179_v17  ;;  %v9077_v4 = vadd.f32 %v9076_v50, %v9075_v11  ;;  %v9078_v20 = vpop.f32.mrb[158].mxu0  ;;  %v12185_v21 = vadd.f32 %v9012_v36, %v9011_v52  ;;  %v9014_v2 = vpop.f32.mrb[186].mxu1  ;;  %v12942_v11 = vld [vmem:[#allocation3_spill] sm:$0xff] }
 0x274   : > { %v9079_v7 = vpop.f32.mrb[159].mxu0  ;;  %v9015_v29 = vpop.f32.mrb[187].mxu1 }
 0x275   : > { %v3850_v9 = vadd.f32 %v9077_v4, %v11997_v49  ;;  %v9080_v46 = vadd.f32 %v9079_v7, %v9078_v20  ;;  %v12192_v57 = vadd.f32 %v9015_v29, %v9014_v2  ;;  %v12204_v20 = vld [vmem:[%s10966_s8 + $0x170] ss:$20 sps:$4 sm:$0xff]  }
 0x276   : > { %5221 = vmatmul.mubr.bf16.gmra.mrb[36].mxu1 %v12182_v12  ;;  %9860 = vmatmul.mubr.bf16.gmra.mrb[68].mxu0 %v10700_v55  ;;  %v10707_v55 = vld [vmem:[%s10966_s8 + $0x290] ss:$20 sps:$4 sm:$0xff]  }
 0x277   : > { %v12196_v58 = vadd.f32 %v11768_v38, %v3850_v9  ;;  %v3853_v62 = vadd.f32 %v9080_v46, %v12000_v34  ;;  %5228 = vmatprep.mubr.bf16.mxu1 %v12188_v23  ;;  %9863 = vmatprep.mubr.bf16.mxu0 %v10706_v8  ;;  %v12210_v9 = vld [vmem:[%s10966_s8 + $0x19c] ss:$20 sps:$4 sm:$0xff]   ;;  %v10715_v34 = vld [vmem:[%s10966_s8 + $0x2b8] ss:$20 sps:$4 sm:$0xff]  }
 0x279   : > { %12941 = vst [vmem:[#allocation8_spill] sm:$0xff] %v12196_v58  ;;  %v12201_v52 = vadd.f32 %v12942_v11, %v3853_v62  ;;  %v9081_v49 = vpop.f32.mrb[160].mxu0  ;;  %v9017_v50 = vpop.f32.mrb[188].mxu1 }
 0x27a   : > { %v9082_v36 = vpop.f32.mrb[161].mxu0  ;;  %v9018_v4 = vpop.f32.mrb[189].mxu1 }
 0x27b   : > { %12943 = vst [vmem:[#allocation3_spill] sm:$0xff] %v12201_v52  ;;  %v9083_v2 = vadd.f32 %v9082_v36, %v9081_v49  ;;  %v9084_v7 = vpop.f32.mrb[162].mxu0  ;;  %v12207_v38 = vadd.f32 %v9018_v4, %v9017_v50  ;;  %v9020_v29 = vpop.f32.mrb[190].mxu1  ;;  %v12944_v49 = vld [vmem:[#allocation4_spill] sm:$0xff]  ;;  %v12946_v4 = vld [vmem:[#allocation5_spill] sm:$0xff] }
 0x27c   : > { %v9085_v46 = vpop.f32.mrb[163].mxu0  ;;  %v9021_v8 = vpop.f32.mrb[191].mxu1 }
 0x27d   : > { %v3858_v62 = vadd.f32 %v9083_v2, %v12005_v41  ;;  %v9086_v11 = vadd.f32 %v9085_v46, %v9084_v7  ;;  %v12214_v52 = vadd.f32 %v9021_v8, %v9020_v29  ;;  %v12226_v46 = vld [vmem:[%s10966_s8 + $0x198] ss:$20 sps:$4 sm:$0xff]  }
 0x27e   : > { %5229 = vmatmul.mubr.bf16.gmra.mrb[40].mxu1 %v12204_v20  ;;  %9864 = vmatmul.mubr.bf16.gmra.mrb[72].mxu0 %v10707_v55  ;;  %v10716_v55 = vld [vmem:[%s10966_s8 + $0x2e0] ss:$20 sps:$4 sm:$0xff]  }
 0x27f   : > { %v12218_v50 = vadd.f32 %v12944_v49, %v3858_v62  ;;  %v3861_v36 = vadd.f32 %v9086_v11, %v12009_v60  ;;  %5236 = vmatprep.mubr.bf16.mxu1 %v12210_v9  ;;  %9867 = vmatprep.mubr.bf16.mxu0 %v10715_v34  ;;  %v10724_v60 = vld [vmem:[%s10966_s8 + $0xa4] ss:$20 sps:$4 sm:$0xff]  }
 0x281   : > { %12945 = vst [vmem:[#allocation4_spill] sm:$0xff] %v12218_v50  ;;  %v12223_v58 = vadd.f32 %v12946_v4, %v3861_v36  ;;  %v9087_v41 = vpop.f32.mrb[164].mxu0  ;;  %v9023_v2 = vpop.f32.mrb[192].mxu1  ;;  %v12232_v50 = vld [vmem:[%s10966_s8 + $0x1c4] ss:$20 sps:$4 sm:$0xff]  }
 0x282   : > { %v9088_v7 = vpop.f32.mrb[165].mxu0  ;;  %v9024_v29 = vpop.f32.mrb[193].mxu1 }
 0x283   : > { %12947 = vst [vmem:[#allocation5_spill] sm:$0xff] %v12223_v58  ;;  %v9089_v8 = vadd.f32 %v9088_v7, %v9087_v41  ;;  %v9090_v17 = vpop.f32.mrb[166].mxu0  ;;  %v12229_v62 = vadd.f32 %v9024_v29, %v9023_v2  ;;  %v9026_v49 = vpop.f32.mrb[194].mxu1 }
 0x284   : > { %v9091_v11 = vpop.f32.mrb[167].mxu0  ;;  %v9027_v34 = vpop.f32.mrb[195].mxu1 }
 0x285   : > { %v3866_v36 = vadd.f32 %v9089_v8, %v12014_v13  ;;  %v9092_v4 = vadd.f32 %v9091_v11, %v9090_v17  ;;  %v12236_v58 = vadd.f32 %v9027_v34, %v9026_v49  ;;  %v12248_v49 = vld [vmem:[%s10966_s8 + $0x1c0] ss:$20 sps:$4 sm:$0xff]  }
 0x286   : > { %5237 = vmatmul.mubr.bf16.gmra.mrb[44].mxu1 %v12226_v46  ;;  %9868 = vmatmul.mubr.bf16.gmra.mrb[216].mxu0 %v10716_v55  ;;  %v10722_v55 = vld [vmem:[%s10966_s8 + $0xa0] ss:$20 sps:$4 sm:$0xff]  }
 0x287   : > { %v12240_v41 = vadd.f32 %v11797_v54, %v3866_v36  ;;  %v3869_v2 = vadd.f32 %v9092_v4, %v12018_v18  ;;  %5244 = vmatprep.mubr.bf16.mxu1 %v12232_v50  ;;  %6368 = vmatprep.mubr.bf16.mxu0 %v10724_v60  ;;  %v12254_v18 = vld [vmem:[%s10966_s8 + $0x1ec] ss:$20 sps:$4 sm:$0xff]  }
 0x288   : > { %v10731_v60 = vld [vmem:[%s10966_s8 + $0xcc] ss:$20 sps:$4 sm:$0xff]  }
 0x289   : > { %12948 = vst [vmem:[#allocation9_spill] sm:$0xff] %v12240_v41  ;;  %v12245_v7 = vadd.f32 %v11801_v32, %v3869_v2  ;;  %v9093_v13 = vpop.f32.mrb[168].mxu0  ;;  %v9029_v17 = vpop.f32.mrb[196].mxu1  ;;  %v10740_v32 = vld [vmem:[%s12933_s1 + $0x608] sm:$0xff]  }
 0x28a   : > { %v9094_v29 = vpop.f32.mrb[169].mxu0  ;;  %v9030_v8 = vpop.f32.mrb[197].mxu1 }
 0x28b   : > { %12949 = vst [vmem:[#allocation10_spill] sm:$0xff] %v12245_v7  ;;  %v9095_v11 = vadd.f32 %v9094_v29, %v9093_v13  ;;  %v9096_v34 = vpop.f32.mrb[170].mxu0  ;;  %v12251_v54 = vadd.f32 %v9030_v8, %v9029_v17  ;;  %v9032_v36 = vpop.f32.mrb[198].mxu1 }
 0x28c   : > { %v9097_v4 = vpop.f32.mrb[171].mxu0  ;;  %v9033_v41 = vpop.f32.mrb[199].mxu1 }
 0x28d   : > { %v3874_v2 = vadd.f32 %v9095_v11, %v12022_v1  ;;  %v9098_v7 = vadd.f32 %v9097_v4, %v9096_v34  ;;  %v12261_v56 = vadd.f32 %v9033_v41, %v9032_v36  ;;  %v10755_v1 = vld [vmem:[%s12933_s1 + $0x610] sm:$0xff]  }
 0x28e   : > { %5245 = vmatmul.mubr.bf16.gmra.mrb[48].mxu1 %v12248_v49  ;;  %6369 = vmatmul.mubr.bf16.vlgmr.msra.gmra.mrb[220].mxu0 %v10722_v55  ;;  %v12283_v4 = vld [vmem:[%s10966_s8 + $0x214] ss:$20 sps:$4 sm:$0xff]  }
 0x28f   : > { %v12265_v13 = vadd.f32 %v11813_v59, %v3874_v2  ;;  %v3877_v17 = vadd.f32 %v9098_v7, %v12032_v48  ;;  %9872 = vmatpush3.bf16.msra.mxu0 %v12159_v15  ;;  %5252 = vmatprep.mubr.bf16.mxu1 %v12254_v18  ;;  %v12277_v48 = vld [vmem:[%s10966_s8 + $0x1e8] ss:$20 sps:$4 sm:$0xff]  }
 0x290   : > { %6376 = vmatprep.mubr.bf16.mxu0 %v10731_v60  ;;  %9873 = vmatprep.subr.bf16.mxu0 %v10740_v32  ;;  %v10733_v15 = vld [vmem:[%s10966_s8 + $0xc8] ss:$20 sps:$4 sm:$0xff]  }
 0x291   : > { %12950 = vst [vmem:[#allocation11_spill] sm:$0xff] %v12265_v13  ;;  %v12274_v41 = vadd.f32 %v11823_v43, %v3877_v17  ;;  %v9099_v29 = vpop.f32.mrb[172].mxu0  ;;  %v9035_v59 = vpop.f32.mrb[200].mxu1  ;;  %v10737_v60 = vld [vmem:[%s10966_s8 + $0xf4] ss:$20 sps:$4 sm:$0xff]  }
 0x292   : > { %v9100_v8 = vpop.f32.mrb[173].mxu0  ;;  %v9036_v55 = vpop.f32.mrb[201].mxu1 }
 0x293   : > { %12951 = vst [vmem:[#allocation12_spill] sm:$0xff] %v12274_v41  ;;  %v9101_v7 = vadd.f32 %v9100_v8, %v9099_v29  ;;  %v9102_v11 = vpop.f32.mrb[174].mxu0  ;;  %v12280_v34 = vadd.f32 %v9036_v55, %v9035_v59  ;;  %v9038_v36 = vpop.f32.mrb[202].mxu1  ;;  %9874 = vmatpush3.bf16.msra.mxu0 %v10740_v32  ;;  %v10770_v29 = vld [vmem:[%s12933_s1 + $0x618] sm:$0xff]   ;;  %v10785_v55 = vld [vmem:[%s12933_s1 + $0x620] sm:$0xff]  }
 0x294   : > { %v9103_v2 = vpop.f32.mrb[175].mxu0  ;;  %v9039_v13 = vpop.f32.mrb[203].mxu1  ;;  %9875 = vmatprep.subr.bf16.mxu0 %v10755_v1 }
 0x295   : > { %v3882_v43 = vadd.f32 %v9101_v7, %v12054_v25  ;;  %v9104_v17 = vadd.f32 %v9103_v2, %v9102_v11  ;;  %v12287_v41 = vadd.f32 %v9039_v13, %v9038_v36  ;;  %v12305_v7 = vld [vmem:[%s10966_s8 + $0x210] ss:$20 sps:$4 sm:$0xff]  }
 0x296   : > { %5253 = vmatmul.mubr.bf16.gmra.mrb[52].mxu1 %v12277_v48  ;;  %6377 = vmatmul.mubr.bf16.gmra.mrb[224].mxu0 %v10733_v15 }
 0x297   : > { %v12294_v59 = vadd.f32 %v11835_v10, %v3882_v43  ;;  %v3885_v32 = vadd.f32 %v9104_v17, %v12064_v14  ;;  %5260 = vmatprep.mubr.bf16.mxu1 %v12283_v4  ;;  %6384 = vmatprep.mubr.bf16.mxu0 %v10737_v60  ;;  %v10739_v14 = vld [vmem:[%s10966_s8 + $0xf0] ss:$20 sps:$4 sm:$0xff]  }
 0x298   : > { %9876 = vmatpush3.bf16.msra.mxu0 %v10755_v1  ;;  %v12309_v60 = vld [vmem:[%s10966_s8 + $0x23c] ss:$20 sps:$4 sm:$0xff]  }
 0x299   : > { %v12299_v25 = vadd.f32 %v11842_v6, %v3885_v32  ;;  %v9105_v13 = vpop.f32.mrb[176].mxu0  ;;  %v9041_v8 = vpop.f32.mrb[204].mxu1  ;;  %9877 = vmatprep.subr.bf16.mxu0 %v10770_v29  ;;  %v10746_v1 = vld [vmem:[%s10966_s8 + $0x11c] ss:$20 sps:$4 sm:$0xff]  }
 0x29a   : > { %v9106_v10 = vpop.f32.mrb[177].mxu0  ;;  %v9042_v15 = vpop.f32.mrb[205].mxu1  ;;  %v10798_v8 = vld [vmem:[%s12933_s1 + $0x628] sm:$0xff]  }
 0x29b   : > { %v9107_v11 = vadd.f32 %v9106_v10, %v9105_v13  ;;  %v9108_v36 = vpop.f32.mrb[178].mxu0  ;;  %v9044_v2 = vpop.f32.mrb[206].mxu1 }
 0x29c   : > { %v9109_v6 = vpop.f32.mrb[179].mxu0  ;;  %v9045_v43 = vpop.f32.mrb[207].mxu1  ;;  %9878 = vmatpush3.bf16.msra.mxu0 %v10770_v29 }
 0x29d   : > { %v3890_v17 = vadd.f32 %v9107_v11, %v12089_v31  ;;  %v9110_v32 = vadd.f32 %v9109_v6, %v9108_v36  ;;  %9879 = vmatprep.subr.bf16.mxu0 %v10785_v55  ;;  %v12329_v36 = vld [vmem:[%s10966_s8 + $0x238] ss:$20 sps:$4 sm:$0xff]  }
 0x29e   : > { %5261 = vmatmul.mubr.bf16.gmra.mrb[56].mxu1 %v12305_v7  ;;  %6385 = vmatmul.mubr.bf16.gmra.mrb[228].mxu0 %v10739_v14  ;;  %v10808_v14 = vld [vmem:[%s12933_s1 + $0x630] sm:$0xff]   ;;  %v12335_v43 = vld [vmem:[%s10966_s8 + $0x264] ss:$20 sps:$4 sm:$0xff]  }
 0x29f   : > { %v12318_v13 = vadd.f32 %v11857_v37, %v3890_v17  ;;  %v3893_v10 = vadd.f32 %v9110_v32, %v12102_v40  ;;  %5268 = vmatprep.mubr.bf16.mxu1 %v12309_v60  ;;  %6392 = vmatprep.mubr.bf16.mxu0 %v10746_v1  ;;  %v10748_v40 = vld [vmem:[%s10966_s8 + $0x118] ss:$20 sps:$4 sm:$0xff]  }
 0x2a0   : > { %9880 = vmatpush3.bf16.msra.mxu0 %v10785_v55 }
 0x2a1   : > { %12952 = vst [vmem:[#allocation13_spill] sm:$0xff] %v12318_v13  ;;  %v12323_v31 = vadd.f32 %v11864_v22, %v3893_v10  ;;  %v9111_v29 = vpop.f32.mrb[180].mxu0  ;;  %v9199_v15 = vpop.f32.mrb[208].mxu1  ;;  %9881 = vmatprep.subr.bf16.mxu0 %v10798_v8  ;;  %v10752_v22 = vld [vmem:[%s10966_s8 + $0x144] ss:$20 sps:$4 sm:$0xff]  }
 0x2a2   : > { %v9112_v37 = vpop.f32.mrb[181].mxu0  ;;  %v9200_v11 = vpop.f32.mrb[209].mxu1 }
 0x2a3   : > { %12953 = vst [vmem:[#allocation14_spill] sm:$0xff] %v12323_v31  ;;  %v9113_v2 = vadd.f32 %v9112_v37, %v9111_v29  ;;  %v9114_v6 = vpop.f32.mrb[182].mxu0  ;;  %v12332_v1 = vadd.f32 %v9200_v11, %v9199_v15  ;;  %v9202_v55 = vpop.f32.mrb[210].mxu1  ;;  %v10815_v29 = vld [vmem:[%s12933_s1 + $0x638] sm:$0xff]  }
 0x2a4   : > { %v9115_v17 = vpop.f32.mrb[183].mxu0  ;;  %v9203_v32 = vpop.f32.mrb[211].mxu1  ;;  %9882 = vmatpush3.bf16.msra.mxu0 %v10798_v8 }
 0x2a5   : > { %v3898_v10 = vadd.f32 %v9113_v2, %v12124_v39  ;;  %v9116_v31 = vadd.f32 %v9115_v17, %v9114_v6  ;;  %v12339_v13 = vadd.f32 %v9203_v32, %v9202_v55  ;;  %9883 = vmatprep.subr.bf16.mxu0 %v10808_v14  ;;  %v12360_v32 = vld [vmem:[%s10966_s8 + $0x28c] ss:$20 sps:$4 sm:$0xff]  }
 0x2a6   : > { %5269 = vmatmul.mubr.bf16.gmra.mrb[60].mxu1 %v12329_v36  ;;  %6393 = vmatmul.mubr.bf16.gmra.mrb[232].mxu0 %v10748_v40  ;;  %v12354_v40 = vld [vmem:[%s10966_s8 + $0x260] ss:$20 sps:$4 sm:$0xff]  }
 0x2a7   : > { %v12346_v15 = vadd.f32 %v11879_v28, %v3898_v10  ;;  %v3901_v8 = vadd.f32 %v9116_v31, %v12135_v44  ;;  %5276 = vmatprep.mubr.bf16.mxu1 %v12335_v43  ;;  %6400 = vmatprep.mubr.bf16.mxu0 %v10752_v22  ;;  %v10754_v28 = vld [vmem:[%s10966_s8 + $0x140] ss:$20 sps:$4 sm:$0xff]  }
 0x2a8   : > { %9884 = vmatpush3.bf16.msra.mxu0 %v10808_v14  ;;  %v10761_v22 = vld [vmem:[%s10966_s8 + $0x16c] ss:$20 sps:$4 sm:$0xff]  }
 0x2a9   : > { %12954 = vst [vmem:[#allocation15_spill] sm:$0xff] %v12346_v15  ;;  %v12351_v39 = vadd.f32 %v11886_v45, %v3901_v8  ;;  %v9117_v37 = vpop.f32.mrb[184].mxu0  ;;  %v9205_v11 = vpop.f32.mrb[212].mxu1  ;;  %9885 = vmatprep.subr.bf16.mxu0 %v10815_v29 }
 0x2aa   : > { %v9118_v2 = vpop.f32.mrb[185].mxu0  ;;  %v9206_v6 = vpop.f32.mrb[213].mxu1 }
 0x2ab   : > { %12955 = vst [vmem:[#allocation16_spill] sm:$0xff] %v12351_v39  ;;  %v9119_v55 = vadd.f32 %v9118_v2, %v9117_v37  ;;  %v9120_v17 = vpop.f32.mrb[186].mxu0  ;;  %v12357_v44 = vadd.f32 %v9206_v6, %v9205_v11  ;;  %v9208_v31 = vpop.f32.mrb[214].mxu1 }
 0x2ac   : > { %v9121_v14 = vpop.f32.mrb[187].mxu0  ;;  %v9209_v10 = vpop.f32.mrb[215].mxu1  ;;  %9886 = vmatpush3.bf16.msra.mxu0 %v10815_v29 }
 0x2ad   : > { %v3906_v45 = vadd.f32 %v9119_v55, %v12163_v24  ;;  %v9122_v8 = vadd.f32 %v9121_v14, %v9120_v17  ;;  %v12364_v39 = vadd.f32 %v9209_v10, %v9208_v31  ;;  %v12376_v17 = vld [vmem:[%s10966_s8 + $0x288] ss:$20 sps:$4 sm:$0xff]  }
 0x2ae   : > { %5277 = vmatmul.mubr.bf16.gmra.mrb[64].mxu1 %v12354_v40  ;;  %6401 = vmatmul.mubr.bf16.gmra.mrb[236].mxu0 %v10754_v28  ;;  %v10763_v28 = vld [vmem:[%s10966_s8 + $0x168] ss:$20 sps:$4 sm:$0xff]  }
 0x2af   : > { %v12368_v37 = vadd.f32 %v11895_v19, %v3906_v45  ;;  %v3909_v11 = vadd.f32 %v9122_v8, %v12170_v27  ;;  %5284 = vmatprep.mubr.bf16.mxu1 %v12360_v32  ;;  %6408 = vmatprep.mubr.bf16.mxu0 %v10761_v22  ;;  %v12382_v45 = vld [vmem:[%s10966_s8 + $0x2b4] ss:$20 sps:$4 sm:$0xff]  }
 0x2b0   : > { %v10767_v27 = vld [vmem:[%s10966_s8 + $0x194] ss:$20 sps:$4 sm:$0xff]  }
 0x2b1   : > { %12956 = vst [vmem:[#allocation17_spill] sm:$0xff] %v12368_v37  ;;  %v12373_v29 = vadd.f32 %v11899_v35, %v3909_v11  ;;  %v9123_v24 = vpop.f32.mrb[188].mxu0  ;;  %v9211_v2 = vpop.f32.mrb[216].mxu1 }
 0x2b2   : > { %v9124_v6 = vpop.f32.mrb[189].mxu0  ;;  %v9212_v55 = vpop.f32.mrb[217].mxu1 }
 0x2b3   : > { %12957 = vst [vmem:[#allocation18_spill] sm:$0xff] %v12373_v29  ;;  %v9125_v31 = vadd.f32 %v9124_v6, %v9123_v24  ;;  %v9126_v14 = vpop.f32.mrb[190].mxu0  ;;  %v12379_v19 = vadd.f32 %v9212_v55, %v9211_v2  ;;  %v9214_v10 = vpop.f32.mrb[218].mxu1 }
 0x2b4   : > { %v9127_v8 = vpop.f32.mrb[191].mxu0  ;;  %v9215_v22 = vpop.f32.mrb[219].mxu1 }
 0x2b5   : > { %v3914_v35 = vadd.f32 %v9125_v31, %v12185_v21  ;;  %v9128_v11 = vadd.f32 %v9127_v8, %v9126_v14  ;;  %v12386_v29 = vadd.f32 %v9215_v22, %v9214_v10  ;;  %v12398_v10 = vld [vmem:[%s10966_s8 + $0x2b0] ss:$20 sps:$4 sm:$0xff]  }
 0x2b6   : > { %5285 = vmatmul.mubr.bf16.gmra.mrb[68].mxu1 %v12376_v17  ;;  %6409 = vmatmul.mubr.bf16.gmra.mrb[240].mxu0 %v10763_v28  ;;  %v10769_v28 = vld [vmem:[%s10966_s8 + $0x190] ss:$20 sps:$4 sm:$0xff]  }
 0x2b7   : > { %v12390_v24 = vadd.f32 %v11905_v42, %v3914_v35  ;;  %v3917_v2 = vadd.f32 %v9128_v11, %v12192_v57  ;;  %5292 = vmatprep.mubr.bf16.mxu1 %v12382_v45  ;;  %6416 = vmatprep.mubr.bf16.mxu0 %v10767_v27  ;;  %v10776_v57 = vld [vmem:[%s10966_s8 + $0x1bc] ss:$20 sps:$4 sm:$0xff]  }
 0x2b9   : > { %12958 = vst [vmem:[#allocation19_spill] sm:$0xff] %v12390_v24  ;;  %v12395_v6 = vadd.f32 %v11909_v47, %v3917_v2  ;;  %v9129_v21 = vpop.f32.mrb[192].mxu0  ;;  %v9217_v55 = vpop.f32.mrb[220].mxu1  ;;  %v12404_v24 = vld [vmem:[%s10966_s8 + $0x2dc] ss:$20 sps:$4 sm:$0xff]  }
 0x2ba   : > { %v9130_v31 = vpop.f32.mrb[193].mxu0  ;;  %v9218_v14 = vpop.f32.mrb[221].mxu1 }
 0x2bb   : > { %12959 = vst [vmem:[#allocation20_spill] sm:$0xff] %v12395_v6  ;;  %v9131_v8 = vadd.f32 %v9130_v31, %v9129_v21  ;;  %v9132_v22 = vpop.f32.mrb[194].mxu0  ;;  %v12401_v42 = vadd.f32 %v9218_v14, %v9217_v55  ;;  %v9220_v35 = vpop.f32.mrb[222].mxu1 }
 0x2bc   : > { %v9133_v11 = vpop.f32.mrb[195].mxu0  ;;  %v9221_v27 = vpop.f32.mrb[223].mxu1 }
 0x2bd   : > { %v3922_v47 = vadd.f32 %v9131_v8, %v12207_v38  ;;  %v9134_v2 = vadd.f32 %v9133_v11, %v9132_v22  ;;  %v12408_v6 = vadd.f32 %v9221_v27, %v9220_v35  ;;  %v12420_v35 = vld [vmem:[%s10966_s8 + $0x2d8] ss:$20 sps:$4 sm:$0xff]  }
 0x2be   : > { %5293 = vmatmul.mubr.bf16.gmra.mrb[72].mxu1 %v12398_v10  ;;  %6417 = vmatmul.mubr.bf16.gmra.mrb[244].mxu0 %v10769_v28  ;;  %v10778_v28 = vld [vmem:[%s10966_s8 + $0x1b8] ss:$20 sps:$4 sm:$0xff]  }
 0x2bf   : > { %v12412_v21 = vadd.f32 %v11916_v16, %v3922_v47  ;;  %v3925_v55 = vadd.f32 %v9134_v2, %v12214_v52  ;;  %5300 = vmatprep.mubr.bf16.mxu1 %v12404_v24  ;;  %6424 = vmatprep.mubr.bf16.mxu0 %v10776_v57  ;;  %v10783_v52 = vld [vmem:[%s10966_s8 + $0xac] ss:$20 sps:$4 sm:$0xff]  }
 0x2c1   : > { %12960 = vst [vmem:[#allocation21_spill] sm:$0xff] %v12412_v21  ;;  %v12417_v31 = vadd.f32 %v11919_v53, %v3925_v55  ;;  %v9135_v38 = vpop.f32.mrb[196].mxu0  ;;  %v9223_v14 = vpop.f32.mrb[224].mxu1  ;;  %v10779_v21 = vld [vmem:[%s10966_s8 + $0x1e4] ss:$20 sps:$4 sm:$0xff]  }
 0x2c2   : > { %v9136_v8 = vpop.f32.mrb[197].mxu0  ;;  %v9224_v22 = vpop.f32.mrb[225].mxu1 }
 0x2c3   : > { %12961 = vst [vmem:[#allocation22_spill] sm:$0xff] %v12417_v31  ;;  %v9137_v11 = vadd.f32 %v9136_v8, %v9135_v38  ;;  %v9138_v27 = vpop.f32.mrb[198].mxu0  ;;  %v12423_v16 = vadd.f32 %v9224_v22, %v9223_v14  ;;  %v9226_v47 = vpop.f32.mrb[226].mxu1 }
 0x2c4   : > { %v9139_v2 = vpop.f32.mrb[199].mxu0  ;;  %v9227_v57 = vpop.f32.mrb[227].mxu1 }
 0x2c5   : > { %v3930_v53 = vadd.f32 %v9137_v11, %v12229_v62  ;;  %v9140_v55 = vadd.f32 %v9139_v2, %v9138_v27  ;;  %v12428_v31 = vadd.f32 %v9227_v57, %v9226_v47  ;;  %v10781_v47 = vld [vmem:[%s10966_s8 + $0xa8] ss:$20 sps:$4 sm:$0xff]   ;;  %v10784_v2 = vld [vmem:[%s10966_s8 + $0x1e0] ss:$20 sps:$4 sm:$0xff]  }
 0x2c6   : > { %5301 = vmatmul.mubr.bf16.gmra.mrb[76].mxu1 %v12420_v35  ;;  %6425 = vmatmul.mubr.bf16.gmra.mrb[248].mxu0 %v10778_v28 }
 0x2c7   : > { %v12432_v38 = vadd.f32 %v11926_v51, %v3930_v53  ;;  %v3933_v14 = vadd.f32 %v9140_v55, %v12236_v58  ;;  %6432 = vmatprep.mubr.bf16.mxu0 %v10779_v21  ;;  %6529 = vmatprep.mubr.bf16.mxu1 %v10783_v52  ;;  %v10788_v53 = vld [vmem:[%s10966_s8 + $0x20c] ss:$20 sps:$4 sm:$0xff]  }
 0x2c9   : > { %12962 = vst [vmem:[#allocation23_spill] sm:$0xff] %v12432_v38  ;;  %v12436_v8 = vadd.f32 %v11929_v61, %v3933_v14  ;;  %v9141_v22 = vpop.f32.mrb[200].mxu0  ;;  %v9229_v62 = vpop.f32.mrb[228].mxu1  ;;  %v10791_v38 = vld [vmem:[%s10966_s8 + $0xd4] ss:$20 sps:$4 sm:$0xff]  }
 0x2ca   : > { %v9142_v11 = vpop.f32.mrb[201].mxu0  ;;  %v9230_v27 = vpop.f32.mrb[229].mxu1 }
 0x2cb   : > { %v9143_v57 = vadd.f32 %v9142_v11, %v9141_v22  ;;  %v9144_v28 = vpop.f32.mrb[202].mxu0  ;;  %v12440_v37 = vadd.f32 %v9230_v27, %v9229_v62  ;;  %v9232_v51 = vpop.f32.mrb[230].mxu1  ;;  %v10786_v27 = vld [vmem:[%s10966_s8 + $0x208] ss:$20 sps:$4 sm:$0xff]  }
 0x2cc   : > { %v9145_v15 = vpop.f32.mrb[203].mxu0  ;;  %v9233_v58 = vpop.f32.mrb[231].mxu1 }
 0x2cd   : > { %v3938_v61 = vadd.f32 %v9143_v57, %v12251_v54  ;;  %v9146_v21 = vadd.f32 %v9145_v15, %v9144_v28  ;;  %v12445_v52 = vadd.f32 %v9233_v58, %v9232_v51  ;;  %v10789_v57 = vld [vmem:[%s10966_s8 + $0xd0] ss:$20 sps:$4 sm:$0xff]   ;;  %v10794_v51 = vld [vmem:[%s10966_s8 + $0x234] ss:$20 sps:$4 sm:$0xff]  }
 0x2ce   : > { %6433 = vmatmul.mubr.bf16.gmra.mrb[252].mxu0 %v10784_v2  ;;  %6530 = vmatmul.mubr.bf16.vlgmr.msra.gmra.mrb[80].mxu1 %v10781_v47  ;;  %v10797_v58 = vld [vmem:[%s10966_s8 + $0xfc] ss:$20 sps:$4 sm:$0xff]  }
 0x2cf   : > { %v12448_v55 = vadd.f32 %v11939_v3, %v3938_v61  ;;  %v3941_v14 = vadd.f32 %v9146_v21, %v12261_v56  ;;  %6440 = vmatprep.mubr.bf16.mxu0 %v10788_v53  ;;  %6537 = vmatprep.mubr.bf16.mxu1 %v10791_v38 }
 0x2d1   : > { %v12452_v22 = vadd.f32 %v11946_v63, %v3941_v14  ;;  %v9147_v62 = vpop.f32.mrb[204].mxu0  ;;  %v9235_v11 = vpop.f32.mrb[232].mxu1 }
 0x2d2   : > { %v9148_v54 = vpop.f32.mrb[205].mxu0  ;;  %v9236_v15 = vpop.f32.mrb[233].mxu1 }
 0x2d3   : > { %12963 = vst [vmem:[#allocation24_spill] sm:$0xff] %v12452_v22  ;;  %v9149_v2 = vadd.f32 %v9148_v54, %v9147_v62  ;;  %v9150_v47 = vpop.f32.mrb[206].mxu0  ;;  %v12456_v28 = vadd.f32 %v9236_v15, %v9235_v11  ;;  %v9238_v3 = vpop.f32.mrb[234].mxu1  ;;  %v10792_v15 = vld [vmem:[%s10966_s8 + $0x230] ss:$20 sps:$4 sm:$0xff]  }
 0x2d4   : > { %v9151_v56 = vpop.f32.mrb[207].mxu0  ;;  %v9239_v38 = vpop.f32.mrb[235].mxu1 }
 0x2d5   : > { %v9152_v53 = vadd.f32 %v9151_v56, %v9150_v47  ;;  %v12460_v63 = vadd.f32 %v9239_v38, %v9238_v3  ;;  %v12463_v61 = vadd.f32 %v9149_v2, %v12280_v34  ;;  %v10795_v47 = vld [vmem:[%s10966_s8 + $0xf8] ss:$20 sps:$4 sm:$0xff]  }
 0x2d6   : > { %6441 = vmatmul.mubr.bf16.gmra.mrb[0].mxu0 %v10786_v27  ;;  %6538 = vmatmul.mubr.bf16.gmra.mrb[84].mxu1 %v10789_v57  ;;  %v10801_v27 = vld [vmem:[%s10966_s8 + $0x25c] ss:$20 sps:$4 sm:$0xff]   ;;  %v10804_v57 = vld [vmem:[%s10966_s8 + $0x124] ss:$20 sps:$4 sm:$0xff]  }
 0x2d7   : > { %6448 = vmatprep.mubr.bf16.mxu0 %v10794_v51  ;;  %6545 = vmatprep.mubr.bf16.mxu1 %v10797_v58  ;;  %v12466_v21 = vadd.f32 %v9152_v53, %v12287_v41  ;;  %v10799_v53 = vld [vmem:[%s10966_s8 + $0x258] ss:$20 sps:$4 sm:$0xff]  }
 0x2d9   : > { %v9153_v14 = vpop.f32.mrb[208].mxu0  ;;  %v9241_v62 = vpop.f32.mrb[236].mxu1 }
 0x2da   : > { %v9154_v11 = vpop.f32.mrb[209].mxu0  ;;  %v9242_v54 = vpop.f32.mrb[237].mxu1  ;;  %v10802_v14 = vld [vmem:[%s10966_s8 + $0x120] ss:$20 sps:$4 sm:$0xff]  }
 0x2db   : > { %v9156_v3 = vpop.f32.mrb[210].mxu0  ;;  %v12470_v56 = vadd.f32 %v9242_v54, %v9241_v62  ;;  %v9244_v34 = vpop.f32.mrb[238].mxu1  ;;  %v10807_v54 = vld [vmem:[%s10966_s8 + $0x284] ss:$20 sps:$4 sm:$0xff]  }
 0x2dc   : > { %v9157_v2 = vpop.f32.mrb[211].mxu0  ;;  %v9245_v51 = vpop.f32.mrb[239].mxu1 }
 0x2dd   : > { %v12474_v58 = vadd.f32 %v9245_v51, %v9244_v34  ;;  %v10805_v34 = vld [vmem:[%s10966_s8 + $0x280] ss:$20 sps:$4 sm:$0xff]  }
 0x2de   : > { %6449 = vmatmul.mubr.bf16.gmra.mrb[4].mxu0 %v10792_v15  ;;  %6546 = vmatmul.mubr.bf16.gmra.mrb[88].mxu1 %v10795_v47  ;;  %v10811_v2 = vld [vmem:[%s10966_s8 + $0x2ac] ss:$20 sps:$4 sm:$0xff]  }
 0x2df   : > { %6456 = vmatprep.mubr.bf16.mxu0 %v10801_v27  ;;  %6553 = vmatprep.mubr.bf16.mxu1 %v10804_v57 }
 0x2e1   : > { %v9247_v41 = vpop.f32.mrb[240].mxu1 }
 0x2e2   : > { %v9248_v38 = vpop.f32.mrb[241].mxu1 }
 0x2e3   : > { %v12478_v62 = vadd.f32 %v9248_v38, %v9247_v41  ;;  %v9250_v11 = vpop.f32.mrb[242].mxu1 }
 0x2e4   : > { %v9251_v3 = vpop.f32.mrb[243].mxu1 }
 0x2e5   : > { %v12481_v22 = vadd.f32 %v9251_v3, %v9250_v11 }
 0x2e6   : > { %6457 = vmatmul.mubr.bf16.gmra.mrb[8].mxu0 %v10799_v53  ;;  %6554 = vmatmul.mubr.bf16.gmra.mrb[92].mxu1 %v10802_v14  ;;  %v10809_v53 = vld [vmem:[%s10966_s8 + $0x2a8] ss:$20 sps:$4 sm:$0xff]  }
 0x2e7   : > { %6464 = vmatprep.mubr.bf16.mxu0 %v10807_v54  ;;  %6561 = vmatprep.mubr.bf16.mxu1 %v12166_v30  ;;  %v10814_v54 = vld [vmem:[%s10966_s8 + $0x2d4] ss:$20 sps:$4 sm:$0xff]  }
 0x2e9   : > { %v9253_v15 = vpop.f32.mrb[244].mxu1 }
 0x2ea   : > { %v9254_v47 = vpop.f32.mrb[245].mxu1 }
 0x2eb   : > { %v12485_v27 = vadd.f32 %v9254_v47, %v9253_v15  ;;  %v9256_v57 = vpop.f32.mrb[246].mxu1  ;;  %v10812_v47 = vld [vmem:[%s10966_s8 + $0x2d0] ss:$20 sps:$4 sm:$0xff]  }
 0x2ec   : > { %v9257_v51 = vpop.f32.mrb[247].mxu1 }
 0x2ed   : > { %v12488_v41 = vadd.f32 %v9257_v51, %v9256_v57 }
 0x2ee   : > { %6465 = vmatmul.mubr.bf16.gmra.mrb[12].mxu0 %v10805_v34  ;;  %6562 = vmatmul.mubr.bf16.gmra.mrb[96].mxu1 %v12182_v12 }
 0x2ef   : > { %6472 = vmatprep.mubr.bf16.mxu0 %v10811_v2  ;;  %6569 = vmatprep.mubr.bf16.mxu1 %v12188_v23  ;;  %v10818_v2 = vld [vmem:[%s10966_s8 + $0x2fc] ss:$20 sps:$4 sm:$0xff]  }
 0x2f1   : > { %v9259_v38 = vpop.f32.mrb[248].mxu1 }
 0x2f2   : > { %v9260_v30 = vpop.f32.mrb[249].mxu1 }
 0x2f3   : > { %v12493_v14 = vadd.f32 %v9260_v30, %v9259_v38  ;;  %v9262_v11 = vpop.f32.mrb[250].mxu1  ;;  %v10816_v30 = vld [vmem:[%s10966_s8 + $0x2f8] ss:$20 sps:$4 sm:$0xff]  }
 0x2f4   : > { %v9263_v3 = vpop.f32.mrb[251].mxu1 }
 0x2f5   : > { %v12496_v15 = vadd.f32 %v9263_v3, %v9262_v11 }
 0x2f6   : > { %6473 = vmatmul.mubr.bf16.gmra.mrb[16].mxu0 %v10809_v53  ;;  %6570 = vmatmul.mubr.bf16.gmra.mrb[100].mxu1 %v12204_v20 }
 0x2f7   : > { %6480 = vmatprep.mubr.bf16.mxu0 %v10814_v54  ;;  %6577 = vmatprep.mubr.bf16.mxu1 %v12210_v9  ;;  %v10819_v54 = vld [vmem:[%s10966_s8 + $0xb0] ss:$20 sps:$4 sm:$0xff]  }
 0x2f9   : > { %v9265_v12 = vpop.f32.mrb[252].mxu1 }
 0x2fa   : > { %v9266_v23 = vpop.f32.mrb[253].mxu1 }
 0x2fb   : > { %v12501_v34 = vadd.f32 %v9266_v23, %v9265_v12  ;;  %v9268_v57 = vpop.f32.mrb[254].mxu1  ;;  %v10820_v23 = vld [vmem:[%s10966_s8 + $0xd8] ss:$20 sps:$4 sm:$0xff]  }
 0x2fc   : > { %v9269_v51 = vpop.f32.mrb[255].mxu1 }
 0x2fd   : > { %v12504_v38 = vadd.f32 %v9269_v51, %v9268_v57 }
 0x2fe   : > { %6481 = vmatmul.mubr.bf16.gmra.mrb[20].mxu0 %v10812_v47  ;;  %6578 = vmatmul.mubr.bf16.gmra.mrb[104].mxu1 %v12226_v46 }
 0x2ff   : > { %6488 = vmatprep.mubr.bf16.mxu0 %v10818_v2  ;;  %6585 = vmatprep.mubr.bf16.mxu1 %v12232_v50  ;;  %v10821_v2 = vld [vmem:[%s10966_s8 + $0x100] ss:$20 sps:$4 sm:$0xff]  }
 0x301   : > { %v9271_v20 = vpop.f32.mrb[0].mxu1 }
 0x302   : > { %v9272_v9 = vpop.f32.mrb[1].mxu1 }
 0x303   : > { %v12509_v53 = vadd.f32 %v9272_v9, %v9271_v20  ;;  %v9274_v11 = vpop.f32.mrb[2].mxu1  ;;  %v10822_v9 = vld [vmem:[%s10966_s8 + $0x128] ss:$20 sps:$4 sm:$0xff]  }
 0x304   : > { %v9275_v3 = vpop.f32.mrb[3].mxu1 }
 0x305   : > { %v12512_v12 = vadd.f32 %v9275_v3, %v9274_v11 }
 0x306   : > { %6489 = vmatmul.mubr.bf16.gmra.mrb[24].mxu0 %v10816_v30  ;;  %6586 = vmatmul.mubr.bf16.gmra.mrb[108].mxu1 %v12248_v49 }
 0x307   : > { %6593 = vmatprep.mubr.bf16.mxu1 %v12254_v18  ;;  %9887 = vmatprep.mubr.bf16.mxu0 %v10819_v54  ;;  %v10823_v54 = vld [vmem:[%s10966_s8 + $0x150] ss:$20 sps:$4 sm:$0xff]  }
 0x309   : > { %v9277_v46 = vpop.f32.mrb[4].mxu1 }
 0x30a   : > { %v9278_v50 = vpop.f32.mrb[5].mxu1 }
 0x30b   : > { %v12517_v47 = vadd.f32 %v9278_v50, %v9277_v46  ;;  %v9280_v57 = vpop.f32.mrb[6].mxu1 }
 0x30c   : > { %v9281_v51 = vpop.f32.mrb[7].mxu1 }
 0x30d   : > { %v12520_v20 = vadd.f32 %v9281_v51, %v9280_v57  ;;  %v10824_v57 = vld [vmem:[%s10966_s8 + $0x178] ss:$20 sps:$4 sm:$0xff]  }
 0x30e   : > { %6594 = vmatmul.mubr.bf16.gmra.mrb[112].mxu1 %v12277_v48  ;;  %9888 = vmatmul.mubr.bf16.vlgmr.msra.gmra.mrb[48].mxu0 %v10820_v23 }
 0x30f   : > { %6601 = vmatprep.mubr.bf16.mxu1 %v12283_v4  ;;  %9891 = vmatprep.mubr.bf16.mxu0 %v10821_v2 }
 0x311   : > { %v9283_v49 = vpop.f32.mrb[8].mxu1 }
 0x312   : > { %v9284_v18 = vpop.f32.mrb[9].mxu1 }
 0x313   : > { %v12525_v30 = vadd.f32 %v9284_v18, %v9283_v49  ;;  %v9286_v11 = vpop.f32.mrb[10].mxu1  ;;  %v10825_v18 = vld [vmem:[%s10966_s8 + $0x1a0] ss:$20 sps:$4 sm:$0xff]  }
 0x314   : > { %v9287_v3 = vpop.f32.mrb[11].mxu1 }
 0x315   : > { %v12528_v46 = vadd.f32 %v9287_v3, %v9286_v11 }
 0x316   : > { %6602 = vmatmul.mubr.bf16.gmra.mrb[116].mxu1 %v12305_v7  ;;  %9892 = vmatmul.mubr.bf16.gmra.mrb[52].mxu0 %v10822_v9 }
 0x317   : > { %6609 = vmatprep.mubr.bf16.mxu1 %v12309_v60  ;;  %9895 = vmatprep.mubr.bf16.mxu0 %v10823_v54 }
 0x319   : > { %v9821_v48 = vpop.f32.mrb[212].mxu0  ;;  %v9289_v4 = vpop.f32.mrb[12].mxu1 }
 0x31a   : > { %v4106_v50 = vpop.f32.mrb[213].mxu0  ;;  %v9290_v23 = vpop.f32.mrb[13].mxu1  ;;  %v10826_v48 = vld [vmem:[%s10966_s8 + $0x1c8] ss:$20 sps:$4 sm:$0xff]  }
 0x31b   : > { %v4107_v2 = vadd.f32 %v4106_v50, %v12463_v61  ;;  %v9822_v51 = vpop.f32.mrb[214].mxu0  ;;  %v9292_v49 = vpop.f32.mrb[14].mxu1  ;;  %v10827_v23 = vld [vmem:[%s10966_s8 + $0x1f0] ss:$20 sps:$4 sm:$0xff]  }
 0x31c   : > { %v4109_v11 = vpop.f32.mrb[215].mxu0  ;;  %v9293_v3 = vpop.f32.mrb[15].mxu1  ;;  %v10828_v49 = vld [vmem:[%s10966_s8 + $0x218] ss:$20 sps:$4 sm:$0xff]  }
 0x31d   : > { %v12536_v7 = vadd.f32 %v4107_v2, %v12087_v26  ;;  %v4110_v60 = vadd.f32 %v4109_v11, %v12466_v21  ;;  %v10829_v11 = vld [vmem:[%s10966_s8 + $0x240] ss:$20 sps:$4 sm:$0xff]  }
 0x31e   : > { %6610 = vmatmul.mubr.bf16.gmra.mrb[120].mxu1 %v12329_v36  ;;  %9896 = vmatmul.mubr.bf16.gmra.mrb[56].mxu0 %v10824_v57 }
 0x31f   : > { %v12541_v9 = vadd.f32 %v4110_v60, %v12100_v0  ;;  %6617 = vmatprep.mubr.bf16.mxu1 %v12335_v43  ;;  %9899 = vmatprep.mubr.bf16.mxu0 %v10825_v18 }
 0x321   : > { %v9311_v61 = vpop.f32.mrb[16].mxu1 }
 0x322   : > { %v9312_v54 = vpop.f32.mrb[17].mxu1 }
 0x323   : > { %v9313_v4 = vadd.f32 %v9312_v54, %v9311_v61  ;;  %v9314_v50 = vpop.f32.mrb[18].mxu1  ;;  %v12965_v61 = vld [vmem:[#allocation7_spill] sm:$0xff] }
 0x324   : > { %v9315_v26 = vpop.f32.mrb[19].mxu1 }
 0x325   : > { %v5183_v21 = vadd.f32 %v9313_v4, %v12332_v1  ;;  %v9316_v2 = vadd.f32 %v9315_v26, %v9314_v50  ;;  %v10830_v4 = vld [vmem:[%s10966_s8 + $0x268] ss:$20 sps:$4 sm:$0xff]  }
 0x326   : > { %6618 = vmatmul.mubr.bf16.gmra.mrb[124].mxu1 %v12354_v40  ;;  %9900 = vmatmul.mubr.bf16.gmra.mrb[60].mxu0 %v10826_v48 }
 0x327   : > { %v5186_v0 = vadd.f32 %v9316_v2, %v12339_v13  ;;  %6625 = vmatprep.mubr.bf16.mxu1 %v12360_v32  ;;  %9903 = vmatprep.mubr.bf16.mxu0 %v10827_v23  ;;  %v12551_v36 = vadd.f32 %v12144_v33, %v5183_v21  ;;  %v10831_v23 = vld [vmem:[%s10966_s8 + $0x290] ss:$20 sps:$4 sm:$0xff]   ;;  %v12966_v21 = vld [vmem:[#allocation8_spill] sm:$0xff] }
 0x329   : > { %v9317_v43 = vpop.f32.mrb[20].mxu1  ;;  %v12554_v57 = vadd.f32 %v12154_v5, %v5186_v0  ;;  %v12964_v5 = vld [vmem:[#allocation6_spill] sm:$0xff] }
 0x32a   : > { %v9318_v51 = vpop.f32.mrb[21].mxu1 }
 0x32b   : > { %v9319_v1 = vadd.f32 %v9318_v51, %v9317_v43  ;;  %v9320_v18 = vpop.f32.mrb[22].mxu1  ;;  %v12967_v43 = vld [vmem:[#allocation3_spill] sm:$0xff] }
 0x32c   : > { %v9321_v40 = vpop.f32.mrb[23].mxu1 }
 0x32d   : > { %v5191_v13 = vadd.f32 %v9319_v1, %v12357_v44  ;;  %v9322_v3 = vadd.f32 %v9321_v40, %v9320_v18  ;;  %v10832_v1 = vld [vmem:[%s10966_s8 + $0x2b8] ss:$20 sps:$4 sm:$0xff]  }
 0x32e   : > { %6626 = vmatmul.mubr.bf16.gmra.mrb[128].mxu1 %v12376_v17  ;;  %9904 = vmatmul.mubr.bf16.gmra.mrb[64].mxu0 %v10828_v49 }
 0x32f   : > { %v5194_v33 = vadd.f32 %v9322_v3, %v12364_v39  ;;  %6633 = vmatprep.mubr.bf16.mxu1 %v12382_v45  ;;  %9907 = vmatprep.mubr.bf16.mxu0 %v10829_v11  ;;  %v12563_v32 = vadd.f32 %v12964_v5, %v5191_v13  ;;  %v10837_v11 = vld [vmem:[%s10966_s8 + $0x304] ss:$20 sps:$4 sm:$0xff]   ;;  %v12968_v3 = vld [vmem:[#allocation4_spill] sm:$0xff] }
 0x331   : > { %v9323_v60 = vpop.f32.mrb[24].mxu1  ;;  %v12566_v54 = vadd.f32 %v12965_v61, %v5194_v33 }
 0x332   : > { %v9324_v48 = vpop.f32.mrb[25].mxu1 }
 0x333   : > { %v9325_v44 = vadd.f32 %v9324_v48, %v9323_v60  ;;  %v9326_v50 = vpop.f32.mrb[26].mxu1  ;;  %v12969_v60 = vld [vmem:[#allocation5_spill] sm:$0xff] }
 0x334   : > { %v9327_v17 = vpop.f32.mrb[27].mxu1 }
 0x335   : > { %v5199_v39 = vadd.f32 %v9325_v44, %v12379_v19  ;;  %v9328_v45 = vadd.f32 %v9327_v17, %v9326_v50  ;;  %v10835_v44 = vld [vmem:[%s10966_s8 + $0x300] ss:$20 sps:$4 sm:$0xff]  }
 0x336   : > { %6634 = vmatmul.mubr.bf16.gmra.mrb[132].mxu1 %v12398_v10  ;;  %9908 = vmatmul.mubr.bf16.gmra.mrb[68].mxu0 %v10830_v4  ;;  %v10833_v10 = vld [vmem:[%s10966_s8 + $0x2e0] ss:$20 sps:$4 sm:$0xff]   ;;  %v10834_v4 = vld [vmem:[%s10966_s8 + $0x308] ss:$20 sps:$4 sm:$0xff]  }
 0x337   : > { %v5202_v26 = vadd.f32 %v9328_v45, %v12386_v29  ;;  %6641 = vmatprep.mubr.bf16.mxu1 %v12404_v24  ;;  %9911 = vmatprep.mubr.bf16.mxu0 %v10831_v23  ;;  %v12575_v2 = vadd.f32 %v12966_v21, %v5199_v39  ;;  %v12970_v39 = vld [vmem:[#allocation9_spill] sm:$0xff]  ;;  %v12971_v21 = vld [vmem:[#allocation10_spill] sm:$0xff] }
 0x339   : > { %v9329_v0 = vpop.f32.mrb[28].mxu1  ;;  %v12578_v51 = vadd.f32 %v12967_v43, %v5202_v26 }
 0x33a   : > { %v9330_v49 = vpop.f32.mrb[29].mxu1 }
 0x33b   : > { %v9331_v18 = vadd.f32 %v9330_v49, %v9329_v0  ;;  %v9332_v19 = vpop.f32.mrb[30].mxu1 }
 0x33c   : > { %v9333_v40 = vpop.f32.mrb[31].mxu1 }
 0x33d   : > { %v5207_v29 = vadd.f32 %v9331_v18, %v12401_v42  ;;  %v9334_v24 = vadd.f32 %v9333_v40, %v9332_v19 }
 0x33e   : > { %6642 = vmatmul.mubr.bf16.gmra.mrb[136].mxu1 %v12420_v35  ;;  %9912 = vmatmul.mubr.bf16.gmra.mrb[72].mxu0 %v10832_v1 }
 0x33f   : > { %v5210_v13 = vadd.f32 %v9334_v24, %v12408_v6  ;;  %9915 = vmatprep.mubr.bf16.mxu0 %v10833_v10  ;;  %6649 = vmatprep.mubr.bf16.mxu1 %v10837_v11  ;;  %v12587_v33 = vadd.f32 %v12968_v3, %v5207_v29  ;;  %v12972_v11 = vld [vmem:[#allocation11_spill] sm:$0xff]  ;;  %v12973_v29 = vld [vmem:[#allocation12_spill] sm:$0xff] }
 0x341   : > { %v9335_v5 = vpop.f32.mrb[32].mxu1  ;;  %v12590_v61 = vadd.f32 %v12969_v60, %v5210_v13 }
 0x342   : > { %v9336_v48 = vpop.f32.mrb[33].mxu1 }
 0x343   : > { %v9337_v50 = vadd.f32 %v9336_v48, %v9335_v5  ;;  %v9338_v42 = vpop.f32.mrb[34].mxu1 }
 0x344   : > { %v9339_v23 = vpop.f32.mrb[35].mxu1 }
 0x345   : > { %v5215_v35 = vadd.f32 %v9337_v50, %v12423_v16  ;;  %v9340_v17 = vadd.f32 %v9339_v23, %v9338_v42 }
 0x346   : > { %9916 = vmatmul.mubr.bf16.gmra.mrb[28].mxu0 %v10834_v4  ;;  %6650 = vmatmul.mubr.bf16.gmra.mrb[140].mxu1 %v10835_v44 }
 0x347   : > { %v5218_v6 = vadd.f32 %v9340_v17, %v12428_v31  ;;  %v12597_v45 = vadd.f32 %v12970_v39, %v5215_v35 }
 0x349   : > { %v9341_v26 = vpop.f32.mrb[36].mxu1  ;;  %v12600_v0 = vadd.f32 %v12971_v21, %v5218_v6 }
 0x34a   : > { %v9342_v43 = vpop.f32.mrb[37].mxu1 }
 0x34b   : > { %v9343_v49 = vadd.f32 %v9342_v43, %v9341_v26  ;;  %v9344_v1 = vpop.f32.mrb[38].mxu1  ;;  %v12974_v43 = vld [vmem:[#allocation13_spill] sm:$0xff] }
 0x34c   : > { %v9345_v18 = vpop.f32.mrb[39].mxu1 }
 0x34d   : > { %v5223_v19 = vadd.f32 %v9343_v49, %v12440_v37  ;;  %v9346_v10 = vadd.f32 %v9345_v18, %v9344_v1  ;;  %v12975_v18 = vld [vmem:[#allocation14_spill] sm:$0xff] }
 0x34f   : > { %v5226_v16 = vadd.f32 %v9346_v10, %v12445_v52  ;;  %v12605_v40 = vadd.f32 %v12972_v11, %v5223_v19 }
 0x351   : > { %v9347_v31 = vpop.f32.mrb[40].mxu1  ;;  %v12608_v24 = vadd.f32 %v12973_v29, %v5226_v16 }
 0x352   : > { %v9348_v13 = vpop.f32.mrb[41].mxu1 }
 0x353   : > { %v9349_v3 = vadd.f32 %v9348_v13, %v9347_v31  ;;  %v9350_v5 = vpop.f32.mrb[42].mxu1 }
 0x354   : > { %v9351_v60 = vpop.f32.mrb[43].mxu1 }
 0x355   : > { %v5231_v48 = vadd.f32 %v9349_v3, %v12456_v28  ;;  %v9352_v4 = vadd.f32 %v9351_v60, %v9350_v5 }
 0x357   : > { %v5234_v44 = vadd.f32 %v9352_v4, %v12460_v63  ;;  %v12613_v37 = vadd.f32 %v12294_v59, %v5231_v48  ;;  %v12976_v4 = vld [vmem:[#allocation15_spill] sm:$0xff] }
 0x359   : > { %v9353_v52 = vpop.f32.mrb[44].mxu1  ;;  %v9869_v50 = vpop.f32.mrb[216].mxu0  ;;  %v12616_v42 = vadd.f32 %v12299_v25, %v5234_v44 }
 0x35a   : > { %v9354_v23 = vpop.f32.mrb[45].mxu1  ;;  %v12618_v35 = vpop.f32.mrb[217].mxu0 }
 0x35b   : > { %v9355_v17 = vadd.f32 %v9354_v23, %v9353_v52  ;;  %v9356_v6 = vpop.f32.mrb[46].mxu1  ;;  %v9870_v39 = vpop.f32.mrb[218].mxu0  ;;  %v12977_v23 = vld [vmem:[#allocation16_spill] sm:$0xff] }
 0x35c   : > { %v9357_v26 = vpop.f32.mrb[47].mxu1  ;;  %v12620_v21 = vpop.f32.mrb[219].mxu0 }
 0x35d   : > { %v5239_v28 = vadd.f32 %v9355_v17, %v12470_v56  ;;  %v9358_v63 = vadd.f32 %v9357_v26, %v9356_v6 }
 0x35f   : > { %v5242_v59 = vadd.f32 %v9358_v63, %v12474_v58  ;;  %v12625_v49 = vadd.f32 %v12974_v43, %v5239_v28 }
 0x361   : > { %v9359_v1 = vpop.f32.mrb[48].mxu1  ;;  %v9447_v25 = vpop.f32.mrb[220].mxu0  ;;  %v12628_v19 = vadd.f32 %v12975_v18, %v5242_v59 }
 0x362   : > { %v9360_v10 = vpop.f32.mrb[49].mxu1  ;;  %v9448_v16 = vpop.f32.mrb[221].mxu0 }
 0x363   : > { %v9361_v11 = vadd.f32 %v9360_v10, %v9359_v1  ;;  %v12630_v31 = vadd.f32 %v9448_v16, %v9447_v25  ;;  %v9362_v29 = vpop.f32.mrb[50].mxu1  ;;  %v9450_v13 = vpop.f32.mrb[222].mxu0  ;;  %v12978_v10 = vld [vmem:[#allocation17_spill] sm:$0xff] }
 0x364   : > { %v9363_v3 = vpop.f32.mrb[51].mxu1  ;;  %v9451_v56 = vpop.f32.mrb[223].mxu0 }
 0x365   : > { %v5247_v5 = vadd.f32 %v9361_v11, %v12478_v62  ;;  %v9364_v58 = vadd.f32 %v9363_v3, %v9362_v29  ;;  %v12633_v60 = vadd.f32 %v9451_v56, %v9450_v13  ;;  %v12979_v13 = vld [vmem:[#allocation18_spill] sm:$0xff] }
 0x367   : > { %v5250_v48 = vadd.f32 %v9364_v58, %v12481_v22  ;;  %v12637_v44 = vadd.f32 %v12976_v4, %v5247_v5 }
 0x369   : > { %v9365_v52 = vpop.f32.mrb[52].mxu1  ;;  %v9453_v50 = vpop.f32.mrb[224].mxu0  ;;  %v12640_v17 = vadd.f32 %v12977_v23, %v5250_v48 }
 0x36a   : > { %v9366_v6 = vpop.f32.mrb[53].mxu1  ;;  %v9454_v39 = vpop.f32.mrb[225].mxu0 }
 0x36b   : > { %v9367_v26 = vadd.f32 %v9366_v6, %v9365_v52  ;;  %v12642_v28 = vadd.f32 %v9454_v39, %v9453_v50  ;;  %v9368_v63 = vpop.f32.mrb[54].mxu1  ;;  %v9456_v62 = vpop.f32.mrb[226].mxu0 }
 0x36c   : > { %v9369_v59 = vpop.f32.mrb[55].mxu1  ;;  %v9457_v43 = vpop.f32.mrb[227].mxu0 }
 0x36d   : > { %v5255_v1 = vadd.f32 %v9367_v26, %v12485_v27  ;;  %v9370_v22 = vadd.f32 %v9369_v59, %v9368_v63  ;;  %v12645_v25 = vadd.f32 %v9457_v43, %v9456_v62  ;;  %v12980_v26 = vld [vmem:[#allocation19_spill] sm:$0xff]  ;;  %v12981_v43 = vld [vmem:[#allocation20_spill] sm:$0xff] }
 0x36f   : > { %v5258_v18 = vadd.f32 %v9370_v22, %v12488_v41  ;;  %v12649_v16 = vadd.f32 %v12978_v10, %v5255_v1 }
 0x371   : > { %v9371_v11 = vpop.f32.mrb[56].mxu1  ;;  %v9459_v29 = vpop.f32.mrb[228].mxu0  ;;  %v12652_v3 = vadd.f32 %v12979_v13, %v5258_v18 }
 0x372   : > { %v9372_v56 = vpop.f32.mrb[57].mxu1  ;;  %v9460_v5 = vpop.f32.mrb[229].mxu0 }
 0x373   : > { %v9373_v58 = vadd.f32 %v9372_v56, %v9371_v11  ;;  %v12654_v48 = vadd.f32 %v9460_v5, %v9459_v29  ;;  %v9374_v4 = vpop.f32.mrb[58].mxu1  ;;  %v9462_v27 = vpop.f32.mrb[230].mxu0 }
 0x374   : > { %v9375_v52 = vpop.f32.mrb[59].mxu1  ;;  %v9463_v50 = vpop.f32.mrb[231].mxu0 }
 0x375   : > { %v5263_v23 = vadd.f32 %v9373_v58, %v12493_v14  ;;  %v9376_v41 = vadd.f32 %v9375_v52, %v9374_v4  ;;  %v12657_v6 = vadd.f32 %v9463_v50, %v9462_v27  ;;  %v12982_v27 = vld [vmem:[#allocation21_spill] sm:$0xff] }
 0x377   : > { %v5266_v39 = vadd.f32 %v9376_v41, %v12496_v15  ;;  %v12661_v63 = vadd.f32 %v12980_v26, %v5263_v23  ;;  %v12983_v41 = vld [vmem:[#allocation22_spill] sm:$0xff] }
 0x379   : > { %v9377_v62 = vpop.f32.mrb[60].mxu1  ;;  %v9465_v59 = vpop.f32.mrb[232].mxu0  ;;  %v12664_v1 = vadd.f32 %v12981_v43, %v5266_v39 }
 0x37a   : > { %v9378_v22 = vpop.f32.mrb[61].mxu1  ;;  %v9466_v18 = vpop.f32.mrb[233].mxu0 }
 0x37b   : > { %v9379_v10 = vadd.f32 %v9378_v22, %v9377_v62  ;;  %v12666_v11 = vadd.f32 %v9466_v18, %v9465_v59  ;;  %v9380_v29 = vpop.f32.mrb[62].mxu1  ;;  %v9468_v14 = vpop.f32.mrb[234].mxu0 }
 0x37c   : > { %v9381_v13 = vpop.f32.mrb[63].mxu1  ;;  %v9469_v56 = vpop.f32.mrb[235].mxu0 }
 0x37d   : > { %v5271_v5 = vadd.f32 %v9379_v10, %v12501_v34  ;;  %v9382_v15 = vadd.f32 %v9381_v13, %v9380_v29  ;;  %v12669_v58 = vadd.f32 %v9469_v56, %v9468_v14  ;;  %v12984_v56 = vld [vmem:[#allocation23_spill] sm:$0xff] }
 0x37f   : > { %v5274_v4 = vadd.f32 %v9382_v15, %v12504_v38  ;;  %v12673_v52 = vadd.f32 %v12982_v27, %v5271_v5 }
 0x381   : > { %v9383_v50 = vpop.f32.mrb[64].mxu1  ;;  %v9471_v23 = vpop.f32.mrb[236].mxu0  ;;  %v12676_v39 = vadd.f32 %v12983_v41, %v5274_v4 }
 0x382   : > { %v9384_v26 = vpop.f32.mrb[65].mxu1  ;;  %v9472_v62 = vpop.f32.mrb[237].mxu0 }
 0x383   : > { %v9385_v59 = vadd.f32 %v9384_v26, %v9383_v50  ;;  %v12678_v43 = vadd.f32 %v9472_v62, %v9471_v23  ;;  %v9386_v22 = vpop.f32.mrb[66].mxu1  ;;  %v9474_v34 = vpop.f32.mrb[238].mxu0 }
 0x384   : > { %v9387_v18 = vpop.f32.mrb[67].mxu1  ;;  %v9475_v10 = vpop.f32.mrb[239].mxu0 }
 0x385   : > { %v5279_v29 = vadd.f32 %v9385_v59, %v12509_v53  ;;  %v9388_v38 = vadd.f32 %v9387_v18, %v9386_v22  ;;  %v12681_v14 = vadd.f32 %v9475_v10, %v9474_v34 }
 0x387   : > { %v5282_v13 = vadd.f32 %v9388_v38, %v12512_v12  ;;  %v12685_v5 = vadd.f32 %v12984_v56, %v5279_v29 }
 0x389   : > { %v9389_v15 = vpop.f32.mrb[68].mxu1  ;;  %v9477_v4 = vpop.f32.mrb[240].mxu0  ;;  %v12688_v27 = vadd.f32 %v12436_v8, %v5282_v13  ;;  %v12986_v13 = vld [vmem:[#allocation24_spill] sm:$0xff] }
 0x38a   : > { %v9390_v50 = vpop.f32.mrb[69].mxu1  ;;  %v9478_v23 = vpop.f32.mrb[241].mxu0 }
 0x38b   : > { %12985 = vst [vmem:[#allocation6_spill] sm:$0xff] %v12688_v27  ;;  %v9391_v41 = vadd.f32 %v9390_v50, %v9389_v15  ;;  %v12690_v26 = vadd.f32 %v9478_v23, %v9477_v4  ;;  %v9392_v62 = vpop.f32.mrb[70].mxu1  ;;  %v9480_v53 = vpop.f32.mrb[242].mxu0 }
 0x38c   : > { %v9393_v59 = vpop.f32.mrb[71].mxu1  ;;  %v9481_v22 = vpop.f32.mrb[243].mxu0 }
 0x38d   : > { %v5287_v34 = vadd.f32 %v9391_v41, %v12517_v47  ;;  %v9394_v12 = vadd.f32 %v9393_v59, %v9392_v62  ;;  %v12693_v18 = vadd.f32 %v9481_v22, %v9480_v53 }
 0x38f   : > { %v5290_v10 = vadd.f32 %v9394_v12, %v12520_v20  ;;  %v12697_v29 = vadd.f32 %v12448_v55, %v5287_v34 }
 0x391   : > { %v9395_v8 = vpop.f32.mrb[72].mxu1  ;;  %v9483_v38 = vpop.f32.mrb[244].mxu0  ;;  %v12700_v56 = vadd.f32 %v12986_v13, %v5290_v10 }
 0x392   : > { %v9396_v15 = vpop.f32.mrb[73].mxu1  ;;  %v9484_v4 = vpop.f32.mrb[245].mxu0 }
 0x393   : > { %v9397_v50 = vadd.f32 %v9396_v15, %v9395_v8  ;;  %v12702_v23 = vadd.f32 %v9484_v4, %v9483_v38  ;;  %v9398_v27 = vpop.f32.mrb[74].mxu1  ;;  %v9486_v47 = vpop.f32.mrb[246].mxu0 }
 0x394   : > { %v9399_v41 = vpop.f32.mrb[75].mxu1  ;;  %v9487_v62 = vpop.f32.mrb[247].mxu0 }
 0x395   : > { %v5295_v53 = vadd.f32 %v9397_v50, %v12525_v30  ;;  %v9400_v20 = vadd.f32 %v9399_v41, %v9398_v27  ;;  %v12705_v59 = vadd.f32 %v9487_v62, %v9486_v47 }
 0x397   : > { %v5456_v55 = vadd.f32 %v12618_v35, %v5295_v53  ;;  %v5298_v22 = vadd.f32 %v9400_v20, %v12528_v46 }
 0x399   : > { %v5459_v34 = vadd.f32 %v12620_v21, %v5298_v22  ;;  %v9489_v12 = vpop.f32.mrb[248].mxu0  ;;  %v9401_v10 = vpop.f32.mrb[76].mxu1  ;;  %v12711_v8 = vadd.f32 %v5456_v55, %v12536_v7 }
 0x39a   : > { %v9490_v38 = vpop.f32.mrb[249].mxu0  ;;  %v9402_v13 = vpop.f32.mrb[77].mxu1 }
 0x39b   : > { %v12713_v15 = vadd.f32 %v9490_v38, %v9489_v12  ;;  %v9492_v4 = vpop.f32.mrb[250].mxu0  ;;  %v9404_v30 = vpop.f32.mrb[78].mxu1  ;;  %v12716_v27 = vadd.f32 %v5459_v34, %v12541_v9 }
 0x39c   : > { %v9493_v50 = vpop.f32.mrb[251].mxu0  ;;  %v9405_v35 = vpop.f32.mrb[79].mxu1 }
 0x39d   : > { %12987 = vst [vmem:[#allocation7_spill] sm:$0xff] %v12716_v27  ;;  %v12718_v47 = vadd.f32 %v9493_v50, %v9492_v4 }
 0x3a1   : > { %v9495_v46 = vpop.f32.mrb[252].mxu0  ;;  %v9559_v21 = vpop.f32.mrb[80].mxu1 }
 0x3a2   : > { %v9496_v41 = vpop.f32.mrb[253].mxu0  ;;  %v9560_v62 = vpop.f32.mrb[81].mxu1 }
 0x3a3   : > { %v12720_v53 = vadd.f32 %v9496_v41, %v9495_v46  ;;  %v9561_v7 = vadd.f32 %v9560_v62, %v9559_v21  ;;  %v9498_v20 = vpop.f32.mrb[254].mxu0  ;;  %v9562_v55 = vpop.f32.mrb[82].mxu1 }
 0x3a4   : > { %v9499_v22 = vpop.f32.mrb[255].mxu0  ;;  %v9563_v12 = vpop.f32.mrb[83].mxu1 }
 0x3a5   : > { %v6532_v10 = vadd.f32 %v9561_v7, %v12630_v31  ;;  %v12723_v38 = vadd.f32 %v9499_v22, %v9498_v20  ;;  %v9564_v9 = vadd.f32 %v9563_v12, %v9562_v55 }
 0x3a7   : > { %v6535_v34 = vadd.f32 %v9564_v9, %v12633_v60  ;;  %v12727_v13 = vadd.f32 %v12551_v36, %v6532_v10 }
 0x3a9   : > { %v9501_v4 = vpop.f32.mrb[0].mxu0  ;;  %v9565_v30 = vpop.f32.mrb[84].mxu1  ;;  %v12730_v50 = vadd.f32 %v12554_v57, %v6535_v34 }
 0x3aa   : > { %v9502_v35 = vpop.f32.mrb[1].mxu0  ;;  %v9566_v46 = vpop.f32.mrb[85].mxu1 }
 0x3ab   : > { %v12732_v21 = vadd.f32 %v9502_v35, %v9501_v4  ;;  %v9567_v41 = vadd.f32 %v9566_v46, %v9565_v30  ;;  %v9504_v62 = vpop.f32.mrb[2].mxu0  ;;  %v9568_v31 = vpop.f32.mrb[86].mxu1 }
 0x3ac   : > { %v9505_v7 = vpop.f32.mrb[3].mxu0  ;;  %v9569_v20 = vpop.f32.mrb[87].mxu1 }
 0x3ad   : > { %v6540_v55 = vadd.f32 %v9567_v41, %v12642_v28  ;;  %v12735_v60 = vadd.f32 %v9505_v7, %v9504_v62  ;;  %v9570_v36 = vadd.f32 %v9569_v20, %v9568_v31 }
 0x3af   : > { %v6543_v22 = vadd.f32 %v9570_v36, %v12645_v25  ;;  %v12739_v12 = vadd.f32 %v12563_v32, %v6540_v55 }
 0x3b1   : > { %v9507_v57 = vpop.f32.mrb[4].mxu0  ;;  %v9571_v10 = vpop.f32.mrb[88].mxu1  ;;  %v12742_v9 = vadd.f32 %v12566_v54, %v6543_v22 }
 0x3b2   : > { %v9508_v34 = vpop.f32.mrb[5].mxu0  ;;  %v9572_v4 = vpop.f32.mrb[89].mxu1 }
 0x3b3   : > { %v12744_v30 = vadd.f32 %v9508_v34, %v9507_v57  ;;  %v9573_v35 = vadd.f32 %v9572_v4, %v9571_v10  ;;  %v9510_v46 = vpop.f32.mrb[6].mxu0  ;;  %v9574_v28 = vpop.f32.mrb[90].mxu1 }
 0x3b4   : > { %v9511_v41 = vpop.f32.mrb[7].mxu0  ;;  %v9575_v62 = vpop.f32.mrb[91].mxu1 }
 0x3b5   : > { %v6548_v31 = vadd.f32 %v9573_v35, %v12654_v48  ;;  %v12747_v25 = vadd.f32 %v9511_v41, %v9510_v46  ;;  %v9576_v32 = vadd.f32 %v9575_v62, %v9574_v28 }
 0x3b7   : > { %v6551_v7 = vadd.f32 %v9576_v32, %v12657_v6  ;;  %v12751_v20 = vadd.f32 %v12575_v2, %v6548_v31 }
 0x3b9   : > { %v9513_v54 = vpop.f32.mrb[8].mxu0  ;;  %v9577_v55 = vpop.f32.mrb[92].mxu1  ;;  %v12754_v36 = vadd.f32 %v12578_v51, %v6551_v7 }
 0x3ba   : > { %v9514_v22 = vpop.f32.mrb[9].mxu0  ;;  %v9578_v57 = vpop.f32.mrb[93].mxu1 }
 0x3bb   : > { %v12756_v10 = vadd.f32 %v9514_v22, %v9513_v54  ;;  %v9579_v34 = vadd.f32 %v9578_v57, %v9577_v55  ;;  %v9516_v4 = vpop.f32.mrb[10].mxu0  ;;  %v9580_v48 = vpop.f32.mrb[94].mxu1 }
 0x3bc   : > { %v9517_v35 = vpop.f32.mrb[11].mxu0  ;;  %v9581_v46 = vpop.f32.mrb[95].mxu1 }
 0x3bd   : > { %v6556_v28 = vadd.f32 %v9579_v34, %v12666_v11  ;;  %v12759_v6 = vadd.f32 %v9517_v35, %v9516_v4  ;;  %v9582_v2 = vadd.f32 %v9581_v46, %v9580_v48 }
 0x3bf   : > { %v6559_v41 = vadd.f32 %v9582_v2, %v12669_v58  ;;  %v12763_v62 = vadd.f32 %v12587_v33, %v6556_v28 }
 0x3c1   : > { %v9519_v51 = vpop.f32.mrb[12].mxu0  ;;  %v9583_v31 = vpop.f32.mrb[96].mxu1  ;;  %v12766_v32 = vadd.f32 %v12590_v61, %v6559_v41 }
 0x3c2   : > { %v9520_v7 = vpop.f32.mrb[13].mxu0  ;;  %v9584_v54 = vpop.f32.mrb[97].mxu1 }
 0x3c3   : > { %v12768_v55 = vadd.f32 %v9520_v7, %v9519_v51  ;;  %v9585_v22 = vadd.f32 %v9584_v54, %v9583_v31  ;;  %v9522_v57 = vpop.f32.mrb[14].mxu0  ;;  %v9586_v11 = vpop.f32.mrb[98].mxu1 }
 0x3c4   : > { %v9523_v34 = vpop.f32.mrb[15].mxu0  ;;  %v9587_v4 = vpop.f32.mrb[99].mxu1 }
 0x3c5   : > { %v6564_v48 = vadd.f32 %v9585_v22, %v12678_v43  ;;  %v12771_v58 = vadd.f32 %v9523_v34, %v9522_v57  ;;  %v9588_v33 = vadd.f32 %v9587_v4, %v9586_v11 }
 0x3c7   : > { %v6567_v35 = vadd.f32 %v9588_v33, %v12681_v14  ;;  %v12775_v46 = vadd.f32 %v12597_v45, %v6564_v48 }
 0x3c9   : > { %v9525_v61 = vpop.f32.mrb[16].mxu0  ;;  %v9589_v28 = vpop.f32.mrb[100].mxu1  ;;  %v12778_v2 = vadd.f32 %v12600_v0, %v6567_v35 }
 0x3ca   : > { %v9526_v41 = vpop.f32.mrb[17].mxu0  ;;  %v9590_v51 = vpop.f32.mrb[101].mxu1 }
 0x3cb   : > { %v12780_v31 = vadd.f32 %v9526_v41, %v9525_v61  ;;  %v9591_v7 = vadd.f32 %v9590_v51, %v9589_v28  ;;  %v9528_v54 = vpop.f32.mrb[18].mxu0  ;;  %v9592_v43 = vpop.f32.mrb[102].mxu1 }
 0x3cc   : > { %v9529_v22 = vpop.f32.mrb[19].mxu0  ;;  %v9593_v57 = vpop.f32.mrb[103].mxu1 }
 0x3cd   : > { %v6572_v11 = vadd.f32 %v9591_v7, %v12690_v26  ;;  %v12783_v14 = vadd.f32 %v9529_v22, %v9528_v54  ;;  %v9594_v45 = vadd.f32 %v9593_v57, %v9592_v43 }
 0x3cf   : > { %v6575_v34 = vadd.f32 %v9594_v45, %v12693_v18  ;;  %v12787_v4 = vadd.f32 %v12605_v40, %v6572_v11 }
 0x3d1   : > { %v9531_v0 = vpop.f32.mrb[20].mxu0  ;;  %v9595_v48 = vpop.f32.mrb[104].mxu1  ;;  %v12790_v33 = vadd.f32 %v12608_v24, %v6575_v34 }
 0x3d2   : > { %v9532_v35 = vpop.f32.mrb[21].mxu0  ;;  %v9596_v61 = vpop.f32.mrb[105].mxu1 }
 0x3d3   : > { %v12792_v28 = vadd.f32 %v9532_v35, %v9531_v0  ;;  %v9597_v41 = vadd.f32 %v9596_v61, %v9595_v48  ;;  %v9534_v51 = vpop.f32.mrb[22].mxu0  ;;  %v9598_v26 = vpop.f32.mrb[106].mxu1 }
 0x3d4   : > { %v9535_v7 = vpop.f32.mrb[23].mxu0  ;;  %v9599_v54 = vpop.f32.mrb[107].mxu1 }
 0x3d5   : > { %v6580_v43 = vadd.f32 %v9597_v41, %v12702_v23  ;;  %v12795_v18 = vadd.f32 %v9535_v7, %v9534_v51  ;;  %v9600_v40 = vadd.f32 %v9599_v54, %v9598_v26 }
 0x3d7   : > { %v6583_v22 = vadd.f32 %v9600_v40, %v12705_v59  ;;  %v12799_v57 = vadd.f32 %v12613_v37, %v6580_v43 }
 0x3d9   : > { %v9537_v24 = vpop.f32.mrb[24].mxu0  ;;  %v9601_v11 = vpop.f32.mrb[108].mxu1  ;;  %v12802_v45 = vadd.f32 %v12616_v42, %v6583_v22  ;;  %v12812_v42 = vld [vmem:[%s12934_s2] ss:$0 sm:$0xff] }
 0x3da   : > { %v9538_v34 = vpop.f32.mrb[25].mxu0  ;;  %v9602_v0 = vpop.f32.mrb[109].mxu1 }
 0x3db   : > { %v9603_v48 = vadd.f32 %v9602_v0, %v9601_v11  ;;  %v9540_v35 = vpop.f32.mrb[26].mxu0  ;;  %v9604_v61 = vpop.f32.mrb[110].mxu1 }
 0x3dc   : > { %v9541_v27 = vpop.f32.mrb[27].mxu0  ;;  %v9605_v23 = vpop.f32.mrb[111].mxu1 }
 0x3dd   : > { %v6588_v41 = vadd.f32 %v9603_v48, %v12713_v15  ;;  %v9606_v51 = vadd.f32 %v9605_v23, %v9604_v61 }
 0x3df   : > { %v6591_v59 = vadd.f32 %v9606_v51, %v12718_v47  ;;  %v12807_v37 = vadd.f32 %v12625_v49, %v6588_v41 }
 0x3e1   : > { %v9607_v26 = vpop.f32.mrb[112].mxu1  ;;  %v9889_v7 = vpop.f32.mrb[48].mxu0  ;;  %v12815_v54 = vadd.f32 %v12628_v19, %v6591_v59 }
 0x3e2   : > { %v9940_v27 = vadd.f32 %v12739_v12, %v9889_v7  ;;  %v9608_v43 = vpop.f32.mrb[113].mxu1  ;;  %v6692_v15 = vpop.f32.mrb[49].mxu0 }
 0x3e3   : > { %v9609_v40 = vadd.f32 %v9608_v43, %v9607_v26  ;;  %v9946_v47 = vadd.f32 %v12727_v13, %v6692_v15  ;;  %v9610_v22 = vpop.f32.mrb[114].mxu1  ;;  %v9890_v49 = vpop.f32.mrb[50].mxu0 }
 0x3e4   : > { %v6860_v24 = vadd.f32 %v9940_v27, %v12812_v42  ;;  %v9952_v11 = vadd.f32 %v12742_v9, %v9890_v49  ;;  %v9611_v34 = vpop.f32.mrb[115].mxu1  ;;  %v6695_v0 = vpop.f32.mrb[51].mxu0 }
 0x3e5   : > { %v6596_v48 = vadd.f32 %v9609_v40, %v12720_v53  ;;  %v6858_v19 = vadd.f32 %v9946_v47, %v12812_v42  ;;  %v9612_v35 = vadd.f32 %v9611_v34, %v9610_v22  ;;  %v9958_v12 = vadd.f32 %v12730_v50, %v6695_v0 }
 0x3e6   : > { %v6892_v61 = vmax.f32 %v6860_v24, 0.0  ;;  %v6861_v23 = vadd.f32 %v9952_v11, %v12812_v42 }
 0x3e7   : > { %v6890_v41 = vmax.f32 %v6858_v19, 0.0  ;;  %v6599_v13 = vadd.f32 %v9612_v35, %v12723_v38  ;;  %v6859_v51 = vadd.f32 %v9958_v12, %v12812_v42  ;;  %v12828_v59 = vadd.f32 %v12637_v44, %v6596_v48 }
 0x3e8   : > { %v6893_v9 = vmax.f32 %v6861_v23, 0.0 }
 0x3e9   : > { %v6959_v26 = vmax.f32 %v6890_v41, %v6892_v61  ;;  %v6891_v53 = vmax.f32 %v6859_v51, 0.0  ;;  %v9613_v7 = vpop.f32.mrb[116].mxu1  ;;  %v9893_v27 = vpop.f32.mrb[52].mxu0  ;;  %v12831_v43 = vadd.f32 %v12640_v17, %v6599_v13 }
 0x3ea   : > { %v9964_v50 = vadd.f32 %v12763_v62, %v9893_v27  ;;  %v9614_v15 = vpop.f32.mrb[117].mxu1  ;;  %v6708_v40 = vpop.f32.mrb[53].mxu0 }
 0x3eb   : > { %v6960_v47 = vmax.f32 %v6891_v53, %v6893_v9  ;;  %v9615_v38 = vadd.f32 %v9614_v15, %v9613_v7  ;;  %v9970_v22 = vadd.f32 %v12751_v20, %v6708_v40  ;;  %v9616_v49 = vpop.f32.mrb[118].mxu1  ;;  %v9894_v44 = vpop.f32.mrb[54].mxu0 }
 0x3ec   : > { %v6864_v24 = vadd.f32 %v9964_v50, %v12812_v42  ;;  %v9976_v11 = vadd.f32 %v12766_v32, %v9894_v44  ;;  %v9617_v34 = vpop.f32.mrb[119].mxu1  ;;  %v6711_v0 = vpop.f32.mrb[55].mxu0 }
 0x3ed   : > { %v6604_v17 = vadd.f32 %v9615_v38, %v12732_v21  ;;  %v6862_v48 = vadd.f32 %v9970_v22, %v12812_v42  ;;  %v9618_v62 = vadd.f32 %v9617_v34, %v9616_v49  ;;  %v9982_v19 = vadd.f32 %v12754_v36, %v6711_v0 }
 0x3ee   : > { %v6896_v35 = vmax.f32 %v6864_v24, 0.0  ;;  %v6865_v12 = vadd.f32 %v9976_v11, %v12812_v42 }
 0x3ef   : > { %v6894_v20 = vmax.f32 %v6862_v48, 0.0  ;;  %v6607_v61 = vadd.f32 %v9618_v62, %v12735_v60  ;;  %v6863_v23 = vadd.f32 %v9982_v19, %v12812_v42  ;;  %v12845_v41 = vadd.f32 %v12649_v16, %v6604_v17 }
 0x3f0   : > { %v6897_v21 = vmax.f32 %v6865_v12, 0.0 }
 0x3f1   : > { %v6964_v32 = vmax.f32 %v6959_v26, %v6894_v20  ;;  %v6973_v36 = vmax.f32 %v6894_v20, %v6896_v35  ;;  %v6895_v13 = vmax.f32 %v6863_v23, 0.0  ;;  %v9619_v51 = vpop.f32.mrb[120].mxu1  ;;  %v9897_v9 = vpop.f32.mrb[56].mxu0  ;;  %v12853_v60 = vadd.f32 %v12652_v3, %v6607_v61 }
 0x3f2   : > { %v9988_v53 = vadd.f32 %v12787_v4, %v9897_v9  ;;  %v9620_v16 = vpop.f32.mrb[121].mxu1  ;;  %v6724_v7 = vpop.f32.mrb[57].mxu0 }
 0x3f3   : > { %6966 = vst [vmem:[%s12850_s10] sm:$0xff] %v6964_v32  ;;  %v6965_v27 = vmax.f32 %v6960_v47, %v6895_v13  ;;  %v6974_v50 = vmax.f32 %v6895_v13, %v6897_v21  ;;  %v9621_v15 = vadd.f32 %v9620_v16, %v9619_v51  ;;  %v9994_v40 = vadd.f32 %v12775_v46, %v6724_v7  ;;  %v9622_v38 = vpop.f32.mrb[122].mxu1  ;;  %v9898_v26 = vpop.f32.mrb[58].mxu0 }
 0x3f4   : > { %v6868_v22 = vadd.f32 %v9988_v53, %v12812_v42  ;;  %v10000_v49 = vadd.f32 %v12790_v33, %v9898_v26  ;;  %v9623_v44 = vpop.f32.mrb[123].mxu1  ;;  %v6727_v24 = vpop.f32.mrb[59].mxu0 }
 0x3f5   : > { %6967 = vst [vmem:[%s12850_s10 + $0x8] sm:$0xff] %v6965_v27  ;;  %v6612_v3 = vadd.f32 %v9621_v15, %v12744_v30  ;;  %v6866_v4 = vadd.f32 %v9994_v40, %v12812_v42  ;;  %v9624_v11 = vadd.f32 %v9623_v44, %v9622_v38  ;;  %v10006_v47 = vadd.f32 %v12778_v2, %v6727_v24 }
 0x3f6   : > { %v6900_v34 = vmax.f32 %v6868_v22, 0.0  ;;  %v6869_v46 = vadd.f32 %v10000_v49, %v12812_v42 }
 0x3f7   : > { %v6898_v0 = vmax.f32 %v6866_v4, 0.0  ;;  %v6615_v17 = vadd.f32 %v9624_v11, %v12747_v25  ;;  %v6867_v48 = vadd.f32 %v10006_v47, %v12812_v42  ;;  %v12868_v33 = vadd.f32 %v12661_v63, %v6612_v3 }
 0x3f8   : > { %v6901_v62 = vmax.f32 %v6869_v46, 0.0 }
 0x3f9   : > { %v6978_v19 = vmax.f32 %v6973_v36, %v6898_v0  ;;  %v6988_v30 = vmax.f32 %v6898_v0, %v6900_v34  ;;  %v6899_v35 = vmax.f32 %v6867_v48, 0.0  ;;  %v9625_v12 = vpop.f32.mrb[124].mxu1  ;;  %v9901_v20 = vpop.f32.mrb[60].mxu0  ;;  %v12871_v2 = vadd.f32 %v12664_v1, %v6615_v17 }
 0x3fa   : > { %v10012_v61 = vadd.f32 %v12807_v37, %v9901_v20  ;;  %v9626_v23 = vpop.f32.mrb[125].mxu1  ;;  %v6740_v21 = vpop.f32.mrb[61].mxu0 }
 0x3fb   : > { %8425 = vst [vmem:[%s12850_s10 + $0x10] sm:$0xff] %v6978_v19  ;;  %v6979_v25 = vmax.f32 %v6974_v50, %v6899_v35  ;;  %v6989_v32 = vmax.f32 %v6899_v35, %v6901_v62  ;;  %v9627_v13 = vadd.f32 %v9626_v23, %v9625_v12  ;;  %v10018_v63 = vadd.f32 %v12799_v57, %v6740_v21  ;;  %v9628_v51 = vpop.f32.mrb[126].mxu1  ;;  %v9902_v36 = vpop.f32.mrb[62].mxu0 }
 0x3fc   : > { %v6872_v9 = vadd.f32 %v10012_v61, %v12812_v42  ;;  %v10024_v53 = vadd.f32 %v12815_v54, %v9902_v36  ;;  %v9629_v16 = vpop.f32.mrb[127].mxu1  ;;  %v6743_v7 = vpop.f32.mrb[63].mxu0  ;;  %v12988_v36 = vld [vmem:[#allocation6_spill] sm:$0xff] }
 0x3fd   : > { %8426 = vst [vmem:[%s12850_s10 + $0x18] sm:$0xff] %v6979_v25  ;;  %v6620_v1 = vadd.f32 %v9627_v13, %v12756_v10  ;;  %v6870_v37 = vadd.f32 %v10018_v63, %v12812_v42  ;;  %v9630_v27 = vadd.f32 %v9629_v16, %v9628_v51  ;;  %v10030_v50 = vadd.f32 %v12802_v45, %v6743_v7 }
 0x3fe   : > { %v6904_v15 = vmax.f32 %v6872_v9, 0.0  ;;  %v6873_v57 = vadd.f32 %v10024_v53, %v12812_v42 }
 0x3ff   : > { %v6902_v40 = vmax.f32 %v6870_v37, 0.0  ;;  %v6623_v38 = vadd.f32 %v9630_v27, %v12759_v6  ;;  %v6871_v26 = vadd.f32 %v10030_v50, %v12812_v42  ;;  %v10059_v54 = vadd.f32 %v12673_v52, %v6620_v1 }
 0x400   : > { %v6905_v22 = vmax.f32 %v6873_v57, 0.0 }
 0x401   : > { %v6993_v49 = vmax.f32 %v6988_v30, %v6902_v40  ;;  %v7003_v44 = vmax.f32 %v6902_v40, %v6904_v15  ;;  %v6903_v10 = vmax.f32 %v6871_v26, 0.0  ;;  %v9631_v24 = vpop.f32.mrb[128].mxu1  ;;  %v9905_v3 = vpop.f32.mrb[64].mxu0  ;;  %v10071_v45 = vadd.f32 %v12676_v39, %v6623_v38 }
 0x402   : > { %v10036_v4 = vadd.f32 %v12845_v41, %v9905_v3  ;;  %v9632_v11 = vpop.f32.mrb[129].mxu1  ;;  %v6756_v47 = vpop.f32.mrb[65].mxu0 }
 0x403   : > { %8427 = vst [vmem:[%s12850_s10 + $0x20] sm:$0xff] %v6993_v49  ;;  %v6994_v34 = vmax.f32 %v6989_v32, %v6903_v10  ;;  %v7004_v6 = vmax.f32 %v6903_v10, %v6905_v22  ;;  %v9633_v46 = vadd.f32 %v9632_v11, %v9631_v24  ;;  %v10042_v0 = vadd.f32 %v12828_v59, %v6756_v47  ;;  %v9634_v52 = vpop.f32.mrb[130].mxu1  ;;  %v9906_v17 = vpop.f32.mrb[66].mxu0 }
 0x404   : > { %v6876_v48 = vadd.f32 %v10036_v4, %v12812_v42  ;;  %v10048_v62 = vadd.f32 %v12853_v60, %v9906_v17  ;;  %v9635_v19 = vpop.f32.mrb[131].mxu1  ;;  %v6759_v30 = vpop.f32.mrb[67].mxu0 }
 0x405   : > { %8428 = vst [vmem:[%s12850_s10 + $0x28] sm:$0xff] %v6994_v34  ;;  %v6628_v39 = vadd.f32 %v9633_v46, %v12768_v55  ;;  %v6874_v41 = vadd.f32 %v10042_v0, %v12812_v42  ;;  %v9636_v35 = vadd.f32 %v9635_v19, %v9634_v52  ;;  %v10054_v12 = vadd.f32 %v12831_v43, %v6759_v30 }
 0x406   : > { %v6908_v20 = vmax.f32 %v6876_v48, 0.0  ;;  %v6877_v59 = vadd.f32 %v10048_v62, %v12812_v42 }
 0x407   : > { %v6906_v61 = vmax.f32 %v6874_v41, 0.0  ;;  %v6631_v23 = vadd.f32 %v9636_v35, %v12771_v58  ;;  %v6875_v21 = vadd.f32 %v10054_v12, %v12812_v42  ;;  %v10089_v60 = vadd.f32 %v12685_v5, %v6628_v39 }
 0x408   : > { %v6909_v25 = vmax.f32 %v6877_v59, 0.0 }
 0x409   : > { %v7008_v32 = vmax.f32 %v7003_v44, %v6906_v61  ;;  %v7018_v13 = vmax.f32 %v6906_v61, %v6908_v20  ;;  %v6907_v55 = vmax.f32 %v6875_v21, 0.0  ;;  %v9637_v63 = vpop.f32.mrb[132].mxu1  ;;  %v9909_v51 = vpop.f32.mrb[68].mxu0  ;;  %v10101_v43 = vadd.f32 %v12988_v36, %v6631_v23 }
 0x40a   : > { %v10060_v9 = vadd.f32 %v10059_v54, %v9909_v51  ;;  %v9638_v53 = vpop.f32.mrb[133].mxu1  ;;  %v6772_v16 = vpop.f32.mrb[69].mxu0 }
 0x40b   : > { %8429 = vst [vmem:[%s12850_s10 + $0x30] sm:$0xff] %v7008_v32  ;;  %v7009_v7 = vmax.f32 %v7004_v6, %v6907_v55  ;;  %v7019_v1 = vmax.f32 %v6907_v55, %v6909_v25  ;;  %v9639_v58 = vadd.f32 %v9638_v53, %v9637_v63  ;;  %v10066_v37 = vadd.f32 %v12868_v33, %v6772_v16  ;;  %v9640_v27 = vpop.f32.mrb[134].mxu1  ;;  %v9910_v5 = vpop.f32.mrb[70].mxu0 }
 0x40c   : > { %v6880_v50 = vadd.f32 %v10060_v9, %v12812_v42  ;;  %v10072_v15 = vadd.f32 %v10071_v45, %v9910_v5  ;;  %v9641_v57 = vpop.f32.mrb[135].mxu1  ;;  %v6775_v40 = vpop.f32.mrb[71].mxu0  ;;  %v12989_v5 = vld [vmem:[#allocation7_spill] sm:$0xff] }
 0x40d   : > { %8430 = vst [vmem:[%s12850_s10 + $0x38] sm:$0xff] %v7009_v7  ;;  %v6636_v38 = vadd.f32 %v9639_v58, %v12780_v31  ;;  %v6878_v26 = vadd.f32 %v10066_v37, %v12812_v42  ;;  %v9642_v54 = vadd.f32 %v9641_v57, %v9640_v27  ;;  %v10078_v22 = vadd.f32 %v12871_v2, %v6775_v40 }
 0x40e   : > { %v6912_v49 = vmax.f32 %v6880_v50, 0.0  ;;  %v6881_v44 = vadd.f32 %v10072_v15, %v12812_v42 }
 0x40f   : > { %v6910_v33 = vmax.f32 %v6878_v26, 0.0  ;;  %v6639_v10 = vadd.f32 %v9642_v54, %v12783_v14  ;;  %v6879_v24 = vadd.f32 %v10078_v22, %v12812_v42  ;;  %v10083_v3 = vadd.f32 %v12697_v29, %v6636_v38 }
 0x410   : > { %v6913_v45 = vmax.f32 %v6881_v44, 0.0 }
 0x411   : > { %v7023_v4 = vmax.f32 %v7018_v13, %v6910_v33  ;;  %v7033_v11 = vmax.f32 %v6910_v33, %v6912_v49  ;;  %v6911_v31 = vmax.f32 %v6879_v24, 0.0  ;;  %v9643_v47 = vpop.f32.mrb[136].mxu1  ;;  %v9913_v34 = vpop.f32.mrb[72].mxu0  ;;  %v10095_v2 = vadd.f32 %v12700_v56, %v6639_v10 }
 0x412   : > { %v10084_v6 = vadd.f32 %v10083_v3, %v9913_v34  ;;  %v9644_v46 = vpop.f32.mrb[137].mxu1  ;;  %v6788_v0 = vpop.f32.mrb[73].mxu0 }
 0x413   : > { %8431 = vst [vmem:[%s12850_s10 + $0x40] sm:$0xff] %v7023_v4  ;;  %v7024_v52 = vmax.f32 %v7019_v1, %v6911_v31  ;;  %v7034_v17 = vmax.f32 %v6911_v31, %v6913_v45  ;;  %v9645_v14 = vadd.f32 %v9644_v46, %v9643_v47  ;;  %v10090_v48 = vadd.f32 %v10089_v60, %v6788_v0  ;;  %v9646_v62 = vpop.f32.mrb[138].mxu1  ;;  %v9914_v19 = vpop.f32.mrb[74].mxu0 }
 0x414   : > { %v6884_v29 = vadd.f32 %v10084_v6, %v12812_v42  ;;  %v10096_v30 = vadd.f32 %v10095_v2, %v9914_v19  ;;  %v9647_v39 = vpop.f32.mrb[139].mxu1  ;;  %v6791_v41 = vpop.f32.mrb[75].mxu0 }
 0x415   : > { %8432 = vst [vmem:[%s12850_s10 + $0x48] sm:$0xff] %v7024_v52  ;;  %v6882_v35 = vadd.f32 %v10090_v48, %v12812_v42  ;;  %v9648_v12 = vadd.f32 %v9647_v39, %v9646_v62  ;;  %v10102_v56 = vadd.f32 %v10101_v43, %v6791_v41  ;;  %v6644_v20 = vadd.f32 %v9645_v14, %v12792_v28 }
 0x416   : > { %v6916_v59 = vmax.f32 %v6884_v29, 0.0  ;;  %v6885_v61 = vadd.f32 %v10096_v30, %v12812_v42 }
 0x417   : > { %v6914_v23 = vmax.f32 %v6882_v35, 0.0  ;;  %v6883_v21 = vadd.f32 %v10102_v56, %v12812_v42  ;;  %v6647_v60 = vadd.f32 %v9648_v12, %v12795_v18 }
 0x418   : > { %v6917_v25 = vmax.f32 %v6885_v61, 0.0 }
 0x419   : > { %v7038_v32 = vmax.f32 %v7033_v11, %v6914_v23  ;;  %v7048_v13 = vmax.f32 %v6914_v23, %v6916_v59  ;;  %v6915_v55 = vmax.f32 %v6883_v21, 0.0  ;;  %v9917_v63 = vpop.f32.mrb[28].mxu0  ;;  %v9649_v51 = vpop.f32.mrb[140].mxu1 }
 0x41a   : > { %v6804_v36 = vpop.f32.mrb[29].mxu0  ;;  %v9650_v9 = vpop.f32.mrb[141].mxu1 }
 0x41b   : > { %8433 = vst [vmem:[%s12850_s10 + $0x50] sm:$0xff] %v7038_v32  ;;  %v7039_v43 = vmax.f32 %v7034_v17, %v6915_v55  ;;  %v7049_v28 = vmax.f32 %v6915_v55, %v6917_v25  ;;  %v6805_v53 = vadd.f32 %v6804_v36, %v6644_v20  ;;  %v9918_v16 = vpop.f32.mrb[30].mxu0  ;;  %v9652_v7 = vpop.f32.mrb[142].mxu1 }
 0x41c   : > { %v6807_v1 = vpop.f32.mrb[31].mxu0  ;;  %v9653_v58 = vpop.f32.mrb[143].mxu1 }
 0x41d   : > { %8434 = vst [vmem:[%s12850_s10 + $0x58] sm:$0xff] %v7039_v43  ;;  %v6847_v18 = vadd.f32 %v6805_v53, %v12711_v8  ;;  %v6808_v37 = vadd.f32 %v6807_v1, %v6647_v60 }
 0x41f   : > { %v6886_v27 = vadd.f32 %v12812_v42, %v6847_v18  ;;  %v6848_v50 = vadd.f32 %v6808_v37, %v12989_v5 }
 0x421   : > { %v6918_v15 = vmax.f32 %v6886_v27, 0.0  ;;  %v6887_v57 = vadd.f32 %v12812_v42, %v6848_v50 }
 0x423   : > { %v7053_v40 = vmax.f32 %v7048_v13, %v6918_v15  ;;  %v6919_v38 = vmax.f32 %v6887_v57, 0.0 }
 0x425   : > { %8435 = vst [vmem:[%s12850_s10 + $0x60] sm:$0xff] %v7053_v40  ;;  %v7054_v26 = vmax.f32 %v7049_v28, %v6919_v38 }
 0x427   : > { %8436 = vst [vmem:[%s12850_s10 + $0x68] sm:$0xff] %v7054_v26 }
 0x428 PF: > { %s13_s12 = sadd.s32 1, %s10903_s12  }
 0x429   : > { %p10_p4 = scmp.ge.s32.totalorder %s13_s12, 4  }
 0x42b   :  { %12 = sbr.rel (!%p10_p4) target bundleno = 1 (0x1), region = 90 }

// kernel: alexnet_forward.12
= control target key start
LH: loop header
LB: loop body
LE: loop exit
PB: predicated region body
PF: predicated region fallthrough
CT: control target
= control target key end

     0   :  { %s2138_s12 = smov 0   ;;  %s2461_s0 = inlined_call_operand.vmem [shape: bf16[2,10,8,384], index: 0, kind: input, shape index: {}]   ;;  %s2462_s1 = inlined_call_operand.vmem [shape: bf16[3,384,128], index: 1, kind: input, shape index: {}]   ;;  %s2463_s2 = inlined_call_operand.vmem [shape: f32[1,128], index: 2, kind: input, shape index: {}]   ;;  %s2464_s3 = inlined_call_operand.vmem [shape: f32[2,3,8,128], index: 3, kind: output, shape index: {}]  }
   0x1 LB: > { %s1502_s13 = sadd.s32 4294967295, %s2116_s12   ;;  %p1506_p0 = scmp.ge.s32.totalorder %s2116_s12, 1  ;;  %s2116_s12 = sphi %s2138_s12, %s13_s12  }
   0x2   : > { %p137_p1 = scmp.lt.s32.totalorder %s2116_s12, 3 }
   0x4   : > { %p138_p2 = pnand %p1506_p0, %p137_p1 }
   0x5   : > { %v2008_v0 = vld [vmem:[%s2462_s1 + $0x100] sm:$0xff] (!%p138_p2)   ;;  %v2011_v3 = vld [vmem:[%s2462_s1 + $0x108] sm:$0xff] (!%p138_p2)   ;;  %v2014_v6 = vld [vmem:[%s2462_s1 + $0x110] sm:$0xff] (!%p138_p2)   ;;  %p161_p3 = scmp.lt.s32.totalorder (!%p138_p2), %s1502_s13, 1 }
   0x6   : > { %141 = sbr.rel (%p138_p2) target bundleno = 353 (0x161), region = 32  ;;  %v2009_v1 = vld [vmem:[%s2462_s1 + $0x140] sm:$0xff] (!%p138_p2)   ;;  %1750 = vmatprep.subr.bf16.mxu0 (!%p138_p2), %v2008_v0  ;;  %v2012_v4 = vld [vmem:[%s2462_s1 + $0x148] sm:$0xff] (!%p138_p2)   ;;  %v2015_v7 = vld [vmem:[%s2462_s1 + $0x150] sm:$0xff] (!%p138_p2)  }
   0x7   : > { %v2010_v2 = vld [vmem:[%s2462_s1 + $0xc0] sm:$0xff] (!%p138_p2)   ;;  %1906 = vmatprep.subr.bf16.mxu1 (!%p138_p2), %v2009_v1  ;;  %v2013_v5 = vld [vmem:[%s2462_s1 + $0xc8] sm:$0xff] (!%p138_p2)   ;;  %v2016_v8 = vld [vmem:[%s2462_s1 + $0xd0] sm:$0xff] (!%p138_p2)  }
   0x8   : > { %1751 = vmatpush3.bf16.msra.mxu0 (!%p138_p2), %v2010_v2  ;;  %1907 = vmatpush3.bf16.msra.mxu1 (!%p138_p2), %v2009_v1  ;;  %v2017_v9 = vld [vmem:[%s2462_s1 + $0x118] sm:$0xff] (!%p138_p2)   ;;  %v2020_v12 = vld [vmem:[%s2462_s1 + $0x120] sm:$0xff] (!%p138_p2)   ;;  %v2023_v15 = vld [vmem:[%s2462_s1 + $0x128] sm:$0xff] (!%p138_p2)  }
   0x9   : > { %1752 = vmatprep.subr.bf16.mxu0 (!%p138_p2), %v2011_v3  ;;  %1908 = vmatprep.subr.bf16.mxu1 (!%p138_p2), %v2012_v4  ;;  %v2018_v10 = vld [vmem:[%s2462_s1 + $0x158] sm:$0xff] (!%p138_p2)   ;;  %v2021_v13 = vld [vmem:[%s2462_s1 + $0x160] sm:$0xff] (!%p138_p2)   ;;  %v2024_v16 = vld [vmem:[%s2462_s1 + $0x168] sm:$0xff] (!%p138_p2)  }
   0xa   : > { %v2019_v11 = vld [vmem:[%s2462_s1 + $0xd8] sm:$0xff] (!%p138_p2)   ;;  %v2022_v14 = vld [vmem:[%s2462_s1 + $0xe0] sm:$0xff] (!%p138_p2)   ;;  %v2025_v17 = vld [vmem:[%s2462_s1 + $0xe8] sm:$0xff] (!%p138_p2)  }
   0xb   : > { %v2026_v18 = vld [vmem:[%s2462_s1 + $0x130] sm:$0xff] (!%p138_p2)   ;;  %v2029_v21 = vld [vmem:[%s2462_s1 + $0x138] sm:$0xff] (!%p138_p2)   ;;  %v2035_v28 = vld [vmem:[%s2462_s1 + $0x40] sm:$0xff] (!%p138_p2)  }
   0xc   : > { %1753 = vmatpush3.bf16.msra.mxu0 (!%p138_p2), %v2013_v5  ;;  %1909 = vmatpush3.bf16.msra.mxu1 (!%p138_p2), %v2012_v4  ;;  %v2027_v19 = vld [vmem:[%s2462_s1 + $0x170] sm:$0xff] (!%p138_p2)   ;;  %v2030_v22 = vld [vmem:[%s2462_s1 + $0x178] sm:$0xff] (!%p138_p2)   ;;  %v2036_v29 = vld [vmem:[%s2462_s1 + $0x80] sm:$0xff] (!%p138_p2)  }
   0xd   : > { %1754 = vmatprep.subr.bf16.mxu0 %v2014_v6  ;;  %1910 = vmatprep.subr.bf16.mxu1 %v2015_v7  ;;  %s2466_s13 = smov (!%p161_p3, %s1502_s13), 1  ;;  %v2028_v20 = vld [vmem:[%s2462_s1 + $0xf0] sm:$0xff]   ;;  %v2031_v27 = vld [vmem:[%s2462_s1 + $0xf8] sm:$0xff]   ;;  %v2038_v31 = vld [vmem:[%s2462_s1] sm:$0xff]  }
   0xe   : > { %s1998_s23 = smul.u32 120, %s2466_s13  ;;  %v2039_v33 = vld [vmem:[%s2462_s1 + $0x48] sm:$0xff]   ;;  %v2044_v39 = vld [vmem:[%s2462_s1 + $0x50] sm:$0xff]   ;;  %v2047_v45 = vld [vmem:[%s2462_s1 + $0x58] sm:$0xff]  }
   0xf   : > { %v2040_v34 = vld [vmem:[%s2462_s1 + $0x88] sm:$0xff]   ;;  %v2045_v40 = vld [vmem:[%s2462_s1 + $0x90] sm:$0xff]   ;;  %v2048_v46 = vld [vmem:[%s2462_s1 + $0x98] sm:$0xff]   ;;  %s1999_s17 = smul.u32 24, %s2466_s13 }
  0x10   : > { %1755 = vmatpush3.bf16.msra.mxu0 %v2016_v8  ;;  %1911 = vmatpush3.bf16.msra.mxu1 %v2015_v7  ;;  %s2216_s5 = scalar_lea.vmem %s2461_s0, %s1998_s23  ;;  %v2041_v38 = vld [vmem:[%s2462_s1 + $0x8] sm:$0xff]   ;;  %v2046_v42 = vld [vmem:[%s2462_s1 + $0x10] sm:$0xff]   ;;  %v2049_v47 = vld [vmem:[%s2462_s1 + $0x18] sm:$0xff]  }
  0x11   : > { %1756 = vmatprep.subr.bf16.mxu0 %v2017_v9  ;;  %1912 = vmatprep.subr.bf16.mxu1 %v2018_v10  ;;  %v2228_v23 = vld [vmem:[%s2216_s5 + $0xc] sm:$0xff]  ;;  %v2231_v24 = vld [vmem:[%s2216_s5 + $0x18] sm:$0xff]  ;;  %v2034_v26 = vld [vmem:[%s2216_s5 + $0x14] ss:$12 sps:$4 sm:$0xff]   ;;  %s170_s20 = scalar_lea.vmem %s2464_s3, %s1999_s17 }
  0x12   : > { %v1574_v25 = vcombine.high %v2228_v23, %v2231_v24  ;;  %1922 = vmatprep.mubr.bf16.mxu1 %v2034_v26  ;;  %v2037_v30 = vld [vmem:[%s2216_s5 + $0x2c] ss:$12 sps:$4 sm:$0xff]   ;;  %v1573_v32 = vcombine.low %v2228_v23, %v2231_v24  ;;  %v2258_v35 = vld [vmem:[%s2216_s5 + $0x24] sm:$0xff]  ;;  %v2261_v36 = vld [vmem:[%s2216_s5 + $0x30] sm:$0xff] }
  0x13   : > { %v1577_v37 = vcombine.high %v2258_v35, %v2261_v36  ;;  %v1576_v41 = vcombine.low %v2258_v35, %v2261_v36  ;;  %v2280_v43 = vld [vmem:[%s2216_s5 + $0x3c] sm:$0xff]  ;;  %v2283_v44 = vld [vmem:[%s2216_s5 + $0x48] sm:$0xff]  ;;  %v2054_v49 = vld [vmem:[%s2216_s5 + $0x44] ss:$12 sps:$4 sm:$0xff]  }
  0x14   : > { %1757 = vmatpush3.bf16.msra.mxu0 %v2019_v11  ;;  %1913 = vmatpush3.bf16.msra.mxu1 %v2018_v10  ;;  %v1580_v48 = vcombine.high %v2280_v43, %v2283_v44  ;;  %v2052_v50 = vld [vmem:[%s2462_s1 + $0x60] sm:$0xff]   ;;  %v2056_v51 = vld [vmem:[%s2216_s5 + $0x5c] ss:$12 sps:$4 sm:$0xff]   ;;  %v1579_v54 = vcombine.low %v2280_v43, %v2283_v44  ;;  %v2313_v56 = vld [vmem:[%s2216_s5 + $0x54] sm:$0xff] }
  0x15   : > { %1758 = vmatprep.subr.bf16.mxu0 %v2020_v12  ;;  %1914 = vmatprep.subr.bf16.mxu1 %v2021_v13  ;;  %v2053_v52 = vld [vmem:[%s2462_s1 + $0xa0] sm:$0xff]   ;;  %v2057_v55 = vld [vmem:[%s2462_s1 + $0x68] sm:$0xff]   ;;  %v2062_v61 = vld [vmem:[%s2462_s1 + $0x70] sm:$0xff]  }
  0x16   : > { %542 = vmatprep.mubr.bf16.mxu0 %v1574_v25  ;;  %v2055_v53 = vld [vmem:[%s2462_s1 + $0x20] sm:$0xff]   ;;  %v2058_v58 = vld [vmem:[%s2462_s1 + $0xa8] sm:$0xff]   ;;  %v2063_v62 = vld [vmem:[%s2462_s1 + $0xb0] sm:$0xff]   ;;  %v1616_v25 = vcombine.high %v2261_v36, %v2280_v43 }
  0x17   : > { %v2316_v57 = vld [vmem:[%s2216_s5 + $0x60] sm:$0xff]  ;;  %v2059_v60 = vld [vmem:[%s2462_s1 + $0x28] sm:$0xff]   ;;  %v2064_v63 = vld [vmem:[%s2462_s1 + $0x30] sm:$0xff]  }
  0x18   : > { %1759 = vmatpush3.bf16.msra.mxu0 %v2022_v14  ;;  %1915 = vmatpush3.bf16.msra.mxu1 %v2021_v13  ;;  %v1583_v59 = vcombine.high %v2313_v56, %v2316_v57  ;;  %v172_v0 = vld [vmem:[%s2216_s5] sm:$0xff]  ;;  %v1582_v1 = vcombine.low %v2313_v56, %v2316_v57  ;;  %v2070_v2 = vld [vmem:[%s2216_s5 + $0x8] ss:$12 sps:$4 sm:$0xff]   ;;  %v2065_v3 = vld [vmem:[%s2462_s1 + $0x78] sm:$0xff]   ;;  %v2368_v14 = vcombine.high %v2231_v24, %v2258_v35 }
  0x19   : > { %1760 = vmatprep.subr.bf16.mxu0 %v2023_v15  ;;  %1916 = vmatprep.subr.bf16.mxu1 %v2024_v16  ;;  %v2066_v4 = vld [vmem:[%s2462_s1 + $0xb8] sm:$0xff]   ;;  %v1610_v5 = vcombine.high %v172_v0, %v2228_v23  ;;  %v2071_v7 = vld [vmem:[%s2462_s1 + $0x1c0] sm:$0xff]   ;;  %v1609_v10 = vcombine.low %v172_v0, %v2228_v23  ;;  %v2075_v12 = vld [vmem:[%s2462_s1 + $0x1c8] sm:$0xff]  }
  0x1a   : > { %v2067_v6 = vld [vmem:[%s2462_s1 + $0x38] sm:$0xff]   ;;  %v2072_v8 = vld [vmem:[%s2462_s1 + $0x200] sm:$0xff]   ;;  %v2076_v13 = vld [vmem:[%s2462_s1 + $0x208] sm:$0xff]  }
  0x1b   : > { %v2073_v9 = vld [vmem:[%s2216_s5 + $0x20] ss:$12 sps:$4 sm:$0xff]   ;;  %v2092_v23 = vld [vmem:[%s2216_s5 + $0x50] ss:$12 sps:$4 sm:$0xff]  }
  0x1c   : > { %1761 = vmatpush3.bf16.msra.mxu0 %v2025_v17  ;;  %1917 = vmatpush3.bf16.msra.mxu1 %v2024_v16  ;;  %v2074_v11 = vld [vmem:[%s2462_s1 + $0x180] sm:$0xff]   ;;  %v2077_v15 = vld [vmem:[%s2462_s1 + $0x188] sm:$0xff]   ;;  %v2080_v16 = vld [vmem:[%s2462_s1 + $0x1d0] sm:$0xff]  }
  0x1d   : > { %1762 = vmatprep.subr.bf16.mxu0 %v2026_v18  ;;  %1918 = vmatprep.subr.bf16.mxu1 %v2027_v19  ;;  %v2081_v17 = vld [vmem:[%s2462_s1 + $0x210] sm:$0xff]   ;;  %v2088_v26 = vld [vmem:[%s2462_s1 + $0x1e0] sm:$0xff]  }
  0x1e   : > { %v2082_v18 = vld [vmem:[%s2462_s1 + $0x190] sm:$0xff]  }
  0x20   : > { %1763 = vmatpush3.bf16.msra.mxu0 %v2028_v20  ;;  %1919 = vmatpush3.bf16.msra.mxu1 %v2027_v19  ;;  %v1612_v19 = vcombine.low %v2231_v24, %v2258_v35  ;;  %v2083_v20 = vld [vmem:[%s2462_s1 + $0x1d8] sm:$0xff]   ;;  %v2098_v35 = vld [vmem:[%s2462_s1 + $0x1f0] sm:$0xff]  }
  0x21   : > { %1764 = vmatprep.subr.bf16.mxu0 %v2029_v21  ;;  %1920 = vmatprep.subr.bf16.mxu1 %v2030_v22  ;;  %v2084_v21 = vld [vmem:[%s2462_s1 + $0x218] sm:$0xff]  }
  0x22   : > { %v2085_v24 = vld [vmem:[%s2462_s1 + $0x198] sm:$0xff]  }
  0x24   : > { %1765 = vmatpush3.bf16.msra.mxu0 %v2031_v27  ;;  %1921 = vmatpush3.bf16.msra.mxu1 %v2030_v22  ;;  %v2091_v22 = vld [vmem:[%s2216_s5 + $0x38] ss:$12 sps:$4 sm:$0xff]  }
  0x25   : > { %1802 = vmatprep.subr.bf16.mxu0 %v2035_v28  ;;  %1930 = vmatprep.subr.bf16.mxu1 %v2036_v29  ;;  %v2089_v27 = vld [vmem:[%s2462_s1 + $0x220] sm:$0xff]   ;;  %v1615_v28 = vcombine.low %v2261_v36, %v2280_v43  ;;  %v2099_v36 = vld [vmem:[%s2462_s1 + $0x230] sm:$0xff]   ;;  %v2103_v43 = vld [vmem:[%s2462_s1 + $0x1b8] sm:$0xff]  }
  0x27   : > { %543 = vmatmul.mubr.bf16.vlgmr.msra.gmra.mrb[0].mxu0 %v1573_v32  ;;  %1923 = vmatmul.mubr.bf16.vlgmr.msra.gmra.mrb[0].mxu1 %v2037_v30  ;;  %v2093_v30 = vld [vmem:[%s2462_s1 + $0x1e8] sm:$0xff]  }
  0x28   : > { %1803 = vmatpush3.bf16.msra.mxu0 %v2038_v31  ;;  %1931 = vmatpush3.bf16.msra.mxu1 %v2036_v29  ;;  %v2090_v29 = vld [vmem:[%s2462_s1 + $0x1a0] sm:$0xff]   ;;  %v2094_v31 = vld [vmem:[%s2462_s1 + $0x228] sm:$0xff]  }
  0x29   : > { %1804 = vmatprep.subr.bf16.mxu0 %v2039_v33  ;;  %1932 = vmatprep.subr.bf16.mxu1 %v2040_v34  ;;  %v2095_v32 = vld [vmem:[%s2462_s1 + $0x1a8] sm:$0xff]   ;;  %v1619_v33 = vcombine.high %v2283_v44, %v2313_v56 }
  0x2a   : > { %550 = vmatprep.mubr.bf16.mxu0 %v1577_v37  ;;  %1926 = vmatprep.mubr.bf16.mxu1 %v2054_v49  ;;  %v1618_v37 = vcombine.low %v2283_v44, %v2313_v56  ;;  %v2105_v44 = vld [vmem:[%s2216_s5 + $0x38] ss:$12 sps:$4 sm:$0xff]  }
  0x2c   : > { %1805 = vmatpush3.bf16.msra.mxu0 %v2041_v38  ;;  %1933 = vmatpush3.bf16.msra.mxu1 %v2040_v34  ;;  %v2104_v34 = vld [vmem:[%s2216_s5 + $0x20] ss:$12 sps:$4 sm:$0xff]  }
  0x2d   : > { %1806 = vmatprep.subr.bf16.mxu0 %v2044_v39  ;;  %1934 = vmatprep.subr.bf16.mxu1 %v2045_v40  ;;  %v1659_v38 = vld [vmem:[%s2216_s5 + $0x6c] sm:$0xff] }
  0x2e   : > { %v2100_v39 = vld [vmem:[%s2462_s1 + $0x1b0] sm:$0xff]  }
  0x2f   : > { %551 = vmatmul.mubr.bf16.gmra.mrb[4].mxu0 %v1576_v41  ;;  %1927 = vmatmul.mubr.bf16.gmra.mrb[4].mxu1 %v2056_v51  ;;  %v2101_v41 = vld [vmem:[%s2462_s1 + $0x1f8] sm:$0xff]  }
  0x30   : > { %1807 = vmatpush3.bf16.msra.mxu0 %v2046_v42  ;;  %1935 = vmatpush3.bf16.msra.mxu1 %v2045_v40  ;;  %v1718_v40 = vcombine.low %v2316_v57, %v1659_v38  ;;  %v2102_v42 = vld [vmem:[%s2462_s1 + $0x238] sm:$0xff]  }
  0x31   : > { %1808 = vmatprep.subr.bf16.mxu0 %v2047_v45  ;;  %1936 = vmatprep.subr.bf16.mxu1 %v2048_v46  ;;  %v2106_v45 = vld [vmem:[%s2216_s5 + $0x50] ss:$12 sps:$4 sm:$0xff]  }
  0x32   : > { %558 = vmatprep.mubr.bf16.mxu0 %v1580_v48  ;;  %1946 = vmatprep.mubr.bf16.mxu1 %v2070_v2 }
  0x34   : > { %1809 = vmatpush3.bf16.msra.mxu0 %v2049_v47  ;;  %1937 = vmatpush3.bf16.msra.mxu1 %v2048_v46  ;;  %v2107_v46 = vld [vmem:[%s2216_s5 + $0x68] ss:$12 sps:$4 sm:$0xff]   ;;  %v1719_v47 = vcombine.high %v2316_v57, %v1659_v38 }
  0x35   : > { %1810 = vmatprep.subr.bf16.mxu0 %v2052_v50  ;;  %1938 = vmatprep.subr.bf16.mxu1 %v2053_v52 }
  0x37   : > { %559 = vmatmul.mubr.bf16.gmra.mrb[8].mxu0 %v1579_v54 }
  0x38   : > { %1811 = vmatpush3.bf16.msra.mxu0 %v2055_v53  ;;  %1939 = vmatpush3.bf16.msra.mxu1 %v2053_v52 }
  0x39   : > { %1812 = vmatprep.subr.bf16.mxu0 %v2057_v55  ;;  %1940 = vmatprep.subr.bf16.mxu1 %v2058_v58 }
  0x3a   : > { %566 = vmatprep.mubr.bf16.mxu0 %v1583_v59 }
  0x3c   : > { %1813 = vmatpush3.bf16.msra.mxu0 %v2059_v60  ;;  %1941 = vmatpush3.bf16.msra.mxu1 %v2058_v58 }
  0x3d   : > { %1814 = vmatprep.subr.bf16.mxu0 %v2062_v61  ;;  %1942 = vmatprep.subr.bf16.mxu1 %v2063_v62 }
  0x3f   : > { %567 = vmatmul.mubr.bf16.gmra.mrb[12].mxu0 %v1582_v1 }
  0x40   : > { %1815 = vmatpush3.bf16.msra.mxu0 %v2064_v63  ;;  %1943 = vmatpush3.bf16.msra.mxu1 %v2063_v62 }
  0x41   : > { %1816 = vmatprep.subr.bf16.mxu0 %v2065_v3  ;;  %1944 = vmatprep.subr.bf16.mxu1 %v2066_v4 }
  0x42   : > { %880 = vmatprep.mubr.bf16.mxu0 %v1610_v5 }
  0x44   : > { %1817 = vmatpush3.bf16.msra.mxu0 %v2067_v6  ;;  %1945 = vmatpush3.bf16.msra.mxu1 %v2066_v4 }
  0x45   : > { %1854 = vmatprep.subr.bf16.mxu0 %v2071_v7  ;;  %1954 = vmatprep.subr.bf16.mxu1 %v2072_v8 }
  0x47   : > { %881 = vmatmul.mubr.bf16.vlgmr.msra.gmra.mrb[16].mxu0 %v1609_v10  ;;  %1947 = vmatmul.mubr.bf16.vlgmr.msra.gmra.mrb[0].mxu1 %v2073_v9 }
  0x48   : > { %1855 = vmatpush3.bf16.msra.mxu0 %v2074_v11  ;;  %1955 = vmatpush3.bf16.msra.mxu1 %v2072_v8 }
  0x49   : > { %1856 = vmatprep.subr.bf16.mxu0 %v2075_v12  ;;  %1956 = vmatprep.subr.bf16.mxu1 %v2076_v13 }
  0x4a   : > { %888 = vmatprep.mubr.bf16.mxu0 %v2368_v14  ;;  %1950 = vmatprep.mubr.bf16.mxu1 %v2091_v22 }
  0x4c   : > { %1857 = vmatpush3.bf16.msra.mxu0 %v2077_v15  ;;  %1957 = vmatpush3.bf16.msra.mxu1 %v2076_v13 }
  0x4d   : > { %1858 = vmatprep.subr.bf16.mxu0 %v2080_v16  ;;  %1958 = vmatprep.subr.bf16.mxu1 %v2081_v17 }
  0x4f   : > { %889 = vmatmul.mubr.bf16.gmra.mrb[20].mxu0 %v1612_v19  ;;  %1951 = vmatmul.mubr.bf16.gmra.mrb[8].mxu1 %v2092_v23 }
  0x50   : > { %1859 = vmatpush3.bf16.msra.mxu0 %v2082_v18  ;;  %1959 = vmatpush3.bf16.msra.mxu1 %v2081_v17 }
  0x51   : > { %1860 = vmatprep.subr.bf16.mxu0 %v2083_v20  ;;  %1960 = vmatprep.subr.bf16.mxu1 %v2084_v21 }
  0x52   : > { %896 = vmatprep.mubr.bf16.mxu0 %v1616_v25  ;;  %1970 = vmatprep.mubr.bf16.mxu1 %v2104_v34 }
  0x54   : > { %1861 = vmatpush3.bf16.msra.mxu0 %v2085_v24  ;;  %1961 = vmatpush3.bf16.msra.mxu1 %v2084_v21 }
  0x55   : > { %1862 = vmatprep.subr.bf16.mxu0 %v2088_v26  ;;  %1962 = vmatprep.subr.bf16.mxu1 %v2089_v27 }
  0x57   : > { %897 = vmatmul.mubr.bf16.gmra.mrb[24].mxu0 %v1615_v28 }
  0x58   : > { %1863 = vmatpush3.bf16.msra.mxu0 %v2090_v29  ;;  %1963 = vmatpush3.bf16.msra.mxu1 %v2089_v27 }
  0x59   : > { %1864 = vmatprep.subr.bf16.mxu0 %v2093_v30  ;;  %1964 = vmatprep.subr.bf16.mxu1 %v2094_v31 }
  0x5a   : > { %904 = vmatprep.mubr.bf16.mxu0 %v1619_v33 }
  0x5c   : > { %1865 = vmatpush3.bf16.msra.mxu0 %v2095_v32  ;;  %1965 = vmatpush3.bf16.msra.mxu1 %v2094_v31 }
  0x5d   : > { %1866 = vmatprep.subr.bf16.mxu0 %v2098_v35  ;;  %1966 = vmatprep.subr.bf16.mxu1 %v2099_v36 }
  0x5f   : > { %905 = vmatmul.mubr.bf16.gmra.mrb[28].mxu0 %v1618_v37 }
  0x60   : > { %1867 = vmatpush3.bf16.msra.mxu0 %v2100_v39  ;;  %1967 = vmatpush3.bf16.msra.mxu1 %v2099_v36 }
  0x61   : > { %1868 = vmatprep.subr.bf16.mxu0 %v2101_v41  ;;  %1968 = vmatprep.subr.bf16.mxu1 %v2102_v42 }
  0x62   : > { %1284 = vmatprep.mubr.bf16.mxu0 %v2368_v14 }
  0x64   : > { %1869 = vmatpush3.bf16.msra.mxu0 %v2103_v43  ;;  %1969 = vmatpush3.bf16.msra.mxu1 %v2102_v42 }
  0x67   : > { %1285 = vmatmul.mubr.bf16.vlgmr.msra.gmra.mrb[32].mxu0 %v1612_v19  ;;  %1971 = vmatmul.mubr.bf16.vlgmr.msra.gmra.mrb[0].mxu1 %v2105_v44 }
  0x68   : > { %1292 = vmatprep.mubr.bf16.mxu0 %v1616_v25  ;;  %1974 = vmatprep.mubr.bf16.mxu1 %v2106_v45 }
  0x6f   : > { %1293 = vmatmul.mubr.bf16.gmra.mrb[36].mxu0 %v1615_v28  ;;  %1975 = vmatmul.mubr.bf16.gmra.mrb[12].mxu1 %v2107_v46 }
  0x70   : > { %1300 = vmatprep.mubr.bf16.mxu0 %v1619_v33 }
  0x77   : > { %1301 = vmatmul.mubr.bf16.gmra.mrb[40].mxu0 %v1618_v37 }
  0x78   : > { %1308 = vmatprep.mubr.bf16.mxu0 %v1719_v47 }
  0x7f   : > { %1309 = vmatmul.mubr.bf16.gmra.mrb[44].mxu0 %v1718_v40 }
  0xfa   : > { %v1766_v48 = vpop.f32.mrb[0].mxu0 }
  0xfb   : > { %v1767_v49 = vpop.f32.mrb[1].mxu0 }
  0xfc   : > { %v1768_v50 = vadd.f32 %v1767_v49, %v1766_v48  ;;  %v1769_v51 = vpop.f32.mrb[2].mxu0 }
  0xfd   : > { %v1770_v52 = vpop.f32.mrb[3].mxu0 }
  0xfe   : > { %v1771_v53 = vadd.f32 %v1770_v52, %v1769_v51 }
 0x102   : > { %v1772_v54 = vpop.f32.mrb[4].mxu0  ;;  %v1928_v61 = vpop.f32.mrb[4].mxu1 }
 0x103   : > { %v1773_v55 = vpop.f32.mrb[5].mxu0  ;;  %v625_v62 = vpop.f32.mrb[5].mxu1 }
 0x104   : > { %v1774_v56 = vadd.f32 %v1773_v55, %v1772_v54  ;;  %v1775_v58 = vpop.f32.mrb[6].mxu0  ;;  %v1929_v63 = vpop.f32.mrb[6].mxu1 }
 0x105   : > { %v1776_v59 = vpop.f32.mrb[7].mxu0  ;;  %v628_v0 = vpop.f32.mrb[7].mxu1  ;;  %v1745_v63 = vld [vmem:[%s2463_s2] ss:$0 sm:$0xff] }
 0x106   : > { %v1777_v60 = vadd.f32 %v1776_v59, %v1775_v58 }
 0x10a   : > { %v1778_v57 = vpop.f32.mrb[8].mxu0 }
 0x10b   : > { %v1779_v1 = vpop.f32.mrb[9].mxu0 }
 0x10c   : > { %v1780_v2 = vadd.f32 %v1779_v1, %v1778_v57  ;;  %v1781_v3 = vpop.f32.mrb[10].mxu0 }
 0x10d   : > { %v1782_v4 = vpop.f32.mrb[11].mxu0 }
 0x10e   : > { %v1783_v5 = vadd.f32 %v1782_v4, %v1781_v3  ;;  %v626_v6 = vadd.f32 %v1780_v2, %v625_v62 }
 0x110   : > { %v629_v7 = vadd.f32 %v1783_v5, %v628_v0 }
 0x112   : > { %v1784_v8 = vpop.f32.mrb[12].mxu0 }
 0x113   : > { %v1785_v9 = vpop.f32.mrb[13].mxu0 }
 0x114   : > { %v1786_v10 = vadd.f32 %v1785_v9, %v1784_v8  ;;  %v1787_v11 = vpop.f32.mrb[14].mxu0 }
 0x115   : > { %v1788_v12 = vpop.f32.mrb[15].mxu0 }
 0x116   : > { %v634_v13 = vadd.f32 %v1928_v61, %v1786_v10 }
 0x11a   : > { %v1818_v14 = vpop.f32.mrb[16].mxu0 }
 0x11b   : > { %v1819_v15 = vpop.f32.mrb[17].mxu0 }
 0x11c   : > { %v1820_v16 = vadd.f32 %v1819_v15, %v1818_v14  ;;  %v1821_v17 = vpop.f32.mrb[18].mxu0 }
 0x11d   : > { %v1822_v18 = vpop.f32.mrb[19].mxu0 }
 0x11e   : > { %v1981_v19 = vadd.f32 %v1820_v16, %v1768_v50  ;;  %v1823_v20 = vadd.f32 %v1822_v18, %v1821_v17 }
 0x120   : > { %v1987_v21 = vadd.f32 %v1823_v20, %v1771_v53 }
 0x122   : > { %v1824_v22 = vpop.f32.mrb[20].mxu0  ;;  %v1952_v23 = vpop.f32.mrb[8].mxu1 }
 0x123   : > { %v1825_v25 = vpop.f32.mrb[21].mxu0  ;;  %v963_v24 = vpop.f32.mrb[9].mxu1 }
 0x124   : > { %v1826_v26 = vadd.f32 %v1825_v25, %v1824_v22  ;;  %v1827_v27 = vpop.f32.mrb[22].mxu0  ;;  %v1953_v28 = vpop.f32.mrb[10].mxu1 }
 0x125   : > { %v1828_v29 = vpop.f32.mrb[23].mxu0  ;;  %v966_v30 = vpop.f32.mrb[11].mxu1 }
 0x126   : > { %v1978_v31 = vadd.f32 %v1826_v26, %v1774_v56  ;;  %v1829_v32 = vadd.f32 %v1828_v29, %v1827_v27 }
 0x128   : > { %v1984_v33 = vadd.f32 %v1829_v32, %v1777_v60 }
 0x12a   : > { %v1830_v34 = vpop.f32.mrb[24].mxu0 }
 0x12b   : > { %v1831_v35 = vpop.f32.mrb[25].mxu0 }
 0x12c   : > { %v1832_v36 = vadd.f32 %v1831_v35, %v1830_v34  ;;  %v1833_v37 = vpop.f32.mrb[26].mxu0 }
 0x12d   : > { %v1834_v38 = vpop.f32.mrb[27].mxu0 }
 0x12e   : > { %v1835_v39 = vadd.f32 %v1834_v38, %v1833_v37  ;;  %v899_v40 = vadd.f32 %v1832_v36, %v626_v6 }
 0x130   : > { %v964_v41 = vadd.f32 %v963_v24, %v899_v40  ;;  %v902_v42 = vadd.f32 %v1835_v39, %v629_v7 }
 0x132   : > { %v967_v43 = vadd.f32 %v966_v30, %v902_v42  ;;  %v1836_v44 = vpop.f32.mrb[28].mxu0 }
 0x133   : > { %v1837_v45 = vpop.f32.mrb[29].mxu0 }
 0x134   : > { %v1838_v46 = vadd.f32 %v1837_v45, %v1836_v44  ;;  %v1839_v47 = vpop.f32.mrb[30].mxu0 }
 0x135   : > { %v1840_v48 = vpop.f32.mrb[31].mxu0 }
 0x136   : > { %v907_v49 = vadd.f32 %v1838_v46, %v634_v13 }
 0x138   : > { %v2448_v50 = vadd.f32 %v1952_v23, %v907_v49 }
 0x13a   : > { %v1870_v51 = vpop.f32.mrb[32].mxu0  ;;  %v1972_v52 = vpop.f32.mrb[0].mxu1 }
 0x13b   : > { %v1871_v53 = vpop.f32.mrb[33].mxu0  ;;  %v1351_v54 = vpop.f32.mrb[1].mxu1 }
 0x13c   : > { %v1872_v55 = vadd.f32 %v1871_v53, %v1870_v51  ;;  %v1873_v56 = vpop.f32.mrb[34].mxu0  ;;  %v1973_v58 = vpop.f32.mrb[2].mxu1 }
 0x13d   : > { %v1874_v59 = vpop.f32.mrb[35].mxu0  ;;  %v1354_v60 = vpop.f32.mrb[3].mxu1 }
 0x13e   : > { %v1982_v61 = vadd.f32 %v1981_v19, %v1872_v55  ;;  %v1875_v62 = vadd.f32 %v1874_v59, %v1873_v56 }
 0x140   : > { %v1983_v0 = vadd.f32 %v1982_v61, %v1351_v54  ;;  %v1988_v57 = vadd.f32 %v1987_v21, %v1875_v62 }
 0x142   : > { %v1397_v1 = vadd.f32 %v1983_v0, %v1745_v63  ;;  %v1989_v2 = vadd.f32 %v1988_v57, %v1354_v60  ;;  %v1876_v3 = vpop.f32.mrb[36].mxu0  ;;  %v1976_v4 = vpop.f32.mrb[12].mxu1 }
 0x143   : > { %v1877_v5 = vpop.f32.mrb[37].mxu0  ;;  %v1367_v6 = vpop.f32.mrb[13].mxu1 }
 0x144   : > { %v1398_v7 = vadd.f32 %v1989_v2, %v1745_v63  ;;  %v1878_v8 = vadd.f32 %v1877_v5, %v1876_v3  ;;  %v1879_v9 = vpop.f32.mrb[38].mxu0  ;;  %v1977_v10 = vpop.f32.mrb[14].mxu1  ;;  %v1405_v13 = vmax.f32 %v1397_v1, 0.0 }
 0x145   : > { %v1880_v11 = vpop.f32.mrb[39].mxu0  ;;  %v1370_v12 = vpop.f32.mrb[15].mxu1 }
 0x146   : > { %v1406_v14 = vmax.f32 %v1398_v7, 0.0  ;;  %v1979_v15 = vadd.f32 %v1978_v31, %v1878_v8  ;;  %v1881_v16 = vadd.f32 %v1880_v11, %v1879_v9 }
 0x148   : > { %v1424_v17 = vmax.f32 %v1405_v13, %v1406_v14  ;;  %v1980_v18 = vadd.f32 %v1979_v15, %v1972_v52  ;;  %v1985_v19 = vadd.f32 %v1984_v33, %v1881_v16 }
 0x14a   : > { %v1399_v20 = vadd.f32 %v1980_v18, %v1745_v63  ;;  %v1986_v21 = vadd.f32 %v1985_v19, %v1973_v58  ;;  %v1882_v22 = vpop.f32.mrb[40].mxu0 }
 0x14b   : > { %v1883_v23 = vpop.f32.mrb[41].mxu0 }
 0x14c   : > { %v1407_v25 = vmax.f32 %v1399_v20, 0.0  ;;  %v1400_v24 = vadd.f32 %v1986_v21, %v1745_v63  ;;  %v1884_v26 = vadd.f32 %v1883_v23, %v1882_v22  ;;  %v1885_v27 = vpop.f32.mrb[42].mxu0 }
 0x14d   : > { %v1886_v28 = vpop.f32.mrb[43].mxu0 }
 0x14e   : > { %v1427_v29 = vmax.f32 %v1424_v17, %v1407_v25  ;;  %v1408_v30 = vmax.f32 %v1400_v24, 0.0  ;;  %v1887_v31 = vadd.f32 %v1886_v28, %v1885_v27  ;;  %v1368_v32 = vadd.f32 %v1884_v26, %v1367_v6 }
 0x150   : > { %1428 = vst [vmem:[%s170_s20] sm:$0xff] %v1427_v29  ;;  %v1386_v33 = vadd.f32 %v1368_v32, %v964_v41  ;;  %v1432_v34 = vmax.f32 %v1407_v25, %v1408_v30  ;;  %v1371_v35 = vadd.f32 %v1887_v31, %v1370_v12 }
 0x152   : > { %v1401_v36 = vadd.f32 %v1745_v63, %v1386_v33  ;;  %v1387_v37 = vadd.f32 %v1371_v35, %v967_v43  ;;  %v1888_v38 = vpop.f32.mrb[44].mxu0 }
 0x153   : > { %v1889_v39 = vpop.f32.mrb[45].mxu0 }
 0x154   : > { %v1409_v40 = vmax.f32 %v1401_v36, 0.0  ;;  %v1402_v42 = vadd.f32 %v1745_v63, %v1387_v37  ;;  %v1890_v44 = vadd.f32 %v1889_v39, %v1888_v38  ;;  %v1891_v45 = vpop.f32.mrb[46].mxu0 }
 0x155   : > { %v1892_v46 = vpop.f32.mrb[47].mxu0 }
 0x156   : > { %v1435_v47 = vmax.f32 %v1432_v34, %v1409_v40  ;;  %v1410_v48 = vmax.f32 %v1402_v42, 0.0  ;;  %v1376_v49 = vadd.f32 %v1976_v4, %v1890_v44 }
 0x158   : > { %1746 = vst [vmem:[%s170_s20 + $0x8] sm:$0xff] %v1435_v47  ;;  %v1441_v51 = vmax.f32 %v1409_v40, %v1410_v48  ;;  %v1388_v52 = vadd.f32 %v1376_v49, %v2448_v50 }
 0x15a   : > { %v1403_v53 = vadd.f32 %v1745_v63, %v1388_v52 }
 0x15c   : > { %v1411_v41 = vmax.f32 %v1403_v53, 0.0 }
 0x15e   : > { %v1444_v54 = vmax.f32 %v1441_v51, %v1411_v41 }
 0x160   : > { %1747 = vst [vmem:[%s170_s20 + $0x10] sm:$0xff] %v1444_v54 }
 0x161 PF: > { %s13_s12 = sadd.s32 1, %s2116_s12  }
 0x162   : > { %p10_p4 = scmp.ge.s32.totalorder %s13_s12, 4  }
 0x164   :  { %12 = sbr.rel (!%p10_p4) target bundleno = 1 (0x1), region = 74 }

// kernel: alexnet_forward.13
= control target key start
LH: loop header
LB: loop body
LE: loop exit
PB: predicated region body
PF: predicated region fallthrough
CT: control target
= control target key end

     0   :  { %v434_v1 = vmov 0.0   ;;  %vm435_vm0 = vmmov 0   ;;  %s540_s1 = inlined_call_operand.vmem [shape: bf16[384,128], index: 1, kind: input, shape index: {}]   ;;  %s541_s0 = inlined_call_operand.vmem [shape: bf16[8,384], index: 0, kind: input, shape index: {}]   ;;  %s542_s2 = inlined_call_operand.vmem [shape: f32[1,128], index: 2, kind: input, shape index: {}]   ;;  %s543_s3 = inlined_call_operand.vmem [shape: f32[8,128], index: 3, kind: output, shape index: {}]  }
   0x1   :  { %v407_v0 = vld [vmem:[%s540_s1 + $0x40] sm:$0xff]   ;;  %385 = vmatprep.subr.bf16.mxu1 %v434_v1  ;;  %401 = vmatprep.mubr.msk.bf16.mxu1 %vm435_vm0, %v434_v1  ;;  %v410_v4 = vld [vmem:[%s540_s1 + $0x48] sm:$0xff]   ;;  %v413_v7 = vld [vmem:[%s540_s1 + $0x50] sm:$0xff]  }
   0x2   :  { %v408_v2 = vld [vmem:[%s540_s1] sm:$0xff]   ;;  %354 = vmatprep.subr.bf16.mxu0 %v407_v0  ;;  %v411_v5 = vld [vmem:[%s540_s1 + $0x8] sm:$0xff]   ;;  %v414_v8 = vld [vmem:[%s540_s1 + $0x10] sm:$0xff]  }
   0x3   :  { %v409_v3 = vld [vmem:[%s540_s1 + $0x80] sm:$0xff]   ;;  %355 = vmatpush3.bf16.msra.mxu0 %v408_v2  ;;  %v412_v6 = vld [vmem:[%s540_s1 + $0x88] sm:$0xff]   ;;  %v415_v9 = vld [vmem:[%s540_s1 + $0x90] sm:$0xff]  }
   0x4   :  { %386 = vmatpush3.bf16.msra.mxu1 %v409_v3  ;;  %356 = vmatprep.subr.bf16.mxu0 %v410_v4  ;;  %v416_v10 = vld [vmem:[%s540_s1 + $0x58] sm:$0xff]   ;;  %v419_v13 = vld [vmem:[%s540_s1 + $0x60] sm:$0xff]   ;;  %v422_v16 = vld [vmem:[%s540_s1 + $0x68] sm:$0xff]  }
   0x5   :  { %387 = vmatprep.subr.bf16.mxu1 %v434_v1  ;;  %v417_v11 = vld [vmem:[%s540_s1 + $0x18] sm:$0xff]   ;;  %v420_v14 = vld [vmem:[%s540_s1 + $0x20] sm:$0xff]   ;;  %v423_v17 = vld [vmem:[%s540_s1 + $0x28] sm:$0xff]  }
   0x6   :  { %v418_v12 = vld [vmem:[%s540_s1 + $0x98] sm:$0xff]   ;;  %v421_v15 = vld [vmem:[%s540_s1 + $0xa0] sm:$0xff]   ;;  %v424_v18 = vld [vmem:[%s540_s1 + $0xa8] sm:$0xff]  }
   0x7   :  { %357 = vmatpush3.bf16.msra.mxu0 %v411_v5  ;;  %v425_v19 = vld [vmem:[%s540_s1 + $0x70] sm:$0xff]   ;;  %v428_v22 = vld [vmem:[%s540_s1 + $0x78] sm:$0xff]   ;;  %v21_v23 = vld [vmem:[%s541_s0] sm:$0xff] }
   0x8   :  { %388 = vmatpush3.bf16.msra.mxu1 %v412_v6  ;;  %358 = vmatprep.subr.bf16.mxu0 %v413_v7  ;;  %v426_v20 = vld [vmem:[%s540_s1 + $0x30] sm:$0xff]   ;;  %v327_v24 = vcombine.high %v21_v23, %v21_v23  ;;  %v429_v25 = vld [vmem:[%s540_s1 + $0x38] sm:$0xff]   ;;  %v326_v27 = vcombine.low %v21_v23, %v21_v23  ;;  %v433_v28 = vld [vmem:[%s541_s0 + $0x8] ss:$0 sps:$4 sm:$0xff]  }
   0x9   :  { %389 = vmatprep.subr.bf16.mxu1 %v434_v1  ;;  %v427_v21 = vld [vmem:[%s540_s1 + $0xb0] sm:$0xff]   ;;  %v430_v26 = vld [vmem:[%s540_s1 + $0xb8] sm:$0xff]   ;;  %v353_v39 = vld [vmem:[%s542_s2] ss:$0 sm:$0xff] }
   0xa   :  { %258 = vmatprep.mubr.bf16.mxu0 %v327_v24 }
   0xb   :  { %359 = vmatpush3.bf16.msra.mxu0 %v414_v8 }
   0xc   :  { %390 = vmatpush3.bf16.msra.mxu1 %v415_v9  ;;  %360 = vmatprep.subr.bf16.mxu0 %v416_v10 }
   0xd   :  { %391 = vmatprep.subr.bf16.mxu1 %v434_v1 }
   0xf   :  { %361 = vmatpush3.bf16.msra.mxu0 %v417_v11 }
  0x10   :  { %392 = vmatpush3.bf16.msra.mxu1 %v418_v12  ;;  %362 = vmatprep.subr.bf16.mxu0 %v419_v13 }
  0x11   :  { %393 = vmatprep.subr.bf16.mxu1 %v434_v1 }
  0x13   :  { %363 = vmatpush3.bf16.msra.mxu0 %v420_v14 }
  0x14   :  { %394 = vmatpush3.bf16.msra.mxu1 %v421_v15  ;;  %364 = vmatprep.subr.bf16.mxu0 %v422_v16 }
  0x15   :  { %395 = vmatprep.subr.bf16.mxu1 %v434_v1 }
  0x17   :  { %365 = vmatpush3.bf16.msra.mxu0 %v423_v17 }
  0x18   :  { %396 = vmatpush3.bf16.msra.mxu1 %v424_v18  ;;  %366 = vmatprep.subr.bf16.mxu0 %v425_v19 }
  0x19   :  { %397 = vmatprep.subr.bf16.mxu1 %v434_v1 }
  0x1b   :  { %367 = vmatpush3.bf16.msra.mxu0 %v426_v20 }
  0x1c   :  { %398 = vmatpush3.bf16.msra.mxu1 %v427_v21  ;;  %368 = vmatprep.subr.bf16.mxu0 %v428_v22 }
  0x1d   :  { %399 = vmatprep.subr.bf16.mxu1 %v434_v1 }
  0x1f   :  { %369 = vmatpush3.bf16.msra.mxu0 %v429_v25 }
  0x20   :  { %400 = vmatpush3.bf16.msra.mxu1 %v430_v26 }
  0x22   :  { %259 = vmatmul.mubr.bf16.vlgmr.msra.gmra.mrb[0].mxu0 %v326_v27 }
  0x23   :  { %402 = vmatmul.mubr.bf16.vlgmr.msra.gmra.mrb[0].mxu1 %v433_v28 }
  0xf5   :  { %v370_v29 = vpop.f32.mrb[0].mxu0 }
  0xf6   :  { %v300_v30 = vpop.f32.mrb[0].mxu1  ;;  %v371_v31 = vpop.f32.mrb[1].mxu0 }
  0xf7   :  { %v372_v32 = vadd.f32 %v371_v31, %v370_v29  ;;  %v403_v33 = vpop.f32.mrb[1].mxu1  ;;  %v373_v34 = vpop.f32.mrb[2].mxu0 }
  0xf8   :  { %v303_v35 = vpop.f32.mrb[2].mxu1  ;;  %v374_v36 = vpop.f32.mrb[3].mxu0 }
  0xf9   :  { %v301_v37 = vadd.f32 %v372_v32, %v300_v30  ;;  %v404_v38 = vpop.f32.mrb[3].mxu1 }
  0xfb   :  { %v319_v40 = vadd.f32 %v353_v39, %v301_v37 }
  0xfd   :  { %v320_v41 = vmax.f32 %v319_v40, 0.0 }
  0xff   :  { %321 = vst [vmem:[%s543_s3] sm:$0xff] %v320_v41 }

// kernel: alexnet_forward.14
= control target key start
LH: loop header
LB: loop body
LE: loop exit
PB: predicated region body
PF: predicated region fallthrough
CT: control target
= control target key end

     0   :  { %v194_v0 = vmov 0.0   ;;  %vm195_vm0 = vmmov 0   ;;  %s249_s1 = inlined_call_operand.vmem [shape: bf16[128,128], index: 1, kind: input, shape index: {}]   ;;  %s250_s0 = inlined_call_operand.vmem [shape: bf16[8,128], index: 0, kind: input, shape index: {}]   ;;  %s251_s2 = inlined_call_operand.vmem [shape: f32[1,128], index: 2, kind: input, shape index: {}]   ;;  %s252_s3 = inlined_call_operand.vmem [shape: f32[8,128], index: 3, kind: output, shape index: {}]  }
   0x1   :  { %164 = vmatprep.subr.bf16.mxu0 %v194_v0  ;;  %v186_v1 = vld [vmem:[%s249_s1] sm:$0xff]   ;;  %180 = vmatprep.mubr.msk.bf16.mxu0 %vm195_vm0, %v194_v0  ;;  %v187_v2 = vld [vmem:[%s249_s1 + $0x8] sm:$0xff]   ;;  %v188_v3 = vld [vmem:[%s249_s1 + $0x10] sm:$0xff]  }
   0x2   :  { %165 = vmatpush3.bf16.msra.mxu0 %v186_v1  ;;  %v189_v4 = vld [vmem:[%s249_s1 + $0x18] sm:$0xff]   ;;  %v190_v5 = vld [vmem:[%s249_s1 + $0x20] sm:$0xff]   ;;  %v191_v6 = vld [vmem:[%s249_s1 + $0x28] sm:$0xff]  }
   0x3   :  { %166 = vmatprep.subr.bf16.mxu0 %v194_v0  ;;  %v192_v7 = vld [vmem:[%s249_s1 + $0x30] sm:$0xff]   ;;  %v193_v8 = vld [vmem:[%s249_s1 + $0x38] sm:$0xff]   ;;  %v21_v9 = vld [vmem:[%s250_s0] sm:$0xf] }
   0x4   :  { %v154_v11 = vld [vmem:[%s251_s2] ss:$0 sm:$0xff] }
   0x6   :  { %167 = vmatpush3.bf16.msra.mxu0 %v187_v2 }
   0x7   :  { %168 = vmatprep.subr.bf16.mxu0 %v194_v0 }
   0xa   :  { %169 = vmatpush3.bf16.msra.mxu0 %v188_v3 }
   0xb   :  { %170 = vmatprep.subr.bf16.mxu0 %v194_v0 }
   0xe   :  { %171 = vmatpush3.bf16.msra.mxu0 %v189_v4 }
   0xf   :  { %172 = vmatprep.subr.bf16.mxu0 %v194_v0 }
  0x12   :  { %173 = vmatpush3.bf16.msra.mxu0 %v190_v5 }
  0x13   :  { %174 = vmatprep.subr.bf16.mxu0 %v194_v0 }
  0x16   :  { %175 = vmatpush3.bf16.msra.mxu0 %v191_v6 }
  0x17   :  { %176 = vmatprep.subr.bf16.mxu0 %v194_v0 }
  0x1a   :  { %177 = vmatpush3.bf16.msra.mxu0 %v192_v7 }
  0x1b   :  { %178 = vmatprep.subr.bf16.mxu0 %v194_v0 }
  0x1e   :  { %179 = vmatpush3.bf16.msra.mxu0 %v193_v8 }
  0x21   :  { %181 = vmatmul.mubr.bf16.vlgmr.msra.gmra.mrb[0].mxu0 %v21_v9 }
  0xf4   :  { %v120_v10 = vpop.f32.mrb[0].mxu0 }
  0xf5   :  { %v182_v12 = vpop.f32.mrb[1].mxu0  ;;  %v139_v14 = vadd.f32 %v154_v11, %v120_v10 }
  0xf6   :  { %v123_v13 = vpop.f32.mrb[2].mxu0 }
  0xf7   :  { %v183_v15 = vpop.f32.mrb[3].mxu0  ;;  %v140_v16 = vmax.f32 %v139_v14, 0.0 }
  0xf9   :  { %141 = vst [vmem:[%s252_s3] sm:$0xff] %v140_v16 }

// kernel: alexnet_forward.15
= control target key start
LH: loop header
LB: loop body
LE: loop exit
PB: predicated region body
PF: predicated region fallthrough
CT: control target
= control target key end

     0   :  { %v193_v0 = vmov 0.0   ;;  %vm194_vm0 = vmmov 0   ;;  %s248_s1 = inlined_call_operand.vmem [shape: bf16[128,128], index: 1, kind: input, shape index: {}]   ;;  %s249_s0 = inlined_call_operand.vmem [shape: bf16[8,128], index: 0, kind: input, shape index: {}]   ;;  %s250_s2 = inlined_call_operand.vmem [shape: f32[1,128], index: 2, kind: input, shape index: {}]   ;;  %s251_s3 = inlined_call_operand.vmem [shape: f32[8,128], index: 3, kind: output, shape index: {}]  }
   0x1   :  { %163 = vmatprep.subr.bf16.mxu0 %v193_v0  ;;  %v185_v1 = vld [vmem:[%s248_s1] sm:$0xff]   ;;  %179 = vmatprep.mubr.msk.bf16.mxu0 %vm194_vm0, %v193_v0  ;;  %v186_v2 = vld [vmem:[%s248_s1 + $0x8] sm:$0xff]   ;;  %v187_v3 = vld [vmem:[%s248_s1 + $0x10] sm:$0xff]  }
   0x2   :  { %164 = vmatpush3.bf16.msra.mxu0 %v185_v1  ;;  %v188_v4 = vld [vmem:[%s248_s1 + $0x18] sm:$0xff]   ;;  %v189_v5 = vld [vmem:[%s248_s1 + $0x20] sm:$0xff]   ;;  %v190_v6 = vld [vmem:[%s248_s1 + $0x28] sm:$0xff]  }
   0x3   :  { %165 = vmatprep.subr.bf16.mxu0 %v193_v0  ;;  %v191_v7 = vld [vmem:[%s248_s1 + $0x30] sm:$0xff]   ;;  %v192_v8 = vld [vmem:[%s248_s1 + $0x38] sm:$0xff]   ;;  %v21_v9 = vld [vmem:[%s249_s0] sm:$0xf] }
   0x4   :  { %v153_v11 = vld [vmem:[%s250_s2] ss:$0 sm:$0xff] }
   0x6   :  { %166 = vmatpush3.bf16.msra.mxu0 %v186_v2 }
   0x7   :  { %167 = vmatprep.subr.bf16.mxu0 %v193_v0 }
   0xa   :  { %168 = vmatpush3.bf16.msra.mxu0 %v187_v3 }
   0xb   :  { %169 = vmatprep.subr.bf16.mxu0 %v193_v0 }
   0xe   :  { %170 = vmatpush3.bf16.msra.mxu0 %v188_v4 }
   0xf   :  { %171 = vmatprep.subr.bf16.mxu0 %v193_v0 }
  0x12   :  { %172 = vmatpush3.bf16.msra.mxu0 %v189_v5 }
  0x13   :  { %173 = vmatprep.subr.bf16.mxu0 %v193_v0 }
  0x16   :  { %174 = vmatpush3.bf16.msra.mxu0 %v190_v6 }
  0x17   :  { %175 = vmatprep.subr.bf16.mxu0 %v193_v0 }
  0x1a   :  { %176 = vmatpush3.bf16.msra.mxu0 %v191_v7 }
  0x1b   :  { %177 = vmatprep.subr.bf16.mxu0 %v193_v0 }
  0x1e   :  { %178 = vmatpush3.bf16.msra.mxu0 %v192_v8 }
  0x21   :  { %180 = vmatmul.mubr.bf16.vlgmr.msra.gmra.mrb[0].mxu0 %v21_v9 }
  0xf4   :  { %v120_v10 = vpop.f32.mrb[0].mxu0 }
  0xf5   :  { %v181_v12 = vpop.f32.mrb[1].mxu0  ;;  %v139_v14 = vadd.f32 %v153_v11, %v120_v10 }
  0xf6   :  { %v123_v13 = vpop.f32.mrb[2].mxu0 }
  0xf7   :  { %v182_v15 = vpop.f32.mrb[3].mxu0  ;;  %140 = vst [vmem:[%s251_s3] sm:$0xff] %v139_v14 }

</bundles_post_ra>
